<compile_context>
chip_gen: v7x
topology: tpu7x:2x2x1
jax: 0.10.0
libtpu: 0.0.40
codegen_flags: <defaults>
</compile_context>

<pallas_src>
import jax
import jax.numpy as jnp
from jax.experimental import pallas as pl
from jax.experimental.pallas import tpu as pltpu

NUM_CHANNELS = 128
EPS = 1e-5
NOUT = 128        # lane-dense output slab: cols 0..8 policy logits, col 9 value

# Padded-activation layout: 25 "position rows" of Bt boards each,
#   row = (hp*5 + wp)*Bt + b,   hp, wp in [0,5);  interior = hp, wp in [1,4).
_INT = tuple((h + 1) * 5 + (w + 1) for h in range(3) for w in range(3))  # 6..18
_EXT = tuple(i - 6 for i in _INT)          # row of position p in the 13-row acc
_TAP = tuple(5 * kh + kw for kh in range(3) for kw in range(3))  # tap start row


def _round_up(n, m):
    return ((n + m - 1) // m) * m


# ---------------- fused Pallas kernel ----------------

def _fused_kernel(x_ref, w0_ref, wconv_ref, scale_ref, shifts_ref,
                  whead_ref, shead_ref, bhead_ref, wfc_ref, bfc_ref,
                  out_ref, pad_ref, cols_ref):
    f32, bf16 = jnp.float32, jnp.bfloat16
    Bt = out_ref.shape[0]
    C = scale_ref.shape[1]

    scale = scale_ref[...]                                   # (1, C) trunk BN scale

    # Zero ONLY the 16 border position-rows; interiors are overwritten each layer.
    pad_ref[0:6 * Bt, :] = jnp.zeros((6 * Bt, C), bf16)
    pad_ref[9 * Bt:11 * Bt, :] = jnp.zeros((2 * Bt, C), bf16)
    pad_ref[14 * Bt:16 * Bt, :] = jnp.zeros((2 * Bt, C), bf16)
    pad_ref[19 * Bt:25 * Bt, :] = jnp.zeros((6 * Bt, C), bf16)

    def conv3x3(layer):
        # VMEM im2col: tap k is ONE contiguous, tile-aligned 13*Bt-row slice of
        # the padded buffer (no gathers, no concatenates).
        for k in range(9):
            s = _TAP[k] * Bt
            cols_ref[:, k * C:(k + 1) * C] = pad_ref[s:s + 13 * Bt, :]
        # Single K=1152 matmul; MXU accumulates internally (MRB on v7x).
        return jnp.dot(cols_ref[...], wconv_ref[layer],
                       preferred_element_type=f32)           # (13*Bt, C) f32

    def finalize(acc13, layer, residual=None, write_pad=True):
        # Per-position BN + (skip) + ReLU on the interior rows only; the border
        # rows of acc13 are garbage and are never read.
        shift = shifts_ref[layer:layer + 1, :]
        outs = []
        for p in range(9):
            y = acc13[_EXT[p] * Bt:(_EXT[p] + 1) * Bt, :] * scale + shift
            if residual is not None:
                y = y + residual[p]
            y = jnp.maximum(y, 0.0)
            if write_pad:
                pad_ref[_INT[p] * Bt:(_INT[p] + 1) * Bt, :] = y.astype(bf16)
            outs.append(y)
        return outs

    # ---- convolution block: conv0 as one (Bt,128)@(128,1152) matmul ----
    h0w = jnp.dot(x_ref[...], w0_ref[...], preferred_element_type=f32)  # (Bt, 9C)
    shift0 = shifts_ref[0:1, :]
    h0 = []
    for p in range(9):
        y = jnp.maximum(h0w[:, p * C:(p + 1) * C] * scale + shift0, 0.0)
        pad_ref[_INT[p] * Bt:(_INT[p] + 1) * Bt, :] = y.astype(bf16)
        h0.append(y)

    # ---- residual block 0 (conv1, conv2); skip kept as live f32 values ----
    finalize(conv3x3(0), 1)
    h1 = finalize(conv3x3(1), 2, residual=h0)

    # ---- residual block 1 (conv3, conv4) ----
    finalize(conv3x3(2), 3)
    h2 = finalize(conv3x3(3), 4, residual=h1, write_pad=False)

    # ---- heads: fused policy+value 1x1 conv + BN + ReLU, then FC with the
    # PyTorch flatten permutation folded into per-position (4C,128) slabs ----
    whead = whead_ref[...]                                   # (C, 4C) bf16
    shead = shead_ref[...]                                   # (1, 4C)
    bhead = bhead_ref[...]                                   # (1, 4C)
    logits = None
    for p in range(9):
        hh = jnp.dot(h2[p].astype(bf16), whead, preferred_element_type=f32)
        hh = jnp.maximum(hh * shead + bhead, 0.0)            # (Bt, 4C)
        contrib = jnp.dot(hh.astype(bf16), wfc_ref[p],
                          preferred_element_type=f32)        # (Bt, 128)
        logits = contrib if logits is None else logits + contrib
    logits = logits + bfc_ref[...]

    # masked softmax over cols 0..8, tanh on col 9, one unmasked lane-dense store
    col = jax.lax.broadcasted_iota(jnp.int32, logits.shape, 1)
    pol_mask = col < 9
    ml = jnp.where(pol_mask, logits, -1e30)
    m = jnp.max(ml, axis=-1, keepdims=True)
    e = jnp.where(pol_mask, jnp.exp(ml - m), 0.0)
    inv = pl.reciprocal(jnp.sum(e, axis=-1, keepdims=True), approx=True)
    out_ref[...] = jnp.where(pol_mask, e * inv,
                             jnp.where(col == 9, jnp.tanh(logits), 0.0))


# ---------------- parameter preparation (once per parameter set) ----------------

def prepare_params(p):
    C = NUM_CHANNELS
    f32, bf16 = jnp.float32, jnp.bfloat16

    # shared trunk BatchNorm (eval mode) folded with each conv bias
    scale = (p["bn_gamma"] / jnp.sqrt(p["bn_var"] + EPS)).astype(f32)         # (C,)
    shifts = jnp.stack([(p[f"conv{i}_b"] - p["bn_mean"]) * scale + p["bn_beta"]
                        for i in range(5)], axis=0).astype(f32)                # (5, C)

    # conv0: fold 3x3 spatial shifts + zero padding into 9 per-output-position
    # (27->128, C) slabs -> one (128, 9C) matrix; wrapper then only reshapes+pads x.
    wp1 = jnp.pad(p["conv0_w"], ((0, 0), (0, 0), (1, 1), (1, 1)))              # (C,3,5,5)
    slabs = []
    for h in range(3):
        for w in range(3):
            blk = wp1[:, :, 2 - h:5 - h, 2 - w:5 - w]                          # (co,ci,ih,iw)
            slabs.append(jnp.transpose(blk, (1, 2, 3, 0)).reshape(27, C))
    w0 = jnp.stack(slabs, axis=1)                                              # (27, 9, C)
    w0 = jnp.pad(w0, ((0, 128 - 27), (0, 0), (0, 0))).reshape(128, 9 * C).astype(bf16)

    # conv1..4: im2col weights (9*C, C) with row = (kh*3+kw)*C + ci
    wconv = jnp.stack([p[f"conv{i}_w"].transpose(2, 3, 1, 0).reshape(9 * C, C)
                       for i in range(1, 5)], axis=0).astype(bf16)             # (4, 9C, C)

    # fused policy+value 1x1 conv: (C, 4C); policy cols 0..2C, value cols 2C..4C
    wp = p["p_conv_w"].reshape(2 * C, C).T
    wv = p["v_conv_w"].reshape(2 * C, C).T
    whead = jnp.concatenate([wp, wv], axis=1).astype(bf16)                     # (C, 4C)
    ps = p["p_bn_gamma"] / jnp.sqrt(p["p_bn_var"] + EPS)
    vs = p["v_bn_gamma"] / jnp.sqrt(p["v_bn_var"] + EPS)
    psh = (p["p_conv_b"] - p["p_bn_mean"]) * ps + p["p_bn_beta"]
    vsh = (p["v_conv_b"] - p["v_bn_mean"]) * vs + p["v_bn_beta"]
    shead = jnp.concatenate([ps, vs]).reshape(1, 4 * C).astype(f32)
    bhead = jnp.concatenate([psh, vsh]).reshape(1, 4 * C).astype(f32)

    # FC heads: PyTorch flatten index is c*9 + position; fold that permutation
    # into per-position (4C, 128) slabs; lane-dense output (cols 0..8 policy, 9 value).
    wfc = jnp.zeros((9, 4 * C, NOUT), f32)
    wp_fc = p["p_fc_w"].reshape(9, 2 * C, 9).transpose(2, 1, 0)                # (pos, c, j)
    wv_fc = p["v_fc_w"].reshape(1, 2 * C, 9).transpose(2, 1, 0)                # (pos, c, 1)
    wfc = wfc.at[:, :2 * C, :9].set(wp_fc)
    wfc = wfc.at[:, 2 * C:, 9:10].set(wv_fc)
    wfc = wfc.astype(bf16)
    bfc = jnp.zeros((1, NOUT), f32)
    bfc = bfc.at[0, :9].set(p["p_fc_b"])
    bfc = bfc.at[0, 9].set(p["v_fc_b"][0])

    return dict(w0=w0, wconv=wconv, scale=scale.reshape(1, C), shifts=shifts,
                whead=whead, shead=shead, bhead=bhead, wfc=wfc, bfc=bfc)


# ---------------- forward wrapper ----------------

def tictactoe_forward(x_nchw, prep, batch_tile=128):
    B = x_nchw.shape[0]
    C = NUM_CHANNELS
    # Bt multiple of 16 keeps every bf16 (16,128)-tile row slice aligned.
    # Default 128 is safe on all generations; v5e/v6e (128 MiB VMEM) can raise
    # to 256-512 for MCTS-sized batches.
    Bt = min(_round_up(batch_tile, 16), _round_up(B, 16))
    Bp = _round_up(B, Bt)
    grid = (Bp // Bt,)

    # Wrapper prep is just reshape + pad: NCHW flatten order (c*9+h*3+w) matches
    # the conv0 weight slab layout built in prepare_params.
    xf = x_nchw.reshape(B, 27).astype(jnp.bfloat16)
    xf = jnp.pad(xf, ((0, Bp - B), (0, 128 - 27)))                             # (Bp, 128)

    def _full(a):
        return pl.BlockSpec(tuple(a.shape), lambda i, _n=a.ndim: (0,) * _n)

    weights = (prep["w0"], prep["wconv"], prep["scale"], prep["shifts"],
               prep["whead"], prep["shead"], prep["bhead"], prep["wfc"], prep["bfc"])
    in_specs = [pl.BlockSpec((Bt, 128), lambda i: (i, 0))] + [_full(a) for a in weights]
    out_spec = pl.BlockSpec((Bt, NOUT), lambda i: (i, 0))

    # Right-sized VMEM budget (weights double-buffered + scratch + I/O blocks +
    # live f32 activations) plus headroom, instead of a blanket 32 MiB.
    weight_bytes = sum(int(a.size) * a.dtype.itemsize for a in weights)
    scratch_bytes = 25 * Bt * C * 2 + 13 * Bt * 9 * C * 2
    block_bytes = 2 * 2 * (Bt * 128 * 2 + Bt * NOUT * 4)
    live_bytes = 50 * Bt * C * 4
    vmem_limit = int(2 * weight_bytes + scratch_bytes + block_bytes
                     + 2 * live_bytes) + (4 << 20)

    out = pl.pallas_call(
        _fused_kernel,
        out_shape=jax.ShapeDtypeStruct((Bp, NOUT), jnp.float32),
        grid=grid,
        in_specs=in_specs,
        out_specs=out_spec,
        scratch_shapes=[pltpu.VMEM((25 * Bt, C), jnp.bfloat16),       # padded activations
                        pltpu.VMEM((13 * Bt, 9 * C), jnp.bfloat16)],  # per-layer im2col
        compiler_params=pltpu.CompilerParams(
            dimension_semantics=("parallel",),
            vmem_limit_bytes=vmem_limit),
    )(xf, *weights)

    policy = out[:B, :9].reshape(B, 3, 3)
    value = out[:B, 9:10]
    return policy, value


# ---------------- parameter init (same distributions as before) ----------------

def init_params(key):
    ks = list(jax.random.split(key, 32))
    k = iter(ks)
    C = NUM_CHANNELS

    def norm(shape, std=0.05):
        return (std * jax.random.normal(next(k), shape)).astype(jnp.float32)

    p = {}
    p["conv0_w"] = norm((C, 3, 3, 3));   p["conv0_b"] = norm((C,))
    for i in range(1, 5):
        p[f"conv{i}_w"] = norm((C, C, 3, 3)); p[f"conv{i}_b"] = norm((C,))
    p["bn_gamma"] = 1.0 + norm((C,)); p["bn_beta"] = norm((C,))
    p["bn_mean"] = norm((C,));        p["bn_var"] = 0.5 + jnp.abs(norm((C,)))
    p["p_conv_w"] = norm((2 * C, C, 1, 1)); p["p_conv_b"] = norm((2 * C,))
    p["p_bn_gamma"] = 1.0 + norm((2 * C,)); p["p_bn_beta"] = norm((2 * C,))
    p["p_bn_mean"] = norm((2 * C,));        p["p_bn_var"] = 0.5 + jnp.abs(norm((2 * C,)))
    p["p_fc_w"] = norm((9, 2 * C * 9));     p["p_fc_b"] = norm((9,))
    p["v_conv_w"] = norm((2 * C, C, 1, 1)); p["v_conv_b"] = norm((2 * C,))
    p["v_bn_gamma"] = 1.0 + norm((2 * C,)); p["v_bn_beta"] = norm((2 * C,))
    p["v_bn_mean"] = norm((2 * C,));        p["v_bn_var"] = 0.5 + jnp.abs(norm((2 * C,)))
    p["v_fc_w"] = norm((1, 2 * C * 9));     p["v_fc_b"] = norm((1,))
    return p


if __name__ == "__main__":
    key = jax.random.PRNGKey(0)
    kx, kp = jax.random.split(key)
    B = 2
    # TicTacToe board planes: (B, 3 input channels, 3, 3), NCHW like PyTorch.
    x = jax.random.normal(kx, (B, 3, 3, 3), dtype=jnp.float32)
    params = init_params(kp)
    prep = prepare_params(params)            # once per parameter set

    fwd = jax.jit(tictactoe_forward)
    policy, value = fwd(x, prep)
    policy = jax.block_until_ready(policy)
    value = jax.block_until_ready(value)

    assert policy.shape == (B, 3, 3)
    assert value.shape == (B, 1)
    # softmax uses the EUP approx reciprocal -> sums to 1 within ~1e-3
    assert jnp.allclose(policy.reshape(B, 9).sum(axis=1), 1.0, atol=5e-3)
    assert jnp.all(jnp.abs(value) <= 1.0)
    print("KERNEL_OK")
</pallas_src>

<mosaic_0001>
module attributes {stable_mosaic.version = 11 : i64} {
  func.func @_fused_kernel(%arg0: i32, %arg1: memref<16x128xbf16, #tpu.memory_space<vmem>>, %arg2: memref<128x1152xbf16, #tpu.memory_space<vmem>>, %arg3: memref<4x1152x128xbf16, #tpu.memory_space<vmem>>, %arg4: memref<1x128xf32, #tpu.memory_space<vmem>>, %arg5: memref<5x128xf32, #tpu.memory_space<vmem>>, %arg6: memref<128x512xbf16, #tpu.memory_space<vmem>>, %arg7: memref<1x512xf32, #tpu.memory_space<vmem>>, %arg8: memref<1x512xf32, #tpu.memory_space<vmem>>, %arg9: memref<9x512x128xbf16, #tpu.memory_space<vmem>>, %arg10: memref<1x128xf32, #tpu.memory_space<vmem>>, %arg11: memref<16x128xf32, #tpu.memory_space<vmem>>, %arg12: memref<400x128xbf16, #tpu.memory_space<vmem>>, %arg13: memref<208x1152xbf16, #tpu.memory_space<vmem>>) attributes {dimension_semantics = [#tpu.dimension_semantics<parallel>], iteration_bounds = array<i64: 1>, scalar_prefetch = 0 : i64, scratch_operands = 2 : i64, tpu.core_type = #tpu.core_type<tc>, window_params = [{transform_indices = @transform_0, window_bounds = array<i64: 16, 128>}, {pipeline_mode = #tpu.pipeline_mode<synchronous>, transform_indices = @transform_1, window_bounds = array<i64: 128, 1152>}, {pipeline_mode = #tpu.pipeline_mode<synchronous>, transform_indices = @transform_2, window_bounds = array<i64: 4, 1152, 128>}, {pipeline_mode = #tpu.pipeline_mode<synchronous>, transform_indices = @transform_3, window_bounds = array<i64: 1, 128>}, {pipeline_mode = #tpu.pipeline_mode<synchronous>, transform_indices = @transform_4, window_bounds = array<i64: 5, 128>}, {pipeline_mode = #tpu.pipeline_mode<synchronous>, transform_indices = @transform_5, window_bounds = array<i64: 128, 512>}, {pipeline_mode = #tpu.pipeline_mode<synchronous>, transform_indices = @transform_6, window_bounds = array<i64: 1, 512>}, {pipeline_mode = #tpu.pipeline_mode<synchronous>, transform_indices = @transform_7, window_bounds = array<i64: 1, 512>}, {pipeline_mode = #tpu.pipeline_mode<synchronous>, transform_indices = @transform_8, window_bounds = array<i64: 9, 512, 128>}, {pipeline_mode = #tpu.pipeline_mode<synchronous>, transform_indices = @transform_9, window_bounds = array<i64: 1, 128>}, {transform_indices = @transform_10, window_bounds = array<i64: 16, 128>}]} {
    %c0 = arith.constant 0 : index
    %c0_0 = arith.constant 0 : index
    %0 = vector.load %arg4[%c0, %c0_0] : memref<1x128xf32, #tpu.memory_space<vmem>>, vector<1x128xf32>
    %cst = arith.constant 0.000000e+00 : bf16
    %1 = vector.broadcast %cst : bf16 to vector<96x128xbf16>
    %c0_1 = arith.constant 0 : index
    %c0_2 = arith.constant 0 : index
    %2 = vector.load %arg12[%c0_1, %c0_2] : memref<400x128xbf16, #tpu.memory_space<vmem>>, vector<96x128xbf16>
    tpu.vector_store %arg12[%c0_1, %c0_2], %1 {strides = array<i32>} : memref<400x128xbf16, #tpu.memory_space<vmem>>, vector<96x128xbf16>,
    %cst_3 = arith.constant 0.000000e+00 : bf16
    %3 = vector.broadcast %cst_3 : bf16 to vector<32x128xbf16>
    %c144 = arith.constant 144 : index
    %c0_4 = arith.constant 0 : index
    %4 = vector.load %arg12[%c144, %c0_4] : memref<400x128xbf16, #tpu.memory_space<vmem>>, vector<32x128xbf16>
    tpu.vector_store %arg12[%c144, %c0_4], %3 {strides = array<i32>} : memref<400x128xbf16, #tpu.memory_space<vmem>>, vector<32x128xbf16>,
    %cst_5 = arith.constant 0.000000e+00 : bf16
    %5 = vector.broadcast %cst_5 : bf16 to vector<32x128xbf16>
    %c224 = arith.constant 224 : index
    %c0_6 = arith.constant 0 : index
    %6 = vector.load %arg12[%c224, %c0_6] : memref<400x128xbf16, #tpu.memory_space<vmem>>, vector<32x128xbf16>
    tpu.vector_store %arg12[%c224, %c0_6], %5 {strides = array<i32>} : memref<400x128xbf16, #tpu.memory_space<vmem>>, vector<32x128xbf16>,
    %cst_7 = arith.constant 0.000000e+00 : bf16
    %7 = vector.broadcast %cst_7 : bf16 to vector<96x128xbf16>
    %c304 = arith.constant 304 : index
    %c0_8 = arith.constant 0 : index
    %8 = vector.load %arg12[%c304, %c0_8] : memref<400x128xbf16, #tpu.memory_space<vmem>>, vector<96x128xbf16>
    tpu.vector_store %arg12[%c304, %c0_8], %7 {strides = array<i32>} : memref<400x128xbf16, #tpu.memory_space<vmem>>, vector<96x128xbf16>,
    %c0_9 = arith.constant 0 : index
    %c0_10 = arith.constant 0 : index
    %9 = vector.load %arg1[%c0_9, %c0_10] : memref<16x128xbf16, #tpu.memory_space<vmem>>, vector<16x128xbf16>
    %c0_11 = arith.constant 0 : index
    %c0_12 = arith.constant 0 : index
    %10 = vector.load %arg2[%c0_11, %c0_12] : memref<128x1152xbf16, #tpu.memory_space<vmem>>, vector<128x1152xbf16>
    %cst_13 = arith.constant dense<0.000000e+00> : vector<16x1152xf32>
    %11 = tpu.matmul %9, %10, %cst_13 {dimension_numbers = #tpu.dot_dimension_numbers<[1], [0], [0], [1], [0, 0, 1, 1], [], []>} : vector<16x128xbf16>, vector<128x1152xbf16>, vector<16x1152xf32> -> vector<16x1152xf32>
    %c0_14 = arith.constant 0 : index
    %c0_15 = arith.constant 0 : index
    %12 = vector.load %arg5[%c0_14, %c0_15] : memref<5x128xf32, #tpu.memory_space<vmem>>, vector<1x128xf32>
    %13 = vector.extract_strided_slice %11 {offsets = [0, 0], sizes = [16, 128], strides = [1, 1]} : vector<16x1152xf32> to vector<16x128xf32>
    %14 = vector.broadcast %0 : vector<1x128xf32> to vector<16x128xf32>
    %15 = arith.mulf %13, %14 : vector<16x128xf32>
    %16 = vector.broadcast %12 : vector<1x128xf32> to vector<16x128xf32>
    %17 = arith.addf %15, %16 : vector<16x128xf32>
    %cst_16 = arith.constant 0.000000e+00 : f32
    %18 = vector.broadcast %cst_16 : f32 to vector<16x128xf32>
    %19 = arith.maximumf %17, %18 : vector<16x128xf32>
    %20 = arith.truncf %19 : vector<16x128xf32> to vector<16x128xbf16>
    %c96 = arith.constant 96 : index
    %c0_17 = arith.constant 0 : index
    %21 = vector.load %arg12[%c96, %c0_17] : memref<400x128xbf16, #tpu.memory_space<vmem>>, vector<16x128xbf16>
    tpu.vector_store %arg12[%c96, %c0_17], %20 {strides = array<i32>} : memref<400x128xbf16, #tpu.memory_space<vmem>>, vector<16x128xbf16>,
    %22 = vector.extract_strided_slice %11 {offsets = [0, 128], sizes = [16, 128], strides = [1, 1]} : vector<16x1152xf32> to vector<16x128xf32>
    %23 = vector.broadcast %0 : vector<1x128xf32> to vector<16x128xf32>
    %24 = arith.mulf %22, %23 : vector<16x128xf32>
    %25 = vector.broadcast %12 : vector<1x128xf32> to vector<16x128xf32>
    %26 = arith.addf %24, %25 : vector<16x128xf32>
    %cst_18 = arith.constant 0.000000e+00 : f32
    %27 = vector.broadcast %cst_18 : f32 to vector<16x128xf32>
    %28 = arith.maximumf %26, %27 : vector<16x128xf32>
    %29 = arith.truncf %28 : vector<16x128xf32> to vector<16x128xbf16>
    %c112 = arith.constant 112 : index
    %c0_19 = arith.constant 0 : index
    %30 = vector.load %arg12[%c112, %c0_19] : memref<400x128xbf16, #tpu.memory_space<vmem>>, vector<16x128xbf16>
    tpu.vector_store %arg12[%c112, %c0_19], %29 {strides = array<i32>} : memref<400x128xbf16, #tpu.memory_space<vmem>>, vector<16x128xbf16>,
    %31 = vector.extract_strided_slice %11 {offsets = [0, 256], sizes = [16, 128], strides = [1, 1]} : vector<16x1152xf32> to vector<16x128xf32>
    %32 = vector.broadcast %0 : vector<1x128xf32> to vector<16x128xf32>
    %33 = arith.mulf %31, %32 : vector<16x128xf32>
    %34 = vector.broadcast %12 : vector<1x128xf32> to vector<16x128xf32>
    %35 = arith.addf %33, %34 : vector<16x128xf32>
    %cst_20 = arith.constant 0.000000e+00 : f32
    %36 = vector.broadcast %cst_20 : f32 to vector<16x128xf32>
    %37 = arith.maximumf %35, %36 : vector<16x128xf32>
    %38 = arith.truncf %37 : vector<16x128xf32> to vector<16x128xbf16>
    %c128 = arith.constant 128 : index
    %c0_21 = arith.constant 0 : index
    %39 = vector.load %arg12[%c128, %c0_21] : memref<400x128xbf16, #tpu.memory_space<vmem>>, vector<16x128xbf16>
    tpu.vector_store %arg12[%c128, %c0_21], %38 {strides = array<i32>} : memref<400x128xbf16, #tpu.memory_space<vmem>>, vector<16x128xbf16>,
    %40 = vector.extract_strided_slice %11 {offsets = [0, 384], sizes = [16, 128], strides = [1, 1]} : vector<16x1152xf32> to vector<16x128xf32>
    %41 = vector.broadcast %0 : vector<1x128xf32> to vector<16x128xf32>
    %42 = arith.mulf %40, %41 : vector<16x128xf32>
    %43 = vector.broadcast %12 : vector<1x128xf32> to vector<16x128xf32>
    %44 = arith.addf %42, %43 : vector<16x128xf32>
    %cst_22 = arith.constant 0.000000e+00 : f32
    %45 = vector.broadcast %cst_22 : f32 to vector<16x128xf32>
    %46 = arith.maximumf %44, %45 : vector<16x128xf32>
    %47 = arith.truncf %46 : vector<16x128xf32> to vector<16x128xbf16>
    %c176 = arith.constant 176 : index
    %c0_23 = arith.constant 0 : index
    %48 = vector.load %arg12[%c176, %c0_23] : memref<400x128xbf16, #tpu.memory_space<vmem>>, vector<16x128xbf16>
    tpu.vector_store %arg12[%c176, %c0_23], %47 {strides = array<i32>} : memref<400x128xbf16, #tpu.memory_space<vmem>>, vector<16x128xbf16>,
    %49 = vector.extract_strided_slice %11 {offsets = [0, 512], sizes = [16, 128], strides = [1, 1]} : vector<16x1152xf32> to vector<16x128xf32>
    %50 = vector.broadcast %0 : vector<1x128xf32> to vector<16x128xf32>
    %51 = arith.mulf %49, %50 : vector<16x128xf32>
    %52 = vector.broadcast %12 : vector<1x128xf32> to vector<16x128xf32>
    %53 = arith.addf %51, %52 : vector<16x128xf32>
    %cst_24 = arith.constant 0.000000e+00 : f32
    %54 = vector.broadcast %cst_24 : f32 to vector<16x128xf32>
    %55 = arith.maximumf %53, %54 : vector<16x128xf32>
    %56 = arith.truncf %55 : vector<16x128xf32> to vector<16x128xbf16>
    %c192 = arith.constant 192 : index
    %c0_25 = arith.constant 0 : index
    %57 = vector.load %arg12[%c192, %c0_25] : memref<400x128xbf16, #tpu.memory_space<vmem>>, vector<16x128xbf16>
    tpu.vector_store %arg12[%c192, %c0_25], %56 {strides = array<i32>} : memref<400x128xbf16, #tpu.memory_space<vmem>>, vector<16x128xbf16>,
    %58 = vector.extract_strided_slice %11 {offsets = [0, 640], sizes = [16, 128], strides = [1, 1]} : vector<16x1152xf32> to vector<16x128xf32>
    %59 = vector.broadcast %0 : vector<1x128xf32> to vector<16x128xf32>
    %60 = arith.mulf %58, %59 : vector<16x128xf32>
    %61 = vector.broadcast %12 : vector<1x128xf32> to vector<16x128xf32>
    %62 = arith.addf %60, %61 : vector<16x128xf32>
    %cst_26 = arith.constant 0.000000e+00 : f32
    %63 = vector.broadcast %cst_26 : f32 to vector<16x128xf32>
    %64 = arith.maximumf %62, %63 : vector<16x128xf32>
    %65 = arith.truncf %64 : vector<16x128xf32> to vector<16x128xbf16>
    %c208 = arith.constant 208 : index
    %c0_27 = arith.constant 0 : index
    %66 = vector.load %arg12[%c208, %c0_27] : memref<400x128xbf16, #tpu.memory_space<vmem>>, vector<16x128xbf16>
    tpu.vector_store %arg12[%c208, %c0_27], %65 {strides = array<i32>} : memref<400x128xbf16, #tpu.memory_space<vmem>>, vector<16x128xbf16>,
    %67 = vector.extract_strided_slice %11 {offsets = [0, 768], sizes = [16, 128], strides = [1, 1]} : vector<16x1152xf32> to vector<16x128xf32>
    %68 = vector.broadcast %0 : vector<1x128xf32> to vector<16x128xf32>
    %69 = arith.mulf %67, %68 : vector<16x128xf32>
    %70 = vector.broadcast %12 : vector<1x128xf32> to vector<16x128xf32>
    %71 = arith.addf %69, %70 : vector<16x128xf32>
    %cst_28 = arith.constant 0.000000e+00 : f32
    %72 = vector.broadcast %cst_28 : f32 to vector<16x128xf32>
    %73 = arith.maximumf %71, %72 : vector<16x128xf32>
    %74 = arith.truncf %73 : vector<16x128xf32> to vector<16x128xbf16>
    %c256 = arith.constant 256 : index
    %c0_29 = arith.constant 0 : index
    %75 = vector.load %arg12[%c256, %c0_29] : memref<400x128xbf16, #tpu.memory_space<vmem>>, vector<16x128xbf16>
    tpu.vector_store %arg12[%c256, %c0_29], %74 {strides = array<i32>} : memref<400x128xbf16, #tpu.memory_space<vmem>>, vector<16x128xbf16>,
    %76 = vector.extract_strided_slice %11 {offsets = [0, 896], sizes = [16, 128], strides = [1, 1]} : vector<16x1152xf32> to vector<16x128xf32>
    %77 = vector.broadcast %0 : vector<1x128xf32> to vector<16x128xf32>
    %78 = arith.mulf %76, %77 : vector<16x128xf32>
    %79 = vector.broadcast %12 : vector<1x128xf32> to vector<16x128xf32>
    %80 = arith.addf %78, %79 : vector<16x128xf32>
    %cst_30 = arith.constant 0.000000e+00 : f32
    %81 = vector.broadcast %cst_30 : f32 to vector<16x128xf32>
    %82 = arith.maximumf %80, %81 : vector<16x128xf32>
    %83 = arith.truncf %82 : vector<16x128xf32> to vector<16x128xbf16>
    %c272 = arith.constant 272 : index
    %c0_31 = arith.constant 0 : index
    %84 = vector.load %arg12[%c272, %c0_31] : memref<400x128xbf16, #tpu.memory_space<vmem>>, vector<16x128xbf16>
    tpu.vector_store %arg12[%c272, %c0_31], %83 {strides = array<i32>} : memref<400x128xbf16, #tpu.memory_space<vmem>>, vector<16x128xbf16>,
    %85 = vector.extract_strided_slice %11 {offsets = [0, 1024], sizes = [16, 128], strides = [1, 1]} : vector<16x1152xf32> to vector<16x128xf32>
    %86 = vector.broadcast %0 : vector<1x128xf32> to vector<16x128xf32>
    %87 = arith.mulf %85, %86 : vector<16x128xf32>
    %88 = vector.broadcast %12 : vector<1x128xf32> to vector<16x128xf32>
    %89 = arith.addf %87, %88 : vector<16x128xf32>
    %cst_32 = arith.constant 0.000000e+00 : f32
    %90 = vector.broadcast %cst_32 : f32 to vector<16x128xf32>
    %91 = arith.maximumf %89, %90 : vector<16x128xf32>
    %92 = arith.truncf %91 : vector<16x128xf32> to vector<16x128xbf16>
    %c288 = arith.constant 288 : index
    %c0_33 = arith.constant 0 : index
    %93 = vector.load %arg12[%c288, %c0_33] : memref<400x128xbf16, #tpu.memory_space<vmem>>, vector<16x128xbf16>
    tpu.vector_store %arg12[%c288, %c0_33], %92 {strides = array<i32>} : memref<400x128xbf16, #tpu.memory_space<vmem>>, vector<16x128xbf16>,
    %c0_34 = arith.constant 0 : index
    %c0_35 = arith.constant 0 : index
    %94 = vector.load %arg12[%c0_34, %c0_35] : memref<400x128xbf16, #tpu.memory_space<vmem>>, vector<208x128xbf16>
    %c0_36 = arith.constant 0 : index
    %c0_37 = arith.constant 0 : index
    %95 = vector.load %arg13[%c0_36, %c0_37] : memref<208x1152xbf16, #tpu.memory_space<vmem>>, vector<208x128xbf16>
    tpu.vector_store %arg13[%c0_36, %c0_37], %94 {strides = array<i32>} : memref<208x1152xbf16, #tpu.memory_space<vmem>>, vector<208x128xbf16>,
    %c16 = arith.constant 16 : index
    %c0_38 = arith.constant 0 : index
    %96 = vector.load %arg12[%c16, %c0_38] : memref<400x128xbf16, #tpu.memory_space<vmem>>, vector<208x128xbf16>
    %c0_39 = arith.constant 0 : index
    %c128_40 = arith.constant 128 : index
    %97 = vector.load %arg13[%c0_39, %c128_40] : memref<208x1152xbf16, #tpu.memory_space<vmem>>, vector<208x128xbf16>
    tpu.vector_store %arg13[%c0_39, %c128_40], %96 {strides = array<i32>} : memref<208x1152xbf16, #tpu.memory_space<vmem>>, vector<208x128xbf16>,
    %c32 = arith.constant 32 : index
    %c0_41 = arith.constant 0 : index
    %98 = vector.load %arg12[%c32, %c0_41] : memref<400x128xbf16, #tpu.memory_space<vmem>>, vector<208x128xbf16>
    %c0_42 = arith.constant 0 : index
    %c256_43 = arith.constant 256 : index
    %99 = vector.load %arg13[%c0_42, %c256_43] : memref<208x1152xbf16, #tpu.memory_space<vmem>>, vector<208x128xbf16>
    tpu.vector_store %arg13[%c0_42, %c256_43], %98 {strides = array<i32>} : memref<208x1152xbf16, #tpu.memory_space<vmem>>, vector<208x128xbf16>,
    %c80 = arith.constant 80 : index
    %c0_44 = arith.constant 0 : index
    %100 = vector.load %arg12[%c80, %c0_44] : memref<400x128xbf16, #tpu.memory_space<vmem>>, vector<208x128xbf16>
    %c0_45 = arith.constant 0 : index
    %c384 = arith.constant 384 : index
    %101 = vector.load %arg13[%c0_45, %c384] : memref<208x1152xbf16, #tpu.memory_space<vmem>>, vector<208x128xbf16>
    tpu.vector_store %arg13[%c0_45, %c384], %100 {strides = array<i32>} : memref<208x1152xbf16, #tpu.memory_space<vmem>>, vector<208x128xbf16>,
    %c96_46 = arith.constant 96 : index
    %c0_47 = arith.constant 0 : index
    %102 = vector.load %arg12[%c96_46, %c0_47] : memref<400x128xbf16, #tpu.memory_space<vmem>>, vector<208x128xbf16>
    %c0_48 = arith.constant 0 : index
    %c512 = arith.constant 512 : index
    %103 = vector.load %arg13[%c0_48, %c512] : memref<208x1152xbf16, #tpu.memory_space<vmem>>, vector<208x128xbf16>
    tpu.vector_store %arg13[%c0_48, %c512], %102 {strides = array<i32>} : memref<208x1152xbf16, #tpu.memory_space<vmem>>, vector<208x128xbf16>,
    %c112_49 = arith.constant 112 : index
    %c0_50 = arith.constant 0 : index
    %104 = vector.load %arg12[%c112_49, %c0_50] : memref<400x128xbf16, #tpu.memory_space<vmem>>, vector<208x128xbf16>
    %c0_51 = arith.constant 0 : index
    %c640 = arith.constant 640 : index
    %105 = vector.load %arg13[%c0_51, %c640] : memref<208x1152xbf16, #tpu.memory_space<vmem>>, vector<208x128xbf16>
    tpu.vector_store %arg13[%c0_51, %c640], %104 {strides = array<i32>} : memref<208x1152xbf16, #tpu.memory_space<vmem>>, vector<208x128xbf16>,
    %c160 = arith.constant 160 : index
    %c0_52 = arith.constant 0 : index
    %106 = vector.load %arg12[%c160, %c0_52] : memref<400x128xbf16, #tpu.memory_space<vmem>>, vector<208x128xbf16>
    %c0_53 = arith.constant 0 : index
    %c768 = arith.constant 768 : index
    %107 = vector.load %arg13[%c0_53, %c768] : memref<208x1152xbf16, #tpu.memory_space<vmem>>, vector<208x128xbf16>
    tpu.vector_store %arg13[%c0_53, %c768], %106 {strides = array<i32>} : memref<208x1152xbf16, #tpu.memory_space<vmem>>, vector<208x128xbf16>,
    %c176_54 = arith.constant 176 : index
    %c0_55 = arith.constant 0 : index
    %108 = vector.load %arg12[%c176_54, %c0_55] : memref<400x128xbf16, #tpu.memory_space<vmem>>, vector<208x128xbf16>
    %c0_56 = arith.constant 0 : index
    %c896 = arith.constant 896 : index
    %109 = vector.load %arg13[%c0_56, %c896] : memref<208x1152xbf16, #tpu.memory_space<vmem>>, vector<208x128xbf16>
    tpu.vector_store %arg13[%c0_56, %c896], %108 {strides = array<i32>} : memref<208x1152xbf16, #tpu.memory_space<vmem>>, vector<208x128xbf16>,
    %c192_57 = arith.constant 192 : index
    %c0_58 = arith.constant 0 : index
    %110 = vector.load %arg12[%c192_57, %c0_58] : memref<400x128xbf16, #tpu.memory_space<vmem>>, vector<208x128xbf16>
    %c0_59 = arith.constant 0 : index
    %c1024 = arith.constant 1024 : index
    %111 = vector.load %arg13[%c0_59, %c1024] : memref<208x1152xbf16, #tpu.memory_space<vmem>>, vector<208x128xbf16>
    tpu.vector_store %arg13[%c0_59, %c1024], %110 {strides = array<i32>} : memref<208x1152xbf16, #tpu.memory_space<vmem>>, vector<208x128xbf16>,
    %c0_60 = arith.constant 0 : index
    %c0_61 = arith.constant 0 : index
    %112 = vector.load %arg13[%c0_60, %c0_61] : memref<208x1152xbf16, #tpu.memory_space<vmem>>, vector<208x1152xbf16>
    %c0_62 = arith.constant 0 : index
    %c0_63 = arith.constant 0 : index
    %c0_64 = arith.constant 0 : index
    %113 = vector.load %arg3[%c0_62, %c0_63, %c0_64] : memref<4x1152x128xbf16, #tpu.memory_space<vmem>>, vector<1x1152x128xbf16>
    %114 = vector.shape_cast %113 : vector<1x1152x128xbf16> to vector<1152x128xbf16>
    %cst_65 = arith.constant dense<0.000000e+00> : vector<208x128xf32>
    %115 = tpu.matmul %112, %114, %cst_65 {dimension_numbers = #tpu.dot_dimension_numbers<[1], [0], [0], [1], [0, 0, 1, 1], [], []>} : vector<208x1152xbf16>, vector<1152x128xbf16>, vector<208x128xf32> -> vector<208x128xf32>
    %c1 = arith.constant 1 : index
    %c0_66 = arith.constant 0 : index
    %116 = vector.load %arg5[%c1, %c0_66] : memref<5x128xf32, #tpu.memory_space<vmem>>, vector<1x128xf32>
    %117 = vector.extract_strided_slice %115 {offsets = [0, 0], sizes = [16, 128], strides = [1, 1]} : vector<208x128xf32> to vector<16x128xf32>
    %118 = vector.broadcast %0 : vector<1x128xf32> to vector<16x128xf32>
    %119 = arith.mulf %117, %118 : vector<16x128xf32>
    %120 = vector.broadcast %116 : vector<1x128xf32> to vector<16x128xf32>
    %121 = arith.addf %119, %120 : vector<16x128xf32>
    %cst_67 = arith.constant 0.000000e+00 : f32
    %122 = vector.broadcast %cst_67 : f32 to vector<16x128xf32>
    %123 = arith.maximumf %121, %122 : vector<16x128xf32>
    %124 = arith.truncf %123 : vector<16x128xf32> to vector<16x128xbf16>
    %c96_68 = arith.constant 96 : index
    %c0_69 = arith.constant 0 : index
    %125 = vector.load %arg12[%c96_68, %c0_69] : memref<400x128xbf16, #tpu.memory_space<vmem>>, vector<16x128xbf16>
    tpu.vector_store %arg12[%c96_68, %c0_69], %124 {strides = array<i32>} : memref<400x128xbf16, #tpu.memory_space<vmem>>, vector<16x128xbf16>,
    %126 = vector.extract_strided_slice %115 {offsets = [16, 0], sizes = [16, 128], strides = [1, 1]} : vector<208x128xf32> to vector<16x128xf32>
    %127 = vector.broadcast %0 : vector<1x128xf32> to vector<16x128xf32>
    %128 = arith.mulf %126, %127 : vector<16x128xf32>
    %129 = vector.broadcast %116 : vector<1x128xf32> to vector<16x128xf32>
    %130 = arith.addf %128, %129 : vector<16x128xf32>
    %cst_70 = arith.constant 0.000000e+00 : f32
    %131 = vector.broadcast %cst_70 : f32 to vector<16x128xf32>
    %132 = arith.maximumf %130, %131 : vector<16x128xf32>
    %133 = arith.truncf %132 : vector<16x128xf32> to vector<16x128xbf16>
    %c112_71 = arith.constant 112 : index
    %c0_72 = arith.constant 0 : index
    %134 = vector.load %arg12[%c112_71, %c0_72] : memref<400x128xbf16, #tpu.memory_space<vmem>>, vector<16x128xbf16>
    tpu.vector_store %arg12[%c112_71, %c0_72], %133 {strides = array<i32>} : memref<400x128xbf16, #tpu.memory_space<vmem>>, vector<16x128xbf16>,
    %135 = vector.extract_strided_slice %115 {offsets = [32, 0], sizes = [16, 128], strides = [1, 1]} : vector<208x128xf32> to vector<16x128xf32>
    %136 = vector.broadcast %0 : vector<1x128xf32> to vector<16x128xf32>
    %137 = arith.mulf %135, %136 : vector<16x128xf32>
    %138 = vector.broadcast %116 : vector<1x128xf32> to vector<16x128xf32>
    %139 = arith.addf %137, %138 : vector<16x128xf32>
    %cst_73 = arith.constant 0.000000e+00 : f32
    %140 = vector.broadcast %cst_73 : f32 to vector<16x128xf32>
    %141 = arith.maximumf %139, %140 : vector<16x128xf32>
    %142 = arith.truncf %141 : vector<16x128xf32> to vector<16x128xbf16>
    %c128_74 = arith.constant 128 : index
    %c0_75 = arith.constant 0 : index
    %143 = vector.load %arg12[%c128_74, %c0_75] : memref<400x128xbf16, #tpu.memory_space<vmem>>, vector<16x128xbf16>
    tpu.vector_store %arg12[%c128_74, %c0_75], %142 {strides = array<i32>} : memref<400x128xbf16, #tpu.memory_space<vmem>>, vector<16x128xbf16>,
    %144 = vector.extract_strided_slice %115 {offsets = [80, 0], sizes = [16, 128], strides = [1, 1]} : vector<208x128xf32> to vector<16x128xf32>
    %145 = vector.broadcast %0 : vector<1x128xf32> to vector<16x128xf32>
    %146 = arith.mulf %144, %145 : vector<16x128xf32>
    %147 = vector.broadcast %116 : vector<1x128xf32> to vector<16x128xf32>
    %148 = arith.addf %146, %147 : vector<16x128xf32>
    %cst_76 = arith.constant 0.000000e+00 : f32
    %149 = vector.broadcast %cst_76 : f32 to vector<16x128xf32>
    %150 = arith.maximumf %148, %149 : vector<16x128xf32>
    %151 = arith.truncf %150 : vector<16x128xf32> to vector<16x128xbf16>
    %c176_77 = arith.constant 176 : index
    %c0_78 = arith.constant 0 : index
    %152 = vector.load %arg12[%c176_77, %c0_78] : memref<400x128xbf16, #tpu.memory_space<vmem>>, vector<16x128xbf16>
    tpu.vector_store %arg12[%c176_77, %c0_78], %151 {strides = array<i32>} : memref<400x128xbf16, #tpu.memory_space<vmem>>, vector<16x128xbf16>,
    %153 = vector.extract_strided_slice %115 {offsets = [96, 0], sizes = [16, 128], strides = [1, 1]} : vector<208x128xf32> to vector<16x128xf32>
    %154 = vector.broadcast %0 : vector<1x128xf32> to vector<16x128xf32>
    %155 = arith.mulf %153, %154 : vector<16x128xf32>
    %156 = vector.broadcast %116 : vector<1x128xf32> to vector<16x128xf32>
    %157 = arith.addf %155, %156 : vector<16x128xf32>
    %cst_79 = arith.constant 0.000000e+00 : f32
    %158 = vector.broadcast %cst_79 : f32 to vector<16x128xf32>
    %159 = arith.maximumf %157, %158 : vector<16x128xf32>
    %160 = arith.truncf %159 : vector<16x128xf32> to vector<16x128xbf16>
    %c192_80 = arith.constant 192 : index
    %c0_81 = arith.constant 0 : index
    %161 = vector.load %arg12[%c192_80, %c0_81] : memref<400x128xbf16, #tpu.memory_space<vmem>>, vector<16x128xbf16>
    tpu.vector_store %arg12[%c192_80, %c0_81], %160 {strides = array<i32>} : memref<400x128xbf16, #tpu.memory_space<vmem>>, vector<16x128xbf16>,
    %162 = vector.extract_strided_slice %115 {offsets = [112, 0], sizes = [16, 128], strides = [1, 1]} : vector<208x128xf32> to vector<16x128xf32>
    %163 = vector.broadcast %0 : vector<1x128xf32> to vector<16x128xf32>
    %164 = arith.mulf %162, %163 : vector<16x128xf32>
    %165 = vector.broadcast %116 : vector<1x128xf32> to vector<16x128xf32>
    %166 = arith.addf %164, %165 : vector<16x128xf32>
    %cst_82 = arith.constant 0.000000e+00 : f32
    %167 = vector.broadcast %cst_82 : f32 to vector<16x128xf32>
    %168 = arith.maximumf %166, %167 : vector<16x128xf32>
    %169 = arith.truncf %168 : vector<16x128xf32> to vector<16x128xbf16>
    %c208_83 = arith.constant 208 : index
    %c0_84 = arith.constant 0 : index
    %170 = vector.load %arg12[%c208_83, %c0_84] : memref<400x128xbf16, #tpu.memory_space<vmem>>, vector<16x128xbf16>
    tpu.vector_store %arg12[%c208_83, %c0_84], %169 {strides = array<i32>} : memref<400x128xbf16, #tpu.memory_space<vmem>>, vector<16x128xbf16>,
    %171 = vector.extract_strided_slice %115 {offsets = [160, 0], sizes = [16, 128], strides = [1, 1]} : vector<208x128xf32> to vector<16x128xf32>
    %172 = vector.broadcast %0 : vector<1x128xf32> to vector<16x128xf32>
    %173 = arith.mulf %171, %172 : vector<16x128xf32>
    %174 = vector.broadcast %116 : vector<1x128xf32> to vector<16x128xf32>
    %175 = arith.addf %173, %174 : vector<16x128xf32>
    %cst_85 = arith.constant 0.000000e+00 : f32
    %176 = vector.broadcast %cst_85 : f32 to vector<16x128xf32>
    %177 = arith.maximumf %175, %176 : vector<16x128xf32>
    %178 = arith.truncf %177 : vector<16x128xf32> to vector<16x128xbf16>
    %c256_86 = arith.constant 256 : index
    %c0_87 = arith.constant 0 : index
    %179 = vector.load %arg12[%c256_86, %c0_87] : memref<400x128xbf16, #tpu.memory_space<vmem>>, vector<16x128xbf16>
    tpu.vector_store %arg12[%c256_86, %c0_87], %178 {strides = array<i32>} : memref<400x128xbf16, #tpu.memory_space<vmem>>, vector<16x128xbf16>,
    %180 = vector.extract_strided_slice %115 {offsets = [176, 0], sizes = [16, 128], strides = [1, 1]} : vector<208x128xf32> to vector<16x128xf32>
    %181 = vector.broadcast %0 : vector<1x128xf32> to vector<16x128xf32>
    %182 = arith.mulf %180, %181 : vector<16x128xf32>
    %183 = vector.broadcast %116 : vector<1x128xf32> to vector<16x128xf32>
    %184 = arith.addf %182, %183 : vector<16x128xf32>
    %cst_88 = arith.constant 0.000000e+00 : f32
    %185 = vector.broadcast %cst_88 : f32 to vector<16x128xf32>
    %186 = arith.maximumf %184, %185 : vector<16x128xf32>
    %187 = arith.truncf %186 : vector<16x128xf32> to vector<16x128xbf16>
    %c272_89 = arith.constant 272 : index
    %c0_90 = arith.constant 0 : index
    %188 = vector.load %arg12[%c272_89, %c0_90] : memref<400x128xbf16, #tpu.memory_space<vmem>>, vector<16x128xbf16>
    tpu.vector_store %arg12[%c272_89, %c0_90], %187 {strides = array<i32>} : memref<400x128xbf16, #tpu.memory_space<vmem>>, vector<16x128xbf16>,
    %189 = vector.extract_strided_slice %115 {offsets = [192, 0], sizes = [16, 128], strides = [1, 1]} : vector<208x128xf32> to vector<16x128xf32>
    %190 = vector.broadcast %0 : vector<1x128xf32> to vector<16x128xf32>
    %191 = arith.mulf %189, %190 : vector<16x128xf32>
    %192 = vector.broadcast %116 : vector<1x128xf32> to vector<16x128xf32>
    %193 = arith.addf %191, %192 : vector<16x128xf32>
    %cst_91 = arith.constant 0.000000e+00 : f32
    %194 = vector.broadcast %cst_91 : f32 to vector<16x128xf32>
    %195 = arith.maximumf %193, %194 : vector<16x128xf32>
    %196 = arith.truncf %195 : vector<16x128xf32> to vector<16x128xbf16>
    %c288_92 = arith.constant 288 : index
    %c0_93 = arith.constant 0 : index
    %197 = vector.load %arg12[%c288_92, %c0_93] : memref<400x128xbf16, #tpu.memory_space<vmem>>, vector<16x128xbf16>
    tpu.vector_store %arg12[%c288_92, %c0_93], %196 {strides = array<i32>} : memref<400x128xbf16, #tpu.memory_space<vmem>>, vector<16x128xbf16>,
    %c0_94 = arith.constant 0 : index
    %c0_95 = arith.constant 0 : index
    %198 = vector.load %arg12[%c0_94, %c0_95] : memref<400x128xbf16, #tpu.memory_space<vmem>>, vector<208x128xbf16>
    %c0_96 = arith.constant 0 : index
    %c0_97 = arith.constant 0 : index
    %199 = vector.load %arg13[%c0_96, %c0_97] : memref<208x1152xbf16, #tpu.memory_space<vmem>>, vector<208x128xbf16>
    tpu.vector_store %arg13[%c0_96, %c0_97], %198 {strides = array<i32>} : memref<208x1152xbf16, #tpu.memory_space<vmem>>, vector<208x128xbf16>,
    %c16_98 = arith.constant 16 : index
    %c0_99 = arith.constant 0 : index
    %200 = vector.load %arg12[%c16_98, %c0_99] : memref<400x128xbf16, #tpu.memory_space<vmem>>, vector<208x128xbf16>
    %c0_100 = arith.constant 0 : index
    %c128_101 = arith.constant 128 : index
    %201 = vector.load %arg13[%c0_100, %c128_101] : memref<208x1152xbf16, #tpu.memory_space<vmem>>, vector<208x128xbf16>
    tpu.vector_store %arg13[%c0_100, %c128_101], %200 {strides = array<i32>} : memref<208x1152xbf16, #tpu.memory_space<vmem>>, vector<208x128xbf16>,
    %c32_102 = arith.constant 32 : index
    %c0_103 = arith.constant 0 : index
    %202 = vector.load %arg12[%c32_102, %c0_103] : memref<400x128xbf16, #tpu.memory_space<vmem>>, vector<208x128xbf16>
    %c0_104 = arith.constant 0 : index
    %c256_105 = arith.constant 256 : index
    %203 = vector.load %arg13[%c0_104, %c256_105] : memref<208x1152xbf16, #tpu.memory_space<vmem>>, vector<208x128xbf16>
    tpu.vector_store %arg13[%c0_104, %c256_105], %202 {strides = array<i32>} : memref<208x1152xbf16, #tpu.memory_space<vmem>>, vector<208x128xbf16>,
    %c80_106 = arith.constant 80 : index
    %c0_107 = arith.constant 0 : index
    %204 = vector.load %arg12[%c80_106, %c0_107] : memref<400x128xbf16, #tpu.memory_space<vmem>>, vector<208x128xbf16>
    %c0_108 = arith.constant 0 : index
    %c384_109 = arith.constant 384 : index
    %205 = vector.load %arg13[%c0_108, %c384_109] : memref<208x1152xbf16, #tpu.memory_space<vmem>>, vector<208x128xbf16>
    tpu.vector_store %arg13[%c0_108, %c384_109], %204 {strides = array<i32>} : memref<208x1152xbf16, #tpu.memory_space<vmem>>, vector<208x128xbf16>,
    %c96_110 = arith.constant 96 : index
    %c0_111 = arith.constant 0 : index
    %206 = vector.load %arg12[%c96_110, %c0_111] : memref<400x128xbf16, #tpu.memory_space<vmem>>, vector<208x128xbf16>
    %c0_112 = arith.constant 0 : index
    %c512_113 = arith.constant 512 : index
    %207 = vector.load %arg13[%c0_112, %c512_113] : memref<208x1152xbf16, #tpu.memory_space<vmem>>, vector<208x128xbf16>
    tpu.vector_store %arg13[%c0_112, %c512_113], %206 {strides = array<i32>} : memref<208x1152xbf16, #tpu.memory_space<vmem>>, vector<208x128xbf16>,
    %c112_114 = arith.constant 112 : index
    %c0_115 = arith.constant 0 : index
    %208 = vector.load %arg12[%c112_114, %c0_115] : memref<400x128xbf16, #tpu.memory_space<vmem>>, vector<208x128xbf16>
    %c0_116 = arith.constant 0 : index
    %c640_117 = arith.constant 640 : index
    %209 = vector.load %arg13[%c0_116, %c640_117] : memref<208x1152xbf16, #tpu.memory_space<vmem>>, vector<208x128xbf16>
    tpu.vector_store %arg13[%c0_116, %c640_117], %208 {strides = array<i32>} : memref<208x1152xbf16, #tpu.memory_space<vmem>>, vector<208x128xbf16>,
    %c160_118 = arith.constant 160 : index
    %c0_119 = arith.constant 0 : index
    %210 = vector.load %arg12[%c160_118, %c0_119] : memref<400x128xbf16, #tpu.memory_space<vmem>>, vector<208x128xbf16>
    %c0_120 = arith.constant 0 : index
    %c768_121 = arith.constant 768 : index
    %211 = vector.load %arg13[%c0_120, %c768_121] : memref<208x1152xbf16, #tpu.memory_space<vmem>>, vector<208x128xbf16>
    tpu.vector_store %arg13[%c0_120, %c768_121], %210 {strides = array<i32>} : memref<208x1152xbf16, #tpu.memory_space<vmem>>, vector<208x128xbf16>,
    %c176_122 = arith.constant 176 : index
    %c0_123 = arith.constant 0 : index
    %212 = vector.load %arg12[%c176_122, %c0_123] : memref<400x128xbf16, #tpu.memory_space<vmem>>, vector<208x128xbf16>
    %c0_124 = arith.constant 0 : index
    %c896_125 = arith.constant 896 : index
    %213 = vector.load %arg13[%c0_124, %c896_125] : memref<208x1152xbf16, #tpu.memory_space<vmem>>, vector<208x128xbf16>
    tpu.vector_store %arg13[%c0_124, %c896_125], %212 {strides = array<i32>} : memref<208x1152xbf16, #tpu.memory_space<vmem>>, vector<208x128xbf16>,
    %c192_126 = arith.constant 192 : index
    %c0_127 = arith.constant 0 : index
    %214 = vector.load %arg12[%c192_126, %c0_127] : memref<400x128xbf16, #tpu.memory_space<vmem>>, vector<208x128xbf16>
    %c0_128 = arith.constant 0 : index
    %c1024_129 = arith.constant 1024 : index
    %215 = vector.load %arg13[%c0_128, %c1024_129] : memref<208x1152xbf16, #tpu.memory_space<vmem>>, vector<208x128xbf16>
    tpu.vector_store %arg13[%c0_128, %c1024_129], %214 {strides = array<i32>} : memref<208x1152xbf16, #tpu.memory_space<vmem>>, vector<208x128xbf16>,
    %c0_130 = arith.constant 0 : index
    %c0_131 = arith.constant 0 : index
    %216 = vector.load %arg13[%c0_130, %c0_131] : memref<208x1152xbf16, #tpu.memory_space<vmem>>, vector<208x1152xbf16>
    %c1_132 = arith.constant 1 : index
    %c0_133 = arith.constant 0 : index
    %c0_134 = arith.constant 0 : index
    %217 = vector.load %arg3[%c1_132, %c0_133, %c0_134] : memref<4x1152x128xbf16, #tpu.memory_space<vmem>>, vector<1x1152x128xbf16>
    %218 = vector.shape_cast %217 : vector<1x1152x128xbf16> to vector<1152x128xbf16>
    %cst_135 = arith.constant dense<0.000000e+00> : vector<208x128xf32>
    %219 = tpu.matmul %216, %218, %cst_135 {dimension_numbers = #tpu.dot_dimension_numbers<[1], [0], [0], [1], [0, 0, 1, 1], [], []>} : vector<208x1152xbf16>, vector<1152x128xbf16>, vector<208x128xf32> -> vector<208x128xf32>
    %c2 = arith.constant 2 : index
    %c0_136 = arith.constant 0 : index
    %220 = vector.load %arg5[%c2, %c0_136] : memref<5x128xf32, #tpu.memory_space<vmem>>, vector<1x128xf32>
    %221 = vector.extract_strided_slice %219 {offsets = [0, 0], sizes = [16, 128], strides = [1, 1]} : vector<208x128xf32> to vector<16x128xf32>
    %222 = vector.broadcast %0 : vector<1x128xf32> to vector<16x128xf32>
    %223 = arith.mulf %221, %222 : vector<16x128xf32>
    %224 = vector.broadcast %220 : vector<1x128xf32> to vector<16x128xf32>
    %225 = arith.addf %223, %224 : vector<16x128xf32>
    %226 = arith.addf %225, %19 : vector<16x128xf32>
    %cst_137 = arith.constant 0.000000e+00 : f32
    %227 = vector.broadcast %cst_137 : f32 to vector<16x128xf32>
    %228 = arith.maximumf %226, %227 : vector<16x128xf32>
    %229 = arith.truncf %228 : vector<16x128xf32> to vector<16x128xbf16>
    %c96_138 = arith.constant 96 : index
    %c0_139 = arith.constant 0 : index
    %230 = vector.load %arg12[%c96_138, %c0_139] : memref<400x128xbf16, #tpu.memory_space<vmem>>, vector<16x128xbf16>
    tpu.vector_store %arg12[%c96_138, %c0_139], %229 {strides = array<i32>} : memref<400x128xbf16, #tpu.memory_space<vmem>>, vector<16x128xbf16>,
    %231 = vector.extract_strided_slice %219 {offsets = [16, 0], sizes = [16, 128], strides = [1, 1]} : vector<208x128xf32> to vector<16x128xf32>
    %232 = vector.broadcast %0 : vector<1x128xf32> to vector<16x128xf32>
    %233 = arith.mulf %231, %232 : vector<16x128xf32>
    %234 = vector.broadcast %220 : vector<1x128xf32> to vector<16x128xf32>
    %235 = arith.addf %233, %234 : vector<16x128xf32>
    %236 = arith.addf %235, %28 : vector<16x128xf32>
    %cst_140 = arith.constant 0.000000e+00 : f32
    %237 = vector.broadcast %cst_140 : f32 to vector<16x128xf32>
    %238 = arith.maximumf %236, %237 : vector<16x128xf32>
    %239 = arith.truncf %238 : vector<16x128xf32> to vector<16x128xbf16>
    %c112_141 = arith.constant 112 : index
    %c0_142 = arith.constant 0 : index
    %240 = vector.load %arg12[%c112_141, %c0_142] : memref<400x128xbf16, #tpu.memory_space<vmem>>, vector<16x128xbf16>
    tpu.vector_store %arg12[%c112_141, %c0_142], %239 {strides = array<i32>} : memref<400x128xbf16, #tpu.memory_space<vmem>>, vector<16x128xbf16>,
    %241 = vector.extract_strided_slice %219 {offsets = [32, 0], sizes = [16, 128], strides = [1, 1]} : vector<208x128xf32> to vector<16x128xf32>
    %242 = vector.broadcast %0 : vector<1x128xf32> to vector<16x128xf32>
    %243 = arith.mulf %241, %242 : vector<16x128xf32>
    %244 = vector.broadcast %220 : vector<1x128xf32> to vector<16x128xf32>
    %245 = arith.addf %243, %244 : vector<16x128xf32>
    %246 = arith.addf %245, %37 : vector<16x128xf32>
    %cst_143 = arith.constant 0.000000e+00 : f32
    %247 = vector.broadcast %cst_143 : f32 to vector<16x128xf32>
    %248 = arith.maximumf %246, %247 : vector<16x128xf32>
    %249 = arith.truncf %248 : vector<16x128xf32> to vector<16x128xbf16>
    %c128_144 = arith.constant 128 : index
    %c0_145 = arith.constant 0 : index
    %250 = vector.load %arg12[%c128_144, %c0_145] : memref<400x128xbf16, #tpu.memory_space<vmem>>, vector<16x128xbf16>
    tpu.vector_store %arg12[%c128_144, %c0_145], %249 {strides = array<i32>} : memref<400x128xbf16, #tpu.memory_space<vmem>>, vector<16x128xbf16>,
    %251 = vector.extract_strided_slice %219 {offsets = [80, 0], sizes = [16, 128], strides = [1, 1]} : vector<208x128xf32> to vector<16x128xf32>
    %252 = vector.broadcast %0 : vector<1x128xf32> to vector<16x128xf32>
    %253 = arith.mulf %251, %252 : vector<16x128xf32>
    %254 = vector.broadcast %220 : vector<1x128xf32> to vector<16x128xf32>
    %255 = arith.addf %253, %254 : vector<16x128xf32>
    %256 = arith.addf %255, %46 : vector<16x128xf32>
    %cst_146 = arith.constant 0.000000e+00 : f32
    %257 = vector.broadcast %cst_146 : f32 to vector<16x128xf32>
    %258 = arith.maximumf %256, %257 : vector<16x128xf32>
    %259 = arith.truncf %258 : vector<16x128xf32> to vector<16x128xbf16>
    %c176_147 = arith.constant 176 : index
    %c0_148 = arith.constant 0 : index
    %260 = vector.load %arg12[%c176_147, %c0_148] : memref<400x128xbf16, #tpu.memory_space<vmem>>, vector<16x128xbf16>
    tpu.vector_store %arg12[%c176_147, %c0_148], %259 {strides = array<i32>} : memref<400x128xbf16, #tpu.memory_space<vmem>>, vector<16x128xbf16>,
    %261 = vector.extract_strided_slice %219 {offsets = [96, 0], sizes = [16, 128], strides = [1, 1]} : vector<208x128xf32> to vector<16x128xf32>
    %262 = vector.broadcast %0 : vector<1x128xf32> to vector<16x128xf32>
    %263 = arith.mulf %261, %262 : vector<16x128xf32>
    %264 = vector.broadcast %220 : vector<1x128xf32> to vector<16x128xf32>
    %265 = arith.addf %263, %264 : vector<16x128xf32>
    %266 = arith.addf %265, %55 : vector<16x128xf32>
    %cst_149 = arith.constant 0.000000e+00 : f32
    %267 = vector.broadcast %cst_149 : f32 to vector<16x128xf32>
    %268 = arith.maximumf %266, %267 : vector<16x128xf32>
    %269 = arith.truncf %268 : vector<16x128xf32> to vector<16x128xbf16>
    %c192_150 = arith.constant 192 : index
    %c0_151 = arith.constant 0 : index
    %270 = vector.load %arg12[%c192_150, %c0_151] : memref<400x128xbf16, #tpu.memory_space<vmem>>, vector<16x128xbf16>
    tpu.vector_store %arg12[%c192_150, %c0_151], %269 {strides = array<i32>} : memref<400x128xbf16, #tpu.memory_space<vmem>>, vector<16x128xbf16>,
    %271 = vector.extract_strided_slice %219 {offsets = [112, 0], sizes = [16, 128], strides = [1, 1]} : vector<208x128xf32> to vector<16x128xf32>
    %272 = vector.broadcast %0 : vector<1x128xf32> to vector<16x128xf32>
    %273 = arith.mulf %271, %272 : vector<16x128xf32>
    %274 = vector.broadcast %220 : vector<1x128xf32> to vector<16x128xf32>
    %275 = arith.addf %273, %274 : vector<16x128xf32>
    %276 = arith.addf %275, %64 : vector<16x128xf32>
    %cst_152 = arith.constant 0.000000e+00 : f32
    %277 = vector.broadcast %cst_152 : f32 to vector<16x128xf32>
    %278 = arith.maximumf %276, %277 : vector<16x128xf32>
    %279 = arith.truncf %278 : vector<16x128xf32> to vector<16x128xbf16>
    %c208_153 = arith.constant 208 : index
    %c0_154 = arith.constant 0 : index
    %280 = vector.load %arg12[%c208_153, %c0_154] : memref<400x128xbf16, #tpu.memory_space<vmem>>, vector<16x128xbf16>
    tpu.vector_store %arg12[%c208_153, %c0_154], %279 {strides = array<i32>} : memref<400x128xbf16, #tpu.memory_space<vmem>>, vector<16x128xbf16>,
    %281 = vector.extract_strided_slice %219 {offsets = [160, 0], sizes = [16, 128], strides = [1, 1]} : vector<208x128xf32> to vector<16x128xf32>
    %282 = vector.broadcast %0 : vector<1x128xf32> to vector<16x128xf32>
    %283 = arith.mulf %281, %282 : vector<16x128xf32>
    %284 = vector.broadcast %220 : vector<1x128xf32> to vector<16x128xf32>
    %285 = arith.addf %283, %284 : vector<16x128xf32>
    %286 = arith.addf %285, %73 : vector<16x128xf32>
    %cst_155 = arith.constant 0.000000e+00 : f32
    %287 = vector.broadcast %cst_155 : f32 to vector<16x128xf32>
    %288 = arith.maximumf %286, %287 : vector<16x128xf32>
    %289 = arith.truncf %288 : vector<16x128xf32> to vector<16x128xbf16>
    %c256_156 = arith.constant 256 : index
    %c0_157 = arith.constant 0 : index
    %290 = vector.load %arg12[%c256_156, %c0_157] : memref<400x128xbf16, #tpu.memory_space<vmem>>, vector<16x128xbf16>
    tpu.vector_store %arg12[%c256_156, %c0_157], %289 {strides = array<i32>} : memref<400x128xbf16, #tpu.memory_space<vmem>>, vector<16x128xbf16>,
    %291 = vector.extract_strided_slice %219 {offsets = [176, 0], sizes = [16, 128], strides = [1, 1]} : vector<208x128xf32> to vector<16x128xf32>
    %292 = vector.broadcast %0 : vector<1x128xf32> to vector<16x128xf32>
    %293 = arith.mulf %291, %292 : vector<16x128xf32>
    %294 = vector.broadcast %220 : vector<1x128xf32> to vector<16x128xf32>
    %295 = arith.addf %293, %294 : vector<16x128xf32>
    %296 = arith.addf %295, %82 : vector<16x128xf32>
    %cst_158 = arith.constant 0.000000e+00 : f32
    %297 = vector.broadcast %cst_158 : f32 to vector<16x128xf32>
    %298 = arith.maximumf %296, %297 : vector<16x128xf32>
    %299 = arith.truncf %298 : vector<16x128xf32> to vector<16x128xbf16>
    %c272_159 = arith.constant 272 : index
    %c0_160 = arith.constant 0 : index
    %300 = vector.load %arg12[%c272_159, %c0_160] : memref<400x128xbf16, #tpu.memory_space<vmem>>, vector<16x128xbf16>
    tpu.vector_store %arg12[%c272_159, %c0_160], %299 {strides = array<i32>} : memref<400x128xbf16, #tpu.memory_space<vmem>>, vector<16x128xbf16>,
    %301 = vector.extract_strided_slice %219 {offsets = [192, 0], sizes = [16, 128], strides = [1, 1]} : vector<208x128xf32> to vector<16x128xf32>
    %302 = vector.broadcast %0 : vector<1x128xf32> to vector<16x128xf32>
    %303 = arith.mulf %301, %302 : vector<16x128xf32>
    %304 = vector.broadcast %220 : vector<1x128xf32> to vector<16x128xf32>
    %305 = arith.addf %303, %304 : vector<16x128xf32>
    %306 = arith.addf %305, %91 : vector<16x128xf32>
    %cst_161 = arith.constant 0.000000e+00 : f32
    %307 = vector.broadcast %cst_161 : f32 to vector<16x128xf32>
    %308 = arith.maximumf %306, %307 : vector<16x128xf32>
    %309 = arith.truncf %308 : vector<16x128xf32> to vector<16x128xbf16>
    %c288_162 = arith.constant 288 : index
    %c0_163 = arith.constant 0 : index
    %310 = vector.load %arg12[%c288_162, %c0_163] : memref<400x128xbf16, #tpu.memory_space<vmem>>, vector<16x128xbf16>
    tpu.vector_store %arg12[%c288_162, %c0_163], %309 {strides = array<i32>} : memref<400x128xbf16, #tpu.memory_space<vmem>>, vector<16x128xbf16>,
    %c0_164 = arith.constant 0 : index
    %c0_165 = arith.constant 0 : index
    %311 = vector.load %arg12[%c0_164, %c0_165] : memref<400x128xbf16, #tpu.memory_space<vmem>>, vector<208x128xbf16>
    %c0_166 = arith.constant 0 : index
    %c0_167 = arith.constant 0 : index
    %312 = vector.load %arg13[%c0_166, %c0_167] : memref<208x1152xbf16, #tpu.memory_space<vmem>>, vector<208x128xbf16>
    tpu.vector_store %arg13[%c0_166, %c0_167], %311 {strides = array<i32>} : memref<208x1152xbf16, #tpu.memory_space<vmem>>, vector<208x128xbf16>,
    %c16_168 = arith.constant 16 : index
    %c0_169 = arith.constant 0 : index
    %313 = vector.load %arg12[%c16_168, %c0_169] : memref<400x128xbf16, #tpu.memory_space<vmem>>, vector<208x128xbf16>
    %c0_170 = arith.constant 0 : index
    %c128_171 = arith.constant 128 : index
    %314 = vector.load %arg13[%c0_170, %c128_171] : memref<208x1152xbf16, #tpu.memory_space<vmem>>, vector<208x128xbf16>
    tpu.vector_store %arg13[%c0_170, %c128_171], %313 {strides = array<i32>} : memref<208x1152xbf16, #tpu.memory_space<vmem>>, vector<208x128xbf16>,
    %c32_172 = arith.constant 32 : index
    %c0_173 = arith.constant 0 : index
    %315 = vector.load %arg12[%c32_172, %c0_173] : memref<400x128xbf16, #tpu.memory_space<vmem>>, vector<208x128xbf16>
    %c0_174 = arith.constant 0 : index
    %c256_175 = arith.constant 256 : index
    %316 = vector.load %arg13[%c0_174, %c256_175] : memref<208x1152xbf16, #tpu.memory_space<vmem>>, vector<208x128xbf16>
    tpu.vector_store %arg13[%c0_174, %c256_175], %315 {strides = array<i32>} : memref<208x1152xbf16, #tpu.memory_space<vmem>>, vector<208x128xbf16>,
    %c80_176 = arith.constant 80 : index
    %c0_177 = arith.constant 0 : index
    %317 = vector.load %arg12[%c80_176, %c0_177] : memref<400x128xbf16, #tpu.memory_space<vmem>>, vector<208x128xbf16>
    %c0_178 = arith.constant 0 : index
    %c384_179 = arith.constant 384 : index
    %318 = vector.load %arg13[%c0_178, %c384_179] : memref<208x1152xbf16, #tpu.memory_space<vmem>>, vector<208x128xbf16>
    tpu.vector_store %arg13[%c0_178, %c384_179], %317 {strides = array<i32>} : memref<208x1152xbf16, #tpu.memory_space<vmem>>, vector<208x128xbf16>,
    %c96_180 = arith.constant 96 : index
    %c0_181 = arith.constant 0 : index
    %319 = vector.load %arg12[%c96_180, %c0_181] : memref<400x128xbf16, #tpu.memory_space<vmem>>, vector<208x128xbf16>
    %c0_182 = arith.constant 0 : index
    %c512_183 = arith.constant 512 : index
    %320 = vector.load %arg13[%c0_182, %c512_183] : memref<208x1152xbf16, #tpu.memory_space<vmem>>, vector<208x128xbf16>
    tpu.vector_store %arg13[%c0_182, %c512_183], %319 {strides = array<i32>} : memref<208x1152xbf16, #tpu.memory_space<vmem>>, vector<208x128xbf16>,
    %c112_184 = arith.constant 112 : index
    %c0_185 = arith.constant 0 : index
    %321 = vector.load %arg12[%c112_184, %c0_185] : memref<400x128xbf16, #tpu.memory_space<vmem>>, vector<208x128xbf16>
    %c0_186 = arith.constant 0 : index
    %c640_187 = arith.constant 640 : index
    %322 = vector.load %arg13[%c0_186, %c640_187] : memref<208x1152xbf16, #tpu.memory_space<vmem>>, vector<208x128xbf16>
    tpu.vector_store %arg13[%c0_186, %c640_187], %321 {strides = array<i32>} : memref<208x1152xbf16, #tpu.memory_space<vmem>>, vector<208x128xbf16>,
    %c160_188 = arith.constant 160 : index
    %c0_189 = arith.constant 0 : index
    %323 = vector.load %arg12[%c160_188, %c0_189] : memref<400x128xbf16, #tpu.memory_space<vmem>>, vector<208x128xbf16>
    %c0_190 = arith.constant 0 : index
    %c768_191 = arith.constant 768 : index
    %324 = vector.load %arg13[%c0_190, %c768_191] : memref<208x1152xbf16, #tpu.memory_space<vmem>>, vector<208x128xbf16>
    tpu.vector_store %arg13[%c0_190, %c768_191], %323 {strides = array<i32>} : memref<208x1152xbf16, #tpu.memory_space<vmem>>, vector<208x128xbf16>,
    %c176_192 = arith.constant 176 : index
    %c0_193 = arith.constant 0 : index
    %325 = vector.load %arg12[%c176_192, %c0_193] : memref<400x128xbf16, #tpu.memory_space<vmem>>, vector<208x128xbf16>
    %c0_194 = arith.constant 0 : index
    %c896_195 = arith.constant 896 : index
    %326 = vector.load %arg13[%c0_194, %c896_195] : memref<208x1152xbf16, #tpu.memory_space<vmem>>, vector<208x128xbf16>
    tpu.vector_store %arg13[%c0_194, %c896_195], %325 {strides = array<i32>} : memref<208x1152xbf16, #tpu.memory_space<vmem>>, vector<208x128xbf16>,
    %c192_196 = arith.constant 192 : index
    %c0_197 = arith.constant 0 : index
    %327 = vector.load %arg12[%c192_196, %c0_197] : memref<400x128xbf16, #tpu.memory_space<vmem>>, vector<208x128xbf16>
    %c0_198 = arith.constant 0 : index
    %c1024_199 = arith.constant 1024 : index
    %328 = vector.load %arg13[%c0_198, %c1024_199] : memref<208x1152xbf16, #tpu.memory_space<vmem>>, vector<208x128xbf16>
    tpu.vector_store %arg13[%c0_198, %c1024_199], %327 {strides = array<i32>} : memref<208x1152xbf16, #tpu.memory_space<vmem>>, vector<208x128xbf16>,
    %c0_200 = arith.constant 0 : index
    %c0_201 = arith.constant 0 : index
    %329 = vector.load %arg13[%c0_200, %c0_201] : memref<208x1152xbf16, #tpu.memory_space<vmem>>, vector<208x1152xbf16>
    %c2_202 = arith.constant 2 : index
    %c0_203 = arith.constant 0 : index
    %c0_204 = arith.constant 0 : index
    %330 = vector.load %arg3[%c2_202, %c0_203, %c0_204] : memref<4x1152x128xbf16, #tpu.memory_space<vmem>>, vector<1x1152x128xbf16>
    %331 = vector.shape_cast %330 : vector<1x1152x128xbf16> to vector<1152x128xbf16>
    %cst_205 = arith.constant dense<0.000000e+00> : vector<208x128xf32>
    %332 = tpu.matmul %329, %331, %cst_205 {dimension_numbers = #tpu.dot_dimension_numbers<[1], [0], [0], [1], [0, 0, 1, 1], [], []>} : vector<208x1152xbf16>, vector<1152x128xbf16>, vector<208x128xf32> -> vector<208x128xf32>
    %c3 = arith.constant 3 : index
    %c0_206 = arith.constant 0 : index
    %333 = vector.load %arg5[%c3, %c0_206] : memref<5x128xf32, #tpu.memory_space<vmem>>, vector<1x128xf32>
    %334 = vector.extract_strided_slice %332 {offsets = [0, 0], sizes = [16, 128], strides = [1, 1]} : vector<208x128xf32> to vector<16x128xf32>
    %335 = vector.broadcast %0 : vector<1x128xf32> to vector<16x128xf32>
    %336 = arith.mulf %334, %335 : vector<16x128xf32>
    %337 = vector.broadcast %333 : vector<1x128xf32> to vector<16x128xf32>
    %338 = arith.addf %336, %337 : vector<16x128xf32>
    %cst_207 = arith.constant 0.000000e+00 : f32
    %339 = vector.broadcast %cst_207 : f32 to vector<16x128xf32>
    %340 = arith.maximumf %338, %339 : vector<16x128xf32>
    %341 = arith.truncf %340 : vector<16x128xf32> to vector<16x128xbf16>
    %c96_208 = arith.constant 96 : index
    %c0_209 = arith.constant 0 : index
    %342 = vector.load %arg12[%c96_208, %c0_209] : memref<400x128xbf16, #tpu.memory_space<vmem>>, vector<16x128xbf16>
    tpu.vector_store %arg12[%c96_208, %c0_209], %341 {strides = array<i32>} : memref<400x128xbf16, #tpu.memory_space<vmem>>, vector<16x128xbf16>,
    %343 = vector.extract_strided_slice %332 {offsets = [16, 0], sizes = [16, 128], strides = [1, 1]} : vector<208x128xf32> to vector<16x128xf32>
    %344 = vector.broadcast %0 : vector<1x128xf32> to vector<16x128xf32>
    %345 = arith.mulf %343, %344 : vector<16x128xf32>
    %346 = vector.broadcast %333 : vector<1x128xf32> to vector<16x128xf32>
    %347 = arith.addf %345, %346 : vector<16x128xf32>
    %cst_210 = arith.constant 0.000000e+00 : f32
    %348 = vector.broadcast %cst_210 : f32 to vector<16x128xf32>
    %349 = arith.maximumf %347, %348 : vector<16x128xf32>
    %350 = arith.truncf %349 : vector<16x128xf32> to vector<16x128xbf16>
    %c112_211 = arith.constant 112 : index
    %c0_212 = arith.constant 0 : index
    %351 = vector.load %arg12[%c112_211, %c0_212] : memref<400x128xbf16, #tpu.memory_space<vmem>>, vector<16x128xbf16>
    tpu.vector_store %arg12[%c112_211, %c0_212], %350 {strides = array<i32>} : memref<400x128xbf16, #tpu.memory_space<vmem>>, vector<16x128xbf16>,
    %352 = vector.extract_strided_slice %332 {offsets = [32, 0], sizes = [16, 128], strides = [1, 1]} : vector<208x128xf32> to vector<16x128xf32>
    %353 = vector.broadcast %0 : vector<1x128xf32> to vector<16x128xf32>
    %354 = arith.mulf %352, %353 : vector<16x128xf32>
    %355 = vector.broadcast %333 : vector<1x128xf32> to vector<16x128xf32>
    %356 = arith.addf %354, %355 : vector<16x128xf32>
    %cst_213 = arith.constant 0.000000e+00 : f32
    %357 = vector.broadcast %cst_213 : f32 to vector<16x128xf32>
    %358 = arith.maximumf %356, %357 : vector<16x128xf32>
    %359 = arith.truncf %358 : vector<16x128xf32> to vector<16x128xbf16>
    %c128_214 = arith.constant 128 : index
    %c0_215 = arith.constant 0 : index
    %360 = vector.load %arg12[%c128_214, %c0_215] : memref<400x128xbf16, #tpu.memory_space<vmem>>, vector<16x128xbf16>
    tpu.vector_store %arg12[%c128_214, %c0_215], %359 {strides = array<i32>} : memref<400x128xbf16, #tpu.memory_space<vmem>>, vector<16x128xbf16>,
    %361 = vector.extract_strided_slice %332 {offsets = [80, 0], sizes = [16, 128], strides = [1, 1]} : vector<208x128xf32> to vector<16x128xf32>
    %362 = vector.broadcast %0 : vector<1x128xf32> to vector<16x128xf32>
    %363 = arith.mulf %361, %362 : vector<16x128xf32>
    %364 = vector.broadcast %333 : vector<1x128xf32> to vector<16x128xf32>
    %365 = arith.addf %363, %364 : vector<16x128xf32>
    %cst_216 = arith.constant 0.000000e+00 : f32
    %366 = vector.broadcast %cst_216 : f32 to vector<16x128xf32>
    %367 = arith.maximumf %365, %366 : vector<16x128xf32>
    %368 = arith.truncf %367 : vector<16x128xf32> to vector<16x128xbf16>
    %c176_217 = arith.constant 176 : index
    %c0_218 = arith.constant 0 : index
    %369 = vector.load %arg12[%c176_217, %c0_218] : memref<400x128xbf16, #tpu.memory_space<vmem>>, vector<16x128xbf16>
    tpu.vector_store %arg12[%c176_217, %c0_218], %368 {strides = array<i32>} : memref<400x128xbf16, #tpu.memory_space<vmem>>, vector<16x128xbf16>,
    %370 = vector.extract_strided_slice %332 {offsets = [96, 0], sizes = [16, 128], strides = [1, 1]} : vector<208x128xf32> to vector<16x128xf32>
    %371 = vector.broadcast %0 : vector<1x128xf32> to vector<16x128xf32>
    %372 = arith.mulf %370, %371 : vector<16x128xf32>
    %373 = vector.broadcast %333 : vector<1x128xf32> to vector<16x128xf32>
    %374 = arith.addf %372, %373 : vector<16x128xf32>
    %cst_219 = arith.constant 0.000000e+00 : f32
    %375 = vector.broadcast %cst_219 : f32 to vector<16x128xf32>
    %376 = arith.maximumf %374, %375 : vector<16x128xf32>
    %377 = arith.truncf %376 : vector<16x128xf32> to vector<16x128xbf16>
    %c192_220 = arith.constant 192 : index
    %c0_221 = arith.constant 0 : index
    %378 = vector.load %arg12[%c192_220, %c0_221] : memref<400x128xbf16, #tpu.memory_space<vmem>>, vector<16x128xbf16>
    tpu.vector_store %arg12[%c192_220, %c0_221], %377 {strides = array<i32>} : memref<400x128xbf16, #tpu.memory_space<vmem>>, vector<16x128xbf16>,
    %379 = vector.extract_strided_slice %332 {offsets = [112, 0], sizes = [16, 128], strides = [1, 1]} : vector<208x128xf32> to vector<16x128xf32>
    %380 = vector.broadcast %0 : vector<1x128xf32> to vector<16x128xf32>
    %381 = arith.mulf %379, %380 : vector<16x128xf32>
    %382 = vector.broadcast %333 : vector<1x128xf32> to vector<16x128xf32>
    %383 = arith.addf %381, %382 : vector<16x128xf32>
    %cst_222 = arith.constant 0.000000e+00 : f32
    %384 = vector.broadcast %cst_222 : f32 to vector<16x128xf32>
    %385 = arith.maximumf %383, %384 : vector<16x128xf32>
    %386 = arith.truncf %385 : vector<16x128xf32> to vector<16x128xbf16>
    %c208_223 = arith.constant 208 : index
    %c0_224 = arith.constant 0 : index
    %387 = vector.load %arg12[%c208_223, %c0_224] : memref<400x128xbf16, #tpu.memory_space<vmem>>, vector<16x128xbf16>
    tpu.vector_store %arg12[%c208_223, %c0_224], %386 {strides = array<i32>} : memref<400x128xbf16, #tpu.memory_space<vmem>>, vector<16x128xbf16>,
    %388 = vector.extract_strided_slice %332 {offsets = [160, 0], sizes = [16, 128], strides = [1, 1]} : vector<208x128xf32> to vector<16x128xf32>
    %389 = vector.broadcast %0 : vector<1x128xf32> to vector<16x128xf32>
    %390 = arith.mulf %388, %389 : vector<16x128xf32>
    %391 = vector.broadcast %333 : vector<1x128xf32> to vector<16x128xf32>
    %392 = arith.addf %390, %391 : vector<16x128xf32>
    %cst_225 = arith.constant 0.000000e+00 : f32
    %393 = vector.broadcast %cst_225 : f32 to vector<16x128xf32>
    %394 = arith.maximumf %392, %393 : vector<16x128xf32>
    %395 = arith.truncf %394 : vector<16x128xf32> to vector<16x128xbf16>
    %c256_226 = arith.constant 256 : index
    %c0_227 = arith.constant 0 : index
    %396 = vector.load %arg12[%c256_226, %c0_227] : memref<400x128xbf16, #tpu.memory_space<vmem>>, vector<16x128xbf16>
    tpu.vector_store %arg12[%c256_226, %c0_227], %395 {strides = array<i32>} : memref<400x128xbf16, #tpu.memory_space<vmem>>, vector<16x128xbf16>,
    %397 = vector.extract_strided_slice %332 {offsets = [176, 0], sizes = [16, 128], strides = [1, 1]} : vector<208x128xf32> to vector<16x128xf32>
    %398 = vector.broadcast %0 : vector<1x128xf32> to vector<16x128xf32>
    %399 = arith.mulf %397, %398 : vector<16x128xf32>
    %400 = vector.broadcast %333 : vector<1x128xf32> to vector<16x128xf32>
    %401 = arith.addf %399, %400 : vector<16x128xf32>
    %cst_228 = arith.constant 0.000000e+00 : f32
    %402 = vector.broadcast %cst_228 : f32 to vector<16x128xf32>
    %403 = arith.maximumf %401, %402 : vector<16x128xf32>
    %404 = arith.truncf %403 : vector<16x128xf32> to vector<16x128xbf16>
    %c272_229 = arith.constant 272 : index
    %c0_230 = arith.constant 0 : index
    %405 = vector.load %arg12[%c272_229, %c0_230] : memref<400x128xbf16, #tpu.memory_space<vmem>>, vector<16x128xbf16>
    tpu.vector_store %arg12[%c272_229, %c0_230], %404 {strides = array<i32>} : memref<400x128xbf16, #tpu.memory_space<vmem>>, vector<16x128xbf16>,
    %406 = vector.extract_strided_slice %332 {offsets = [192, 0], sizes = [16, 128], strides = [1, 1]} : vector<208x128xf32> to vector<16x128xf32>
    %407 = vector.broadcast %0 : vector<1x128xf32> to vector<16x128xf32>
    %408 = arith.mulf %406, %407 : vector<16x128xf32>
    %409 = vector.broadcast %333 : vector<1x128xf32> to vector<16x128xf32>
    %410 = arith.addf %408, %409 : vector<16x128xf32>
    %cst_231 = arith.constant 0.000000e+00 : f32
    %411 = vector.broadcast %cst_231 : f32 to vector<16x128xf32>
    %412 = arith.maximumf %410, %411 : vector<16x128xf32>
    %413 = arith.truncf %412 : vector<16x128xf32> to vector<16x128xbf16>
    %c288_232 = arith.constant 288 : index
    %c0_233 = arith.constant 0 : index
    %414 = vector.load %arg12[%c288_232, %c0_233] : memref<400x128xbf16, #tpu.memory_space<vmem>>, vector<16x128xbf16>
    tpu.vector_store %arg12[%c288_232, %c0_233], %413 {strides = array<i32>} : memref<400x128xbf16, #tpu.memory_space<vmem>>, vector<16x128xbf16>,
    %c0_234 = arith.constant 0 : index
    %c0_235 = arith.constant 0 : index
    %415 = vector.load %arg12[%c0_234, %c0_235] : memref<400x128xbf16, #tpu.memory_space<vmem>>, vector<208x128xbf16>
    %c0_236 = arith.constant 0 : index
    %c0_237 = arith.constant 0 : index
    %416 = vector.load %arg13[%c0_236, %c0_237] : memref<208x1152xbf16, #tpu.memory_space<vmem>>, vector<208x128xbf16>
    tpu.vector_store %arg13[%c0_236, %c0_237], %415 {strides = array<i32>} : memref<208x1152xbf16, #tpu.memory_space<vmem>>, vector<208x128xbf16>,
    %c16_238 = arith.constant 16 : index
    %c0_239 = arith.constant 0 : index
    %417 = vector.load %arg12[%c16_238, %c0_239] : memref<400x128xbf16, #tpu.memory_space<vmem>>, vector<208x128xbf16>
    %c0_240 = arith.constant 0 : index
    %c128_241 = arith.constant 128 : index
    %418 = vector.load %arg13[%c0_240, %c128_241] : memref<208x1152xbf16, #tpu.memory_space<vmem>>, vector<208x128xbf16>
    tpu.vector_store %arg13[%c0_240, %c128_241], %417 {strides = array<i32>} : memref<208x1152xbf16, #tpu.memory_space<vmem>>, vector<208x128xbf16>,
    %c32_242 = arith.constant 32 : index
    %c0_243 = arith.constant 0 : index
    %419 = vector.load %arg12[%c32_242, %c0_243] : memref<400x128xbf16, #tpu.memory_space<vmem>>, vector<208x128xbf16>
    %c0_244 = arith.constant 0 : index
    %c256_245 = arith.constant 256 : index
    %420 = vector.load %arg13[%c0_244, %c256_245] : memref<208x1152xbf16, #tpu.memory_space<vmem>>, vector<208x128xbf16>
    tpu.vector_store %arg13[%c0_244, %c256_245], %419 {strides = array<i32>} : memref<208x1152xbf16, #tpu.memory_space<vmem>>, vector<208x128xbf16>,
    %c80_246 = arith.constant 80 : index
    %c0_247 = arith.constant 0 : index
    %421 = vector.load %arg12[%c80_246, %c0_247] : memref<400x128xbf16, #tpu.memory_space<vmem>>, vector<208x128xbf16>
    %c0_248 = arith.constant 0 : index
    %c384_249 = arith.constant 384 : index
    %422 = vector.load %arg13[%c0_248, %c384_249] : memref<208x1152xbf16, #tpu.memory_space<vmem>>, vector<208x128xbf16>
    tpu.vector_store %arg13[%c0_248, %c384_249], %421 {strides = array<i32>} : memref<208x1152xbf16, #tpu.memory_space<vmem>>, vector<208x128xbf16>,
    %c96_250 = arith.constant 96 : index
    %c0_251 = arith.constant 0 : index
    %423 = vector.load %arg12[%c96_250, %c0_251] : memref<400x128xbf16, #tpu.memory_space<vmem>>, vector<208x128xbf16>
    %c0_252 = arith.constant 0 : index
    %c512_253 = arith.constant 512 : index
    %424 = vector.load %arg13[%c0_252, %c512_253] : memref<208x1152xbf16, #tpu.memory_space<vmem>>, vector<208x128xbf16>
    tpu.vector_store %arg13[%c0_252, %c512_253], %423 {strides = array<i32>} : memref<208x1152xbf16, #tpu.memory_space<vmem>>, vector<208x128xbf16>,
    %c112_254 = arith.constant 112 : index
    %c0_255 = arith.constant 0 : index
    %425 = vector.load %arg12[%c112_254, %c0_255] : memref<400x128xbf16, #tpu.memory_space<vmem>>, vector<208x128xbf16>
    %c0_256 = arith.constant 0 : index
    %c640_257 = arith.constant 640 : index
    %426 = vector.load %arg13[%c0_256, %c640_257] : memref<208x1152xbf16, #tpu.memory_space<vmem>>, vector<208x128xbf16>
    tpu.vector_store %arg13[%c0_256, %c640_257], %425 {strides = array<i32>} : memref<208x1152xbf16, #tpu.memory_space<vmem>>, vector<208x128xbf16>,
    %c160_258 = arith.constant 160 : index
    %c0_259 = arith.constant 0 : index
    %427 = vector.load %arg12[%c160_258, %c0_259] : memref<400x128xbf16, #tpu.memory_space<vmem>>, vector<208x128xbf16>
    %c0_260 = arith.constant 0 : index
    %c768_261 = arith.constant 768 : index
    %428 = vector.load %arg13[%c0_260, %c768_261] : memref<208x1152xbf16, #tpu.memory_space<vmem>>, vector<208x128xbf16>
    tpu.vector_store %arg13[%c0_260, %c768_261], %427 {strides = array<i32>} : memref<208x1152xbf16, #tpu.memory_space<vmem>>, vector<208x128xbf16>,
    %c176_262 = arith.constant 176 : index
    %c0_263 = arith.constant 0 : index
    %429 = vector.load %arg12[%c176_262, %c0_263] : memref<400x128xbf16, #tpu.memory_space<vmem>>, vector<208x128xbf16>
    %c0_264 = arith.constant 0 : index
    %c896_265 = arith.constant 896 : index
    %430 = vector.load %arg13[%c0_264, %c896_265] : memref<208x1152xbf16, #tpu.memory_space<vmem>>, vector<208x128xbf16>
    tpu.vector_store %arg13[%c0_264, %c896_265], %429 {strides = array<i32>} : memref<208x1152xbf16, #tpu.memory_space<vmem>>, vector<208x128xbf16>,
    %c192_266 = arith.constant 192 : index
    %c0_267 = arith.constant 0 : index
    %431 = vector.load %arg12[%c192_266, %c0_267] : memref<400x128xbf16, #tpu.memory_space<vmem>>, vector<208x128xbf16>
    %c0_268 = arith.constant 0 : index
    %c1024_269 = arith.constant 1024 : index
    %432 = vector.load %arg13[%c0_268, %c1024_269] : memref<208x1152xbf16, #tpu.memory_space<vmem>>, vector<208x128xbf16>
    tpu.vector_store %arg13[%c0_268, %c1024_269], %431 {strides = array<i32>} : memref<208x1152xbf16, #tpu.memory_space<vmem>>, vector<208x128xbf16>,
    %c0_270 = arith.constant 0 : index
    %c0_271 = arith.constant 0 : index
    %433 = vector.load %arg13[%c0_270, %c0_271] : memref<208x1152xbf16, #tpu.memory_space<vmem>>, vector<208x1152xbf16>
    %c3_272 = arith.constant 3 : index
    %c0_273 = arith.constant 0 : index
    %c0_274 = arith.constant 0 : index
    %434 = vector.load %arg3[%c3_272, %c0_273, %c0_274] : memref<4x1152x128xbf16, #tpu.memory_space<vmem>>, vector<1x1152x128xbf16>
    %435 = vector.shape_cast %434 : vector<1x1152x128xbf16> to vector<1152x128xbf16>
    %cst_275 = arith.constant dense<0.000000e+00> : vector<208x128xf32>
    %436 = tpu.matmul %433, %435, %cst_275 {dimension_numbers = #tpu.dot_dimension_numbers<[1], [0], [0], [1], [0, 0, 1, 1], [], []>} : vector<208x1152xbf16>, vector<1152x128xbf16>, vector<208x128xf32> -> vector<208x128xf32>
    %c4 = arith.constant 4 : index
    %c0_276 = arith.constant 0 : index
    %437 = vector.load %arg5[%c4, %c0_276] : memref<5x128xf32, #tpu.memory_space<vmem>>, vector<1x128xf32>
    %438 = vector.extract_strided_slice %436 {offsets = [0, 0], sizes = [16, 128], strides = [1, 1]} : vector<208x128xf32> to vector<16x128xf32>
    %439 = vector.broadcast %0 : vector<1x128xf32> to vector<16x128xf32>
    %440 = arith.mulf %438, %439 : vector<16x128xf32>
    %441 = vector.broadcast %437 : vector<1x128xf32> to vector<16x128xf32>
    %442 = arith.addf %440, %441 : vector<16x128xf32>
    %443 = arith.addf %442, %228 : vector<16x128xf32>
    %cst_277 = arith.constant 0.000000e+00 : f32
    %444 = vector.broadcast %cst_277 : f32 to vector<16x128xf32>
    %445 = arith.maximumf %443, %444 : vector<16x128xf32>
    %446 = vector.extract_strided_slice %436 {offsets = [16, 0], sizes = [16, 128], strides = [1, 1]} : vector<208x128xf32> to vector<16x128xf32>
    %447 = vector.broadcast %0 : vector<1x128xf32> to vector<16x128xf32>
    %448 = arith.mulf %446, %447 : vector<16x128xf32>
    %449 = vector.broadcast %437 : vector<1x128xf32> to vector<16x128xf32>
    %450 = arith.addf %448, %449 : vector<16x128xf32>
    %451 = arith.addf %450, %238 : vector<16x128xf32>
    %cst_278 = arith.constant 0.000000e+00 : f32
    %452 = vector.broadcast %cst_278 : f32 to vector<16x128xf32>
    %453 = arith.maximumf %451, %452 : vector<16x128xf32>
    %454 = vector.extract_strided_slice %436 {offsets = [32, 0], sizes = [16, 128], strides = [1, 1]} : vector<208x128xf32> to vector<16x128xf32>
    %455 = vector.broadcast %0 : vector<1x128xf32> to vector<16x128xf32>
    %456 = arith.mulf %454, %455 : vector<16x128xf32>
    %457 = vector.broadcast %437 : vector<1x128xf32> to vector<16x128xf32>
    %458 = arith.addf %456, %457 : vector<16x128xf32>
    %459 = arith.addf %458, %248 : vector<16x128xf32>
    %cst_279 = arith.constant 0.000000e+00 : f32
    %460 = vector.broadcast %cst_279 : f32 to vector<16x128xf32>
    %461 = arith.maximumf %459, %460 : vector<16x128xf32>
    %462 = vector.extract_strided_slice %436 {offsets = [80, 0], sizes = [16, 128], strides = [1, 1]} : vector<208x128xf32> to vector<16x128xf32>
    %463 = vector.broadcast %0 : vector<1x128xf32> to vector<16x128xf32>
    %464 = arith.mulf %462, %463 : vector<16x128xf32>
    %465 = vector.broadcast %437 : vector<1x128xf32> to vector<16x128xf32>
    %466 = arith.addf %464, %465 : vector<16x128xf32>
    %467 = arith.addf %466, %258 : vector<16x128xf32>
    %cst_280 = arith.constant 0.000000e+00 : f32
    %468 = vector.broadcast %cst_280 : f32 to vector<16x128xf32>
    %469 = arith.maximumf %467, %468 : vector<16x128xf32>
    %470 = vector.extract_strided_slice %436 {offsets = [96, 0], sizes = [16, 128], strides = [1, 1]} : vector<208x128xf32> to vector<16x128xf32>
    %471 = vector.broadcast %0 : vector<1x128xf32> to vector<16x128xf32>
    %472 = arith.mulf %470, %471 : vector<16x128xf32>
    %473 = vector.broadcast %437 : vector<1x128xf32> to vector<16x128xf32>
    %474 = arith.addf %472, %473 : vector<16x128xf32>
    %475 = arith.addf %474, %268 : vector<16x128xf32>
    %cst_281 = arith.constant 0.000000e+00 : f32
    %476 = vector.broadcast %cst_281 : f32 to vector<16x128xf32>
    %477 = arith.maximumf %475, %476 : vector<16x128xf32>
    %478 = vector.extract_strided_slice %436 {offsets = [112, 0], sizes = [16, 128], strides = [1, 1]} : vector<208x128xf32> to vector<16x128xf32>
    %479 = vector.broadcast %0 : vector<1x128xf32> to vector<16x128xf32>
    %480 = arith.mulf %478, %479 : vector<16x128xf32>
    %481 = vector.broadcast %437 : vector<1x128xf32> to vector<16x128xf32>
    %482 = arith.addf %480, %481 : vector<16x128xf32>
    %483 = arith.addf %482, %278 : vector<16x128xf32>
    %cst_282 = arith.constant 0.000000e+00 : f32
    %484 = vector.broadcast %cst_282 : f32 to vector<16x128xf32>
    %485 = arith.maximumf %483, %484 : vector<16x128xf32>
    %486 = vector.extract_strided_slice %436 {offsets = [160, 0], sizes = [16, 128], strides = [1, 1]} : vector<208x128xf32> to vector<16x128xf32>
    %487 = vector.broadcast %0 : vector<1x128xf32> to vector<16x128xf32>
    %488 = arith.mulf %486, %487 : vector<16x128xf32>
    %489 = vector.broadcast %437 : vector<1x128xf32> to vector<16x128xf32>
    %490 = arith.addf %488, %489 : vector<16x128xf32>
    %491 = arith.addf %490, %288 : vector<16x128xf32>
    %cst_283 = arith.constant 0.000000e+00 : f32
    %492 = vector.broadcast %cst_283 : f32 to vector<16x128xf32>
    %493 = arith.maximumf %491, %492 : vector<16x128xf32>
    %494 = vector.extract_strided_slice %436 {offsets = [176, 0], sizes = [16, 128], strides = [1, 1]} : vector<208x128xf32> to vector<16x128xf32>
    %495 = vector.broadcast %0 : vector<1x128xf32> to vector<16x128xf32>
    %496 = arith.mulf %494, %495 : vector<16x128xf32>
    %497 = vector.broadcast %437 : vector<1x128xf32> to vector<16x128xf32>
    %498 = arith.addf %496, %497 : vector<16x128xf32>
    %499 = arith.addf %498, %298 : vector<16x128xf32>
    %cst_284 = arith.constant 0.000000e+00 : f32
    %500 = vector.broadcast %cst_284 : f32 to vector<16x128xf32>
    %501 = arith.maximumf %499, %500 : vector<16x128xf32>
    %502 = vector.extract_strided_slice %436 {offsets = [192, 0], sizes = [16, 128], strides = [1, 1]} : vector<208x128xf32> to vector<16x128xf32>
    %503 = vector.broadcast %0 : vector<1x128xf32> to vector<16x128xf32>
    %504 = arith.mulf %502, %503 : vector<16x128xf32>
    %505 = vector.broadcast %437 : vector<1x128xf32> to vector<16x128xf32>
    %506 = arith.addf %504, %505 : vector<16x128xf32>
    %507 = arith.addf %506, %308 : vector<16x128xf32>
    %cst_285 = arith.constant 0.000000e+00 : f32
    %508 = vector.broadcast %cst_285 : f32 to vector<16x128xf32>
    %509 = arith.maximumf %507, %508 : vector<16x128xf32>
    %c0_286 = arith.constant 0 : index
    %c0_287 = arith.constant 0 : index
    %510 = vector.load %arg6[%c0_286, %c0_287] : memref<128x512xbf16, #tpu.memory_space<vmem>>, vector<128x512xbf16>
    %c0_288 = arith.constant 0 : index
    %c0_289 = arith.constant 0 : index
    %511 = vector.load %arg7[%c0_288, %c0_289] : memref<1x512xf32, #tpu.memory_space<vmem>>, vector<1x512xf32>
    %c0_290 = arith.constant 0 : index
    %c0_291 = arith.constant 0 : index
    %512 = vector.load %arg8[%c0_290, %c0_291] : memref<1x512xf32, #tpu.memory_space<vmem>>, vector<1x512xf32>
    %513 = arith.truncf %445 : vector<16x128xf32> to vector<16x128xbf16>
    %cst_292 = arith.constant dense<0.000000e+00> : vector<16x512xf32>
    %514 = tpu.matmul %513, %510, %cst_292 {dimension_numbers = #tpu.dot_dimension_numbers<[1], [0], [0], [1], [0, 0, 1, 1], [], []>} : vector<16x128xbf16>, vector<128x512xbf16>, vector<16x512xf32> -> vector<16x512xf32>
    %515 = vector.broadcast %511 : vector<1x512xf32> to vector<16x512xf32>
    %516 = arith.mulf %514, %515 : vector<16x512xf32>
    %517 = vector.broadcast %512 : vector<1x512xf32> to vector<16x512xf32>
    %518 = arith.addf %516, %517 : vector<16x512xf32>
    %cst_293 = arith.constant 0.000000e+00 : f32
    %519 = vector.broadcast %cst_293 : f32 to vector<16x512xf32>
    %520 = arith.maximumf %518, %519 : vector<16x512xf32>
    %521 = arith.truncf %520 : vector<16x512xf32> to vector<16x512xbf16>
    %c0_294 = arith.constant 0 : index
    %c0_295 = arith.constant 0 : index
    %c0_296 = arith.constant 0 : index
    %522 = vector.load %arg9[%c0_294, %c0_295, %c0_296] : memref<9x512x128xbf16, #tpu.memory_space<vmem>>, vector<1x512x128xbf16>
    %523 = vector.shape_cast %522 : vector<1x512x128xbf16> to vector<512x128xbf16>
    %cst_297 = arith.constant dense<0.000000e+00> : vector<16x128xf32>
    %524 = tpu.matmul %521, %523, %cst_297 {dimension_numbers = #tpu.dot_dimension_numbers<[1], [0], [0], [1], [0, 0, 1, 1], [], []>} : vector<16x512xbf16>, vector<512x128xbf16>, vector<16x128xf32> -> vector<16x128xf32>
    %525 = arith.truncf %453 : vector<16x128xf32> to vector<16x128xbf16>
    %cst_298 = arith.constant dense<0.000000e+00> : vector<16x512xf32>
    %526 = tpu.matmul %525, %510, %cst_298 {dimension_numbers = #tpu.dot_dimension_numbers<[1], [0], [0], [1], [0, 0, 1, 1], [], []>} : vector<16x128xbf16>, vector<128x512xbf16>, vector<16x512xf32> -> vector<16x512xf32>
    %527 = vector.broadcast %511 : vector<1x512xf32> to vector<16x512xf32>
    %528 = arith.mulf %526, %527 : vector<16x512xf32>
    %529 = vector.broadcast %512 : vector<1x512xf32> to vector<16x512xf32>
    %530 = arith.addf %528, %529 : vector<16x512xf32>
    %cst_299 = arith.constant 0.000000e+00 : f32
    %531 = vector.broadcast %cst_299 : f32 to vector<16x512xf32>
    %532 = arith.maximumf %530, %531 : vector<16x512xf32>
    %533 = arith.truncf %532 : vector<16x512xf32> to vector<16x512xbf16>
    %c1_300 = arith.constant 1 : index
    %c0_301 = arith.constant 0 : index
    %c0_302 = arith.constant 0 : index
    %534 = vector.load %arg9[%c1_300, %c0_301, %c0_302] : memref<9x512x128xbf16, #tpu.memory_space<vmem>>, vector<1x512x128xbf16>
    %535 = vector.shape_cast %534 : vector<1x512x128xbf16> to vector<512x128xbf16>
    %cst_303 = arith.constant dense<0.000000e+00> : vector<16x128xf32>
    %536 = tpu.matmul %533, %535, %cst_303 {dimension_numbers = #tpu.dot_dimension_numbers<[1], [0], [0], [1], [0, 0, 1, 1], [], []>} : vector<16x512xbf16>, vector<512x128xbf16>, vector<16x128xf32> -> vector<16x128xf32>
    %537 = arith.addf %524, %536 : vector<16x128xf32>
    %538 = arith.truncf %461 : vector<16x128xf32> to vector<16x128xbf16>
    %cst_304 = arith.constant dense<0.000000e+00> : vector<16x512xf32>
    %539 = tpu.matmul %538, %510, %cst_304 {dimension_numbers = #tpu.dot_dimension_numbers<[1], [0], [0], [1], [0, 0, 1, 1], [], []>} : vector<16x128xbf16>, vector<128x512xbf16>, vector<16x512xf32> -> vector<16x512xf32>
    %540 = vector.broadcast %511 : vector<1x512xf32> to vector<16x512xf32>
    %541 = arith.mulf %539, %540 : vector<16x512xf32>
    %542 = vector.broadcast %512 : vector<1x512xf32> to vector<16x512xf32>
    %543 = arith.addf %541, %542 : vector<16x512xf32>
    %cst_305 = arith.constant 0.000000e+00 : f32
    %544 = vector.broadcast %cst_305 : f32 to vector<16x512xf32>
    %545 = arith.maximumf %543, %544 : vector<16x512xf32>
    %546 = arith.truncf %545 : vector<16x512xf32> to vector<16x512xbf16>
    %c2_306 = arith.constant 2 : index
    %c0_307 = arith.constant 0 : index
    %c0_308 = arith.constant 0 : index
    %547 = vector.load %arg9[%c2_306, %c0_307, %c0_308] : memref<9x512x128xbf16, #tpu.memory_space<vmem>>, vector<1x512x128xbf16>
    %548 = vector.shape_cast %547 : vector<1x512x128xbf16> to vector<512x128xbf16>
    %cst_309 = arith.constant dense<0.000000e+00> : vector<16x128xf32>
    %549 = tpu.matmul %546, %548, %cst_309 {dimension_numbers = #tpu.dot_dimension_numbers<[1], [0], [0], [1], [0, 0, 1, 1], [], []>} : vector<16x512xbf16>, vector<512x128xbf16>, vector<16x128xf32> -> vector<16x128xf32>
    %550 = arith.addf %537, %549 : vector<16x128xf32>
    %551 = arith.truncf %469 : vector<16x128xf32> to vector<16x128xbf16>
    %cst_310 = arith.constant dense<0.000000e+00> : vector<16x512xf32>
    %552 = tpu.matmul %551, %510, %cst_310 {dimension_numbers = #tpu.dot_dimension_numbers<[1], [0], [0], [1], [0, 0, 1, 1], [], []>} : vector<16x128xbf16>, vector<128x512xbf16>, vector<16x512xf32> -> vector<16x512xf32>
    %553 = vector.broadcast %511 : vector<1x512xf32> to vector<16x512xf32>
    %554 = arith.mulf %552, %553 : vector<16x512xf32>
    %555 = vector.broadcast %512 : vector<1x512xf32> to vector<16x512xf32>
    %556 = arith.addf %554, %555 : vector<16x512xf32>
    %cst_311 = arith.constant 0.000000e+00 : f32
    %557 = vector.broadcast %cst_311 : f32 to vector<16x512xf32>
    %558 = arith.maximumf %556, %557 : vector<16x512xf32>
    %559 = arith.truncf %558 : vector<16x512xf32> to vector<16x512xbf16>
    %c3_312 = arith.constant 3 : index
    %c0_313 = arith.constant 0 : index
    %c0_314 = arith.constant 0 : index
    %560 = vector.load %arg9[%c3_312, %c0_313, %c0_314] : memref<9x512x128xbf16, #tpu.memory_space<vmem>>, vector<1x512x128xbf16>
    %561 = vector.shape_cast %560 : vector<1x512x128xbf16> to vector<512x128xbf16>
    %cst_315 = arith.constant dense<0.000000e+00> : vector<16x128xf32>
    %562 = tpu.matmul %559, %561, %cst_315 {dimension_numbers = #tpu.dot_dimension_numbers<[1], [0], [0], [1], [0, 0, 1, 1], [], []>} : vector<16x512xbf16>, vector<512x128xbf16>, vector<16x128xf32> -> vector<16x128xf32>
    %563 = arith.addf %550, %562 : vector<16x128xf32>
    %564 = arith.truncf %477 : vector<16x128xf32> to vector<16x128xbf16>
    %cst_316 = arith.constant dense<0.000000e+00> : vector<16x512xf32>
    %565 = tpu.matmul %564, %510, %cst_316 {dimension_numbers = #tpu.dot_dimension_numbers<[1], [0], [0], [1], [0, 0, 1, 1], [], []>} : vector<16x128xbf16>, vector<128x512xbf16>, vector<16x512xf32> -> vector<16x512xf32>
    %566 = vector.broadcast %511 : vector<1x512xf32> to vector<16x512xf32>
    %567 = arith.mulf %565, %566 : vector<16x512xf32>
    %568 = vector.broadcast %512 : vector<1x512xf32> to vector<16x512xf32>
    %569 = arith.addf %567, %568 : vector<16x512xf32>
    %cst_317 = arith.constant 0.000000e+00 : f32
    %570 = vector.broadcast %cst_317 : f32 to vector<16x512xf32>
    %571 = arith.maximumf %569, %570 : vector<16x512xf32>
    %572 = arith.truncf %571 : vector<16x512xf32> to vector<16x512xbf16>
    %c4_318 = arith.constant 4 : index
    %c0_319 = arith.constant 0 : index
    %c0_320 = arith.constant 0 : index
    %573 = vector.load %arg9[%c4_318, %c0_319, %c0_320] : memref<9x512x128xbf16, #tpu.memory_space<vmem>>, vector<1x512x128xbf16>
    %574 = vector.shape_cast %573 : vector<1x512x128xbf16> to vector<512x128xbf16>
    %cst_321 = arith.constant dense<0.000000e+00> : vector<16x128xf32>
    %575 = tpu.matmul %572, %574, %cst_321 {dimension_numbers = #tpu.dot_dimension_numbers<[1], [0], [0], [1], [0, 0, 1, 1], [], []>} : vector<16x512xbf16>, vector<512x128xbf16>, vector<16x128xf32> -> vector<16x128xf32>
    %576 = arith.addf %563, %575 : vector<16x128xf32>
    %577 = arith.truncf %485 : vector<16x128xf32> to vector<16x128xbf16>
    %cst_322 = arith.constant dense<0.000000e+00> : vector<16x512xf32>
    %578 = tpu.matmul %577, %510, %cst_322 {dimension_numbers = #tpu.dot_dimension_numbers<[1], [0], [0], [1], [0, 0, 1, 1], [], []>} : vector<16x128xbf16>, vector<128x512xbf16>, vector<16x512xf32> -> vector<16x512xf32>
    %579 = vector.broadcast %511 : vector<1x512xf32> to vector<16x512xf32>
    %580 = arith.mulf %578, %579 : vector<16x512xf32>
    %581 = vector.broadcast %512 : vector<1x512xf32> to vector<16x512xf32>
    %582 = arith.addf %580, %581 : vector<16x512xf32>
    %cst_323 = arith.constant 0.000000e+00 : f32
    %583 = vector.broadcast %cst_323 : f32 to vector<16x512xf32>
    %584 = arith.maximumf %582, %583 : vector<16x512xf32>
    %585 = arith.truncf %584 : vector<16x512xf32> to vector<16x512xbf16>
    %c5 = arith.constant 5 : index
    %c0_324 = arith.constant 0 : index
    %c0_325 = arith.constant 0 : index
    %586 = vector.load %arg9[%c5, %c0_324, %c0_325] : memref<9x512x128xbf16, #tpu.memory_space<vmem>>, vector<1x512x128xbf16>
    %587 = vector.shape_cast %586 : vector<1x512x128xbf16> to vector<512x128xbf16>
    %cst_326 = arith.constant dense<0.000000e+00> : vector<16x128xf32>
    %588 = tpu.matmul %585, %587, %cst_326 {dimension_numbers = #tpu.dot_dimension_numbers<[1], [0], [0], [1], [0, 0, 1, 1], [], []>} : vector<16x512xbf16>, vector<512x128xbf16>, vector<16x128xf32> -> vector<16x128xf32>
    %589 = arith.addf %576, %588 : vector<16x128xf32>
    %590 = arith.truncf %493 : vector<16x128xf32> to vector<16x128xbf16>
    %cst_327 = arith.constant dense<0.000000e+00> : vector<16x512xf32>
    %591 = tpu.matmul %590, %510, %cst_327 {dimension_numbers = #tpu.dot_dimension_numbers<[1], [0], [0], [1], [0, 0, 1, 1], [], []>} : vector<16x128xbf16>, vector<128x512xbf16>, vector<16x512xf32> -> vector<16x512xf32>
    %592 = vector.broadcast %511 : vector<1x512xf32> to vector<16x512xf32>
    %593 = arith.mulf %591, %592 : vector<16x512xf32>
    %594 = vector.broadcast %512 : vector<1x512xf32> to vector<16x512xf32>
    %595 = arith.addf %593, %594 : vector<16x512xf32>
    %cst_328 = arith.constant 0.000000e+00 : f32
    %596 = vector.broadcast %cst_328 : f32 to vector<16x512xf32>
    %597 = arith.maximumf %595, %596 : vector<16x512xf32>
    %598 = arith.truncf %597 : vector<16x512xf32> to vector<16x512xbf16>
    %c6 = arith.constant 6 : index
    %c0_329 = arith.constant 0 : index
    %c0_330 = arith.constant 0 : index
    %599 = vector.load %arg9[%c6, %c0_329, %c0_330] : memref<9x512x128xbf16, #tpu.memory_space<vmem>>, vector<1x512x128xbf16>
    %600 = vector.shape_cast %599 : vector<1x512x128xbf16> to vector<512x128xbf16>
    %cst_331 = arith.constant dense<0.000000e+00> : vector<16x128xf32>
    %601 = tpu.matmul %598, %600, %cst_331 {dimension_numbers = #tpu.dot_dimension_numbers<[1], [0], [0], [1], [0, 0, 1, 1], [], []>} : vector<16x512xbf16>, vector<512x128xbf16>, vector<16x128xf32> -> vector<16x128xf32>
    %602 = arith.addf %589, %601 : vector<16x128xf32>
    %603 = arith.truncf %501 : vector<16x128xf32> to vector<16x128xbf16>
    %cst_332 = arith.constant dense<0.000000e+00> : vector<16x512xf32>
    %604 = tpu.matmul %603, %510, %cst_332 {dimension_numbers = #tpu.dot_dimension_numbers<[1], [0], [0], [1], [0, 0, 1, 1], [], []>} : vector<16x128xbf16>, vector<128x512xbf16>, vector<16x512xf32> -> vector<16x512xf32>
    %605 = vector.broadcast %511 : vector<1x512xf32> to vector<16x512xf32>
    %606 = arith.mulf %604, %605 : vector<16x512xf32>
    %607 = vector.broadcast %512 : vector<1x512xf32> to vector<16x512xf32>
    %608 = arith.addf %606, %607 : vector<16x512xf32>
    %cst_333 = arith.constant 0.000000e+00 : f32
    %609 = vector.broadcast %cst_333 : f32 to vector<16x512xf32>
    %610 = arith.maximumf %608, %609 : vector<16x512xf32>
    %611 = arith.truncf %610 : vector<16x512xf32> to vector<16x512xbf16>
    %c7 = arith.constant 7 : index
    %c0_334 = arith.constant 0 : index
    %c0_335 = arith.constant 0 : index
    %612 = vector.load %arg9[%c7, %c0_334, %c0_335] : memref<9x512x128xbf16, #tpu.memory_space<vmem>>, vector<1x512x128xbf16>
    %613 = vector.shape_cast %612 : vector<1x512x128xbf16> to vector<512x128xbf16>
    %cst_336 = arith.constant dense<0.000000e+00> : vector<16x128xf32>
    %614 = tpu.matmul %611, %613, %cst_336 {dimension_numbers = #tpu.dot_dimension_numbers<[1], [0], [0], [1], [0, 0, 1, 1], [], []>} : vector<16x512xbf16>, vector<512x128xbf16>, vector<16x128xf32> -> vector<16x128xf32>
    %615 = arith.addf %602, %614 : vector<16x128xf32>
    %616 = arith.truncf %509 : vector<16x128xf32> to vector<16x128xbf16>
    %cst_337 = arith.constant dense<0.000000e+00> : vector<16x512xf32>
    %617 = tpu.matmul %616, %510, %cst_337 {dimension_numbers = #tpu.dot_dimension_numbers<[1], [0], [0], [1], [0, 0, 1, 1], [], []>} : vector<16x128xbf16>, vector<128x512xbf16>, vector<16x512xf32> -> vector<16x512xf32>
    %618 = vector.broadcast %511 : vector<1x512xf32> to vector<16x512xf32>
    %619 = arith.mulf %617, %618 : vector<16x512xf32>
    %620 = vector.broadcast %512 : vector<1x512xf32> to vector<16x512xf32>
    %621 = arith.addf %619, %620 : vector<16x512xf32>
    %cst_338 = arith.constant 0.000000e+00 : f32
    %622 = vector.broadcast %cst_338 : f32 to vector<16x512xf32>
    %623 = arith.maximumf %621, %622 : vector<16x512xf32>
    %624 = arith.truncf %623 : vector<16x512xf32> to vector<16x512xbf16>
    %c8 = arith.constant 8 : index
    %c0_339 = arith.constant 0 : index
    %c0_340 = arith.constant 0 : index
    %625 = vector.load %arg9[%c8, %c0_339, %c0_340] : memref<9x512x128xbf16, #tpu.memory_space<vmem>>, vector<1x512x128xbf16>
    %626 = vector.shape_cast %625 : vector<1x512x128xbf16> to vector<512x128xbf16>
    %cst_341 = arith.constant dense<0.000000e+00> : vector<16x128xf32>
    %627 = tpu.matmul %624, %626, %cst_341 {dimension_numbers = #tpu.dot_dimension_numbers<[1], [0], [0], [1], [0, 0, 1, 1], [], []>} : vector<16x512xbf16>, vector<512x128xbf16>, vector<16x128xf32> -> vector<16x128xf32>
    %628 = arith.addf %615, %627 : vector<16x128xf32>
    %c0_342 = arith.constant 0 : index
    %c0_343 = arith.constant 0 : index
    %629 = vector.load %arg10[%c0_342, %c0_343] : memref<1x128xf32, #tpu.memory_space<vmem>>, vector<1x128xf32>
    %630 = vector.broadcast %629 : vector<1x128xf32> to vector<16x128xf32>
    %631 = arith.addf %628, %630 : vector<16x128xf32>
    %632 = tpu.iota {dimensions = array<i32: 1>} : vector<16x128xi32>
    %c9_i32 = arith.constant 9 : i32
    %633 = vector.broadcast %c9_i32 : i32 to vector<16x128xi32>
    %634 = arith.cmpi slt, %632, %633 : vector<16x128xi32>
    %cst_344 = arith.constant -1.000000e+30 : f32
    %635 = vector.broadcast %cst_344 : f32 to vector<16x128xf32>
    %636 = arith.select %634, %631, %635 : vector<16x128xi1>, vector<16x128xf32>
    %cst_345 = arith.constant dense<0xFF800000> : vector<16xf32>
    %637 = vector.multi_reduction <maximumf>, %636, %cst_345 [1] : vector<16x128xf32> to vector<16xf32>
    %638 = vector.shape_cast %637 : vector<16xf32> to vector<16x1xf32>
    %639 = vector.broadcast %638 : vector<16x1xf32> to vector<16x128xf32>
    %640 = arith.subf %636, %639 : vector<16x128xf32>
    %641 = math.exp %640 : vector<16x128xf32>
    %cst_346 = arith.constant 0.000000e+00 : f32
    %642 = vector.broadcast %cst_346 : f32 to vector<16x128xf32>
    %643 = arith.select %634, %641, %642 : vector<16x128xi1>, vector<16x128xf32>
    %cst_347 = arith.constant dense<0.000000e+00> : vector<16xf32>
    %644 = vector.multi_reduction <add>, %643, %cst_347 [1] : vector<16x128xf32> to vector<16xf32>
    %645 = vector.shape_cast %644 : vector<16xf32> to vector<16x1xf32>
    %646 = tpu.reciprocal %645 {approx = true} : vector<16x1xf32> -> vector<16x1xf32>
    %647 = vector.broadcast %646 : vector<16x1xf32> to vector<16x128xf32>
    %648 = arith.mulf %643, %647 : vector<16x128xf32>
    %c9_i32_348 = arith.constant 9 : i32
    %649 = vector.broadcast %c9_i32_348 : i32 to vector<16x128xi32>
    %650 = arith.cmpi eq, %632, %649 : vector<16x128xi32>
    %651 = math.tanh %631 : vector<16x128xf32>
    %cst_349 = arith.constant 0.000000e+00 : f32
    %652 = vector.broadcast %cst_349 : f32 to vector<16x128xf32>
    %653 = arith.select %650, %651, %652 : vector<16x128xi1>, vector<16x128xf32>
    %654 = arith.select %634, %648, %653 : vector<16x128xi1>, vector<16x128xf32>
    %c0_350 = arith.constant 0 : index
    %c0_351 = arith.constant 0 : index
    %655 = vector.load %arg11[%c0_350, %c0_351] : memref<16x128xf32, #tpu.memory_space<vmem>>, vector<16x128xf32>
    tpu.vector_store %arg11[%c0_350, %c0_351], %654 {strides = array<i32>} : memref<16x128xf32, #tpu.memory_space<vmem>>, vector<16x128xf32>,
    return
  }
  func.func @transform_0(%arg0: i32) -> (i32, i32) {
    %c0_i32 = arith.constant 0 : i32
    %c0_i32_0 = arith.constant 0 : i32
    return %arg0, %c0_i32 : i32, i32
  }
  func.func @transform_1(%arg0: i32) -> (i32, i32) {
    %c0_i32 = arith.constant 0 : i32
    %c0_i32_0 = arith.constant 0 : i32
    %c0_i32_1 = arith.constant 0 : i32
    return %c0_i32, %c0_i32_0 : i32, i32
  }
  func.func @transform_2(%arg0: i32) -> (i32, i32, i32) {
    %c0_i32 = arith.constant 0 : i32
    %c0_i32_0 = arith.constant 0 : i32
    %c0_i32_1 = arith.constant 0 : i32
    %c0_i32_2 = arith.constant 0 : i32
    return %c0_i32, %c0_i32_0, %c0_i32_1 : i32, i32, i32
  }
  func.func @transform_3(%arg0: i32) -> (i32, i32) {
    %c0_i32 = arith.constant 0 : i32
    %c0_i32_0 = arith.constant 0 : i32
    %c0_i32_1 = arith.constant 0 : i32
    return %c0_i32, %c0_i32_0 : i32, i32
  }
  func.func @transform_4(%arg0: i32) -> (i32, i32) {
    %c0_i32 = arith.constant 0 : i32
    %c0_i32_0 = arith.constant 0 : i32
    %c0_i32_1 = arith.constant 0 : i32
    return %c0_i32, %c0_i32_0 : i32, i32
  }
  func.func @transform_5(%arg0: i32) -> (i32, i32) {
    %c0_i32 = arith.constant 0 : i32
    %c0_i32_0 = arith.constant 0 : i32
    %c0_i32_1 = arith.constant 0 : i32
    return %c0_i32, %c0_i32_0 : i32, i32
  }
  func.func @transform_6(%arg0: i32) -> (i32, i32) {
    %c0_i32 = arith.constant 0 : i32
    %c0_i32_0 = arith.constant 0 : i32
    %c0_i32_1 = arith.constant 0 : i32
    return %c0_i32, %c0_i32_0 : i32, i32
  }
  func.func @transform_7(%arg0: i32) -> (i32, i32) {
    %c0_i32 = arith.constant 0 : i32
    %c0_i32_0 = arith.constant 0 : i32
    %c0_i32_1 = arith.constant 0 : i32
    return %c0_i32, %c0_i32_0 : i32, i32
  }
  func.func @transform_8(%arg0: i32) -> (i32, i32, i32) {
    %c0_i32 = arith.constant 0 : i32
    %c0_i32_0 = arith.constant 0 : i32
    %c0_i32_1 = arith.constant 0 : i32
    %c0_i32_2 = arith.constant 0 : i32
    return %c0_i32, %c0_i32_0, %c0_i32_1 : i32, i32, i32
  }
  func.func @transform_9(%arg0: i32) -> (i32, i32) {
    %c0_i32 = arith.constant 0 : i32
    %c0_i32_0 = arith.constant 0 : i32
    %c0_i32_1 = arith.constant 0 : i32
    return %c0_i32, %c0_i32_0 : i32, i32
  }
  func.func @transform_10(%arg0: i32) -> (i32, i32) {
    %c0_i32 = arith.constant 0 : i32
    %c0_i32_0 = arith.constant 0 : i32
    return %arg0, %c0_i32 : i32, i32
  }
}

</mosaic_0001>

<bundles_post_ra>
// kernel: tictactoe_forward.1
= control target key start
LH: loop header
LB: loop body
LE: loop exit
PB: predicated region body
PF: predicated region fallthrough
CT: control target
= control target key end

     0   :  { %15 = vsyncpa [#allocation5], 0  ;;  %s18833_s0 = inlined_call_operand.vmem [shape: bf16[16,128], index: 0, kind: input, shape index: {}]   ;;  %s18834_s1 = inlined_call_operand.hbm [shape: bf16[128,1152], index: 1, kind: input, shape index: {}]   ;;  %s18835_s2 = inlined_call_operand.hbm [shape: bf16[4,1152,128], index: 2, kind: input, shape index: {}]   ;;  %s18836_s3 = inlined_call_operand.hbm [shape: f32[1,128], index: 3, kind: input, shape index: {}]   ;;  %s18837_s4 = inlined_call_operand.hbm [shape: f32[5,128], index: 4, kind: input, shape index: {}]   ;;  %s18838_s5 = inlined_call_operand.hbm [shape: bf16[128,512], index: 5, kind: input, shape index: {}]   ;;  %s18839_s6 = inlined_call_operand.hbm [shape: f32[1,512], index: 6, kind: input, shape index: {}]   ;;  %s18840_s7 = inlined_call_operand.hbm [shape: f32[1,512], index: 7, kind: input, shape index: {}]   ;;  %s18841_s8 = inlined_call_operand.hbm [shape: bf16[9,512,128], index: 8, kind: input, shape index: {}]   ;;  %s18842_s9 = inlined_call_operand.hbm [shape: f32[1,128], index: 9, kind: input, shape index: {}]   ;;  %s18843_s10 = inlined_call_operand.vmem [shape: f32[16,128], index: 10, kind: output, shape index: {}]  }
   0x1   :  { %16 = vsyncpa [#allocation7], 0 }
   0x2   :  { %17 = vsyncpa [#allocation10], 0 }
   0x3   :  { %18 = vsyncpa [#allocation13], 0 }
   0x4   :  { %19 = vsyncpa [#allocation16], 0  ;;  %s15931_s13 = smov [#allocation6]   ;;  %s15723_s17 = scalar_lea.hbm %s18835_s2, 36864 }
   0x5   :  { %s39_s14 = sshll.u32 %s15931_s13, 4  ;;  %p15724_p0 = scmp.ne.s32.totalorder %s18835_s2, %s15723_s17  ;;  %s40_s14 = int_to_ptr.vmem [resolvable:$true] %s39_s14 }
   0x6   :  { %p15727_p1 = scmp.lt.u32.totalorder %s15723_s17, %s18835_s2 }
   0x8   :  { %p15729_p2 = pnand %p15727_p1, %p15724_p0 }
   0xa   :  { %15732 = shalt.err (!%p15729_p2)
}
   0xb   :  { %s15733_s22 = scalar_lea.vmem %s40_s14, 36864  ;;  %p15738_p4 = scmp.lt.s32.totalorder %s40_s14, %s40_s14 }
   0xc   :  { %p15734_p3 = scmp.ne.s32.totalorder %s40_s14, %s15733_s22  ;;  %p15739_p5 = scmp.lt.s32.totalorder %s15733_s22, %s15733_s22 }
   0xe   :  { %p15740_p6 = por %p15739_p5, %p15738_p4 }
  0x10   :  { %p15741_p7 = pnand %p15740_p6, %p15734_p3 }
  0x12   :  { %15744 = shalt.err (!%p15741_p7)
}
  0x13   :  { %s15932_s23 = smov 64   ;;  %s15933_s24 = smov 4  }
  0x14   :  { %45 = dma.hbm_to_vmem [thread:$0]  %s18835_s2, 36864, %s40_s14, [#allocation7], %s15932_s23, %s15932_s23, %s15933_s24  }
  0x15   :  { %s15934_s27 = smov [#allocation9]   ;;  %s15935_s29 = smov [#allocation12]  }
  0x16   :  { %s62_s28 = sshll.u32 %s15934_s27, 4  ;;  %s84_s30 = sshll.u32 %s15935_s29, 4  ;;  %s63_s28 = int_to_ptr.vmem [resolvable:$true] %s62_s28  ;;  %s85_s30 = int_to_ptr.vmem [resolvable:$true] %s84_s30 }
  0x17   :  { %s15745_s13 = scalar_lea.hbm %s18837_s4, 128 }
  0x18   :  { %p15746_p8 = scmp.ne.s32.totalorder %s18837_s4, %s15745_s13  ;;  %p15749_p9 = scmp.lt.u32.totalorder %s15745_s13, %s18837_s4 }
  0x1a   :  { %p15751_p10 = pnand %p15749_p9, %p15746_p8 }
  0x1c   :  { %15754 = shalt.err (!%p15751_p10)
}
  0x1d   :  { %s15755_s2 = scalar_lea.vmem %s63_s28, 128  ;;  %p15760_p12 = scmp.lt.s32.totalorder %s63_s28, %s63_s28 }
  0x1e   :  { %p15756_p11 = scmp.ne.s32.totalorder %s63_s28, %s15755_s2  ;;  %p15761_p13 = scmp.lt.s32.totalorder %s15755_s2, %s15755_s2 }
  0x20   :  { %p15762_p0 = por %p15761_p13, %p15760_p12 }
  0x22   :  { %p15763_p1 = pnand %p15762_p0, %p15756_p11 }
  0x24   :  { %15766 = shalt.err (!%p15763_p1)
}
  0x25   :  { %65 = dma.hbm_to_vmem [thread:$0]  %s18837_s4, 128, %s63_s28, [#allocation10]  }
  0x26   :  { %s15767_s22 = scalar_lea.hbm %s18839_s6, 64 }
  0x27   :  { %p15768_p2 = scmp.ne.s32.totalorder %s18839_s6, %s15767_s22  ;;  %p15771_p3 = scmp.lt.u32.totalorder %s15767_s22, %s18839_s6 }
  0x29   :  { %p15773_p4 = pnand %p15771_p3, %p15768_p2 }
  0x2b   :  { %15776 = shalt.err (!%p15773_p4)
}
  0x2c   :  { %s15777_s11 = scalar_lea.vmem %s85_s30, 64  ;;  %p15782_p6 = scmp.lt.s32.totalorder %s85_s30, %s85_s30 }
  0x2d   :  { %p15778_p5 = scmp.ne.s32.totalorder %s85_s30, %s15777_s11  ;;  %p15783_p7 = scmp.lt.s32.totalorder %s15777_s11, %s15777_s11 }
  0x2f   :  { %p15784_p8 = por %p15783_p7, %p15782_p6 }
  0x31   :  { %p15785_p9 = pnand %p15784_p8, %p15778_p5 }
  0x33   :  { %15788 = shalt.err (!%p15785_p9)
}
  0x34   :  { %87 = dma.hbm_to_vmem [thread:$0]  %s18839_s6, 64, %s85_s30, [#allocation13]  }
  0x35   :  { %s15936_s12 = smov [#allocation15]   ;;  %s15937_s15 = smov [#allocation4]  }
  0x36   :  { %s103_s13 = sshll.u32 %s15936_s12, 4  ;;  %s27_s16 = sshll.u32 %s15937_s15, 4  ;;  %s104_s13 = int_to_ptr.vmem [resolvable:$true] %s103_s13  ;;  %s28_s16 = int_to_ptr.vmem [resolvable:$true] %s27_s16 }
  0x37   :  { %s15789_s2 = scalar_lea.hbm %s18841_s8, 36864 }
  0x38   :  { %p15790_p10 = scmp.ne.s32.totalorder %s18841_s8, %s15789_s2  ;;  %p15793_p11 = scmp.lt.u32.totalorder %s15789_s2, %s18841_s8 }
  0x3a   :  { %p15795_p12 = pnand %p15793_p11, %p15790_p10 }
  0x3c   :  { %15798 = shalt.err (!%p15795_p12)
}
  0x3d   :  { %s15799_s6 = scalar_lea.vmem %s104_s13, 36864  ;;  %p15804_p0 = scmp.lt.s32.totalorder %s104_s13, %s104_s13 }
  0x3e   :  { %p15800_p13 = scmp.ne.s32.totalorder %s104_s13, %s15799_s6  ;;  %p15805_p1 = scmp.lt.s32.totalorder %s15799_s6, %s15799_s6 }
  0x40   :  { %p15806_p2 = por %p15805_p1, %p15804_p0 }
  0x42   :  { %p15807_p3 = pnand %p15806_p2, %p15800_p13 }
  0x44   :  { %15810 = shalt.err (!%p15807_p3)
}
  0x45   :  { %109 = dma.hbm_to_vmem [thread:$0]  %s18841_s8, 36864, %s104_s13, [#allocation16], %s15932_s23, %s15932_s23, %s15933_s24  }
  0x46   :  { %s15811_s27 = scalar_lea.hbm %s18834_s1, 9216 }
  0x47   :  { %p15812_p4 = scmp.ne.s32.totalorder %s18834_s1, %s15811_s27  ;;  %p15815_p5 = scmp.lt.u32.totalorder %s15811_s27, %s18834_s1 }
  0x49   :  { %p15817_p6 = pnand %p15815_p5, %p15812_p4 }
  0x4b   :  { %15820 = shalt.err (!%p15817_p6)
}
  0x4c   :  { %s15821_s12 = scalar_lea.vmem %s28_s16, 9216  ;;  %p15826_p8 = scmp.lt.s32.totalorder %s28_s16, %s28_s16 }
  0x4d   :  { %p15822_p7 = scmp.ne.s32.totalorder %s28_s16, %s15821_s12  ;;  %p15827_p9 = scmp.lt.s32.totalorder %s15821_s12, %s15821_s12 }
  0x4f   :  { %p15828_p10 = por %p15827_p9, %p15826_p8 }
  0x51   :  { %p15829_p11 = pnand %p15828_p10, %p15822_p7 }
  0x53   :  { %15832 = shalt.err (!%p15829_p11)
}
  0x54   :  { %s15938_s8 = smov 576   ;;  %s15939_s23 = smov 36  }
  0x55   :  { %33 = dma.hbm_to_vmem [thread:$0]  %s18834_s1, 9216, %s28_s16, [#allocation5], %s15938_s8, %s15938_s8, %s15939_s23  }
  0x56   :  { %s15940_s15 = smov [#allocation8]   ;;  %s15941_s18 = smov [#allocation11]  }
  0x57   :  { %s52_s17 = sshll.u32 %s15940_s15, 4  ;;  %s71_s2 = sshll.u32 %s15941_s18, 4  ;;  %s53_s17 = int_to_ptr.vmem [resolvable:$true] %s52_s17  ;;  %s72_s2 = int_to_ptr.vmem [resolvable:$true] %s71_s2 }
  0x58   :  { %s15833_s20 = scalar_lea.hbm %s18836_s3, 16 }
  0x59   :  { %p15834_p12 = scmp.ne.s32.totalorder %s18836_s3, %s15833_s20  ;;  %p15837_p13 = scmp.lt.u32.totalorder %s15833_s20, %s18836_s3 }
  0x5b   :  { %p15839_p0 = pnand %p15837_p13, %p15834_p12 }
  0x5d   :  { %15842 = shalt.err (!%p15839_p0)
}
  0x5e   :  { %s15843_s1 = scalar_lea.vmem %s53_s17, 16  ;;  %s15847_s16 = scalar_lea.vmem %s53_s17, 32 }
  0x5f   :  { %p15844_p1 = scmp.ne.s32.totalorder %s53_s17, %s15843_s1  ;;  %p15848_p2 = scmp.lt.s32.totalorder %s53_s17, %s53_s17 }
  0x60   :  { %p15849_p3 = scmp.lt.s32.totalorder %s15847_s16, %s15843_s1 }
  0x62   :  { %p15850_p4 = por %p15849_p3, %p15848_p2 }
  0x64   :  { %p15851_p5 = pnand %p15850_p4, %p15844_p1 }
  0x66   :  { %15854 = shalt.err (!%p15851_p5)
}
  0x67   :  { %55 = dma.hbm_to_vmem [thread:$0]  %s18836_s3, 16, %s53_s17, [#allocation7]  }
  0x68   :  { %s15855_s11 = scalar_lea.hbm %s18838_s5, 4096 }
  0x69   :  { %p15856_p6 = scmp.ne.s32.totalorder %s18838_s5, %s15855_s11  ;;  %p15859_p7 = scmp.lt.u32.totalorder %s15855_s11, %s18838_s5 }
  0x6b   :  { %p15861_p8 = pnand %p15859_p7, %p15856_p6 }
  0x6d   :  { %15864 = shalt.err (!%p15861_p8)
}
  0x6e   :  { %s15865_s23 = scalar_lea.vmem %s72_s2, 4096  ;;  %p15870_p10 = scmp.lt.s32.totalorder %s72_s2, %s72_s2 }
  0x6f   :  { %p15866_p9 = scmp.ne.s32.totalorder %s72_s2, %s15865_s23  ;;  %p15871_p11 = scmp.lt.s32.totalorder %s15865_s23, %s15865_s23 }
  0x71   :  { %p15872_p12 = por %p15871_p11, %p15870_p10 }
  0x73   :  { %p15873_p13 = pnand %p15872_p12, %p15866_p9 }
  0x75   :  { %15876 = shalt.err (!%p15873_p13)
}
  0x76   :  { %s15942_s3 = smov 256   ;;  %s15943_s24 = smov 16  }
  0x77   :  { %77 = dma.hbm_to_vmem [thread:$0]  %s18838_s5, 4096, %s72_s2, [#allocation10], %s15942_s3, %s15942_s3, %s15943_s24  }
  0x78   :  { %s15944_s17 = smov [#allocation14]   ;;  %s15945_s14 = smov [#allocation17]  }
  0x79   :  { %s94_s18 = sshll.u32 %s15944_s17, 4  ;;  %s116_s19 = sshll.u32 %s15945_s14, 4  ;;  %s95_s18 = int_to_ptr.vmem [resolvable:$true] %s94_s18  ;;  %s117_s19 = int_to_ptr.vmem [resolvable:$true] %s116_s19 }
  0x7a   :  { %s15877_s6 = scalar_lea.hbm %s18840_s7, 64 }
  0x7b   :  { %p15878_p0 = scmp.ne.s32.totalorder %s18840_s7, %s15877_s6  ;;  %p15881_p1 = scmp.lt.u32.totalorder %s15877_s6, %s18840_s7 }
  0x7d   :  { %p15883_p2 = pnand %p15881_p1, %p15878_p0 }
  0x7f   :  { %15886 = shalt.err (!%p15883_p2)
}
  0x80   :  { %s15887_s5 = scalar_lea.vmem %s95_s18, 64  ;;  %p15892_p4 = scmp.lt.s32.totalorder %s95_s18, %s95_s18 }
  0x81   :  { %p15888_p3 = scmp.ne.s32.totalorder %s95_s18, %s15887_s5  ;;  %p15893_p5 = scmp.lt.s32.totalorder %s15887_s5, %s15887_s5 }
  0x83   :  { %p15894_p6 = por %p15893_p5, %p15892_p4 }
  0x85   :  { %p15895_p7 = pnand %p15894_p6, %p15888_p3 }
  0x87   :  { %15898 = shalt.err (!%p15895_p7)
}
  0x88   :  { %97 = dma.hbm_to_vmem [thread:$0]  %s18840_s7, 64, %s95_s18, [#allocation13]  }
  0x89   :  { %s15899_s29 = scalar_lea.hbm %s18842_s9, 16 }
  0x8a   :  { %p15900_p8 = scmp.ne.s32.totalorder %s18842_s9, %s15899_s29  ;;  %p15903_p9 = scmp.lt.u32.totalorder %s15899_s29, %s18842_s9 }
  0x8c   :  { %p15905_p10 = pnand %p15903_p9, %p15900_p8 }
  0x8e   :  { %15908 = shalt.err (!%p15905_p10)
}
  0x8f   :  { %s15909_s8 = scalar_lea.vmem %s117_s19, 16  ;;  %s15913_s23 = scalar_lea.vmem %s117_s19, 32 }
  0x90   :  { %p15910_p11 = scmp.ne.s32.totalorder %s117_s19, %s15909_s8  ;;  %p15914_p12 = scmp.lt.s32.totalorder %s117_s19, %s117_s19 }
  0x91   :  { %p15915_p13 = scmp.lt.s32.totalorder %s15913_s23, %s15909_s8 }
  0x93   :  { %p15916_p0 = por %p15915_p13, %p15914_p12 }
  0x95   :  { %p15917_p1 = pnand %p15916_p0, %p15910_p11 }
  0x97   :  { %15920 = shalt.err (!%p15917_p1)
}
  0x98   :  { %119 = dma.hbm_to_vmem [thread:$0]  %s18842_s9, 16, %s117_s19, [#allocation16]  }
  0x99   :  { %15921 = dma.done.wait [#allocation5], 9216  }
  0x9a   :  { %15922 = vsyncadd [#allocation5], 4294958080 }
  0x9b   :  { %15923 = dma.done.wait [#allocation7], 36880  }
  0x9c   :  { %15924 = vsyncadd [#allocation7], 4294930416 }
  0x9d   :  { %15925 = dma.done.wait [#allocation10], 4224  }
  0x9e   :  { %15926 = vsyncadd [#allocation10], 4294963072 }
  0x9f   :  { %15927 = dma.done.wait [#allocation13], 128  }
  0xa0   :  { %15928 = vsyncadd [#allocation13], 4294967168 }
  0xa1   :  { %15929 = dma.done.wait [#allocation16], 36880  }
  0xa2   :  { %15930 = vsyncadd [#allocation16], 4294930416  ;;  %v18880_v0 = vmov 0   ;;  %v14912_v1 = vld [vmem:[#allocation4 + $0x4] ss:$36 sps:$4 sm:$0xff]   ;;  %vm15948_vm0 = vmmov 0  }
  0xa3   :  { %653 = vmatprep.mubr.bf16.mxu0 %v18880_v0  ;;  %696 = vmatprep.mubr.bf16.mxu1 %v18880_v0  ;;  %v14914_v2 = vld [vmem:[#allocation4] ss:$36 sps:$4 sm:$0xff]   ;;  %v14915_v3 = vld [vmem:[#allocation4 + $0x4c] ss:$36 sps:$4 sm:$0xff]   ;;  %v14918_v5 = vld [vmem:[#allocation4 + $0x94] ss:$36 sps:$4 sm:$0xff]  }
  0xa4   :  { %621 = vmatprep.subr.bf16.mxu0 %v14912_v1  ;;  %v14917_v4 = vld [vmem:[#allocation4 + $0x48] ss:$36 sps:$4 sm:$0xff]   ;;  %v14920_v8 = vld [vmem:[#allocation4 + $0x90] ss:$36 sps:$4 sm:$0xff]   ;;  %v14921_v9 = vld [vmem:[#allocation4 + $0xdc] ss:$36 sps:$4 sm:$0xff]  }
  0xa5   :  { %622 = vmatpush1.bf16.msra.mxu0 %v14914_v2  ;;  %v14924_v6 = vld [vmem:[#allocation4 + $0xc] ss:$36 sps:$4 sm:$0xff]   ;;  %v14930_v10 = vld [vmem:[#allocation4 + $0x54] ss:$36 sps:$4 sm:$0xff]   ;;  %v14936_v13 = vld [vmem:[#allocation4 + $0x9c] ss:$36 sps:$4 sm:$0xff]  }
  0xa6   :  { %623 = vmatprep.subr.bf16.mxu0 %v14915_v3  ;;  %v14926_v7 = vld [vmem:[#allocation4 + $0x8] ss:$36 sps:$4 sm:$0xff]   ;;  %664 = vmatprep.subr.bf16.mxu1 %v14924_v6  ;;  %v14932_v11 = vld [vmem:[#allocation4 + $0x50] ss:$36 sps:$4 sm:$0xff]   ;;  %v14923_v12 = vld [vmem:[#allocation4 + $0xd8] ss:$36 sps:$4 sm:$0xff]  }
  0xa7   :  { %665 = vmatpush1.bf16.msra.mxu1 %v14926_v7  ;;  %v14927_v14 = vld [vmem:[#allocation4 + $0x124] ss:$36 sps:$4 sm:$0xff]   ;;  %v14938_v15 = vld [vmem:[#allocation4 + $0x98] ss:$36 sps:$4 sm:$0xff]   ;;  %v14933_v18 = vld [vmem:[#allocation4 + $0x16c] ss:$36 sps:$4 sm:$0xff]  }
  0xa8   :  { %666 = vmatprep.subr.bf16.mxu1 %v14930_v10  ;;  %v14942_v16 = vld [vmem:[#allocation4 + $0xe4] ss:$36 sps:$4 sm:$0xff]   ;;  %v14948_v20 = vld [vmem:[#allocation4 + $0x12c] ss:$36 sps:$4 sm:$0xff]   ;;  %v14939_v22 = vld [vmem:[#allocation4 + $0x1b4] ss:$36 sps:$4 sm:$0xff]  }
  0xa9   :  { %624 = vmatpush1.bf16.msra.mxu0 %v14917_v4  ;;  %v14929_v17 = vld [vmem:[#allocation4 + $0x120] ss:$36 sps:$4 sm:$0xff]   ;;  %v14935_v21 = vld [vmem:[#allocation4 + $0x168] ss:$36 sps:$4 sm:$0xff]   ;;  %v14952_v24 = vld [vmem:[#allocation4 + $0x174] ss:$36 sps:$4 sm:$0xff]  }
  0xaa   :  { %625 = vmatprep.subr.bf16.mxu0 %v14918_v5  ;;  %v14944_v19 = vld [vmem:[#allocation4 + $0xe0] ss:$36 sps:$4 sm:$0xff]   ;;  %v14950_v23 = vld [vmem:[#allocation4 + $0x128] ss:$36 sps:$4 sm:$0xff]   ;;  %v14941_v25 = vld [vmem:[#allocation4 + $0x1b0] ss:$36 sps:$4 sm:$0xff]  }
  0xab   :  { %667 = vmatpush1.bf16.msra.mxu1 %v14932_v11  ;;  %v14945_v26 = vld [vmem:[#allocation4 + $0x1fc] ss:$36 sps:$4 sm:$0xff]   ;;  %v14954_v27 = vld [vmem:[#allocation4 + $0x170] ss:$36 sps:$4 sm:$0xff]   ;;  %v14958_v33 = vld [vmem:[#allocation4 + $0x204] ss:$36 sps:$4 sm:$0xff]  }
  0xac   :  { %668 = vmatprep.subr.bf16.mxu1 %v14936_v13  ;;  %v14955_v28 = vld [vmem:[#allocation4 + $0x1bc] ss:$36 sps:$4 sm:$0xff]   ;;  %v14963_v31 = vld [vmem:[#allocation4 + $0x14] ss:$36 sps:$4 sm:$0xff]   ;;  %v14969_v39 = vld [vmem:[#allocation4 + $0xa4] ss:$36 sps:$4 sm:$0xff]  }
  0xad   :  { %626 = vmatpush1.bf16.msra.mxu0 %v14920_v8  ;;  %v14947_v29 = vld [vmem:[#allocation4 + $0x1f8] ss:$36 sps:$4 sm:$0xff]   ;;  %v16123_v30 = vld [vmem:[%s18833_s0] sm:$0xff]   ;;  %v14961_v34 = vld [vmem:[#allocation4 + $0x10] ss:$36 sps:$4 sm:$0xff]   ;;  %v18878_v3 = vmov 0.0  }
  0xae   :  { %627 = vmatprep.subr.bf16.mxu0 %v14921_v9  ;;  %v14957_v32 = vld [vmem:[#allocation4 + $0x1b8] ss:$36 sps:$4 sm:$0xff]   ;;  %v14960_v36 = vld [vmem:[#allocation4 + $0x200] ss:$36 sps:$4 sm:$0xff]   ;;  %v14972_v43 = vld [vmem:[#allocation4 + $0xec] ss:$36 sps:$4 sm:$0xff]  }
  0xaf   :  { %669 = vmatpush1.bf16.msra.mxu1 %v14938_v15  ;;  %v14966_v35 = vld [vmem:[#allocation4 + $0x5c] ss:$36 sps:$4 sm:$0xff]   ;;  %v14990_v41 = vld [vmem:[#allocation4 + $0x64] ss:$36 sps:$4 sm:$0xff]   ;;  %v14993_v45 = vld [vmem:[#allocation4 + $0xac] ss:$36 sps:$4 sm:$0xff]  }
  0xb0   :  { %670 = vmatprep.subr.bf16.mxu1 %v14942_v16  ;;  %v14987_v37 = vld [vmem:[#allocation4 + $0x1c] ss:$36 sps:$4 sm:$0xff]   ;;  %v14970_v46 = vld [vmem:[#allocation4 + $0xe8] ss:$36 sps:$4 sm:$0xff]   ;;  %v14975_v47 = vld [vmem:[#allocation4 + $0x134] ss:$36 sps:$4 sm:$0xff]  }
  0xb1   :  { %628 = vmatpush1.bf16.msra.mxu0 %v14923_v12  ;;  %v14964_v38 = vld [vmem:[#allocation4 + $0x58] ss:$36 sps:$4 sm:$0xff]   ;;  %v14967_v42 = vld [vmem:[#allocation4 + $0xa0] ss:$36 sps:$4 sm:$0xff]   ;;  %v14991_v48 = vld [vmem:[#allocation4 + $0xa8] ss:$36 sps:$4 sm:$0xff]  }
  0xb2   :  { %629 = vmatprep.subr.bf16.mxu0 %v14927_v14  ;;  %v14985_v40 = vld [vmem:[#allocation4 + $0x18] ss:$36 sps:$4 sm:$0xff]   ;;  %v14988_v44 = vld [vmem:[#allocation4 + $0x60] ss:$36 sps:$4 sm:$0xff]   ;;  %v14973_v50 = vld [vmem:[#allocation4 + $0x130] ss:$36 sps:$4 sm:$0xff]  }
  0xb3   :  { %671 = vmatpush1.bf16.msra.mxu1 %v14944_v19  ;;  %v14996_v49 = vld [vmem:[#allocation4 + $0xf4] ss:$36 sps:$4 sm:$0xff]   ;;  %v14978_v51 = vld [vmem:[#allocation4 + $0x17c] ss:$36 sps:$4 sm:$0xff]   ;;  %v14981_v55 = vld [vmem:[#allocation4 + $0x1c4] ss:$36 sps:$4 sm:$0xff]  }
  0xb4   :  { %672 = vmatprep.subr.bf16.mxu1 %v14948_v20  ;;  %v14994_v52 = vld [vmem:[#allocation4 + $0xf0] ss:$36 sps:$4 sm:$0xff]   ;;  %v14999_v53 = vld [vmem:[#allocation4 + $0x13c] ss:$36 sps:$4 sm:$0xff]   ;;  %v15002_v57 = vld [vmem:[#allocation4 + $0x184] ss:$36 sps:$4 sm:$0xff]  }
  0xb5   :  { %630 = vmatpush1.bf16.msra.mxu0 %v14929_v17  ;;  %v14976_v54 = vld [vmem:[#allocation4 + $0x178] ss:$36 sps:$4 sm:$0xff]   ;;  %v14979_v58 = vld [vmem:[#allocation4 + $0x1c0] ss:$36 sps:$4 sm:$0xff]   ;;  %v14984_v59 = vld [vmem:[#allocation4 + $0x20c] ss:$36 sps:$4 sm:$0xff]  }
  0xb6   :  { %631 = vmatprep.subr.bf16.mxu0 %v14933_v18  ;;  %v14997_v56 = vld [vmem:[#allocation4 + $0x138] ss:$36 sps:$4 sm:$0xff]   ;;  %v15000_v60 = vld [vmem:[#allocation4 + $0x180] ss:$36 sps:$4 sm:$0xff]   ;;  %v15005_v61 = vld [vmem:[#allocation4 + $0x1cc] ss:$36 sps:$4 sm:$0xff]  }
  0xb7   :  { %673 = vmatpush1.bf16.msra.mxu1 %v14950_v23  ;;  %v14982_v62 = vld [vmem:[#allocation4 + $0x208] ss:$36 sps:$4 sm:$0xff]   ;;  %v15008_v1 = vld [vmem:[#allocation4 + $0x214] ss:$36 sps:$4 sm:$0xff]   ;;  %v15009_v2 = vld [vmem:[#allocation4 + $0x20] ss:$36 sps:$4 sm:$0xff]  }
  0xb8   :  { %674 = vmatprep.subr.bf16.mxu1 %v14952_v24  ;;  %v15003_v63 = vld [vmem:[#allocation4 + $0x1c8] ss:$36 sps:$4 sm:$0xff]   ;;  %v15006_v4 = vld [vmem:[#allocation4 + $0x210] ss:$36 sps:$4 sm:$0xff]   ;;  %v15017_v5 = vld [vmem:[#allocation6 + $0x40] sm:$0xff]  }
  0xb9   :  { %632 = vmatpush1.bf16.msra.mxu0 %v14935_v21  ;;  %v15010_v6 = vld [vmem:[#allocation4 + $0x68] ss:$36 sps:$4 sm:$0xff]   ;;  %v15019_v7 = vld [vmem:[#allocation6] sm:$0xff]   ;;  %v15011_v9 = vld [vmem:[#allocation4 + $0xb0] ss:$36 sps:$4 sm:$0xff]  }
  0xba   :  { %633 = vmatprep.subr.bf16.mxu0 %v14939_v22  ;;  %v15021_v8 = vld [vmem:[#allocation6 + $0x48] sm:$0xff]   ;;  %v15025_v11 = vld [vmem:[#allocation6 + $0x50] sm:$0xff]   ;;  %v15012_v12 = vld [vmem:[#allocation4 + $0xf8] ss:$36 sps:$4 sm:$0xff]  }
  0xbb   :  { %675 = vmatpush1.bf16.msra.mxu1 %v14954_v27  ;;  %v15023_v10 = vld [vmem:[#allocation6 + $0x8] sm:$0xff]   ;;  %v15027_v13 = vld [vmem:[#allocation6 + $0x10] sm:$0xff]   ;;  %v15029_v14 = vld [vmem:[#allocation6 + $0x58] sm:$0xff]  }
  0xbc   :  { %676 = vmatprep.subr.bf16.mxu1 %v14955_v28  ;;  %v15013_v15 = vld [vmem:[#allocation4 + $0x140] ss:$36 sps:$4 sm:$0xff]   ;;  %v15031_v16 = vld [vmem:[#allocation6 + $0x18] sm:$0xff]   ;;  %v15014_v18 = vld [vmem:[#allocation4 + $0x188] ss:$36 sps:$4 sm:$0xff]  }
  0xbd   :  { %634 = vmatpush1.bf16.msra.mxu0 %v14941_v25  ;;  %v15033_v17 = vld [vmem:[#allocation6 + $0x60] sm:$0xff]   ;;  %v15037_v20 = vld [vmem:[#allocation6 + $0x68] sm:$0xff]   ;;  %v15015_v21 = vld [vmem:[#allocation4 + $0x1d0] ss:$36 sps:$4 sm:$0xff]  }
  0xbe   :  { %635 = vmatprep.subr.bf16.mxu0 %v14945_v26  ;;  %v15035_v19 = vld [vmem:[#allocation6 + $0x20] sm:$0xff]   ;;  %v15016_v22 = vld [vmem:[#allocation4 + $0x218] ss:$36 sps:$4 sm:$0xff]   ;;  %v15039_v23 = vld [vmem:[#allocation6 + $0x28] sm:$0xff]  }
  0xbf   :  { %677 = vmatpush1.bf16.msra.mxu1 %v14957_v32  ;;  %v15041_v24 = vld [vmem:[#allocation6 + $0x70] sm:$0xff]   ;;  %v15018_v25 = vld [vmem:[#allocation6 + $0xc0] sm:$0xff]   ;;  %v15045_v27 = vld [vmem:[#allocation6 + $0x78] sm:$0xff]  }
  0xc0   :  { %678 = vmatprep.subr.bf16.mxu1 %v14958_v33  ;;  %v15043_v26 = vld [vmem:[#allocation6 + $0x30] sm:$0xff]   ;;  %v15020_v28 = vld [vmem:[#allocation6 + $0x80] sm:$0xff]   ;;  %v15024_v33 = vld [vmem:[#allocation6 + $0x88] sm:$0xff]  }
  0xc1   :  { %636 = vmatpush1.bf16.msra.mxu0 %v14947_v29  ;;  %v15022_v29 = vld [vmem:[#allocation6 + $0xc8] sm:$0xff]   ;;  %v15049_v32 = vld [vmem:[#allocation6 + $0x140] sm:$0xff]  }
  0xc2   :  { %707 = vmatprep.subr.bf16.mxu0 %v14963_v31  ;;  %v15047_v31 = vld [vmem:[#allocation6 + $0x38] sm:$0xff]  }
  0xc3   :  { %679 = vmatpush1.bf16.msra.mxu1 %v14960_v36  ;;  %v15051_v36 = vld [vmem:[#allocation6 + $0x148] sm:$0xff]  }
  0xc4   :  { %654 = vmatmul.mubr.bf16.vlgmr.msra.gmra.mrb[0].mxu0 %v16123_v30  ;;  %750 = vmatprep.subr.bf16.mxu1 %v14987_v37  ;;  %v15028_v37 = vld [vmem:[#allocation6 + $0x90] sm:$0xff]  }
  0xc5   :  { %708 = vmatpush1.bf16.msra.mxu0 %v14961_v34  ;;  %739 = vmatprep.mubr.bf16.mxu0 %v18880_v0  ;;  %v15026_v34 = vld [vmem:[#allocation6 + $0xd0] sm:$0xff]  }
  0xc6   :  { %709 = vmatprep.subr.bf16.mxu0 %v14966_v35  ;;  %697 = vmatmul.mubr.bf16.vlgmr.msra.gmra.mrb[0].mxu1 %v16123_v30  ;;  %v15050_v35 = vld [vmem:[#allocation6 + $0x100] sm:$0xff]  }
  0xc7   :  { %751 = vmatpush1.bf16.msra.mxu1 %v14985_v40  ;;  %782 = vmatprep.mubr.bf16.mxu1 %v18880_v0  ;;  %v15053_v40 = vld [vmem:[#allocation6 + $0x150] sm:$0xff]  }
  0xc8   :  { %752 = vmatprep.subr.bf16.mxu1 %v14990_v41  ;;  %v15032_v41 = vld [vmem:[#allocation6 + $0x98] sm:$0xff]  }
  0xc9   :  { %710 = vmatpush1.bf16.msra.mxu0 %v14964_v38  ;;  %v15030_v38 = vld [vmem:[#allocation6 + $0xd8] sm:$0xff]  }
  0xca   :  { %711 = vmatprep.subr.bf16.mxu0 %v14969_v39  ;;  %v15052_v39 = vld [vmem:[#allocation6 + $0x108] sm:$0xff]  }
  0xcb   :  { %753 = vmatpush1.bf16.msra.mxu1 %v14988_v44  ;;  %v15038_v44 = vld [vmem:[#allocation6 + $0xe8] sm:$0xff]  }
  0xcc   :  { %754 = vmatprep.subr.bf16.mxu1 %v14993_v45  ;;  %v15040_v45 = vld [vmem:[#allocation6 + $0xa8] sm:$0xff]  }
  0xcd   :  { %712 = vmatpush1.bf16.msra.mxu0 %v14967_v42  ;;  %v15054_v42 = vld [vmem:[#allocation6 + $0x110] sm:$0xff]  }
  0xce   :  { %713 = vmatprep.subr.bf16.mxu0 %v14972_v43  ;;  %v15036_v43 = vld [vmem:[#allocation6 + $0xa0] sm:$0xff]  }
  0xcf   :  { %755 = vmatpush1.bf16.msra.mxu1 %v14991_v48  ;;  %v15046_v48 = vld [vmem:[#allocation6 + $0xf8] sm:$0xff]  }
  0xd0   :  { %756 = vmatprep.subr.bf16.mxu1 %v14996_v49  ;;  %v15048_v49 = vld [vmem:[#allocation6 + $0xb8] sm:$0xff]  }
  0xd1   :  { %714 = vmatpush1.bf16.msra.mxu0 %v14970_v46  ;;  %v15042_v46 = vld [vmem:[#allocation6 + $0xf0] sm:$0xff]  }
  0xd2   :  { %715 = vmatprep.subr.bf16.mxu0 %v14975_v47  ;;  %v15044_v47 = vld [vmem:[#allocation6 + $0xb0] sm:$0xff]  }
  0xd3   :  { %757 = vmatpush1.bf16.msra.mxu1 %v14994_v52  ;;  %v15057_v52 = vld [vmem:[#allocation6 + $0x160] sm:$0xff]  }
  0xd4   :  { %758 = vmatprep.subr.bf16.mxu1 %v14999_v53  ;;  %v15058_v53 = vld [vmem:[#allocation6 + $0x120] sm:$0xff]  }
  0xd5   :  { %716 = vmatpush1.bf16.msra.mxu0 %v14973_v50  ;;  %v15055_v50 = vld [vmem:[#allocation6 + $0x158] sm:$0xff]  }
  0xd6   :  { %717 = vmatprep.subr.bf16.mxu0 %v14978_v51  ;;  %v15056_v51 = vld [vmem:[#allocation6 + $0x118] sm:$0xff]  }
  0xd7   :  { %759 = vmatpush1.bf16.msra.mxu1 %v14997_v56  ;;  %v15061_v56 = vld [vmem:[#allocation6 + $0x170] sm:$0xff]  }
  0xd8   :  { %760 = vmatprep.subr.bf16.mxu1 %v15002_v57  ;;  %v15062_v57 = vld [vmem:[#allocation6 + $0x130] sm:$0xff]  }
  0xd9   :  { %718 = vmatpush1.bf16.msra.mxu0 %v14976_v54  ;;  %v15059_v54 = vld [vmem:[#allocation6 + $0x168] sm:$0xff]  }
  0xda   :  { %719 = vmatprep.subr.bf16.mxu0 %v14981_v55  ;;  %v15060_v55 = vld [vmem:[#allocation6 + $0x128] sm:$0xff]  }
  0xdb   :  { %761 = vmatpush1.bf16.msra.mxu1 %v15000_v60  ;;  %v15065_v60 = vld [vmem:[#allocation6 + $0x1c0] sm:$0xff]  }
  0xdc   :  { %762 = vmatprep.subr.bf16.mxu1 %v15005_v61  ;;  %v15066_v61 = vld [vmem:[#allocation6 + $0x180] sm:$0xff]  }
  0xdd   :  { %720 = vmatpush1.bf16.msra.mxu0 %v14979_v58  ;;  %v15063_v58 = vld [vmem:[#allocation6 + $0x178] sm:$0xff]  }
  0xde   :  { %721 = vmatprep.subr.bf16.mxu0 %v14984_v59  ;;  %v15064_v59 = vld [vmem:[#allocation6 + $0x138] sm:$0xff]  }
  0xdf   :  { %763 = vmatpush1.bf16.msra.mxu1 %v15003_v63  ;;  %v15069_v63 = vld [vmem:[#allocation6 + $0x188] sm:$0xff]  }
  0xe0   :  { %764 = vmatprep.subr.bf16.mxu1 %v15008_v1  ;;  %v15070_v1 = vld [vmem:[#allocation6 + $0x1d0] sm:$0xff]  }
  0xe1   :  { %722 = vmatpush1.bf16.msra.mxu0 %v14982_v62  ;;  %v15068_v62 = vld [vmem:[#allocation6 + $0x1c8] sm:$0xff]  }
  0xe2   :  { %14602 = vmatprep.subr.bf16.mxu0 %v18878_v3 }
  0xe3   :  { %765 = vmatpush1.bf16.msra.mxu1 %v15006_v4  ;;  %v15072_v4 = vld [vmem:[#allocation6 + $0x1d8] sm:$0xff]  }
  0xe4   :  { %740 = vmatmul.mubr.bf16.vlgmr.msra.gmra.mrb[4].mxu0 %v16123_v30  ;;  %12618 = vmatprep.subr.bf16.mxu1 %v15017_v5  ;;  %v15073_v5 = vld [vmem:[#allocation6 + $0x198] sm:$0xff]  }
  0xe5   :  { %14603 = vmatpush3.bf16.msra.mxu0 %v15009_v2  ;;  %14618 = vmatprep.mubr.msk.bf16.mxu0 %vm15948_vm0, %v18878_v3  ;;  %v15071_v2 = vld [vmem:[#allocation6 + $0x190] sm:$0xff]  }
  0xe6   :  { %14604 = vmatprep.subr.bf16.mxu0 %v18878_v3  ;;  %783 = vmatmul.mubr.bf16.vlgmr.msra.gmra.mrb[4].mxu1 %v16123_v30 }
  0xe7   :  { %12619 = vmatpush3.bf16.msra.mxu1 %v15019_v7  ;;  %1876 = vmatprep.mubr.bf16.mxu1 %v18880_v0  ;;  %v15076_v7 = vld [vmem:[#allocation6 + $0x1a0] sm:$0xff]  }
  0xe8   :  { %12620 = vmatprep.subr.bf16.mxu1 %v15021_v8  ;;  %v15077_v8 = vld [vmem:[#allocation6 + $0x1e8] sm:$0xff]  }
  0xe9   :  { %14605 = vmatpush3.bf16.msra.mxu0 %v15010_v6  ;;  %v15075_v6 = vld [vmem:[#allocation6 + $0x1e0] sm:$0xff]  }
  0xea   :  { %14606 = vmatprep.subr.bf16.mxu0 %v18878_v3 }
  0xeb   :  { %12621 = vmatpush3.bf16.msra.mxu1 %v15023_v10  ;;  %v15079_v10 = vld [vmem:[#allocation6 + $0x1f0] sm:$0xff]  }
  0xec   :  { %12622 = vmatprep.subr.bf16.mxu1 %v15025_v11  ;;  %v15080_v11 = vld [vmem:[#allocation6 + $0x1b0] sm:$0xff]  }
  0xed   :  { %14607 = vmatpush3.bf16.msra.mxu0 %v15011_v9  ;;  %v15078_v9 = vld [vmem:[#allocation6 + $0x1a8] sm:$0xff]  }
  0xee   :  { %14608 = vmatprep.subr.bf16.mxu0 %v18878_v3 }
  0xef   :  { %12623 = vmatpush3.bf16.msra.mxu1 %v15027_v13  ;;  %v15083_v13 = vld [vmem:[#allocation6 + $0x1b8] sm:$0xff]  }
  0xf0   :  { %12624 = vmatprep.subr.bf16.mxu1 %v15029_v14  ;;  %v16155_v14 = vld [vmem:[#allocation8] ss:$0 sm:$0xff] }
  0xf1   :  { %14609 = vmatpush3.bf16.msra.mxu0 %v15012_v12  ;;  %v15082_v12 = vld [vmem:[#allocation6 + $0x1f8] sm:$0xff]  }
  0xf2   :  { %14610 = vmatprep.subr.bf16.mxu0 %v18878_v3 }
  0xf3   :  { %12625 = vmatpush3.bf16.msra.mxu1 %v15031_v16 }
  0xf4   :  { %12626 = vmatprep.subr.bf16.mxu1 %v15033_v17 }
  0xf5   :  { %14611 = vmatpush3.bf16.msra.mxu0 %v15013_v15  ;;  %v16157_v15 = vld [vmem:[#allocation9] ss:$0 sm:$0xff] }
  0xf6   :  { %14612 = vmatprep.subr.bf16.mxu0 %v18878_v3 }
  0xf7   :  { %12627 = vmatpush3.bf16.msra.mxu1 %v15035_v19 }
  0xf8   :  { %12628 = vmatprep.subr.bf16.mxu1 %v15037_v20 }
  0xf9   :  { %14613 = vmatpush3.bf16.msra.mxu0 %v15014_v18 }
  0xfa   :  { %14614 = vmatprep.subr.bf16.mxu0 %v18878_v3 }
  0xfb   :  { %12629 = vmatpush3.bf16.msra.mxu1 %v15039_v23 }
  0xfc   :  { %12630 = vmatprep.subr.bf16.mxu1 %v15041_v24 }
  0xfd   :  { %14615 = vmatpush3.bf16.msra.mxu0 %v15015_v21 }
  0xfe   :  { %14616 = vmatprep.subr.bf16.mxu0 %v18878_v3 }
  0xff   :  { %12631 = vmatpush3.bf16.msra.mxu1 %v15043_v26 }
 0x100   :  { %12632 = vmatprep.subr.bf16.mxu1 %v15045_v27 }
 0x101   :  { %14617 = vmatpush3.bf16.msra.mxu0 %v15016_v22 }
 0x102   :  { %12712 = vmatprep.subr.bf16.mxu0 %v15018_v25 }
 0x103   :  { %12633 = vmatpush3.bf16.msra.mxu1 %v15047_v31 }
 0x104   :  { %14619 = vmatmul.mubr.bf16.vlgmr.msra.gmra.mrb[8].mxu0 %v16123_v30  ;;  %12806 = vmatprep.subr.bf16.mxu1 %v15049_v32  ;;  %v15034_v30 = vld [vmem:[#allocation6 + $0xe0] sm:$0xff]  }
 0x105   :  { %12713 = vmatpush3.bf16.msra.mxu0 %v15020_v28  ;;  %2005 = vmatprep.mubr.bf16.mxu0 %v18880_v0 }
 0x106   :  { %12714 = vmatprep.subr.bf16.mxu0 %v15022_v29  ;;  %1877 = vmatmul.mubr.bf16.vlgmr.msra.gmra.mrb[8].mxu1 %v18880_v0 }
 0x107   :  { %12807 = vmatpush3.bf16.msra.mxu1 %v15050_v35  ;;  %1884 = vmatprep.mubr.bf16.mxu1 %v18880_v0 }
 0x108   :  { %12808 = vmatprep.subr.bf16.mxu1 %v15051_v36 }
 0x109   :  { %12715 = vmatpush3.bf16.msra.mxu0 %v15024_v33 }
 0x10a   :  { %12716 = vmatprep.subr.bf16.mxu0 %v15026_v34 }
 0x10b   :  { %12809 = vmatpush3.bf16.msra.mxu1 %v15052_v39 }
 0x10c   :  { %12810 = vmatprep.subr.bf16.mxu1 %v15053_v40 }
 0x10d   :  { %12717 = vmatpush3.bf16.msra.mxu0 %v15028_v37 }
 0x10e   :  { %12718 = vmatprep.subr.bf16.mxu0 %v15030_v38  ;;  %1885 = vmatmul.mubr.bf16.gmra.mrb[12].mxu1 %v18880_v0 }
 0x10f   :  { %1892 = vmatprep.mubr.bf16.mxu1 %v18880_v0  ;;  %12811 = vmatpush3.bf16.msra.mxu1 %v15054_v42 }
 0x110   :  { %12812 = vmatprep.subr.bf16.mxu1 %v15055_v50 }
 0x111   :  { %12719 = vmatpush3.bf16.msra.mxu0 %v15032_v41 }
 0x112   :  { %12720 = vmatprep.subr.bf16.mxu0 %v15034_v30 }
 0x113   :  { %12813 = vmatpush3.bf16.msra.mxu1 %v15056_v51 }
 0x114   :  { %12814 = vmatprep.subr.bf16.mxu1 %v15057_v52 }
 0x115   :  { %12721 = vmatpush3.bf16.msra.mxu0 %v15036_v43 }
 0x116   :  { %12722 = vmatprep.subr.bf16.mxu0 %v15038_v44  ;;  %1893 = vmatmul.mubr.bf16.gmra.mrb[16].mxu1 %v18880_v0 }
 0x117   :  { %1900 = vmatprep.mubr.bf16.mxu1 %v18880_v0  ;;  %12815 = vmatpush3.bf16.msra.mxu1 %v15058_v53 }
 0x118   :  { %12816 = vmatprep.subr.bf16.mxu1 %v15059_v54 }
 0x119   :  { %12723 = vmatpush3.bf16.msra.mxu0 %v15040_v45 }
 0x11a   :  { %12724 = vmatprep.subr.bf16.mxu0 %v15042_v46 }
 0x11b   :  { %12817 = vmatpush3.bf16.msra.mxu1 %v15060_v55 }
 0x11c   :  { %12818 = vmatprep.subr.bf16.mxu1 %v15061_v56 }
 0x11d   :  { %12725 = vmatpush3.bf16.msra.mxu0 %v15044_v47 }
 0x11e   :  { %12726 = vmatprep.subr.bf16.mxu0 %v15046_v48  ;;  %1901 = vmatmul.mubr.bf16.gmra.mrb[20].mxu1 %v18880_v0 }
 0x11f   :  { %1906 = vmatprep.mubr.bf16.mxu1 %v18880_v0  ;;  %12819 = vmatpush3.bf16.msra.mxu1 %v15062_v57 }
 0x120   :  { %12820 = vmatprep.subr.bf16.mxu1 %v15063_v58 }
 0x121   :  { %12727 = vmatpush3.bf16.msra.mxu0 %v15048_v49 }
 0x122   :  { %12900 = vmatprep.subr.bf16.mxu0 %v15065_v60 }
 0x123   :  { %12821 = vmatpush3.bf16.msra.mxu1 %v15064_v59 }
 0x124   :  { %2006 = vmatmul.mubr.bf16.vlgmr.msra.gmra.mrb[12].mxu0 %v18880_v0  ;;  %14622 = vmatprep.subr.bf16.mxu1 %v18878_v3 }
 0x125   :  { %12901 = vmatpush3.bf16.msra.mxu0 %v15066_v61 }
 0x126   :  { %1907 = vmatmul.mubr.bf16.gmra.mrb[24].mxu1 %v18880_v0  ;;  %12902 = vmatprep.subr.bf16.mxu0 %v15068_v62 }
 0x129   :  { %12903 = vmatpush3.bf16.msra.mxu0 %v15069_v63 }
 0x12a   :  { %12904 = vmatprep.subr.bf16.mxu0 %v15070_v1 }
 0x12d   :  { %12905 = vmatpush3.bf16.msra.mxu0 %v15071_v2 }
 0x12e   :  { %12906 = vmatprep.subr.bf16.mxu0 %v15072_v4 }
 0x131   :  { %12907 = vmatpush3.bf16.msra.mxu0 %v15073_v5 }
 0x132   :  { %12908 = vmatprep.subr.bf16.mxu0 %v15075_v6 }
 0x135   :  { %12909 = vmatpush3.bf16.msra.mxu0 %v15076_v7 }
 0x136   :  { %12910 = vmatprep.subr.bf16.mxu0 %v15077_v8 }
 0x139   :  { %12911 = vmatpush3.bf16.msra.mxu0 %v15078_v9 }
 0x13a   :  { %12912 = vmatprep.subr.bf16.mxu0 %v15079_v10 }
 0x13d   :  { %12913 = vmatpush3.bf16.msra.mxu0 %v15080_v11 }
 0x13e   :  { %12914 = vmatprep.subr.bf16.mxu0 %v15082_v12 }
 0x141   :  { %12915 = vmatpush3.bf16.msra.mxu0 %v15083_v13 }
 0x197   :  { %v655_v16 = vpop.f32.mrb[0].mxu0 }
 0x198   :  { %v841_v17 = vmul.f32 %v16155_v14, %v655_v16  ;;  %v657_v18 = vpop.f32.mrb[1].mxu0 }
 0x199   :  { %v853_v19 = vmul.f32 %v16155_v14, %v657_v18  ;;  %v659_v20 = vpop.f32.mrb[2].mxu0  ;;  %v698_v31 = vpop.f32.mrb[0].mxu1 }
 0x19a   :  { %v16162_v21 = vadd.f32 %v16157_v15, %v841_v17  ;;  %v842_v22 = vmul.f32 %v16155_v14, %v659_v20  ;;  %v661_v23 = vpop.f32.mrb[3].mxu0  ;;  %v861_v33 = vmul.f32 %v16155_v14, %v698_v31  ;;  %v700_v34 = vpop.f32.mrb[1].mxu1 }
 0x19b   :  { %v16166_v24 = vadd.f32 %v16157_v15, %v853_v19  ;;  %v854_v25 = vmul.f32 %v16155_v14, %v661_v23  ;;  %v702_v36 = vpop.f32.mrb[2].mxu1  ;;  %v869_v45 = vmul.f32 %v16155_v14, %v700_v34 }
 0x19c   :  { %v849_v26 = vmax.f32 %v16162_v21, 0.0  ;;  %v16171_v27 = vadd.f32 %v16157_v15, %v842_v22  ;;  %v16187_v38 = vadd.f32 %v16157_v15, %v861_v33  ;;  %v862_v39 = vmul.f32 %v16155_v14, %v702_v36  ;;  %v704_v40 = vpop.f32.mrb[3].mxu1 }
 0x19d   :  { %v857_v28 = vmax.f32 %v16166_v24, 0.0  ;;  %v16175_v29 = vadd.f32 %v16157_v15, %v854_v25  ;;  %v870_v46 = vmul.f32 %v16155_v14, %v704_v40  ;;  %v16224_v49 = vadd.f32 %v16157_v15, %v869_v45  ;;  %v15067_v25 = vld [vmem:[#allocation6 + $0x200] sm:$0xff]  }
 0x19e   :  { %v850_v32 = vmax.f32 %v16171_v27, 0.0  ;;  %v16199_v30 = vadd.f32 %v16157_v15, %v862_v39  ;;  %v865_v42 = vmax.f32 %v16187_v38, 0.0 }
 0x19f   :  { %v858_v35 = vmax.f32 %v16175_v29, 0.0  ;;  %v16227_v51 = vadd.f32 %v16157_v15, %v870_v46  ;;  %v18855_v55 = vmax.f32 %v16224_v49, 0.0 }
 0x1a0   :  { %v16184_v37 = vpack.c.bf16 %v850_v32, %v849_v26  ;;  %v866_v43 = vmax.f32 %v16199_v30, 0.0 }
 0x1a1   :  { %v16194_v41 = vpack.c.bf16 %v858_v35, %v857_v28  ;;  %v18854_v59 = vmax.f32 %v16227_v51, 0.0 }
 0x1a2   :  { %1912 = vmatprep.mubr.bf16.mxu1 %v16184_v37  ;;  %2013 = vmatprep.mubr.bf16.mxu0 %v16184_v37  ;;  %v16211_v44 = vpack.c.bf16 %v866_v43, %v865_v42 }
 0x1a3   :  { %1913 = vmatmul.mubr.bf16.gmra.mrb[28].mxu1 %v18880_v0  ;;  %2014 = vmatmul.mubr.bf16.gmra.mrb[16].mxu0 %v18880_v0  ;;  %v16255_v5 = vpack.c.bf16 %v18854_v59, %v18855_v55 }
 0x1a4   :  { %1920 = vmatprep.mubr.bf16.mxu1 %v16194_v41  ;;  %2021 = vmatprep.mubr.bf16.mxu0 %v16194_v41 }
 0x1ab   :  { %1921 = vmatmul.mubr.bf16.gmra.mrb[32].mxu1 %v16184_v37  ;;  %2022 = vmatmul.mubr.bf16.gmra.mrb[20].mxu0 %v18880_v0 }
 0x1ac   :  { %1928 = vmatprep.mubr.bf16.mxu1 %v16211_v44  ;;  %2029 = vmatprep.mubr.bf16.mxu0 %v16211_v44 }
 0x1b3   :  { %1929 = vmatmul.mubr.bf16.gmra.mrb[36].mxu1 %v16194_v41  ;;  %2030 = vmatmul.mubr.bf16.gmra.mrb[24].mxu0 %v18880_v0 }
 0x1b4   :  { %1936 = vmatprep.mubr.bf16.mxu1 %v18880_v0  ;;  %2035 = vmatprep.mubr.bf16.mxu0 %v18880_v0 }
 0x1b7   :  { %v741_v47 = vpop.f32.mrb[4].mxu0 }
 0x1b8   :  { %v743_v48 = vpop.f32.mrb[5].mxu0  ;;  %v877_v53 = vmul.f32 %v16155_v14, %v741_v47 }
 0x1b9   :  { %v745_v50 = vpop.f32.mrb[6].mxu0  ;;  %v885_v56 = vmul.f32 %v16155_v14, %v743_v48  ;;  %v784_v58 = vpop.f32.mrb[4].mxu1  ;;  %v15074_v48 = vld [vmem:[#allocation6 + $0x208] sm:$0xff]  }
 0x1ba   :  { %v747_v52 = vpop.f32.mrb[7].mxu0  ;;  %v878_v54 = vmul.f32 %v16155_v14, %v745_v50  ;;  %v786_v60 = vpop.f32.mrb[5].mxu1  ;;  %v16240_v62 = vadd.f32 %v16157_v15, %v877_v53  ;;  %v893_v12 = vmul.f32 %v16155_v14, %v784_v58 }
 0x1bb   :  { %1937 = vmatmul.mubr.bf16.gmra.mrb[40].mxu1 %v16211_v44  ;;  %2036 = vmatmul.mubr.bf16.gmra.mrb[28].mxu0 %v16184_v37  ;;  %v886_v57 = vmul.f32 %v16155_v14, %v747_v52  ;;  %v788_v61 = vpop.f32.mrb[6].mxu1  ;;  %v16246_v2 = vadd.f32 %v16157_v15, %v885_v56  ;;  %v901_v34 = vmul.f32 %v16155_v14, %v786_v60  ;;  %v15081_v56 = vld [vmem:[#allocation6 + $0x210] sm:$0xff]  }
 0x1bc   :  { %1942 = vmatprep.mubr.bf16.mxu1 %v18880_v0  ;;  %2041 = vmatprep.mubr.bf16.mxu0 %v18880_v0  ;;  %v16243_v63 = vadd.f32 %v16157_v15, %v878_v54  ;;  %v790_v1 = vpop.f32.mrb[7].mxu1  ;;  %v18853_v6 = vmax.f32 %v16240_v62, 0.0  ;;  %v894_v16 = vmul.f32 %v16155_v14, %v788_v61  ;;  %v16294_v20 = vadd.f32 %v16157_v15, %v893_v12 }
 0x1bd   :  { %v16249_v4 = vadd.f32 %v16157_v15, %v886_v57  ;;  %v18851_v8 = vmax.f32 %v16246_v2, 0.0  ;;  %v902_v45 = vmul.f32 %v16155_v14, %v790_v1  ;;  %v16312_v50 = vadd.f32 %v16157_v15, %v901_v34  ;;  %v15084_v1 = vld [vmem:[#allocation6 + $0x218] sm:$0xff]   ;;  %v15086_v34 = vld [vmem:[#allocation6 + $0x228] sm:$0xff]  }
 0x1be   :  { %v18852_v7 = vmax.f32 %v16243_v63, 0.0  ;;  %v16299_v22 = vadd.f32 %v16157_v15, %v894_v16  ;;  %v18849_v33 = vmax.f32 %v16294_v20, 0.0 }
 0x1bf   :  { %v18850_v9 = vmax.f32 %v16249_v4, 0.0  ;;  %v16316_v52 = vadd.f32 %v16157_v15, %v902_v45  ;;  %v18847_v54 = vmax.f32 %v16312_v50, 0.0 }
 0x1c0   :  { %v16269_v10 = vpack.c.bf16 %v18852_v7, %v18853_v6  ;;  %v18848_v40 = vmax.f32 %v16299_v22, 0.0 }
 0x1c1   :  { %v16279_v11 = vpack.c.bf16 %v18850_v9, %v18851_v8  ;;  %v18846_v15 = vmax.f32 %v16316_v52, 0.0  ;;  %v15130_v8 = vld [vmem:[#allocation6 + $0x360] sm:$0xff]  }
 0x1c2   :  { %v16327_v58 = vpack.c.bf16 %v18848_v40, %v18849_v33 }
 0x1c3   :  { %1943 = vmatmul.mubr.bf16.gmra.mrb[44].mxu1 %v18880_v0  ;;  %2042 = vmatmul.mubr.bf16.gmra.mrb[32].mxu0 %v16194_v41 }
 0x1c4   :  { %1948 = vmatprep.mubr.bf16.mxu1 %v16255_v5  ;;  %2049 = vmatprep.mubr.bf16.mxu0 %v16255_v5 }
 0x1cb   :  { %1949 = vmatmul.mubr.bf16.gmra.mrb[48].mxu1 %v18880_v0  ;;  %2050 = vmatmul.mubr.bf16.gmra.mrb[36].mxu0 %v16211_v44 }
 0x1cc   :  { %1956 = vmatprep.mubr.bf16.mxu1 %v16269_v10  ;;  %2057 = vmatprep.mubr.bf16.mxu0 %v16269_v10 }
 0x1d3   :  { %1957 = vmatmul.mubr.bf16.gmra.mrb[52].mxu1 %v16255_v5  ;;  %2058 = vmatmul.mubr.bf16.gmra.mrb[40].mxu0 %v18880_v0 }
 0x1d4   :  { %1964 = vmatprep.mubr.bf16.mxu1 %v16279_v11  ;;  %2065 = vmatprep.mubr.bf16.mxu0 %v16279_v11 }
 0x1d7   :  { %v16286_v13 = vpop.f32.mrb[8].mxu0 }
 0x1d8   :  { %v14620_v17 = vpop.f32.mrb[9].mxu0 }
 0x1d9   :  { %v16289_v18 = vpop.f32.mrb[10].mxu0  ;;  %v12634_v23 = vpop.f32.mrb[8].mxu1 }
 0x1da   :  { %v14621_v19 = vpop.f32.mrb[11].mxu0  ;;  %v12635_v31 = vpop.f32.mrb[9].mxu1 }
 0x1db   :  { %1965 = vmatmul.mubr.bf16.gmra.mrb[56].mxu1 %v16269_v10  ;;  %2066 = vmatmul.mubr.bf16.gmra.mrb[44].mxu0 %v18880_v0  ;;  %v16303_v36 = vadd.f32 %v12635_v31, %v12634_v23  ;;  %v12637_v39 = vpop.f32.mrb[10].mxu1  ;;  %v16344_v23 = vpack.c.bf16 %v18846_v15, %v18847_v54 }
 0x1dc   :  { %2134 = vmatprep.mubr.bf16.mxu1 %v16194_v41  ;;  %2071 = vmatprep.mubr.bf16.mxu0 %v18880_v0  ;;  %v12638_v46 = vpop.f32.mrb[11].mxu1 }
 0x1dd   :  { %v16307_v47 = vadd.f32 %v12638_v46, %v12637_v39 }
 0x1e1   :  { %v12640_v14 = vpop.f32.mrb[12].mxu1 }
 0x1e2   :  { %v12641_v53 = vpop.f32.mrb[13].mxu1 }
 0x1e3   :  { %2072 = vmatmul.mubr.bf16.gmra.mrb[48].mxu0 %v16255_v5  ;;  %2135 = vmatmul.mubr.bf16.vlgmr.msra.gmra.mrb[60].mxu1 %v16184_v37  ;;  %v16321_v57 = vadd.f32 %v12641_v53, %v12640_v14  ;;  %v12643_v37 = vpop.f32.mrb[14].mxu1 }
 0x1e4   :  { %14623 = vmatpush3.bf16.msra.mxu1 %v15067_v25  ;;  %2142 = vmatprep.mubr.bf16.mxu1 %v16211_v44  ;;  %v12644_v60 = vpop.f32.mrb[15].mxu1 }
 0x1e5   :  { %2077 = vmatprep.mubr.bf16.mxu0 %v18880_v0  ;;  %14624 = vmatprep.subr.bf16.mxu1 %v18878_v3  ;;  %v16331_v61 = vadd.f32 %v12644_v60, %v12643_v37 }
 0x1e8   :  { %14625 = vmatpush3.bf16.msra.mxu1 %v15074_v48 }
 0x1e9   :  { %14626 = vmatprep.subr.bf16.mxu1 %v18878_v3  ;;  %v12646_v12 = vpop.f32.mrb[16].mxu1 }
 0x1ea   :  { %v12647_v16 = vpop.f32.mrb[17].mxu1 }
 0x1eb   :  { %2078 = vmatmul.mubr.bf16.gmra.mrb[52].mxu0 %v16269_v10  ;;  %2143 = vmatmul.mubr.bf16.gmra.mrb[64].mxu1 %v16194_v41  ;;  %v16338_v17 = vadd.f32 %v12647_v16, %v12646_v12  ;;  %v12649_v19 = vpop.f32.mrb[18].mxu1  ;;  %v15085_v41 = vld [vmem:[#allocation6 + $0x220] sm:$0xff]   ;;  %v15088_v16 = vld [vmem:[#allocation6 + $0x238] sm:$0xff]  }
 0x1ec   :  { %2085 = vmatprep.mubr.bf16.mxu0 %v16327_v58  ;;  %2150 = vmatprep.mubr.bf16.mxu1 %v18880_v0  ;;  %v12650_v25 = vpop.f32.mrb[19].mxu1 }
 0x1ed   :  { %14627 = vmatpush3.bf16.msra.mxu1 %v15081_v56  ;;  %v16346_v31 = vadd.f32 %v12650_v25, %v12649_v19  ;;  %v15087_v56 = vld [vmem:[#allocation6 + $0x230] sm:$0xff]  }
 0x1ee   :  { %14628 = vmatprep.subr.bf16.mxu1 %v18878_v3 }
 0x1f1   :  { %14629 = vmatpush3.bf16.msra.mxu1 %v15084_v1  ;;  %v12652_v39 = vpop.f32.mrb[20].mxu1 }
 0x1f2   :  { %14630 = vmatprep.subr.bf16.mxu1 %v18878_v3  ;;  %v12653_v45 = vpop.f32.mrb[21].mxu1 }
 0x1f3   :  { %2086 = vmatmul.mubr.bf16.gmra.mrb[56].mxu0 %v16279_v11  ;;  %2151 = vmatmul.mubr.bf16.gmra.mrb[68].mxu1 %v16211_v44  ;;  %v12655_v48 = vpop.f32.mrb[22].mxu1 }
 0x1f4   :  { %2093 = vmatprep.mubr.bf16.mxu0 %v16344_v23  ;;  %2158 = vmatprep.mubr.bf16.mxu1 %v18880_v0  ;;  %v12656_v53 = vpop.f32.mrb[23].mxu1  ;;  %v15654_v48 = vld [vmem:[#allocation9] ss:$0 sm:$0xff] }
 0x1f5   :  { %14631 = vmatpush3.bf16.msra.mxu1 %v15085_v41 }
 0x1f6   :  { %14632 = vmatprep.subr.bf16.mxu1 %v18878_v3 }
 0x1f7   :  { %v12728_v46 = vpop.f32.mrb[12].mxu0 }
 0x1f8   :  { %v12729_v14 = vpop.f32.mrb[13].mxu0 }
 0x1f9   :  { %14633 = vmatpush3.bf16.msra.mxu1 %v15086_v34  ;;  %v12730_v37 = vadd.f32 %v12729_v14, %v12728_v46  ;;  %v12731_v60 = vpop.f32.mrb[14].mxu0  ;;  %v12658_v41 = vpop.f32.mrb[24].mxu1 }
 0x1fa   :  { %14634 = vmatprep.subr.bf16.mxu1 %v18878_v3  ;;  %v12732_v44 = vpop.f32.mrb[15].mxu0  ;;  %v12659_v25 = vpop.f32.mrb[25].mxu1  ;;  %v15096_v41 = vld [vmem:[#allocation6 + $0x258] sm:$0xff]  }
 0x1fb   :  { %2094 = vmatmul.mubr.bf16.gmra.mrb[60].mxu0 %v18880_v0  ;;  %2159 = vmatmul.mubr.bf16.gmra.mrb[72].mxu1 %v18880_v0  ;;  %v16358_v1 = vadd.f32 %v12730_v37, %v16303_v36  ;;  %v12733_v12 = vadd.f32 %v12732_v44, %v12731_v60  ;;  %v12661_v34 = vpop.f32.mrb[26].mxu1  ;;  %v15090_v36 = vld [vmem:[#allocation6 + $0x240] sm:$0xff]   ;;  %v15091_v37 = vld [vmem:[#allocation6 + $0x288] sm:$0xff]   ;;  %v15093_v44 = vld [vmem:[#allocation6 + $0x290] sm:$0xff]  }
 0x1fc   :  { %2164 = vmatprep.mubr.bf16.mxu1 %v16255_v5  ;;  %2263 = vmatprep.mubr.bf16.mxu0 %v16255_v5  ;;  %v12662_v39 = vpop.f32.mrb[27].mxu1  ;;  %v15092_v60 = vld [vmem:[#allocation6 + $0x248] sm:$0xff]   ;;  %v15097_v25 = vld [vmem:[#allocation6 + $0x2a0] sm:$0xff]  }
 0x1fd   :  { %14635 = vmatpush3.bf16.msra.mxu1 %v15087_v56  ;;  %v16363_v19 = vadd.f32 %v12733_v12, %v16307_v47  ;;  %v15653_v47 = vld [vmem:[#allocation8] ss:$0 sm:$0xff]  ;;  %v15094_v12 = vld [vmem:[#allocation6 + $0x250] sm:$0xff]   ;;  %v15099_v39 = vld [vmem:[#allocation6 + $0x2a8] sm:$0xff]  }
 0x1fe   :  { %14636 = vmatprep.subr.bf16.mxu1 %v18878_v3  ;;  %v909_v45 = vmul.f32 %v15653_v47, %v16286_v13  ;;  %v910_v46 = vmul.f32 %v15653_v47, %v16289_v18  ;;  %v15098_v34 = vld [vmem:[#allocation6 + $0x260] sm:$0xff]   ;;  %v15104_v47 = vld [vmem:[#allocation6 + $0x2c8] sm:$0xff]  }
 0x200   :  { %v16388_v14 = vadd.f32 %v15654_v48, %v909_v45  ;;  %v16390_v53 = vadd.f32 %v15654_v48, %v910_v46  ;;  %v15106_v45 = vld [vmem:[#allocation6 + $0x310] sm:$0xff]   ;;  %v15109_v48 = vld [vmem:[#allocation6 + $0x318] sm:$0xff]  }
 0x201   :  { %14637 = vmatpush3.bf16.msra.mxu1 %v15088_v16  ;;  %v15095_v16 = vld [vmem:[#allocation6 + $0x298] sm:$0xff]   ;;  %v15108_v46 = vld [vmem:[#allocation6 + $0x2d0] sm:$0xff]  }
 0x202   :  { %v18844_v56 = vmax.f32 %v16388_v14, 0.0  ;;  %v18845_v13 = vmax.f32 %v16390_v53, 0.0 }
 0x203   :  { %2165 = vmatmul.mubr.bf16.gmra.mrb[76].mxu1 %v18880_v0  ;;  %2264 = vmatmul.mubr.bf16.vlgmr.msra.gmra.mrb[64].mxu0 %v18880_v0 }
 0x204   :  { %2170 = vmatprep.mubr.bf16.mxu1 %v16269_v10  ;;  %2271 = vmatprep.mubr.bf16.mxu0 %v16269_v10  ;;  %v16402_v18 = vpack.c.bf16 %v18845_v13, %v18844_v56 }
 0x20b   :  { %2171 = vmatmul.mubr.bf16.gmra.mrb[80].mxu1 %v16255_v5  ;;  %2272 = vmatmul.mubr.bf16.gmra.mrb[68].mxu0 %v16255_v5  ;;  %v15089_v5 = vld [vmem:[#allocation6 + $0x280] sm:$0xff]  }
 0x20c   :  { %2178 = vmatprep.mubr.bf16.mxu1 %v16279_v11  ;;  %2279 = vmatprep.mubr.bf16.mxu0 %v16279_v11 }
 0x20d   :  { %13015 = vmatprep.subr.bf16.mxu0 %v15089_v5  ;;  %v15102_v5 = vld [vmem:[#allocation6 + $0x2c0] sm:$0xff]  }
 0x20e   :  { %13016 = vmatpush3.bf16.msra.mxu0 %v15090_v36  ;;  %v15103_v36 = vld [vmem:[#allocation6 + $0x308] sm:$0xff]  }
 0x20f   :  { %13017 = vmatprep.subr.bf16.mxu0 %v15091_v37  ;;  %v15105_v37 = vld [vmem:[#allocation6 + $0x2b0] sm:$0xff]  }
 0x212   :  { %13018 = vmatpush3.bf16.msra.mxu0 %v15092_v60  ;;  %v15107_v60 = vld [vmem:[#allocation6 + $0x270] sm:$0xff]  }
 0x213   :  { %2179 = vmatmul.mubr.bf16.gmra.mrb[84].mxu1 %v16269_v10  ;;  %2280 = vmatmul.mubr.bf16.gmra.mrb[72].mxu0 %v16269_v10 }
 0x214   :  { %2186 = vmatprep.mubr.bf16.mxu1 %v18880_v0  ;;  %2287 = vmatprep.mubr.bf16.mxu0 %v18880_v0 }
 0x215   :  { %13019 = vmatprep.subr.bf16.mxu0 %v15093_v44  ;;  %v15110_v44 = vld [vmem:[#allocation6 + $0x2d8] sm:$0xff]  }
 0x216   :  { %13020 = vmatpush3.bf16.msra.mxu0 %v15094_v12  ;;  %v15111_v12 = vld [vmem:[#allocation6 + $0x320] sm:$0xff]  }
 0x217   :  { %13021 = vmatprep.subr.bf16.mxu0 %v15095_v16  ;;  %v15112_v16 = vld [vmem:[#allocation6 + $0x2e0] sm:$0xff]  }
 0x21a   :  { %13022 = vmatpush3.bf16.msra.mxu0 %v15096_v41  ;;  %v15113_v41 = vld [vmem:[#allocation6 + $0x328] sm:$0xff]  }
 0x21b   :  { %2187 = vmatmul.mubr.bf16.gmra.mrb[88].mxu1 %v16279_v11  ;;  %2288 = vmatmul.mubr.bf16.gmra.mrb[76].mxu0 %v16279_v11 }
 0x21c   :  { %2194 = vmatprep.mubr.bf16.mxu1 %v18880_v0  ;;  %2293 = vmatprep.mubr.bf16.mxu0 %v18880_v0 }
 0x21d   :  { %13023 = vmatprep.subr.bf16.mxu0 %v15097_v25 }
 0x21e   :  { %13024 = vmatpush3.bf16.msra.mxu0 %v15098_v34 }
 0x21f   :  { %13025 = vmatprep.subr.bf16.mxu0 %v15099_v39  ;;  %v15114_v39 = vld [vmem:[#allocation6 + $0x2b8] sm:$0xff]  }
 0x223   :  { %2195 = vmatmul.mubr.bf16.gmra.mrb[92].mxu1 %v18880_v0  ;;  %2294 = vmatmul.mubr.bf16.gmra.mrb[80].mxu0 %v18880_v0 }
 0x224   :  { %2200 = vmatprep.mubr.bf16.mxu1 %v16327_v58  ;;  %2299 = vmatprep.mubr.bf16.mxu0 %v16327_v58 }
 0x22b   :  { %2201 = vmatmul.mubr.bf16.gmra.mrb[96].mxu1 %v18880_v0  ;;  %2300 = vmatmul.mubr.bf16.gmra.mrb[84].mxu0 %v18880_v0 }
 0x22c   :  { %2206 = vmatprep.mubr.bf16.mxu1 %v16344_v23  ;;  %2307 = vmatprep.mubr.bf16.mxu0 %v16344_v23 }
 0x233   :  { %2207 = vmatmul.mubr.bf16.gmra.mrb[100].mxu1 %v16327_v58  ;;  %2308 = vmatmul.mubr.bf16.gmra.mrb[88].mxu0 %v16327_v58 }
 0x234   :  { %2214 = vmatprep.mubr.bf16.mxu1 %v16402_v18  ;;  %2315 = vmatprep.mubr.bf16.mxu0 %v16402_v18 }
 0x23b   :  { %2215 = vmatmul.mubr.bf16.gmra.mrb[104].mxu1 %v16344_v23  ;;  %2316 = vmatmul.mubr.bf16.gmra.mrb[92].mxu0 %v16344_v23 }
 0x23c   :  { %2222 = vmatprep.mubr.bf16.mxu1 %v18880_v0  ;;  %2323 = vmatprep.mubr.bf16.mxu0 %v18880_v0 }
 0x243   :  { %2223 = vmatmul.mubr.bf16.gmra.mrb[108].mxu1 %v16402_v18  ;;  %2324 = vmatmul.mubr.bf16.gmra.mrb[96].mxu0 %v16402_v18 }
 0x244   :  { %2329 = vmatprep.mubr.bf16.mxu0 %v18880_v0  ;;  %14638 = vmatprep.mubr.msk.bf16.mxu1 %vm15948_vm0, %v18878_v3 }
 0x24b   :  { %2330 = vmatmul.mubr.bf16.gmra.mrb[100].mxu0 %v18880_v0  ;;  %14639 = vmatmul.mubr.bf16.vlgmr.msra.gmra.mrb[112].mxu1 %v16269_v10  ;;  %v15100_v10 = vld [vmem:[#allocation6 + $0x268] sm:$0xff]  }
 0x24c   :  { %2335 = vmatprep.mubr.bf16.mxu0 %v18880_v0  ;;  %14642 = vmatprep.mubr.msk.bf16.mxu1 %vm15948_vm0, %v18878_v3 }
 0x24d   :  { %13026 = vmatpush3.bf16.msra.mxu0 %v15100_v10 }
 0x24e   :  { %13027 = vmatprep.subr.bf16.mxu0 %v15105_v37 }
 0x251   :  { %13028 = vmatpush3.bf16.msra.mxu0 %v15107_v60 }
 0x252   :  { %13029 = vmatprep.subr.bf16.mxu0 %v15114_v39 }
 0x253   :  { %2336 = vmatmul.mubr.bf16.gmra.mrb[104].mxu0 %v18880_v0  ;;  %14643 = vmatmul.mubr.bf16.gmra.mrb[116].mxu1 %v16279_v11  ;;  %v15101_v11 = vld [vmem:[#allocation6 + $0x300] sm:$0xff]  }
 0x254   :  { %2343 = vmatprep.mubr.bf16.mxu0 %v18880_v0  ;;  %14646 = vmatprep.mubr.msk.bf16.mxu1 %vm15948_vm0, %v18878_v3 }
 0x255   :  { %13109 = vmatprep.subr.bf16.mxu1 %v15101_v11 }
 0x256   :  { %13110 = vmatpush3.bf16.msra.mxu1 %v15102_v5  ;;  %v15116_v5 = vld [vmem:[#allocation6 + $0x278] sm:$0xff]  }
 0x257   :  { %13111 = vmatprep.subr.bf16.mxu1 %v15103_v36  ;;  %v15117_v36 = vld [vmem:[#allocation6 + $0x330] sm:$0xff]   ;;  %13030 = vmatpush3.bf16.msra.mxu0 %v15116_v5 }
 0x25a   :  { %13112 = vmatpush3.bf16.msra.mxu1 %v15104_v47 }
 0x25b   :  { %2344 = vmatmul.mubr.bf16.gmra.mrb[108].mxu0 %v18880_v0  ;;  %14647 = vmatmul.mubr.bf16.gmra.mrb[120].mxu1 %v18880_v0 }
 0x25c   :  { %2351 = vmatprep.mubr.bf16.mxu0 %v18880_v0  ;;  %14650 = vmatprep.mubr.msk.bf16.mxu1 %vm15948_vm0, %v18878_v3 }
 0x25d   :  { %13113 = vmatprep.subr.bf16.mxu1 %v15106_v45 }
 0x25e   :  { %13114 = vmatpush3.bf16.msra.mxu1 %v15108_v46 }
 0x25f   :  { %13115 = vmatprep.subr.bf16.mxu1 %v15109_v48 }
 0x262   :  { %13116 = vmatpush3.bf16.msra.mxu1 %v15110_v44  ;;  %v15119_v44 = vld [vmem:[#allocation6 + $0x338] sm:$0xff]  }
 0x263   :  { %2352 = vmatmul.mubr.bf16.gmra.mrb[112].mxu0 %v18880_v0  ;;  %14651 = vmatmul.mubr.bf16.gmra.mrb[124].mxu1 %v18880_v0 }
 0x264   :  { %14654 = vmatprep.mubr.msk.bf16.mxu1 %vm15948_vm0, %v18878_v3  ;;  %3526 = vmatprep.mubr.bf16.mxu0 %v18880_v0 }
 0x265   :  { %13117 = vmatprep.subr.bf16.mxu1 %v15111_v12 }
 0x266   :  { %13118 = vmatpush3.bf16.msra.mxu1 %v15112_v16 }
 0x267   :  { %13119 = vmatprep.subr.bf16.mxu1 %v15113_v41 }
 0x26b   :  { %14655 = vmatmul.mubr.bf16.gmra.mrb[128].mxu1 %v16327_v58  ;;  %v15115_v58 = vld [vmem:[#allocation6 + $0x2e8] sm:$0xff]   ;;  %3527 = vmatmul.mubr.bf16.vlgmr.msra.gmra.mrb[116].mxu0 %v18880_v0 }
 0x26c   :  { %14658 = vmatprep.mubr.msk.bf16.mxu1 %vm15948_vm0, %v18878_v3  ;;  %13120 = vmatpush3.bf16.msra.mxu1 %v15115_v58 }
 0x26d   :  { %13121 = vmatprep.subr.bf16.mxu1 %v15117_v36  ;;  %3534 = vmatprep.mubr.bf16.mxu0 %v18880_v0 }
 0x273   :  { %14659 = vmatmul.mubr.bf16.gmra.mrb[132].mxu1 %v16344_v23  ;;  %v15118_v23 = vld [vmem:[#allocation6 + $0x2f0] sm:$0xff]   ;;  %3535 = vmatmul.mubr.bf16.gmra.mrb[120].mxu0 %v18880_v0 }
 0x274   :  { %14662 = vmatprep.mubr.msk.bf16.mxu1 %vm15948_vm0, %v18878_v3  ;;  %13122 = vmatpush3.bf16.msra.mxu1 %v15118_v23 }
 0x275   :  { %13123 = vmatprep.subr.bf16.mxu1 %v15119_v44  ;;  %3542 = vmatprep.mubr.bf16.mxu0 %v18880_v0 }
 0x276   :  { %v12664_v25 = vpop.f32.mrb[28].mxu1  ;;  %v12734_v34 = vpop.f32.mrb[16].mxu0 }
 0x277   :  { %v12665_v10 = vpop.f32.mrb[29].mxu1  ;;  %v12735_v11 = vpop.f32.mrb[17].mxu0 }
 0x278   :  { %v16443_v47 = vadd.f32 %v12665_v10, %v12664_v25  ;;  %v12736_v45 = vadd.f32 %v12735_v11, %v12734_v34  ;;  %v12667_v46 = vpop.f32.mrb[30].mxu1  ;;  %v12737_v48 = vpop.f32.mrb[18].mxu0  ;;  %v15120_v25 = vld [vmem:[#allocation6 + $0x2f8] sm:$0xff]  }
 0x279   :  { %v12668_v37 = vpop.f32.mrb[31].mxu1  ;;  %v12738_v60 = vpop.f32.mrb[19].mxu0  ;;  %13124 = vmatpush3.bf16.msra.mxu1 %v15120_v25 }
 0x27a   :  { %v16446_v12 = vadd.f32 %v12736_v45, %v16321_v57  ;;  %v16448_v16 = vadd.f32 %v12668_v37, %v12667_v46  ;;  %v12739_v41 = vadd.f32 %v12738_v60, %v12737_v48  ;;  %v15121_v37 = vld [vmem:[#allocation6 + $0x380] sm:$0xff]  }
 0x27b   :  { %14663 = vmatmul.mubr.bf16.gmra.mrb[136].mxu1 %v16402_v18  ;;  %v15122_v60 = vld [vmem:[#allocation6 + $0x340] sm:$0xff]   ;;  %13203 = vmatprep.subr.bf16.mxu0 %v15121_v37 }
 0x27c   :  { %v16452_v58 = vadd.f32 %v12739_v41, %v16331_v61  ;;  %14666 = vmatprep.mubr.msk.bf16.mxu1 %vm15948_vm0, %v18878_v3  ;;  %13204 = vmatpush3.bf16.msra.mxu0 %v15122_v60 }
 0x27d   :  { %3543 = vmatmul.mubr.bf16.gmra.mrb[124].mxu0 %v18880_v0 }
 0x27e   :  { %v12670_v57 = vpop.f32.mrb[32].mxu1  ;;  %v12740_v34 = vpop.f32.mrb[20].mxu0  ;;  %3550 = vmatprep.mubr.bf16.mxu0 %v18880_v0 }
 0x27f   :  { %v12671_v39 = vpop.f32.mrb[33].mxu1  ;;  %v12741_v10 = vpop.f32.mrb[21].mxu0 }
 0x280   :  { %v16458_v11 = vadd.f32 %v12671_v39, %v12670_v57  ;;  %v12742_v18 = vadd.f32 %v12741_v10, %v12740_v34  ;;  %v12673_v5 = vpop.f32.mrb[34].mxu1  ;;  %v12743_v36 = vpop.f32.mrb[22].mxu0 }
 0x281   :  { %v12674_v61 = vpop.f32.mrb[35].mxu1  ;;  %v12744_v45 = vpop.f32.mrb[23].mxu0 }
 0x282   :  { %v16461_v46 = vadd.f32 %v12742_v18, %v16338_v17  ;;  %v16463_v48 = vadd.f32 %v12674_v61, %v12673_v5  ;;  %v12745_v23 = vadd.f32 %v12744_v45, %v12743_v36 }
 0x283   :  { %14667 = vmatmul.mubr.bf16.gmra.mrb[140].mxu1 %v18880_v0 }
 0x284   :  { %v16467_v44 = vadd.f32 %v12745_v23, %v16346_v31  ;;  %14670 = vmatprep.mubr.msk.bf16.mxu1 %vm15948_vm0, %v18878_v3 }
 0x285   :  { %3551 = vmatmul.mubr.bf16.gmra.mrb[128].mxu0 %v18880_v0 }
 0x286   :  { %v12676_v41 = vpop.f32.mrb[36].mxu1  ;;  %v12746_v25 = vpop.f32.mrb[24].mxu0  ;;  %3556 = vmatprep.mubr.bf16.mxu0 %v18880_v0 }
 0x287   :  { %v12677_v17 = vpop.f32.mrb[37].mxu1  ;;  %v12747_v57 = vpop.f32.mrb[25].mxu0 }
 0x288   :  { %v16473_v34 = vadd.f32 %v12677_v17, %v12676_v41  ;;  %v12679_v39 = vpop.f32.mrb[38].mxu1  ;;  %v12749_v10 = vpop.f32.mrb[26].mxu0  ;;  %v15123_v17 = vld [vmem:[#allocation6 + $0x388] sm:$0xff]  }
 0x289   :  { %v12680_v18 = vpop.f32.mrb[39].mxu1  ;;  %v12750_v31 = vpop.f32.mrb[27].mxu0  ;;  %13205 = vmatprep.subr.bf16.mxu0 %v15123_v17  ;;  %v15124_v57 = vld [vmem:[#allocation6 + $0x348] sm:$0xff]   ;;  %v15125_v17 = vld [vmem:[#allocation6 + $0x390] sm:$0xff]  }
 0x28a   :  { %v16475_v5 = vadd.f32 %v12680_v18, %v12679_v39  ;;  %13206 = vmatpush3.bf16.msra.mxu0 %v15124_v57 }
 0x28b   :  { %14671 = vmatmul.mubr.bf16.gmra.mrb[144].mxu1 %v18880_v0  ;;  %13207 = vmatprep.subr.bf16.mxu0 %v15125_v17 }
 0x28c   :  { %14674 = vmatprep.mubr.msk.bf16.mxu1 %vm15948_vm0, %v18878_v3 }
 0x28d   :  { %3557 = vmatmul.mubr.bf16.gmra.mrb[132].mxu0 %v18880_v0 }
 0x28e   :  { %v12682_v36 = vpop.f32.mrb[40].mxu1  ;;  %v12752_v61 = vpop.f32.mrb[28].mxu0 }
 0x28f   :  { %v12683_v45 = vpop.f32.mrb[41].mxu1  ;;  %v12753_v23 = vpop.f32.mrb[29].mxu0 }
 0x290   :  { %v12685_v37 = vpop.f32.mrb[42].mxu1  ;;  %v12755_v60 = vpop.f32.mrb[30].mxu0 }
 0x291   :  { %v12686_v41 = vpop.f32.mrb[43].mxu1  ;;  %v12756_v25 = vpop.f32.mrb[31].mxu0 }
 0x293   :  { %14675 = vmatmul.mubr.bf16.gmra.mrb[148].mxu1 %v18880_v0 }
 0x294   :  { %14678 = vmatprep.mubr.msk.bf16.mxu1 %vm15948_vm0, %v18878_v3 }
 0x296   :  { %v12688_v39 = vpop.f32.mrb[44].mxu1  ;;  %v12758_v10 = vpop.f32.mrb[32].mxu0 }
 0x297   :  { %v12689_v18 = vpop.f32.mrb[45].mxu1  ;;  %v12759_v31 = vpop.f32.mrb[33].mxu0 }
 0x298   :  { %v12760_v36 = vadd.f32 %v12759_v31, %v12758_v10  ;;  %v12691_v61 = vpop.f32.mrb[46].mxu1  ;;  %v12761_v45 = vpop.f32.mrb[34].mxu0 }
 0x299   :  { %v12692_v23 = vpop.f32.mrb[47].mxu1  ;;  %v12762_v37 = vpop.f32.mrb[35].mxu0 }
 0x29a   :  { %v16488_v60 = vadd.f32 %v12760_v36, %v16443_v47  ;;  %v12763_v41 = vadd.f32 %v12762_v37, %v12761_v45 }
 0x29b   :  { %14679 = vmatmul.mubr.bf16.gmra.mrb[152].mxu1 %v18880_v0 }
 0x29c   :  { %v16492_v25 = vadd.f32 %v12763_v41, %v16448_v16  ;;  %14682 = vmatprep.mubr.msk.bf16.mxu1 %vm15948_vm0, %v18878_v3 }
 0x29e   :  { %v12694_v57 = vpop.f32.mrb[48].mxu1  ;;  %v12764_v39 = vpop.f32.mrb[36].mxu0 }
 0x29f   :  { %v12695_v10 = vpop.f32.mrb[49].mxu1  ;;  %v12765_v18 = vpop.f32.mrb[37].mxu0 }
 0x2a0   :  { %v16497_v31 = vadd.f32 %v12695_v10, %v12694_v57  ;;  %v12766_v47 = vadd.f32 %v12765_v18, %v12764_v39  ;;  %v12697_v36 = vpop.f32.mrb[50].mxu1  ;;  %v12767_v61 = vpop.f32.mrb[38].mxu0  ;;  %v15126_v57 = vld [vmem:[#allocation6 + $0x350] sm:$0xff]  }
 0x2a1   :  { %v12698_v45 = vpop.f32.mrb[51].mxu1  ;;  %v12768_v23 = vpop.f32.mrb[39].mxu0  ;;  %13208 = vmatpush3.bf16.msra.mxu0 %v15126_v57 }
 0x2a2   :  { %v16500_v16 = vadd.f32 %v12766_v47, %v16458_v11  ;;  %v16502_v37 = vadd.f32 %v12698_v45, %v12697_v36  ;;  %v12769_v41 = vadd.f32 %v12768_v23, %v12767_v61 }
 0x2a3   :  { %14683 = vmatmul.mubr.bf16.gmra.mrb[156].mxu1 %v18880_v0 }
 0x2a4   :  { %v16506_v17 = vadd.f32 %v12769_v41, %v16463_v48  ;;  %14686 = vmatprep.mubr.msk.bf16.mxu1 %vm15948_vm0, %v18878_v3 }
 0x2a6   :  { %v12700_v39 = vpop.f32.mrb[52].mxu1  ;;  %v12770_v10 = vpop.f32.mrb[40].mxu0 }
 0x2a7   :  { %v12701_v18 = vpop.f32.mrb[53].mxu1  ;;  %v12771_v56 = vpop.f32.mrb[41].mxu0 }
 0x2a8   :  { %v16510_v13 = vadd.f32 %v12701_v18, %v12700_v39  ;;  %v12772_v11 = vadd.f32 %v12771_v56, %v12770_v10  ;;  %v12703_v47 = vpop.f32.mrb[54].mxu1  ;;  %v12773_v36 = vpop.f32.mrb[42].mxu0 }
 0x2a9   :  { %v12704_v61 = vpop.f32.mrb[55].mxu1  ;;  %v12774_v45 = vpop.f32.mrb[43].mxu0 }
 0x2aa   :  { %v16513_v23 = vadd.f32 %v12772_v11, %v16473_v34  ;;  %v16515_v48 = vadd.f32 %v12704_v61, %v12703_v47  ;;  %v12775_v41 = vadd.f32 %v12774_v45, %v12773_v36  ;;  %v15127_v47 = vld [vmem:[#allocation6 + $0x398] sm:$0xff]  }
 0x2ab   :  { %14687 = vmatmul.mubr.bf16.gmra.mrb[160].mxu1 %v18880_v0  ;;  %v15128_v61 = vld [vmem:[#allocation6 + $0x358] sm:$0xff]   ;;  %13209 = vmatprep.subr.bf16.mxu0 %v15127_v47 }
 0x2ac   :  { %v16519_v15 = vadd.f32 %v12775_v41, %v16475_v5  ;;  %3655 = vmatprep.mubr.bf16.mxu1 %v18880_v0  ;;  %13210 = vmatpush3.bf16.msra.mxu0 %v15128_v61 }
 0x2ae   :  { %v12706_v57 = vpop.f32.mrb[56].mxu1  ;;  %v12776_v39 = vpop.f32.mrb[44].mxu0 }
 0x2af   :  { %v12707_v56 = vpop.f32.mrb[57].mxu1  ;;  %v12777_v10 = vpop.f32.mrb[45].mxu0 }
 0x2b0   :  { %v16522_v18 = vadd.f32 %v12707_v56, %v12706_v57  ;;  %v12709_v54 = vpop.f32.mrb[58].mxu1  ;;  %v12779_v40 = vpop.f32.mrb[46].mxu0 }
 0x2b1   :  { %v12710_v34 = vpop.f32.mrb[59].mxu1  ;;  %v12780_v11 = vpop.f32.mrb[47].mxu0  ;;  %v15129_v40 = vld [vmem:[#allocation6 + $0x3a0] sm:$0xff]  }
 0x2b2   :  { %v16524_v36 = vadd.f32 %v12710_v34, %v12709_v54  ;;  %13211 = vmatprep.subr.bf16.mxu0 %v15129_v40  ;;  %v15132_v40 = vld [vmem:[#allocation6 + $0x368] sm:$0xff]  }
 0x2b3   :  { %3656 = vmatmul.mubr.bf16.vlgmr.msra.gmra.mrb[164].mxu1 %v18880_v0  ;;  %13212 = vmatpush3.bf16.msra.mxu0 %v15130_v8 }
 0x2b6   :  { %v12782_v5 = vpop.f32.mrb[48].mxu0  ;;  %v12822_v45 = vpop.f32.mrb[60].mxu1 }
 0x2b7   :  { %v12783_v41 = vpop.f32.mrb[49].mxu0  ;;  %v12823_v39 = vpop.f32.mrb[61].mxu1 }
 0x2b8   :  { %v12824_v33 = vadd.f32 %v12823_v39, %v12822_v45  ;;  %v12785_v10 = vpop.f32.mrb[50].mxu0  ;;  %v12825_v57 = vpop.f32.mrb[62].mxu1 }
 0x2b9   :  { %v12786_v56 = vpop.f32.mrb[51].mxu0  ;;  %v12826_v9 = vpop.f32.mrb[63].mxu1 }
 0x2ba   :  { %v16528_v11 = vadd.f32 %v12824_v33, %v16358_v1  ;;  %v12827_v54 = vadd.f32 %v12826_v9, %v12825_v57  ;;  %v15131_v57 = vld [vmem:[#allocation6 + $0x3a8] sm:$0xff]  }
 0x2bb   :  { %13213 = vmatprep.subr.bf16.mxu0 %v15131_v57 }
 0x2bc   :  { %v16531_v34 = vadd.f32 %v12827_v54, %v16363_v19  ;;  %13214 = vmatpush3.bf16.msra.mxu0 %v15132_v40 }
 0x2be   :  { %v12788_v47 = vpop.f32.mrb[52].mxu0  ;;  %v12828_v61 = vpop.f32.mrb[64].mxu1 }
 0x2bf   :  { %v12789_v5 = vpop.f32.mrb[53].mxu0  ;;  %v12829_v41 = vpop.f32.mrb[65].mxu1 }
 0x2c0   :  { %v12790_v45 = vadd.f32 %v12789_v5, %v12788_v47  ;;  %v12830_v39 = vadd.f32 %v12829_v41, %v12828_v61  ;;  %v12791_v10 = vpop.f32.mrb[54].mxu0  ;;  %v12831_v56 = vpop.f32.mrb[66].mxu1 }
 0x2c1   :  { %v12792_v7 = vpop.f32.mrb[55].mxu0  ;;  %v12832_v6 = vpop.f32.mrb[67].mxu1 }
 0x2c2   :  { %v16534_v59 = vadd.f32 %v12790_v45, %v16497_v31  ;;  %v16537_v9 = vadd.f32 %v12830_v39, %v16446_v12  ;;  %v12793_v33 = vadd.f32 %v12792_v7, %v12791_v10  ;;  %v12833_v1 = vadd.f32 %v12832_v6, %v12831_v56 }
 0x2c4   :  { %v16540_v8 = vadd.f32 %v12793_v33, %v16502_v37  ;;  %v16543_v19 = vadd.f32 %v12833_v1, %v16452_v58 }
 0x2c6   :  { %v12794_v54 = vpop.f32.mrb[56].mxu0  ;;  %v12834_v47 = vpop.f32.mrb[68].mxu1 }
 0x2c7   :  { %v12795_v61 = vpop.f32.mrb[57].mxu0  ;;  %v12835_v5 = vpop.f32.mrb[69].mxu1 }
 0x2c8   :  { %v12796_v31 = vadd.f32 %v12795_v61, %v12794_v54  ;;  %v12836_v41 = vadd.f32 %v12835_v5, %v12834_v47  ;;  %v12797_v12 = vpop.f32.mrb[58].mxu0  ;;  %v12837_v45 = vpop.f32.mrb[70].mxu1 }
 0x2c9   :  { %v12798_v7 = vpop.f32.mrb[59].mxu0  ;;  %v12838_v6 = vpop.f32.mrb[71].mxu1 }
 0x2ca   :  { %v16546_v37 = vadd.f32 %v12796_v31, %v16510_v13  ;;  %v16549_v58 = vadd.f32 %v12836_v41, %v16461_v46  ;;  %v12799_v39 = vadd.f32 %v12798_v7, %v12797_v12  ;;  %v12839_v10 = vadd.f32 %v12838_v6, %v12837_v45 }
 0x2cc   :  { %v16552_v56 = vadd.f32 %v12799_v39, %v16515_v48  ;;  %v16555_v33 = vadd.f32 %v12839_v10, %v16467_v44 }
 0x2ce   :  { %v12800_v1 = vpop.f32.mrb[60].mxu0  ;;  %v12840_v57 = vpop.f32.mrb[72].mxu1 }
 0x2cf   :  { %v12801_v40 = vpop.f32.mrb[61].mxu0  ;;  %v12841_v54 = vpop.f32.mrb[73].mxu1 }
 0x2d0   :  { %v12802_v47 = vadd.f32 %v12801_v40, %v12800_v1  ;;  %v12803_v61 = vpop.f32.mrb[62].mxu0  ;;  %v12843_v5 = vpop.f32.mrb[74].mxu1  ;;  %v15133_v40 = vld [vmem:[#allocation6 + $0x3b0] sm:$0xff]  }
 0x2d1   :  { %v12804_v13 = vpop.f32.mrb[63].mxu0  ;;  %v12844_v31 = vpop.f32.mrb[75].mxu1  ;;  %v15134_v54 = vld [vmem:[#allocation6 + $0x370] sm:$0xff]   ;;  %13215 = vmatprep.subr.bf16.mxu0 %v15133_v40 }
 0x2d2   :  { %v16558_v46 = vadd.f32 %v12802_v47, %v16522_v18  ;;  %v12805_v41 = vadd.f32 %v12804_v13, %v12803_v61  ;;  %13216 = vmatpush3.bf16.msra.mxu0 %v15134_v54 }
 0x2d4   :  { %v16561_v12 = vadd.f32 %v12805_v41, %v16524_v36 }
 0x2d6   :  { %v12846_v48 = vpop.f32.mrb[76].mxu1  ;;  %v12916_v45 = vpop.f32.mrb[64].mxu0 }
 0x2d7   :  { %v12847_v44 = vpop.f32.mrb[77].mxu1  ;;  %v12917_v7 = vpop.f32.mrb[65].mxu0 }
 0x2d8   :  { %v12918_v6 = vadd.f32 %v12917_v7, %v12916_v45  ;;  %v12849_v39 = vpop.f32.mrb[78].mxu1  ;;  %v12919_v10 = vpop.f32.mrb[66].mxu0 }
 0x2d9   :  { %v12850_v57 = vpop.f32.mrb[79].mxu1  ;;  %v12920_v1 = vpop.f32.mrb[67].mxu0 }
 0x2da   :  { %v12921_v5 = vadd.f32 %v12920_v1, %v12919_v10  ;;  %v16564_v31 = vadd.f32 %v12918_v6, %v16528_v11  ;;  %v15135_v57 = vld [vmem:[#allocation6 + $0x3b8] sm:$0xff]  }
 0x2db   :  { %v15136_v10 = vld [vmem:[#allocation6 + $0x378] sm:$0xff]   ;;  %13217 = vmatprep.subr.bf16.mxu0 %v15135_v57 }
 0x2dc   :  { %v16567_v18 = vadd.f32 %v12921_v5, %v16531_v34  ;;  %13218 = vmatpush3.bf16.msra.mxu0 %v15136_v10  ;;  %v15137_v5 = vld [vmem:[#allocation6 + $0x400] sm:$0xff]  }
 0x2dd   :  { %14690 = vmatprep.subr.bf16.mxu0 %v18878_v3  ;;  %13297 = vmatprep.subr.bf16.mxu1 %v15137_v5 }
 0x2de   :  { %v12852_v36 = vpop.f32.mrb[80].mxu1  ;;  %v12922_v47 = vpop.f32.mrb[68].mxu0 }
 0x2df   :  { %v12853_v61 = vpop.f32.mrb[81].mxu1  ;;  %v12923_v13 = vpop.f32.mrb[69].mxu0 }
 0x2e0   :  { %v12854_v41 = vadd.f32 %v12853_v61, %v12852_v36  ;;  %v12924_v48 = vadd.f32 %v12923_v13, %v12922_v47  ;;  %v12855_v45 = vpop.f32.mrb[82].mxu1  ;;  %v12925_v44 = vpop.f32.mrb[70].mxu0  ;;  %v15138_v36 = vld [vmem:[#allocation6 + $0x3c0] sm:$0xff]  }
 0x2e1   :  { %v12856_v7 = vpop.f32.mrb[83].mxu1  ;;  %v12926_v39 = vpop.f32.mrb[71].mxu0  ;;  %13298 = vmatpush3.bf16.msra.mxu1 %v15138_v36 }
 0x2e2   :  { %v16570_v11 = vadd.f32 %v12854_v41, %v16488_v60  ;;  %v12857_v6 = vadd.f32 %v12856_v7, %v12855_v45  ;;  %v12927_v1 = vadd.f32 %v12926_v39, %v12925_v44  ;;  %v16573_v34 = vadd.f32 %v12924_v48, %v16537_v9 }
 0x2e4   :  { %v16576_v40 = vadd.f32 %v12857_v6, %v16492_v25  ;;  %v16579_v54 = vadd.f32 %v12927_v1, %v16543_v19 }
 0x2e6   :  { %v12858_v47 = vpop.f32.mrb[84].mxu1  ;;  %v12928_v60 = vpop.f32.mrb[72].mxu0 }
 0x2e7   :  { %v12859_v61 = vpop.f32.mrb[85].mxu1  ;;  %v12929_v13 = vpop.f32.mrb[73].mxu0 }
 0x2e8   :  { %v12860_v41 = vadd.f32 %v12859_v61, %v12858_v47  ;;  %v12930_v9 = vadd.f32 %v12929_v13, %v12928_v60  ;;  %v12861_v48 = vpop.f32.mrb[86].mxu1  ;;  %v12931_v45 = vpop.f32.mrb[74].mxu0  ;;  %v15140_v47 = vld [vmem:[#allocation6 + $0x408] sm:$0xff]  }
 0x2e9   :  { %v12862_v25 = vpop.f32.mrb[87].mxu1  ;;  %v12932_v44 = vpop.f32.mrb[75].mxu0  ;;  %v15141_v61 = vld [vmem:[#allocation6 + $0x3c8] sm:$0xff]   ;;  %13299 = vmatprep.subr.bf16.mxu1 %v15140_v47  ;;  %v15145_v47 = vld [vmem:[#allocation6 + $0x3d8] sm:$0xff]  }
 0x2ea   :  { %v16583_v19 = vadd.f32 %v12860_v41, %v16500_v16  ;;  %v12863_v7 = vadd.f32 %v12862_v25, %v12861_v48  ;;  %v12933_v39 = vadd.f32 %v12932_v44, %v12931_v45  ;;  %v16586_v57 = vadd.f32 %v12930_v9, %v16549_v58  ;;  %13300 = vmatpush3.bf16.msra.mxu1 %v15141_v61  ;;  %v15142_v9 = vld [vmem:[#allocation6 + $0x410] sm:$0xff]  }
 0x2eb   :  { %13301 = vmatprep.subr.bf16.mxu1 %v15142_v9  ;;  %v15150_v9 = vld [vmem:[#allocation6 + $0x3e8] sm:$0xff]  }
 0x2ec   :  { %v16589_v10 = vadd.f32 %v12863_v7, %v16506_v17  ;;  %v16592_v6 = vadd.f32 %v12933_v39, %v16555_v33  ;;  %v15143_v33 = vld [vmem:[#allocation6 + $0x3d0] sm:$0xff]   ;;  %v15144_v39 = vld [vmem:[#allocation6 + $0x418] sm:$0xff]  }
 0x2ee   :  { %v12864_v1 = vpop.f32.mrb[88].mxu1  ;;  %v12934_v5 = vpop.f32.mrb[76].mxu0  ;;  %13302 = vmatpush3.bf16.msra.mxu1 %v15143_v33 }
 0x2ef   :  { %v12865_v36 = vpop.f32.mrb[89].mxu1  ;;  %v12935_v60 = vpop.f32.mrb[77].mxu0  ;;  %13303 = vmatprep.subr.bf16.mxu1 %v15144_v39 }
 0x2f0   :  { %v12866_v13 = vadd.f32 %v12865_v36, %v12864_v1  ;;  %v12867_v16 = vpop.f32.mrb[90].mxu1  ;;  %v12937_v41 = vpop.f32.mrb[78].mxu0 }
 0x2f1   :  { %v12868_v48 = vpop.f32.mrb[91].mxu1  ;;  %v12938_v45 = vpop.f32.mrb[79].mxu0 }
 0x2f2   :  { %v16595_v58 = vadd.f32 %v12866_v13, %v16513_v23  ;;  %v12869_v17 = vadd.f32 %v12868_v48, %v12867_v16  ;;  %13304 = vmatpush3.bf16.msra.mxu1 %v15145_v47  ;;  %v15147_v13 = vld [vmem:[#allocation6 + $0x420] sm:$0xff]   ;;  %v15149_v48 = vld [vmem:[#allocation6 + $0x428] sm:$0xff]  }
 0x2f3   :  { %v15148_v16 = vld [vmem:[#allocation6 + $0x3e0] sm:$0xff]   ;;  %13305 = vmatprep.subr.bf16.mxu1 %v15147_v13 }
 0x2f4   :  { %v16598_v25 = vadd.f32 %v12869_v17, %v16519_v15 }
 0x2f6   :  { %v12870_v44 = vpop.f32.mrb[92].mxu1  ;;  %v12940_v7 = vpop.f32.mrb[80].mxu0  ;;  %13306 = vmatpush3.bf16.msra.mxu1 %v15148_v16  ;;  %v15154_v16 = vld [vmem:[#allocation6 + $0x438] sm:$0xff]  }
 0x2f7   :  { %v12871_v1 = vpop.f32.mrb[93].mxu1  ;;  %v12941_v5 = vpop.f32.mrb[81].mxu0  ;;  %13307 = vmatprep.subr.bf16.mxu1 %v15149_v48  ;;  %v15155_v48 = vld [vmem:[#allocation6 + $0x3f8] sm:$0xff]  }
 0x2f8   :  { %v12873_v36 = vpop.f32.mrb[94].mxu1  ;;  %v12943_v60 = vpop.f32.mrb[82].mxu0 }
 0x2f9   :  { %v12874_v61 = vpop.f32.mrb[95].mxu1  ;;  %v12944_v23 = vpop.f32.mrb[83].mxu0  ;;  %v15151_v36 = vld [vmem:[#allocation6 + $0x430] sm:$0xff]  }
 0x2fa   :  { %13308 = vmatpush3.bf16.msra.mxu1 %v15150_v9  ;;  %v15152_v60 = vld [vmem:[#allocation6 + $0x3f0] sm:$0xff]  }
 0x2fb   :  { %13309 = vmatprep.subr.bf16.mxu1 %v15151_v36 }
 0x2fe   :  { %v12876_v15 = vpop.f32.mrb[96].mxu1  ;;  %v12946_v41 = vpop.f32.mrb[84].mxu0  ;;  %13310 = vmatpush3.bf16.msra.mxu1 %v15152_v60 }
 0x2ff   :  { %v12877_v45 = vpop.f32.mrb[97].mxu1  ;;  %v12947_v17 = vpop.f32.mrb[85].mxu0  ;;  %13311 = vmatprep.subr.bf16.mxu1 %v15154_v16 }
 0x300   :  { %v12948_v33 = vadd.f32 %v12947_v17, %v12946_v41  ;;  %v12879_v44 = vpop.f32.mrb[98].mxu1  ;;  %v12949_v7 = vpop.f32.mrb[86].mxu0 }
 0x301   :  { %v12880_v1 = vpop.f32.mrb[99].mxu1  ;;  %v12950_v5 = vpop.f32.mrb[87].mxu0 }
 0x302   :  { %v12951_v39 = vadd.f32 %v12950_v5, %v12949_v7  ;;  %v16601_v47 = vadd.f32 %v12948_v33, %v16570_v11  ;;  %13312 = vmatpush3.bf16.msra.mxu1 %v15155_v48 }
 0x304   :  { %v16604_v61 = vadd.f32 %v12951_v39, %v16576_v40 }
 0x306   :  { %v12882_v23 = vpop.f32.mrb[100].mxu1  ;;  %v12952_v13 = vpop.f32.mrb[88].mxu0 }
 0x307   :  { %v12883_v15 = vpop.f32.mrb[101].mxu1  ;;  %v12953_v41 = vpop.f32.mrb[89].mxu0 }
 0x308   :  { %v12884_v45 = vadd.f32 %v12883_v15, %v12882_v23  ;;  %v12954_v17 = vadd.f32 %v12953_v41, %v12952_v13  ;;  %v12885_v9 = vpop.f32.mrb[102].mxu1  ;;  %v12955_v44 = vpop.f32.mrb[90].mxu0 }
 0x309   :  { %v12886_v11 = vpop.f32.mrb[103].mxu1  ;;  %v12956_v33 = vpop.f32.mrb[91].mxu0 }
 0x30a   :  { %v16607_v7 = vadd.f32 %v12884_v45, %v16534_v59  ;;  %v12887_v40 = vadd.f32 %v12886_v11, %v12885_v9  ;;  %v12957_v1 = vadd.f32 %v12956_v33, %v12955_v44  ;;  %v16610_v5 = vadd.f32 %v12954_v17, %v16583_v19 }
 0x30c   :  { %v16613_v39 = vadd.f32 %v12887_v40, %v16540_v8  ;;  %v16616_v36 = vadd.f32 %v12957_v1, %v16589_v10 }
 0x30e   :  { %v12888_v60 = vpop.f32.mrb[104].mxu1  ;;  %v12958_v23 = vpop.f32.mrb[92].mxu0 }
 0x30f   :  { %v12889_v13 = vpop.f32.mrb[105].mxu1  ;;  %v12959_v16 = vpop.f32.mrb[93].mxu0 }
 0x310   :  { %v12890_v15 = vadd.f32 %v12889_v13, %v12888_v60  ;;  %v12960_v41 = vadd.f32 %v12959_v16, %v12958_v23  ;;  %v12891_v48 = vpop.f32.mrb[106].mxu1  ;;  %v12961_v59 = vpop.f32.mrb[94].mxu0 }
 0x311   :  { %v12892_v45 = vpop.f32.mrb[107].mxu1  ;;  %v12962_v9 = vpop.f32.mrb[95].mxu0 }
 0x312   :  { %v16619_v44 = vadd.f32 %v12890_v15, %v16546_v37  ;;  %v12893_v19 = vadd.f32 %v12892_v45, %v12891_v48  ;;  %v12963_v17 = vadd.f32 %v12962_v9, %v12961_v59  ;;  %v16622_v8 = vadd.f32 %v12960_v41, %v16595_v58 }
 0x314   :  { %v16625_v10 = vadd.f32 %v12893_v19, %v16552_v56  ;;  %v16628_v11 = vadd.f32 %v12963_v17, %v16598_v25  ;;  %v16637_v19 = vld [vmem:[#allocation9 + $0x1] ss:$0 sm:$0xff] }
 0x316   :  { %v12894_v33 = vpop.f32.mrb[108].mxu1  ;;  %v12964_v40 = vpop.f32.mrb[96].mxu0 }
 0x317   :  { %v12895_v1 = vpop.f32.mrb[109].mxu1  ;;  %v12965_v60 = vpop.f32.mrb[97].mxu0  ;;  %v16639_v40 = vld [vmem:[#allocation8] ss:$0 sm:$0xff] }
 0x318   :  { %v12896_v23 = vadd.f32 %v12895_v1, %v12894_v33  ;;  %v12897_v13 = vpop.f32.mrb[110].mxu1  ;;  %v12967_v16 = vpop.f32.mrb[98].mxu0 }
 0x319   :  { %v12898_v37 = vpop.f32.mrb[111].mxu1  ;;  %v12968_v15 = vpop.f32.mrb[99].mxu0 }
 0x31a   :  { %v16631_v48 = vadd.f32 %v12896_v23, %v16558_v46  ;;  %v12899_v58 = vadd.f32 %v12898_v37, %v12897_v13 }
 0x31c   :  { %v16634_v41 = vadd.f32 %v12899_v58, %v16561_v12 }
 0x31e   :  { %v2394_v56 = vpop.f32.mrb[112].mxu1  ;;  %v12970_v59 = vpop.f32.mrb[100].mxu0 }
 0x31f   :  { %v2395_v25 = vadd.f32 %v2394_v56, %v16564_v31  ;;  %v14640_v45 = vpop.f32.mrb[113].mxu1  ;;  %v12971_v9 = vpop.f32.mrb[101].mxu0 }
 0x320   :  { %v2397_v17 = vpop.f32.mrb[114].mxu1  ;;  %v12973_v33 = vpop.f32.mrb[102].mxu0 }
 0x321   :  { %v2490_v1 = vmul.f32 %v16639_v40, %v2395_v25  ;;  %v2398_v46 = vadd.f32 %v2397_v17, %v16567_v18  ;;  %v14641_v60 = vpop.f32.mrb[115].mxu1  ;;  %v12974_v23 = vpop.f32.mrb[103].mxu0 }
 0x323   :  { %v2496_v12 = vadd.f32 %v16637_v19, %v2490_v1  ;;  %v2491_v13 = vmul.f32 %v16639_v40, %v2398_v46 }
 0x325   :  { %v2497_v31 = vadd.f32 %v16637_v19, %v2491_v13  ;;  %v2498_v15 = vmax.f32 %v2496_v12, 0.0 }
 0x326   :  { %v12976_v16 = vpop.f32.mrb[104].mxu0  ;;  %v2402_v37 = vpop.f32.mrb[116].mxu1 }
 0x327   :  { %v2499_v58 = vmax.f32 %v2497_v31, 0.0  ;;  %v2403_v56 = vadd.f32 %v2402_v37, %v16573_v34  ;;  %v12977_v59 = vpop.f32.mrb[105].mxu0  ;;  %v14644_v45 = vpop.f32.mrb[117].mxu1 }
 0x328   :  { %v12978_v9 = vadd.f32 %v12977_v59, %v12976_v16  ;;  %v12979_v25 = vpop.f32.mrb[106].mxu0  ;;  %v2405_v33 = vpop.f32.mrb[118].mxu1 }
 0x329   :  { %v16647_v18 = vpack.c.bf16 %v2499_v58, %v2498_v15  ;;  %v2502_v17 = vmul.f32 %v16639_v40, %v2403_v56  ;;  %v2406_v1 = vadd.f32 %v2405_v33, %v16579_v54  ;;  %v12980_v46 = vpop.f32.mrb[107].mxu0  ;;  %v14645_v60 = vpop.f32.mrb[119].mxu1 }
 0x32a   :  { %v12981_v23 = vadd.f32 %v12980_v46, %v12979_v25  ;;  %v16652_v13 = vadd.f32 %v12978_v9, %v16607_v7 }
 0x32b   :  { %v2504_v12 = vadd.f32 %v16637_v19, %v2502_v17  ;;  %v2503_v34 = vmul.f32 %v16639_v40, %v2406_v1  ;;  %3562 = vmatprep.mubr.bf16.mxu0 %v16647_v18  ;;  %3663 = vmatprep.mubr.bf16.mxu1 %v16647_v18 }
 0x32c   :  { %3563 = vmatmul.mubr.bf16.gmra.mrb[136].mxu0 %v18880_v0  ;;  %3664 = vmatmul.mubr.bf16.gmra.mrb[168].mxu1 %v18880_v0  ;;  %v16661_v54 = vadd.f32 %v12981_v23, %v16613_v39 }
 0x32d   :  { %v2505_v31 = vadd.f32 %v16637_v19, %v2503_v34  ;;  %v2506_v37 = vmax.f32 %v2504_v12, 0.0 }
 0x32e   :  { %v12982_v16 = vpop.f32.mrb[108].mxu0  ;;  %v2410_v7 = vpop.f32.mrb[120].mxu1 }
 0x32f   :  { %v2507_v15 = vmax.f32 %v2505_v31, 0.0  ;;  %v2411_v58 = vadd.f32 %v2410_v7, %v16586_v57  ;;  %v12983_v56 = vpop.f32.mrb[109].mxu0  ;;  %v14648_v59 = vpop.f32.mrb[121].mxu1 }
 0x330   :  { %v12984_v45 = vadd.f32 %v12983_v56, %v12982_v16  ;;  %v12985_v9 = vpop.f32.mrb[110].mxu0  ;;  %v2413_v25 = vpop.f32.mrb[122].mxu1 }
 0x331   :  { %v16665_v33 = vpack.c.bf16 %v2507_v15, %v2506_v37  ;;  %v2510_v17 = vmul.f32 %v16639_v40, %v2411_v58  ;;  %v2414_v39 = vadd.f32 %v2413_v25, %v16592_v6  ;;  %v12986_v1 = vpop.f32.mrb[111].mxu0  ;;  %v14649_v46 = vpop.f32.mrb[123].mxu1 }
 0x332   :  { %v12987_v60 = vadd.f32 %v12986_v1, %v12985_v9  ;;  %v16670_v23 = vadd.f32 %v12984_v45, %v16619_v44 }
 0x333   :  { %v2512_v12 = vadd.f32 %v16637_v19, %v2510_v17  ;;  %v2511_v57 = vmul.f32 %v16639_v40, %v2414_v39  ;;  %3570 = vmatprep.mubr.bf16.mxu0 %v16665_v33  ;;  %3671 = vmatprep.mubr.bf16.mxu1 %v16665_v33 }
 0x334   :  { %3571 = vmatmul.mubr.bf16.gmra.mrb[140].mxu0 %v16647_v18  ;;  %3672 = vmatmul.mubr.bf16.gmra.mrb[172].mxu1 %v18880_v0  ;;  %v16679_v6 = vadd.f32 %v12987_v60, %v16625_v10 }
 0x335   :  { %v2513_v34 = vadd.f32 %v16637_v19, %v2511_v57  ;;  %v2514_v16 = vmax.f32 %v2512_v12, 0.0 }
 0x336   :  { %v12988_v31 = vpop.f32.mrb[112].mxu0  ;;  %v2418_v44 = vpop.f32.mrb[124].mxu1 }
 0x337   :  { %v2515_v7 = vmax.f32 %v2513_v34, 0.0  ;;  %v12989_v37 = vpop.f32.mrb[113].mxu0  ;;  %v14652_v15 = vpop.f32.mrb[125].mxu1 }
 0x338   :  { %v12990_v58 = vadd.f32 %v12989_v37, %v12988_v31  ;;  %v12991_v56 = vpop.f32.mrb[114].mxu0  ;;  %v2420_v59 = vpop.f32.mrb[126].mxu1 }
 0x339   :  { %v16682_v45 = vpack.c.bf16 %v2515_v7, %v2514_v16  ;;  %v12992_v9 = vpop.f32.mrb[115].mxu0  ;;  %v14653_v25 = vpop.f32.mrb[127].mxu1 }
 0x33a   :  { %v12993_v17 = vadd.f32 %v12992_v9, %v12991_v56  ;;  %v16685_v39 = vadd.f32 %v12990_v58, %v16631_v48 }
 0x33b   :  { %3578 = vmatprep.mubr.bf16.mxu0 %v16682_v45  ;;  %3679 = vmatprep.mubr.bf16.mxu1 %v16682_v45 }
 0x33c   :  { %3579 = vmatmul.mubr.bf16.gmra.mrb[144].mxu0 %v16665_v33  ;;  %3680 = vmatmul.mubr.bf16.gmra.mrb[176].mxu1 %v18880_v0  ;;  %v16692_v10 = vadd.f32 %v12993_v17, %v16634_v41 }
 0x33d   :  { %3586 = vmatprep.mubr.bf16.mxu0 %v18880_v0  ;;  %3685 = vmatprep.mubr.bf16.mxu1 %v18880_v0 }
 0x33e   :  { %v2424_v1 = vpop.f32.mrb[128].mxu1  ;;  %v13031_v25 = vpop.f32.mrb[116].mxu0 }
 0x33f   :  { %v14656_v46 = vpop.f32.mrb[129].mxu1 }
 0x340   :  { %v2426_v60 = vpop.f32.mrb[130].mxu1 }
 0x341   :  { %v14657_v48 = vpop.f32.mrb[131].mxu1 }
 0x344   :  { %3587 = vmatmul.mubr.bf16.gmra.mrb[148].mxu0 %v16682_v45  ;;  %3686 = vmatmul.mubr.bf16.gmra.mrb[180].mxu1 %v16647_v18 }
 0x345   :  { %3592 = vmatprep.mubr.bf16.mxu0 %v18880_v0  ;;  %3691 = vmatprep.mubr.bf16.mxu1 %v18880_v0 }
 0x346   :  { %v2430_v12 = vpop.f32.mrb[132].mxu1 }
 0x347   :  { %v2431_v41 = vadd.f32 %v2430_v12, %v16601_v47  ;;  %v14660_v57 = vpop.f32.mrb[133].mxu1 }
 0x348   :  { %v2433_v34 = vpop.f32.mrb[134].mxu1 }
 0x349   :  { %v2518_v31 = vmul.f32 %v16639_v40, %v2431_v41  ;;  %v2434_v44 = vadd.f32 %v2433_v34, %v16604_v61  ;;  %v14661_v16 = vpop.f32.mrb[135].mxu1 }
 0x34b   :  { %v2520_v7 = vadd.f32 %v16637_v19, %v2518_v31  ;;  %v2519_v37 = vmul.f32 %v16639_v40, %v2434_v44 }
 0x34c   :  { %3593 = vmatmul.mubr.bf16.gmra.mrb[152].mxu0 %v18880_v0  ;;  %3692 = vmatmul.mubr.bf16.gmra.mrb[184].mxu1 %v16665_v33 }
 0x34d   :  { %v2521_v15 = vadd.f32 %v16637_v19, %v2519_v37  ;;  %v2522_v56 = vmax.f32 %v2520_v7, 0.0 }
 0x34e   :  { %v2438_v58 = vpop.f32.mrb[136].mxu1 }
 0x34f   :  { %v2523_v47 = vmax.f32 %v2521_v15, 0.0  ;;  %v2439_v59 = vadd.f32 %v2438_v58, %v16610_v5  ;;  %v14664_v9 = vpop.f32.mrb[137].mxu1  ;;  %v13032_v5 = vpop.f32.mrb[117].mxu0 }
 0x350   :  { %v2441_v17 = vpop.f32.mrb[138].mxu1  ;;  %v16720_v57 = vadd.f32 %v13032_v5, %v13031_v25  ;;  %v13034_v34 = vpop.f32.mrb[118].mxu0 }
 0x351   :  { %v16709_v61 = vpack.c.bf16 %v2523_v47, %v2522_v56  ;;  %v2526_v1 = vmul.f32 %v16639_v40, %v2439_v59  ;;  %v2442_v46 = vadd.f32 %v2441_v17, %v16616_v36  ;;  %v14665_v60 = vpop.f32.mrb[139].mxu1  ;;  %v13035_v31 = vpop.f32.mrb[119].mxu0 }
 0x352   :  { %v16723_v15 = vadd.f32 %v13035_v31, %v13034_v34  ;;  %v13037_v25 = vpop.f32.mrb[120].mxu0 }
 0x353   :  { %v2528_v48 = vadd.f32 %v16637_v19, %v2526_v1  ;;  %v2527_v12 = vmul.f32 %v16639_v40, %v2442_v46  ;;  %3598 = vmatprep.mubr.bf16.mxu0 %v16709_v61  ;;  %3699 = vmatprep.mubr.bf16.mxu1 %v16709_v61 }
 0x354   :  { %3599 = vmatmul.mubr.bf16.gmra.mrb[156].mxu0 %v18880_v0  ;;  %3700 = vmatmul.mubr.bf16.gmra.mrb[188].mxu1 %v16682_v45 }
 0x355   :  { %v2529_v41 = vadd.f32 %v16637_v19, %v2527_v12  ;;  %v2530_v44 = vmax.f32 %v2528_v48, 0.0 }
 0x356   :  { %v2446_v36 = vpop.f32.mrb[140].mxu1 }
 0x357   :  { %v2531_v16 = vmax.f32 %v2529_v41, 0.0  ;;  %v2447_v7 = vadd.f32 %v2446_v36, %v16622_v8  ;;  %v14668_v37 = vpop.f32.mrb[141].mxu1  ;;  %v13038_v8 = vpop.f32.mrb[121].mxu0 }
 0x358   :  { %v2449_v58 = vpop.f32.mrb[142].mxu1  ;;  %v16736_v60 = vadd.f32 %v13038_v8, %v13037_v25  ;;  %v15139_v8 = vld [vmem:[#allocation6 + $0x440] sm:$0xff]  }
 0x359   :  { %v16725_v56 = vpack.c.bf16 %v2531_v16, %v2530_v44  ;;  %v2534_v47 = vmul.f32 %v16639_v40, %v2447_v7  ;;  %v2450_v59 = vadd.f32 %v2449_v58, %v16628_v11  ;;  %v14669_v9 = vpop.f32.mrb[143].mxu1  ;;  %v13040_v11 = vpop.f32.mrb[122].mxu0 }
 0x35a   :  { %v13041_v12 = vpop.f32.mrb[123].mxu0 }
 0x35b   :  { %v2536_v17 = vadd.f32 %v16637_v19, %v2534_v47  ;;  %v2535_v1 = vmul.f32 %v16639_v40, %v2450_v59  ;;  %3606 = vmatprep.mubr.bf16.mxu0 %v16725_v56  ;;  %3707 = vmatprep.mubr.bf16.mxu1 %v16725_v56  ;;  %v16738_v36 = vadd.f32 %v13041_v12, %v13040_v11  ;;  %v13043_v7 = vpop.f32.mrb[124].mxu0 }
 0x35c   :  { %3607 = vmatmul.mubr.bf16.gmra.mrb[160].mxu0 %v16709_v61  ;;  %3708 = vmatmul.mubr.bf16.gmra.mrb[192].mxu1 %v18880_v0  ;;  %v13044_v37 = vpop.f32.mrb[125].mxu0 }
 0x35d   :  { %v2537_v46 = vadd.f32 %v16637_v19, %v2535_v1  ;;  %v2538_v5 = vmax.f32 %v2536_v17, 0.0  ;;  %v16748_v58 = vadd.f32 %v13044_v37, %v13043_v7  ;;  %v13046_v47 = vpop.f32.mrb[126].mxu0 }
 0x35e   :  { %v2454_v48 = vpop.f32.mrb[144].mxu1  ;;  %v13047_v9 = vpop.f32.mrb[127].mxu0 }
 0x35f   :  { %v2539_v41 = vmax.f32 %v2537_v46, 0.0  ;;  %v14672_v34 = vpop.f32.mrb[145].mxu1  ;;  %v16750_v17 = vadd.f32 %v13047_v9, %v13046_v47  ;;  %v13049_v11 = vpop.f32.mrb[128].mxu0 }
 0x360   :  { %v2456_v31 = vpop.f32.mrb[146].mxu1  ;;  %v13050_v48 = vpop.f32.mrb[129].mxu0 }
 0x361   :  { %v16740_v44 = vpack.c.bf16 %v2539_v41, %v2538_v5  ;;  %v14673_v16 = vpop.f32.mrb[147].mxu1  ;;  %v13052_v12 = vpop.f32.mrb[130].mxu0  ;;  %v15146_v5 = vld [vmem:[#allocation6 + $0x448] sm:$0xff]  }
 0x362   :  { %v13053_v41 = vpop.f32.mrb[131].mxu0 }
 0x363   :  { %3614 = vmatprep.mubr.bf16.mxu0 %v16740_v44  ;;  %3715 = vmatprep.mubr.bf16.mxu1 %v16740_v44  ;;  %v13055_v9 = vpop.f32.mrb[132].mxu0 }
 0x364   :  { %3615 = vmatmul.mubr.bf16.gmra.mrb[164].mxu0 %v16725_v56  ;;  %3716 = vmatmul.mubr.bf16.gmra.mrb[196].mxu1 %v18880_v0 }
 0x365   :  { %3784 = vmatprep.mubr.bf16.mxu0 %v16665_v33  ;;  %3721 = vmatprep.mubr.bf16.mxu1 %v18880_v0 }
 0x366   :  { %v2460_v59 = vpop.f32.mrb[148].mxu1 }
 0x367   :  { %v14676_v25 = vpop.f32.mrb[149].mxu1  ;;  %v15153_v59 = vld [vmem:[#allocation6 + $0x450] sm:$0xff]  }
 0x368   :  { %v2462_v1 = vpop.f32.mrb[150].mxu1 }
 0x369   :  { %v14677_v46 = vpop.f32.mrb[151].mxu1 }
 0x36c   :  { %3722 = vmatmul.mubr.bf16.gmra.mrb[200].mxu1 %v16709_v61  ;;  %3785 = vmatmul.mubr.bf16.vlgmr.msra.gmra.mrb[168].mxu0 %v16647_v18 }
 0x36d   :  { %14691 = vmatpush3.bf16.msra.mxu0 %v15139_v8  ;;  %3792 = vmatprep.mubr.bf16.mxu0 %v16682_v45  ;;  %v13056_v8 = vpop.f32.mrb[133].mxu0 }
 0x36e   :  { %v2466_v34 = vpop.f32.mrb[152].mxu1  ;;  %3727 = vmatprep.mubr.bf16.mxu1 %v18880_v0  ;;  %14692 = vmatprep.subr.bf16.mxu0 %v18878_v3 }
 0x36f   :  { %v2467_v31 = vadd.f32 %v2466_v34, %v16652_v13  ;;  %v14680_v16 = vpop.f32.mrb[153].mxu1  ;;  %v13058_v13 = vpop.f32.mrb[134].mxu0 }
 0x370   :  { %v2469_v7 = vpop.f32.mrb[154].mxu1  ;;  %v13059_v11 = vpop.f32.mrb[135].mxu0 }
 0x371   :  { %v2542_v37 = vmul.f32 %v16639_v40, %v2467_v31  ;;  %v2470_v47 = vadd.f32 %v2469_v7, %v16661_v54  ;;  %v14681_v18 = vpop.f32.mrb[155].mxu1  ;;  %14693 = vmatpush3.bf16.msra.mxu0 %v15146_v5  ;;  %v15156_v54 = vld [vmem:[#allocation6 + $0x458] sm:$0xff]  }
 0x372   :  { %14694 = vmatprep.subr.bf16.mxu0 %v18878_v3 }
 0x373   :  { %v2544_v25 = vadd.f32 %v16637_v19, %v2542_v37  ;;  %v2543_v1 = vmul.f32 %v16639_v40, %v2470_v47  ;;  %v15157_v47 = vld [vmem:[#allocation6 + $0x460] sm:$0xff]  }
 0x374   :  { %3728 = vmatmul.mubr.bf16.gmra.mrb[204].mxu1 %v16725_v56  ;;  %3793 = vmatmul.mubr.bf16.gmra.mrb[172].mxu0 %v16665_v33 }
 0x375   :  { %v2545_v46 = vadd.f32 %v16637_v19, %v2543_v1  ;;  %3800 = vmatprep.mubr.bf16.mxu0 %v18880_v0  ;;  %14695 = vmatpush3.bf16.msra.mxu0 %v15153_v59  ;;  %v2546_v12 = vmax.f32 %v2544_v25, 0.0 }
 0x376   :  { %v2474_v48 = vpop.f32.mrb[156].mxu1  ;;  %14696 = vmatprep.subr.bf16.mxu0 %v18878_v3 }
 0x377   :  { %v2547_v5 = vmax.f32 %v2545_v46, 0.0  ;;  %v2475_v41 = vadd.f32 %v2474_v48, %v16670_v23  ;;  %v14684_v34 = vpop.f32.mrb[157].mxu1 }
 0x378   :  { %v2477_v31 = vpop.f32.mrb[158].mxu1 }
 0x379   :  { %v16769_v16 = vpack.c.bf16 %v2547_v5, %v2546_v12  ;;  %v2550_v33 = vmul.f32 %v16639_v40, %v2475_v41  ;;  %v2478_v7 = vadd.f32 %v2477_v31, %v16679_v6  ;;  %v14685_v37 = vpop.f32.mrb[159].mxu1  ;;  %14697 = vmatpush3.bf16.msra.mxu0 %v15156_v54  ;;  %v15158_v6 = vld [vmem:[#allocation6 + $0x468] sm:$0xff]   ;;  %v15159_v12 = vld [vmem:[#allocation6 + $0x470] sm:$0xff]  }
 0x37a   :  { %14698 = vmatprep.subr.bf16.mxu0 %v18878_v3 }
 0x37b   :  { %v2552_v18 = vadd.f32 %v16637_v19, %v2550_v33  ;;  %v2551_v59 = vmul.f32 %v16639_v40, %v2478_v7  ;;  %3735 = vmatprep.mubr.bf16.mxu1 %v16769_v16 }
 0x37c   :  { %3736 = vmatmul.mubr.bf16.gmra.mrb[208].mxu1 %v16740_v44  ;;  %3801 = vmatmul.mubr.bf16.gmra.mrb[176].mxu0 %v16682_v45 }
 0x37d   :  { %v2553_v23 = vadd.f32 %v16637_v19, %v2551_v59  ;;  %3808 = vmatprep.mubr.bf16.mxu0 %v18880_v0  ;;  %14699 = vmatpush3.bf16.msra.mxu0 %v15157_v47  ;;  %v2554_v25 = vmax.f32 %v2552_v18, 0.0 }
 0x37e   :  { %v2482_v9 = vpop.f32.mrb[160].mxu1  ;;  %14700 = vmatprep.subr.bf16.mxu0 %v18878_v3 }
 0x37f   :  { %v2555_v1 = vmax.f32 %v2553_v23, 0.0  ;;  %v2483_v8 = vadd.f32 %v2482_v9, %v16685_v39  ;;  %v14688_v13 = vpop.f32.mrb[161].mxu1  ;;  %v15165_v9 = vld [vmem:[#allocation6 + $0x4d0] sm:$0xff]  }
 0x380   :  { %v2485_v46 = vpop.f32.mrb[162].mxu1  ;;  %v15169_v13 = vld [vmem:[#allocation6 + $0x4e0] sm:$0xff]  }
 0x381   :  { %v16783_v54 = vpack.c.bf16 %v2555_v1, %v2554_v25  ;;  %v2558_v11 = vmul.f32 %v16639_v40, %v2483_v8  ;;  %v2486_v45 = vadd.f32 %v2485_v46, %v16692_v10  ;;  %14701 = vmatpush3.bf16.msra.mxu0 %v15158_v6  ;;  %v14689_v48 = vpop.f32.mrb[163].mxu1  ;;  %v15160_v10 = vld [vmem:[#allocation6 + $0x478] sm:$0xff]   ;;  %v15164_v6 = vld [vmem:[#allocation6 + $0x488] sm:$0xff]   ;;  %v15166_v25 = vld [vmem:[#allocation6 + $0x490] sm:$0xff]  }
 0x382   :  { %14702 = vmatprep.subr.bf16.mxu0 %v18878_v3  ;;  %v15167_v1 = vld [vmem:[#allocation6 + $0x4d8] sm:$0xff]   ;;  %v15170_v46 = vld [vmem:[#allocation6 + $0x4a0] sm:$0xff]   ;;  %v15175_v48 = vld [vmem:[#allocation6 + $0x548] sm:$0xff]  }
 0x383   :  { %v2560_v5 = vadd.f32 %v16637_v19, %v2558_v11  ;;  %v2559_v41 = vmul.f32 %v16639_v40, %v2486_v45  ;;  %3743 = vmatprep.mubr.bf16.mxu1 %v16783_v54  ;;  %v15168_v8 = vld [vmem:[#allocation6 + $0x498] sm:$0xff]   ;;  %v15172_v11 = vld [vmem:[#allocation6 + $0x4a8] sm:$0xff]   ;;  %v15174_v45 = vld [vmem:[#allocation6 + $0x500] sm:$0xff]  }
 0x384   :  { %3744 = vmatmul.mubr.bf16.gmra.mrb[212].mxu1 %v18880_v0  ;;  %3809 = vmatmul.mubr.bf16.gmra.mrb[180].mxu0 %v18880_v0 }
 0x385   :  { %v2561_v39 = vadd.f32 %v16637_v19, %v2559_v41  ;;  %3814 = vmatprep.mubr.bf16.mxu0 %v16709_v61  ;;  %3913 = vmatprep.mubr.bf16.mxu1 %v16709_v61  ;;  %v2562_v31 = vmax.f32 %v2560_v5, 0.0  ;;  %v15178_v5 = vld [vmem:[#allocation6 + $0x550] sm:$0xff]  }
 0x386   :  { %14703 = vmatpush3.bf16.msra.mxu0 %v15159_v12  ;;  %v13125_v34 = vpop.f32.mrb[164].mxu1  ;;  %v15176_v12 = vld [vmem:[#allocation6 + $0x508] sm:$0xff]   ;;  %v15180_v41 = vld [vmem:[#allocation6 + $0x510] sm:$0xff]  }
 0x387   :  { %v2563_v33 = vmax.f32 %v2561_v39, 0.0  ;;  %14704 = vmatprep.subr.bf16.mxu0 %v18878_v3  ;;  %v13126_v40 = vpop.f32.mrb[165].mxu1  ;;  %v15177_v39 = vld [vmem:[#allocation6 + $0x4f0] sm:$0xff]  }
 0x388   :  { %v13127_v7 = vadd.f32 %v13126_v40, %v13125_v34  ;;  %v13128_v37 = vpop.f32.mrb[166].mxu1  ;;  %v15181_v34 = vld [vmem:[#allocation6 + $0x558] sm:$0xff]   ;;  %v15184_v40 = vld [vmem:[#allocation6 + $0x520] sm:$0xff]  }
 0x389   :  { %v16797_v47 = vpack.c.bf16 %v2563_v33, %v2562_v31  ;;  %v13129_v18 = vpop.f32.mrb[167].mxu1  ;;  %v15182_v31 = vld [vmem:[#allocation6 + $0x518] sm:$0xff]   ;;  %v15183_v33 = vld [vmem:[#allocation6 + $0x560] sm:$0xff]  }
 0x38a   :  { %14705 = vmatpush3.bf16.msra.mxu0 %v15160_v10  ;;  %v16800_v19 = vadd.f32 %v13127_v7, %v16720_v57  ;;  %v13130_v59 = vadd.f32 %v13129_v18, %v13128_v37  ;;  %v15162_v57 = vld [vmem:[#allocation6 + $0x480] sm:$0xff]   ;;  %v15179_v10 = vld [vmem:[#allocation6 + $0x4b0] sm:$0xff]   ;;  %v15187_v18 = vld [vmem:[#allocation6 + $0x528] sm:$0xff]  }
 0x38c   :  { %3815 = vmatmul.mubr.bf16.gmra.mrb[184].mxu0 %v18880_v0  ;;  %3914 = vmatmul.mubr.bf16.vlgmr.msra.gmra.mrb[216].mxu1 %v18880_v0  ;;  %v16805_v23 = vadd.f32 %v13130_v59, %v16723_v15  ;;  %v15163_v15 = vld [vmem:[#allocation6 + $0x4c8] sm:$0xff]  }
 0x38d   :  { %3820 = vmatprep.mubr.bf16.mxu0 %v16725_v56  ;;  %3921 = vmatprep.mubr.bf16.mxu1 %v16725_v56 }
 0x394   :  { %3821 = vmatmul.mubr.bf16.gmra.mrb[188].mxu0 %v16709_v61  ;;  %3922 = vmatmul.mubr.bf16.gmra.mrb[220].mxu1 %v16709_v61  ;;  %v15161_v61 = vld [vmem:[#allocation6 + $0x4c0] sm:$0xff]  }
 0x395   :  { %3828 = vmatprep.mubr.bf16.mxu0 %v16740_v44  ;;  %3929 = vmatprep.mubr.bf16.mxu1 %v16740_v44 }
 0x396   :  { %13412 = vmatprep.subr.bf16.mxu1 %v15161_v61 }
 0x397   :  { %13413 = vmatpush3.bf16.msra.mxu1 %v15162_v57 }
 0x398   :  { %13414 = vmatprep.subr.bf16.mxu1 %v15163_v15 }
 0x39b   :  { %13415 = vmatpush3.bf16.msra.mxu1 %v15164_v6 }
 0x39c   :  { %3829 = vmatmul.mubr.bf16.gmra.mrb[192].mxu0 %v16725_v56  ;;  %3930 = vmatmul.mubr.bf16.gmra.mrb[224].mxu1 %v16725_v56 }
 0x39d   :  { %3836 = vmatprep.mubr.bf16.mxu0 %v18880_v0  ;;  %3937 = vmatprep.mubr.bf16.mxu1 %v18880_v0 }
 0x39e   :  { %13416 = vmatprep.subr.bf16.mxu1 %v15165_v9 }
 0x39f   :  { %13417 = vmatpush3.bf16.msra.mxu1 %v15166_v25  ;;  %v15186_v25 = vld [vmem:[#allocation6 + $0x4f8] sm:$0xff]  }
 0x3a0   :  { %13418 = vmatprep.subr.bf16.mxu1 %v15167_v1 }
 0x3a3   :  { %13419 = vmatpush3.bf16.msra.mxu1 %v15168_v8  ;;  %v15188_v8 = vld [vmem:[#allocation6 + $0x4b8] sm:$0xff]  }
 0x3a4   :  { %3837 = vmatmul.mubr.bf16.gmra.mrb[196].mxu0 %v16740_v44  ;;  %3938 = vmatmul.mubr.bf16.gmra.mrb[228].mxu1 %v16740_v44 }
 0x3a5   :  { %3844 = vmatprep.mubr.bf16.mxu0 %v18880_v0  ;;  %3943 = vmatprep.mubr.bf16.mxu1 %v18880_v0 }
 0x3a6   :  { %13420 = vmatprep.subr.bf16.mxu1 %v15169_v13  ;;  %v15189_v13 = vld [vmem:[#allocation6 + $0x570] sm:$0xff]  }
 0x3a7   :  { %13421 = vmatpush3.bf16.msra.mxu1 %v15170_v46 }
 0x3ac   :  { %3845 = vmatmul.mubr.bf16.gmra.mrb[200].mxu0 %v18880_v0  ;;  %3944 = vmatmul.mubr.bf16.gmra.mrb[232].mxu1 %v18880_v0 }
 0x3ad   :  { %3850 = vmatprep.mubr.bf16.mxu0 %v16769_v16  ;;  %3949 = vmatprep.mubr.bf16.mxu1 %v16769_v16 }
 0x3b4   :  { %3851 = vmatmul.mubr.bf16.gmra.mrb[204].mxu0 %v18880_v0  ;;  %3950 = vmatmul.mubr.bf16.gmra.mrb[236].mxu1 %v18880_v0 }
 0x3b5   :  { %3856 = vmatprep.mubr.bf16.mxu0 %v16783_v54  ;;  %3957 = vmatprep.mubr.bf16.mxu1 %v16783_v54 }
 0x3bc   :  { %3857 = vmatmul.mubr.bf16.gmra.mrb[208].mxu0 %v16769_v16  ;;  %3958 = vmatmul.mubr.bf16.gmra.mrb[240].mxu1 %v16769_v16 }
 0x3bd   :  { %3864 = vmatprep.mubr.bf16.mxu0 %v16797_v47  ;;  %3965 = vmatprep.mubr.bf16.mxu1 %v16797_v47 }
 0x3c4   :  { %3865 = vmatmul.mubr.bf16.gmra.mrb[212].mxu0 %v16783_v54  ;;  %3966 = vmatmul.mubr.bf16.gmra.mrb[244].mxu1 %v16783_v54 }
 0x3c5   :  { %3872 = vmatprep.mubr.bf16.mxu0 %v18880_v0  ;;  %3973 = vmatprep.mubr.bf16.mxu1 %v18880_v0 }
 0x3cc   :  { %3873 = vmatmul.mubr.bf16.gmra.mrb[216].mxu0 %v16797_v47  ;;  %3974 = vmatmul.mubr.bf16.gmra.mrb[248].mxu1 %v16797_v47 }
 0x3cd   :  { %3979 = vmatprep.mubr.bf16.mxu1 %v18880_v0  ;;  %14706 = vmatprep.mubr.msk.bf16.mxu0 %vm15948_vm0, %v18878_v3 }
 0x3d4   :  { %3980 = vmatmul.mubr.bf16.gmra.mrb[252].mxu1 %v18880_v0  ;;  %14707 = vmatmul.mubr.bf16.vlgmr.msra.gmra.mrb[220].mxu0 %v16725_v56  ;;  %v15171_v56 = vld [vmem:[#allocation6 + $0x4e8] sm:$0xff]  }
 0x3d5   :  { %3985 = vmatprep.mubr.bf16.mxu1 %v18880_v0  ;;  %14710 = vmatprep.mubr.msk.bf16.mxu0 %vm15948_vm0, %v18878_v3 }
 0x3d6   :  { %13422 = vmatprep.subr.bf16.mxu1 %v15171_v56 }
 0x3d7   :  { %13423 = vmatpush3.bf16.msra.mxu1 %v15172_v11  ;;  %v15190_v11 = vld [vmem:[#allocation6 + $0x530] sm:$0xff]  }
 0x3d8   :  { %13424 = vmatprep.subr.bf16.mxu1 %v15177_v39 }
 0x3db   :  { %13425 = vmatpush3.bf16.msra.mxu1 %v15179_v10 }
 0x3dc   :  { %3986 = vmatmul.mubr.bf16.gmra.mrb[0].mxu1 %v18880_v0  ;;  %14711 = vmatmul.mubr.bf16.gmra.mrb[224].mxu0 %v16740_v44  ;;  %v15173_v44 = vld [vmem:[#allocation6 + $0x540] sm:$0xff]  }
 0x3dd   :  { %3993 = vmatprep.mubr.bf16.mxu1 %v18880_v0  ;;  %14714 = vmatprep.mubr.msk.bf16.mxu0 %vm15948_vm0, %v18878_v3 }
 0x3de   :  { %13506 = vmatprep.subr.bf16.mxu0 %v15173_v44  ;;  %13426 = vmatprep.subr.bf16.mxu1 %v15186_v25 }
 0x3df   :  { %13507 = vmatpush3.bf16.msra.mxu0 %v15174_v45  ;;  %13427 = vmatpush3.bf16.msra.mxu1 %v15188_v8 }
 0x3e0   :  { %13508 = vmatprep.subr.bf16.mxu0 %v15175_v48  ;;  %v15191_v48 = vld [vmem:[#allocation6 + $0x578] sm:$0xff]  }
 0x3e3   :  { %13509 = vmatpush3.bf16.msra.mxu0 %v15176_v12 }
 0x3e4   :  { %3994 = vmatmul.mubr.bf16.gmra.mrb[4].mxu1 %v18880_v0  ;;  %14715 = vmatmul.mubr.bf16.gmra.mrb[228].mxu0 %v18880_v0 }
 0x3e5   :  { %4001 = vmatprep.mubr.bf16.mxu1 %v18880_v0  ;;  %14718 = vmatprep.mubr.msk.bf16.mxu0 %vm15948_vm0, %v18878_v3 }
 0x3e6   :  { %13510 = vmatprep.subr.bf16.mxu0 %v15178_v5  ;;  %v15192_v5 = vld [vmem:[#allocation6 + $0x538] sm:$0xff]  }
 0x3e7   :  { %13511 = vmatpush3.bf16.msra.mxu0 %v15180_v41 }
 0x3e8   :  { %13512 = vmatprep.subr.bf16.mxu0 %v15181_v34 }
 0x3eb   :  { %13513 = vmatpush3.bf16.msra.mxu0 %v15182_v31 }
 0x3ec   :  { %4002 = vmatmul.mubr.bf16.gmra.mrb[8].mxu1 %v18880_v0  ;;  %14719 = vmatmul.mubr.bf16.gmra.mrb[232].mxu0 %v18880_v0 }
 0x3ed   :  { %14722 = vmatprep.mubr.msk.bf16.mxu0 %vm15948_vm0, %v18878_v3  ;;  %5194 = vmatprep.mubr.bf16.mxu1 %v18880_v0 }
 0x3ee   :  { %13514 = vmatprep.subr.bf16.mxu0 %v15183_v33 }
 0x3ef   :  { %13515 = vmatpush3.bf16.msra.mxu0 %v15184_v40 }
 0x3f4   :  { %14723 = vmatmul.mubr.bf16.gmra.mrb[236].mxu0 %v16769_v16  ;;  %v15185_v16 = vld [vmem:[#allocation6 + $0x568] sm:$0xff]   ;;  %5195 = vmatmul.mubr.bf16.vlgmr.msra.gmra.mrb[12].mxu1 %v18880_v0 }
 0x3f5   :  { %14726 = vmatprep.mubr.msk.bf16.mxu0 %vm15948_vm0, %v18878_v3  ;;  %13516 = vmatprep.subr.bf16.mxu0 %v15185_v16 }
 0x3f6   :  { %13517 = vmatpush3.bf16.msra.mxu0 %v15187_v18  ;;  %5202 = vmatprep.mubr.bf16.mxu1 %v18880_v0 }
 0x3f7   :  { %13518 = vmatprep.subr.bf16.mxu0 %v15189_v13 }
 0x3fa   :  { %13519 = vmatpush3.bf16.msra.mxu0 %v15190_v11 }
 0x3fb   :  { %13520 = vmatprep.subr.bf16.mxu0 %v15191_v48 }
 0x3fc   :  { %14727 = vmatmul.mubr.bf16.gmra.mrb[240].mxu0 %v16783_v54  ;;  %5203 = vmatmul.mubr.bf16.gmra.mrb[16].mxu1 %v18880_v0 }
 0x3fd   :  { %14730 = vmatprep.mubr.msk.bf16.mxu0 %vm15948_vm0, %v18878_v3  ;;  %5210 = vmatprep.mubr.bf16.mxu1 %v18880_v0 }
 0x3fe   :  { %13521 = vmatpush3.bf16.msra.mxu0 %v15192_v5 }
 0x3ff   :  { %v13061_v7 = vpop.f32.mrb[136].mxu0  ;;  %v13131_v37 = vpop.f32.mrb[168].mxu1 }
 0x400   :  { %v13062_v59 = vpop.f32.mrb[137].mxu0  ;;  %v13132_v61 = vpop.f32.mrb[169].mxu1 }
 0x401   :  { %v16868_v57 = vadd.f32 %v13062_v59, %v13061_v7  ;;  %v13133_v15 = vadd.f32 %v13132_v61, %v13131_v37  ;;  %v13064_v6 = vpop.f32.mrb[138].mxu0  ;;  %v13134_v9 = vpop.f32.mrb[170].mxu1  ;;  %v15193_v37 = vld [vmem:[#allocation6 + $0x5c0] sm:$0xff]  }
 0x402   :  { %v13065_v1 = vpop.f32.mrb[139].mxu0  ;;  %v13135_v54 = vpop.f32.mrb[171].mxu1  ;;  %13600 = vmatprep.subr.bf16.mxu1 %v15193_v37 }
 0x403   :  { %v16871_v46 = vadd.f32 %v13133_v15, %v16736_v60  ;;  %v16873_v56 = vadd.f32 %v13065_v1, %v13064_v6  ;;  %v13136_v44 = vadd.f32 %v13135_v54, %v13134_v9  ;;  %v15194_v15 = vld [vmem:[#allocation6 + $0x580] sm:$0xff]  }
 0x404   :  { %14731 = vmatmul.mubr.bf16.gmra.mrb[244].mxu0 %v16797_v47  ;;  %13601 = vmatpush3.bf16.msra.mxu1 %v15194_v15 }
 0x405   :  { %v16877_v45 = vadd.f32 %v13136_v44, %v16738_v36  ;;  %14734 = vmatprep.mubr.msk.bf16.mxu0 %vm15948_vm0, %v18878_v3  ;;  %5211 = vmatmul.mubr.bf16.gmra.mrb[20].mxu1 %v18880_v0 }
 0x406   :  { %5218 = vmatprep.mubr.bf16.mxu1 %v18880_v0 }
 0x407   :  { %v13067_v12 = vpop.f32.mrb[140].mxu0  ;;  %v13137_v60 = vpop.f32.mrb[172].mxu1 }
 0x408   :  { %v13068_v41 = vpop.f32.mrb[141].mxu0  ;;  %v13138_v39 = vpop.f32.mrb[173].mxu1 }
 0x409   :  { %v16883_v47 = vadd.f32 %v13068_v41, %v13067_v12  ;;  %v13139_v36 = vadd.f32 %v13138_v39, %v13137_v60  ;;  %v13070_v10 = vpop.f32.mrb[142].mxu0  ;;  %v13140_v34 = vpop.f32.mrb[174].mxu1  ;;  %v15195_v39 = vld [vmem:[#allocation6 + $0x5c8] sm:$0xff]  }
 0x40a   :  { %v13071_v31 = vpop.f32.mrb[143].mxu0  ;;  %v13141_v33 = vpop.f32.mrb[175].mxu1  ;;  %13602 = vmatprep.subr.bf16.mxu1 %v15195_v39 }
 0x40b   :  { %v16886_v40 = vadd.f32 %v13139_v36, %v16748_v58  ;;  %v16888_v16 = vadd.f32 %v13071_v31, %v13070_v10  ;;  %v13142_v7 = vadd.f32 %v13141_v33, %v13140_v34  ;;  %v15196_v36 = vld [vmem:[#allocation6 + $0x588] sm:$0xff]  }
 0x40c   :  { %14735 = vmatmul.mubr.bf16.gmra.mrb[248].mxu0 %v18880_v0  ;;  %13603 = vmatpush3.bf16.msra.mxu1 %v15196_v36 }
 0x40d   :  { %v16892_v18 = vadd.f32 %v13142_v7, %v16750_v17  ;;  %14738 = vmatprep.mubr.msk.bf16.mxu0 %vm15948_vm0, %v18878_v3  ;;  %5219 = vmatmul.mubr.bf16.gmra.mrb[24].mxu1 %v18880_v0 }
 0x40e   :  { %5224 = vmatprep.mubr.bf16.mxu1 %v18880_v0 }
 0x40f   :  { %v13073_v59 = vpop.f32.mrb[144].mxu0  ;;  %v13143_v61 = vpop.f32.mrb[176].mxu1 }
 0x410   :  { %v13074_v58 = vpop.f32.mrb[145].mxu0  ;;  %v13144_v6 = vpop.f32.mrb[177].mxu1 }
 0x411   :  { %v16898_v9 = vadd.f32 %v13074_v58, %v13073_v59  ;;  %v13076_v25 = vpop.f32.mrb[146].mxu0  ;;  %v13146_v1 = vpop.f32.mrb[178].mxu1 }
 0x412   :  { %v13077_v17 = vpop.f32.mrb[147].mxu0  ;;  %v13147_v54 = vpop.f32.mrb[179].mxu1 }
 0x413   :  { %v16900_v8 = vadd.f32 %v13077_v17, %v13076_v25 }
 0x414   :  { %14739 = vmatmul.mubr.bf16.gmra.mrb[252].mxu0 %v18880_v0 }
 0x415   :  { %14742 = vmatprep.mubr.msk.bf16.mxu0 %vm15948_vm0, %v18878_v3  ;;  %5225 = vmatmul.mubr.bf16.gmra.mrb[28].mxu1 %v18880_v0 }
 0x417   :  { %v13079_v13 = vpop.f32.mrb[148].mxu0  ;;  %v13149_v44 = vpop.f32.mrb[180].mxu1 }
 0x418   :  { %v13080_v11 = vpop.f32.mrb[149].mxu0  ;;  %v13150_v48 = vpop.f32.mrb[181].mxu1 }
 0x419   :  { %v13082_v12 = vpop.f32.mrb[150].mxu0  ;;  %v13152_v60 = vpop.f32.mrb[182].mxu1 }
 0x41a   :  { %v13083_v5 = vpop.f32.mrb[151].mxu0  ;;  %v13153_v41 = vpop.f32.mrb[183].mxu1 }
 0x41c   :  { %14743 = vmatmul.mubr.bf16.gmra.mrb[0].mxu0 %v18880_v0 }
 0x41d   :  { %14746 = vmatprep.mubr.msk.bf16.mxu0 %vm15948_vm0, %v18878_v3 }
 0x41f   :  { %v13085_v10 = vpop.f32.mrb[152].mxu0  ;;  %v13155_v34 = vpop.f32.mrb[184].mxu1 }
 0x420   :  { %v13086_v31 = vpop.f32.mrb[153].mxu0  ;;  %v13156_v33 = vpop.f32.mrb[185].mxu1 }
 0x421   :  { %v13157_v7 = vadd.f32 %v13156_v33, %v13155_v34  ;;  %v13088_v37 = vpop.f32.mrb[154].mxu0  ;;  %v13158_v59 = vpop.f32.mrb[186].mxu1  ;;  %v15197_v33 = vld [vmem:[#allocation6 + $0x5d0] sm:$0xff]  }
 0x422   :  { %v13089_v61 = vpop.f32.mrb[155].mxu0  ;;  %v13159_v15 = vpop.f32.mrb[187].mxu1  ;;  %13604 = vmatprep.subr.bf16.mxu1 %v15197_v33 }
 0x423   :  { %v16913_v58 = vadd.f32 %v13157_v7, %v16868_v57  ;;  %v13160_v6 = vadd.f32 %v13159_v15, %v13158_v59 }
 0x424   :  { %14747 = vmatmul.mubr.bf16.gmra.mrb[4].mxu0 %v18880_v0 }
 0x425   :  { %v16917_v25 = vadd.f32 %v13160_v6, %v16873_v56  ;;  %14750 = vmatprep.mubr.msk.bf16.mxu0 %vm15948_vm0, %v18878_v3  ;;  %v15198_v6 = vld [vmem:[#allocation6 + $0x590] sm:$0xff]  }
 0x426   :  { %13605 = vmatpush3.bf16.msra.mxu1 %v15198_v6 }
 0x427   :  { %v13091_v1 = vpop.f32.mrb[156].mxu0  ;;  %v13161_v17 = vpop.f32.mrb[188].mxu1 }
 0x428   :  { %v13092_v54 = vpop.f32.mrb[157].mxu0  ;;  %v13162_v13 = vpop.f32.mrb[189].mxu1 }
 0x429   :  { %v16922_v44 = vadd.f32 %v13092_v54, %v13091_v1  ;;  %v13163_v11 = vadd.f32 %v13162_v13, %v13161_v17  ;;  %v13094_v57 = vpop.f32.mrb[158].mxu0  ;;  %v13164_v48 = vpop.f32.mrb[190].mxu1 }
 0x42a   :  { %v13095_v12 = vpop.f32.mrb[159].mxu0  ;;  %v13165_v60 = vpop.f32.mrb[191].mxu1 }
 0x42b   :  { %v16925_v5 = vadd.f32 %v13163_v11, %v16883_v47  ;;  %v16927_v56 = vadd.f32 %v13095_v12, %v13094_v57  ;;  %v13166_v41 = vadd.f32 %v13165_v60, %v13164_v48 }
 0x42c   :  { %14751 = vmatmul.mubr.bf16.gmra.mrb[8].mxu0 %v18880_v0 }
 0x42d   :  { %v16931_v39 = vadd.f32 %v13166_v41, %v16888_v16  ;;  %14754 = vmatprep.mubr.msk.bf16.mxu0 %vm15948_vm0, %v18878_v3 }
 0x42f   :  { %v13097_v36 = vpop.f32.mrb[160].mxu0  ;;  %v13167_v10 = vpop.f32.mrb[192].mxu1 }
 0x430   :  { %v13098_v34 = vpop.f32.mrb[161].mxu0  ;;  %v13168_v31 = vpop.f32.mrb[193].mxu1 }
 0x431   :  { %v16935_v7 = vadd.f32 %v13098_v34, %v13097_v36  ;;  %v13169_v47 = vadd.f32 %v13168_v31, %v13167_v10  ;;  %v13100_v37 = vpop.f32.mrb[162].mxu0  ;;  %v13170_v59 = vpop.f32.mrb[194].mxu1  ;;  %v15199_v34 = vld [vmem:[#allocation6 + $0x5d8] sm:$0xff]  }
 0x432   :  { %v13101_v61 = vpop.f32.mrb[163].mxu0  ;;  %v13171_v15 = vpop.f32.mrb[195].mxu1  ;;  %v15200_v31 = vld [vmem:[#allocation6 + $0x598] sm:$0xff]   ;;  %13606 = vmatprep.subr.bf16.mxu1 %v15199_v34 }
 0x433   :  { %v16938_v16 = vadd.f32 %v13169_v47, %v16898_v9  ;;  %v16940_v1 = vadd.f32 %v13101_v61, %v13100_v37  ;;  %v13172_v17 = vadd.f32 %v13171_v15, %v13170_v59  ;;  %13607 = vmatpush3.bf16.msra.mxu1 %v15200_v31 }
 0x434   :  { %14755 = vmatmul.mubr.bf16.gmra.mrb[12].mxu0 %v18880_v0 }
 0x435   :  { %v16944_v54 = vadd.f32 %v13172_v17, %v16900_v8  ;;  %5323 = vmatprep.mubr.bf16.mxu0 %v18880_v0 }
 0x437   :  { %v13103_v13 = vpop.f32.mrb[164].mxu0  ;;  %v13173_v11 = vpop.f32.mrb[196].mxu1 }
 0x438   :  { %v13104_v57 = vpop.f32.mrb[165].mxu0  ;;  %v13174_v48 = vpop.f32.mrb[197].mxu1 }
 0x439   :  { %v16947_v12 = vadd.f32 %v13104_v57, %v13103_v13  ;;  %v13106_v60 = vpop.f32.mrb[166].mxu0  ;;  %v13176_v9 = vpop.f32.mrb[198].mxu1  ;;  %v15201_v57 = vld [vmem:[#allocation6 + $0x5e0] sm:$0xff]  }
 0x43a   :  { %v13107_v41 = vpop.f32.mrb[167].mxu0  ;;  %v13177_v36 = vpop.f32.mrb[199].mxu1  ;;  %v15202_v48 = vld [vmem:[#allocation6 + $0x5a0] sm:$0xff]   ;;  %13608 = vmatprep.subr.bf16.mxu1 %v15201_v57 }
 0x43b   :  { %v16949_v10 = vadd.f32 %v13107_v41, %v13106_v60  ;;  %13609 = vmatpush3.bf16.msra.mxu1 %v15202_v48 }
 0x43c   :  { %5324 = vmatmul.mubr.bf16.vlgmr.msra.gmra.mrb[16].mxu0 %v18880_v0 }
 0x43f   :  { %v13179_v8 = vpop.f32.mrb[200].mxu1  ;;  %v13219_v33 = vpop.f32.mrb[168].mxu0 }
 0x440   :  { %v13180_v47 = vpop.f32.mrb[201].mxu1  ;;  %v13220_v37 = vpop.f32.mrb[169].mxu0 }
 0x441   :  { %v13221_v59 = vadd.f32 %v13220_v37, %v13219_v33  ;;  %v13182_v61 = vpop.f32.mrb[202].mxu1  ;;  %v13222_v15 = vpop.f32.mrb[170].mxu0 }
 0x442   :  { %v13183_v6 = vpop.f32.mrb[203].mxu1  ;;  %v13223_v17 = vpop.f32.mrb[171].mxu0 }
 0x443   :  { %v16953_v13 = vadd.f32 %v13221_v59, %v16800_v19  ;;  %v13224_v11 = vadd.f32 %v13223_v17, %v13222_v15 }
 0x445   :  { %v16956_v60 = vadd.f32 %v13224_v11, %v16805_v23 }
 0x447   :  { %v13185_v9 = vpop.f32.mrb[204].mxu1  ;;  %v13225_v41 = vpop.f32.mrb[172].mxu0 }
 0x448   :  { %v13186_v36 = vpop.f32.mrb[205].mxu1  ;;  %v13226_v34 = vpop.f32.mrb[173].mxu0 }
 0x449   :  { %v13187_v31 = vadd.f32 %v13186_v36, %v13185_v9  ;;  %v13227_v8 = vadd.f32 %v13226_v34, %v13225_v41  ;;  %v13188_v33 = vpop.f32.mrb[206].mxu1  ;;  %v13228_v47 = vpop.f32.mrb[174].mxu0 }
 0x44a   :  { %v13189_v37 = vpop.f32.mrb[207].mxu1  ;;  %v13229_v61 = vpop.f32.mrb[175].mxu0 }
 0x44b   :  { %v16959_v19 = vadd.f32 %v13187_v31, %v16922_v44  ;;  %v16962_v59 = vadd.f32 %v13227_v8, %v16871_v46  ;;  %v13190_v23 = vadd.f32 %v13189_v37, %v13188_v33  ;;  %v13230_v15 = vadd.f32 %v13229_v61, %v13228_v47 }
 0x44d   :  { %v16965_v6 = vadd.f32 %v13190_v23, %v16927_v56  ;;  %v16968_v17 = vadd.f32 %v13230_v15, %v16877_v45 }
 0x44f   :  { %v13191_v11 = vpop.f32.mrb[208].mxu1  ;;  %v13231_v57 = vpop.f32.mrb[176].mxu0 }
 0x450   :  { %v13192_v48 = vpop.f32.mrb[209].mxu1  ;;  %v13232_v9 = vpop.f32.mrb[177].mxu0 }
 0x451   :  { %v13193_v41 = vadd.f32 %v13192_v48, %v13191_v11  ;;  %v13233_v36 = vadd.f32 %v13232_v9, %v13231_v57  ;;  %v13194_v34 = vpop.f32.mrb[210].mxu1  ;;  %v13234_v44 = vpop.f32.mrb[178].mxu0  ;;  %v15203_v11 = vld [vmem:[#allocation6 + $0x5e8] sm:$0xff]  }
 0x452   :  { %v13195_v31 = vpop.f32.mrb[211].mxu1  ;;  %v13235_v55 = vpop.f32.mrb[179].mxu0  ;;  %v15204_v57 = vld [vmem:[#allocation6 + $0x5a8] sm:$0xff]   ;;  %13610 = vmatprep.subr.bf16.mxu1 %v15203_v11 }
 0x453   :  { %v16971_v46 = vadd.f32 %v13193_v41, %v16935_v7  ;;  %v16974_v8 = vadd.f32 %v13233_v36, %v16886_v40  ;;  %v13196_v56 = vadd.f32 %v13195_v31, %v13194_v34  ;;  %v13236_v33 = vadd.f32 %v13235_v55, %v13234_v44  ;;  %13611 = vmatpush3.bf16.msra.mxu1 %v15204_v57 }
 0x455   :  { %v16977_v45 = vadd.f32 %v13196_v56, %v16940_v1  ;;  %v16980_v47 = vadd.f32 %v13236_v33, %v16892_v18 }
 0x457   :  { %v13197_v37 = vpop.f32.mrb[212].mxu1  ;;  %v13237_v61 = vpop.f32.mrb[180].mxu0 }
 0x458   :  { %v13198_v23 = vpop.f32.mrb[213].mxu1  ;;  %v13238_v15 = vpop.f32.mrb[181].mxu0 }
 0x459   :  { %v13199_v48 = vadd.f32 %v13198_v23, %v13197_v37  ;;  %v13200_v7 = vpop.f32.mrb[214].mxu1  ;;  %v13240_v9 = vpop.f32.mrb[182].mxu0 }
 0x45a   :  { %v13201_v41 = vpop.f32.mrb[215].mxu1  ;;  %v13241_v40 = vpop.f32.mrb[183].mxu0 }
 0x45b   :  { %v16983_v55 = vadd.f32 %v13199_v48, %v16947_v12  ;;  %v13202_v1 = vadd.f32 %v13201_v41, %v13200_v7  ;;  %v15205_v12 = vld [vmem:[#allocation6 + $0x5f0] sm:$0xff]  }
 0x45c   :  { %v15206_v48 = vld [vmem:[#allocation6 + $0x5b0] sm:$0xff]   ;;  %13612 = vmatprep.subr.bf16.mxu1 %v15205_v12 }
 0x45d   :  { %v16986_v18 = vadd.f32 %v13202_v1, %v16949_v10  ;;  %13613 = vmatpush3.bf16.msra.mxu1 %v15206_v48 }
 0x45f   :  { %v13243_v36 = vpop.f32.mrb[184].mxu0  ;;  %v13313_v34 = vpop.f32.mrb[216].mxu1 }
 0x460   :  { %v13244_v44 = vpop.f32.mrb[185].mxu0  ;;  %v13314_v31 = vpop.f32.mrb[217].mxu1 }
 0x461   :  { %v13315_v56 = vadd.f32 %v13314_v31, %v13313_v34  ;;  %v13246_v33 = vpop.f32.mrb[186].mxu0  ;;  %v13316_v37 = vpop.f32.mrb[218].mxu1 }
 0x462   :  { %v13247_v61 = vpop.f32.mrb[187].mxu0  ;;  %v13317_v23 = vpop.f32.mrb[219].mxu1 }
 0x463   :  { %v13318_v15 = vadd.f32 %v13317_v23, %v13316_v37  ;;  %v16989_v11 = vadd.f32 %v13315_v56, %v16953_v13  ;;  %v15207_v37 = vld [vmem:[#allocation6 + $0x5f8] sm:$0xff]  }
 0x464   :  { %v15208_v61 = vld [vmem:[#allocation6 + $0x5b8] sm:$0xff]   ;;  %13614 = vmatprep.subr.bf16.mxu1 %v15207_v37 }
 0x465   :  { %v16992_v57 = vadd.f32 %v13318_v15, %v16956_v60  ;;  %13615 = vmatpush3.bf16.msra.mxu1 %v15208_v61 }
 0x466   :  { %14758 = vmatprep.subr.bf16.mxu1 %v18878_v3 }
 0x467   :  { %v13249_v10 = vpop.f32.mrb[188].mxu0  ;;  %v13319_v7 = vpop.f32.mrb[220].mxu1 }
 0x468   :  { %v13250_v9 = vpop.f32.mrb[189].mxu0  ;;  %v13320_v41 = vpop.f32.mrb[221].mxu1 }
 0x469   :  { %v13251_v40 = vadd.f32 %v13250_v9, %v13249_v10  ;;  %v13321_v1 = vadd.f32 %v13320_v41, %v13319_v7  ;;  %v13252_v36 = vpop.f32.mrb[190].mxu0  ;;  %v13322_v34 = vpop.f32.mrb[222].mxu1  ;;  %v15209_v7 = vld [vmem:[#allocation6 + $0x640] sm:$0xff]  }
 0x46a   :  { %v13253_v44 = vpop.f32.mrb[191].mxu0  ;;  %v13323_v31 = vpop.f32.mrb[223].mxu1  ;;  %v15210_v9 = vld [vmem:[#allocation6 + $0x600] sm:$0xff]   ;;  %13694 = vmatprep.subr.bf16.mxu0 %v15209_v7  ;;  %v15212_v7 = vld [vmem:[#allocation6 + $0x648] sm:$0xff]  }
 0x46b   :  { %v16995_v13 = vadd.f32 %v13251_v40, %v16913_v58  ;;  %v13254_v56 = vadd.f32 %v13253_v44, %v13252_v36  ;;  %v13324_v33 = vadd.f32 %v13323_v31, %v13322_v34  ;;  %v16998_v60 = vadd.f32 %v13321_v1, %v16962_v59  ;;  %13695 = vmatpush3.bf16.msra.mxu0 %v15210_v9 }
 0x46c   :  { %13696 = vmatprep.subr.bf16.mxu0 %v15212_v7 }
 0x46d   :  { %v17001_v23 = vadd.f32 %v13254_v56, %v16917_v25  ;;  %v17004_v15 = vadd.f32 %v13324_v33, %v16968_v17 }
 0x46f   :  { %v13255_v12 = vpop.f32.mrb[192].mxu0  ;;  %v13325_v48 = vpop.f32.mrb[224].mxu1 }
 0x470   :  { %v13256_v10 = vpop.f32.mrb[193].mxu0  ;;  %v13326_v58 = vpop.f32.mrb[225].mxu1 }
 0x471   :  { %v13257_v59 = vadd.f32 %v13256_v10, %v13255_v12  ;;  %v13327_v41 = vadd.f32 %v13326_v58, %v13325_v48  ;;  %v13258_v40 = vpop.f32.mrb[194].mxu0  ;;  %v13328_v1 = vpop.f32.mrb[226].mxu1 }
 0x472   :  { %v13259_v36 = vpop.f32.mrb[195].mxu0  ;;  %v13329_v25 = vpop.f32.mrb[227].mxu1 }
 0x473   :  { %v17008_v17 = vadd.f32 %v13257_v59, %v16925_v5  ;;  %v13260_v34 = vadd.f32 %v13259_v36, %v13258_v40  ;;  %v13330_v44 = vadd.f32 %v13329_v25, %v13328_v1  ;;  %v17011_v31 = vadd.f32 %v13327_v41, %v16974_v8  ;;  %v15213_v1 = vld [vmem:[#allocation6 + $0x608] sm:$0xff]   ;;  %v15215_v41 = vld [vmem:[#allocation6 + $0x610] sm:$0xff]  }
 0x474   :  { %13697 = vmatpush3.bf16.msra.mxu0 %v15213_v1 }
 0x475   :  { %v17014_v56 = vadd.f32 %v13260_v34, %v16931_v39  ;;  %v17017_v33 = vadd.f32 %v13330_v44, %v16980_v47  ;;  %v15214_v47 = vld [vmem:[#allocation6 + $0x650] sm:$0xff]  }
 0x476   :  { %13698 = vmatprep.subr.bf16.mxu0 %v15214_v47 }
 0x477   :  { %v13261_v37 = vpop.f32.mrb[196].mxu0  ;;  %v13331_v61 = vpop.f32.mrb[228].mxu1 }
 0x478   :  { %v13262_v12 = vpop.f32.mrb[197].mxu0  ;;  %v13332_v48 = vpop.f32.mrb[229].mxu1  ;;  %13699 = vmatpush3.bf16.msra.mxu0 %v15215_v41  ;;  %v15221_v41 = vld [vmem:[#allocation6 + $0x668] sm:$0xff]  }
 0x479   :  { %v13263_v10 = vadd.f32 %v13262_v12, %v13261_v37  ;;  %v13264_v58 = vpop.f32.mrb[198].mxu0  ;;  %v13334_v5 = vpop.f32.mrb[230].mxu1  ;;  %v15216_v12 = vld [vmem:[#allocation6 + $0x658] sm:$0xff]  }
 0x47a   :  { %v13265_v59 = vpop.f32.mrb[199].mxu0  ;;  %v13335_v40 = vpop.f32.mrb[231].mxu1  ;;  %13700 = vmatprep.subr.bf16.mxu0 %v15216_v12  ;;  %v15220_v5 = vld [vmem:[#allocation6 + $0x620] sm:$0xff]   ;;  %v15223_v12 = vld [vmem:[#allocation6 + $0x670] sm:$0xff]  }
 0x47b   :  { %v17020_v8 = vadd.f32 %v13263_v10, %v16938_v16  ;;  %v13266_v9 = vadd.f32 %v13265_v59, %v13264_v58  ;;  %v15217_v10 = vld [vmem:[#allocation6 + $0x618] sm:$0xff]   ;;  %v15219_v58 = vld [vmem:[#allocation6 + $0x660] sm:$0xff]  }
 0x47c   :  { %13701 = vmatpush3.bf16.msra.mxu0 %v15217_v10 }
 0x47d   :  { %v17023_v39 = vadd.f32 %v13266_v9, %v16944_v54  ;;  %13702 = vmatprep.subr.bf16.mxu0 %v15219_v58 }
 0x47f   :  { %v13267_v36 = vpop.f32.mrb[200].mxu0  ;;  %v13337_v25 = vpop.f32.mrb[232].mxu1 }
 0x480   :  { %v13268_v34 = vpop.f32.mrb[201].mxu0  ;;  %v13338_v44 = vpop.f32.mrb[233].mxu1  ;;  %13703 = vmatpush3.bf16.msra.mxu0 %v15220_v5 }
 0x481   :  { %v13270_v37 = vpop.f32.mrb[202].mxu0  ;;  %v13340_v61 = vpop.f32.mrb[234].mxu1  ;;  %v15222_v34 = vld [vmem:[#allocation6 + $0x628] sm:$0xff]   ;;  %13704 = vmatprep.subr.bf16.mxu0 %v15221_v41 }
 0x482   :  { %v13271_v48 = vpop.f32.mrb[203].mxu0  ;;  %v13341_v16 = vpop.f32.mrb[235].mxu1 }
 0x483   :  { %v15224_v48 = vld [vmem:[#allocation6 + $0x630] sm:$0xff]  }
 0x484   :  { %13705 = vmatpush3.bf16.msra.mxu0 %v15222_v34 }
 0x485   :  { %13706 = vmatprep.subr.bf16.mxu0 %v15223_v12 }
 0x487   :  { %v13273_v54 = vpop.f32.mrb[204].mxu0  ;;  %v13343_v7 = vpop.f32.mrb[236].mxu1 }
 0x488   :  { %v13274_v59 = vpop.f32.mrb[205].mxu0  ;;  %v13344_v40 = vpop.f32.mrb[237].mxu1  ;;  %13707 = vmatpush3.bf16.msra.mxu0 %v15224_v48 }
 0x489   :  { %v13345_v1 = vadd.f32 %v13344_v40, %v13343_v7  ;;  %v13276_v9 = vpop.f32.mrb[206].mxu0  ;;  %v13346_v47 = vpop.f32.mrb[238].mxu1 }
 0x48a   :  { %v13277_v36 = vpop.f32.mrb[207].mxu0  ;;  %v13347_v25 = vpop.f32.mrb[239].mxu1  ;;  %v15226_v9 = vld [vmem:[#allocation6 + $0x678] sm:$0xff]  }
 0x48b   :  { %v13348_v44 = vadd.f32 %v13347_v25, %v13346_v47  ;;  %v17026_v37 = vadd.f32 %v13345_v1, %v16995_v13  ;;  %v15227_v47 = vld [vmem:[#allocation6 + $0x638] sm:$0xff]   ;;  %13708 = vmatprep.subr.bf16.mxu0 %v15226_v9 }
 0x48c   :  { %13709 = vmatpush3.bf16.msra.mxu0 %v15227_v47 }
 0x48d   :  { %v17029_v61 = vadd.f32 %v13348_v44, %v17001_v23 }
 0x48f   :  { %v13279_v16 = vpop.f32.mrb[208].mxu0  ;;  %v13349_v10 = vpop.f32.mrb[240].mxu1 }
 0x490   :  { %v13280_v58 = vpop.f32.mrb[209].mxu0  ;;  %v13350_v5 = vpop.f32.mrb[241].mxu1 }
 0x491   :  { %v13281_v54 = vadd.f32 %v13280_v58, %v13279_v16  ;;  %v13351_v7 = vadd.f32 %v13350_v5, %v13349_v10  ;;  %v13282_v59 = vpop.f32.mrb[210].mxu0  ;;  %v13352_v40 = vpop.f32.mrb[242].mxu1 }
 0x492   :  { %v13283_v13 = vpop.f32.mrb[211].mxu0  ;;  %v13353_v1 = vpop.f32.mrb[243].mxu1 }
 0x493   :  { %v17032_v41 = vadd.f32 %v13281_v54, %v16959_v19  ;;  %v13284_v23 = vadd.f32 %v13283_v13, %v13282_v59  ;;  %v13354_v36 = vadd.f32 %v13353_v1, %v13352_v40  ;;  %v17035_v25 = vadd.f32 %v13351_v7, %v17008_v17 }
 0x495   :  { %v17038_v34 = vadd.f32 %v13284_v23, %v16965_v6  ;;  %v17041_v44 = vadd.f32 %v13354_v36, %v17014_v56 }
 0x497   :  { %v13285_v12 = vpop.f32.mrb[212].mxu0  ;;  %v13355_v48 = vpop.f32.mrb[244].mxu1 }
 0x498   :  { %v13286_v16 = vpop.f32.mrb[213].mxu0  ;;  %v13356_v10 = vpop.f32.mrb[245].mxu1 }
 0x499   :  { %v13287_v58 = vadd.f32 %v13286_v16, %v13285_v12  ;;  %v13357_v19 = vadd.f32 %v13356_v10, %v13355_v48  ;;  %v13288_v5 = vpop.f32.mrb[214].mxu0  ;;  %v13358_v54 = vpop.f32.mrb[246].mxu1 }
 0x49a   :  { %v13289_v59 = vpop.f32.mrb[215].mxu0  ;;  %v13359_v40 = vpop.f32.mrb[247].mxu1 }
 0x49b   :  { %v17044_v17 = vadd.f32 %v13287_v58, %v16971_v46  ;;  %v13290_v7 = vadd.f32 %v13289_v59, %v13288_v5  ;;  %v13360_v9 = vadd.f32 %v13359_v40, %v13358_v54  ;;  %v17047_v6 = vadd.f32 %v13357_v19, %v17020_v8  ;;  %v17062_v40 = vld [vmem:[#allocation9 + $0x2] ss:$0 sm:$0xff] }
 0x49d   :  { %v17050_v56 = vadd.f32 %v13290_v7, %v16977_v45  ;;  %v17053_v13 = vadd.f32 %v13360_v9, %v17023_v39 }
 0x49f   :  { %v13291_v1 = vpop.f32.mrb[216].mxu0  ;;  %v13361_v47 = vpop.f32.mrb[248].mxu1 }
 0x4a0   :  { %v13292_v23 = vpop.f32.mrb[217].mxu0  ;;  %v13362_v36 = vpop.f32.mrb[249].mxu1 }
 0x4a1   :  { %v13293_v12 = vadd.f32 %v13292_v23, %v13291_v1  ;;  %v13294_v48 = vpop.f32.mrb[218].mxu0  ;;  %v13364_v16 = vpop.f32.mrb[250].mxu1  ;;  %v17064_v1 = vld [vmem:[#allocation8] ss:$0 sm:$0xff] }
 0x4a2   :  { %v13295_v46 = vpop.f32.mrb[219].mxu0  ;;  %v13365_v10 = vpop.f32.mrb[251].mxu1 }
 0x4a3   :  { %v17056_v58 = vadd.f32 %v13293_v12, %v16983_v55  ;;  %v13296_v8 = vadd.f32 %v13295_v46, %v13294_v48 }
 0x4a5   :  { %v17059_v19 = vadd.f32 %v13296_v8, %v16986_v18 }
 0x4a7   :  { %v4044_v45 = vpop.f32.mrb[220].mxu0  ;;  %v13367_v5 = vpop.f32.mrb[252].mxu1 }
 0x4a8   :  { %v4045_v39 = vadd.f32 %v4044_v45, %v16989_v11  ;;  %v14708_v54 = vpop.f32.mrb[221].mxu0  ;;  %v13368_v59 = vpop.f32.mrb[253].mxu1 }
 0x4a9   :  { %v4047_v7 = vpop.f32.mrb[222].mxu0  ;;  %v13370_v9 = vpop.f32.mrb[254].mxu1 }
 0x4aa   :  { %v4140_v47 = vmul.f32 %v17064_v1, %v4045_v39  ;;  %v4048_v55 = vadd.f32 %v4047_v7, %v16992_v57  ;;  %v14709_v23 = vpop.f32.mrb[223].mxu0  ;;  %v13371_v36 = vpop.f32.mrb[255].mxu1 }
 0x4ac   :  { %v4146_v18 = vadd.f32 %v17062_v40, %v4140_v47  ;;  %v4141_v12 = vmul.f32 %v17064_v1, %v4048_v55 }
 0x4ae   :  { %v17072_v11 = vadd.f32 %v4146_v18, %v849_v26  ;;  %v4147_v48 = vadd.f32 %v17062_v40, %v4141_v12 }
 0x4af   :  { %v13373_v16 = vpop.f32.mrb[0].mxu1  ;;  %v4052_v46 = vpop.f32.mrb[224].mxu0 }
 0x4b0   :  { %v17077_v10 = vadd.f32 %v4147_v48, %v850_v32  ;;  %v4053_v57 = vadd.f32 %v4052_v46, %v16998_v60  ;;  %v13374_v8 = vpop.f32.mrb[1].mxu1  ;;  %v14712_v45 = vpop.f32.mrb[225].mxu0  ;;  %v18873_v59 = vmax.f32 %v17072_v11, 0.0 }
 0x4b1   :  { %v13375_v5 = vadd.f32 %v13374_v8, %v13373_v16  ;;  %v13376_v39 = vpop.f32.mrb[2].mxu1  ;;  %v4055_v54 = vpop.f32.mrb[226].mxu0 }
 0x4b2   :  { %v18872_v21 = vmax.f32 %v17077_v10, 0.0  ;;  %v4154_v26 = vmul.f32 %v17064_v1, %v4053_v57  ;;  %v4056_v7 = vadd.f32 %v4055_v54, %v17004_v15  ;;  %v13377_v9 = vpop.f32.mrb[3].mxu1  ;;  %v14713_v47 = vpop.f32.mrb[227].mxu0 }
 0x4b3   :  { %v13378_v27 = vadd.f32 %v13377_v9, %v13376_v39  ;;  %v17085_v32 = vadd.f32 %v13375_v5, %v17032_v41 }
 0x4b4   :  { %v4156_v60 = vadd.f32 %v17062_v40, %v4154_v26  ;;  %v4155_v55 = vmul.f32 %v17064_v1, %v4056_v7  ;;  %v17093_v23 = vpack.c.bf16 %v18872_v21, %v18873_v59  ;;  %v17926_v21 = vld [vmem:[#allocation11 + $0xac] ss:$16 sps:$4 sm:$0xff]  }
 0x4b5   :  { %v17096_v36 = vadd.f32 %v13378_v27, %v17038_v34  ;;  %18952 = vst [vmem:[#allocation37_spill] sm:$0xff] %v17926_v21 }
 0x4b6   :  { %v17100_v15 = vadd.f32 %v4156_v60, %v857_v28  ;;  %v4157_v41 = vadd.f32 %v17062_v40, %v4155_v55  ;;  %5230 = vmatprep.mubr.bf16.mxu1 %v17093_v23  ;;  %5331 = vmatprep.mubr.bf16.mxu0 %v17093_v23 }
 0x4b7   :  { %v13379_v18 = vpop.f32.mrb[4].mxu1  ;;  %v4060_v12 = vpop.f32.mrb[228].mxu0  ;;  %5231 = vmatmul.mubr.bf16.gmra.mrb[32].mxu1 %v18880_v0  ;;  %5332 = vmatmul.mubr.bf16.gmra.mrb[20].mxu0 %v18880_v0 }
 0x4b8   :  { %v17109_v34 = vadd.f32 %v4157_v41, %v858_v35  ;;  %v4061_v24 = vadd.f32 %v4060_v12, %v17011_v31  ;;  %v13380_v28 = vpop.f32.mrb[5].mxu1  ;;  %v14716_v48 = vpop.f32.mrb[229].mxu0  ;;  %v18871_v8 = vmax.f32 %v17100_v15, 0.0 }
 0x4b9   :  { %v13381_v16 = vadd.f32 %v13380_v28, %v13379_v18  ;;  %v13382_v46 = vpop.f32.mrb[6].mxu1  ;;  %v4063_v57 = vpop.f32.mrb[230].mxu0 }
 0x4ba   :  { %v18870_v45 = vmax.f32 %v17109_v34, 0.0  ;;  %v4164_v5 = vmul.f32 %v17064_v1, %v4061_v24  ;;  %v4064_v39 = vadd.f32 %v4063_v57, %v17017_v33  ;;  %v13383_v54 = vpop.f32.mrb[7].mxu1  ;;  %v14717_v26 = vpop.f32.mrb[231].mxu0 }
 0x4bb   :  { %v13384_v29 = vadd.f32 %v13383_v54, %v13382_v46  ;;  %v17117_v35 = vadd.f32 %v13381_v16, %v17044_v17 }
 0x4bc   :  { %v17123_v31 = vpack.c.bf16 %v18870_v45, %v18871_v8  ;;  %v4166_v7 = vadd.f32 %v17062_v40, %v4164_v5  ;;  %v4165_v9 = vmul.f32 %v17064_v1, %v4064_v39  ;;  %v17924_v8 = vld [vmem:[#allocation11 + $0xa4] ss:$16 sps:$4 sm:$0xff]  }
 0x4bd   :  { %v17128_v47 = vadd.f32 %v13384_v29, %v17050_v56  ;;  %18951 = vst [vmem:[#allocation36_spill] sm:$0xff] %v17924_v8 }
 0x4be   :  { %v17132_v33 = vadd.f32 %v4166_v7, %v865_v42  ;;  %v4167_v17 = vadd.f32 %v17062_v40, %v4165_v9  ;;  %5238 = vmatprep.mubr.bf16.mxu1 %v17123_v31  ;;  %5339 = vmatprep.mubr.bf16.mxu0 %v17123_v31 }
 0x4bf   :  { %v13385_v27 = vpop.f32.mrb[8].mxu1  ;;  %v4068_v60 = vpop.f32.mrb[232].mxu0  ;;  %5239 = vmatmul.mubr.bf16.gmra.mrb[36].mxu1 %v17093_v23  ;;  %5340 = vmatmul.mubr.bf16.gmra.mrb[24].mxu0 %v18880_v0 }
 0x4c0   :  { %v17141_v56 = vadd.f32 %v4167_v17, %v866_v43  ;;  %v13386_v55 = vpop.f32.mrb[9].mxu1  ;;  %v14720_v38 = vpop.f32.mrb[233].mxu0  ;;  %v18869_v12 = vmax.f32 %v17132_v33, 0.0 }
 0x4c1   :  { %v13387_v42 = vadd.f32 %v13386_v55, %v13385_v27  ;;  %v13388_v41 = vpop.f32.mrb[10].mxu1  ;;  %v4070_v18 = vpop.f32.mrb[234].mxu0  ;;  %v18926_v55 = vmax.f32 %v16224_v49, 0.0 }
 0x4c2   :  { %v18868_v24 = vmax.f32 %v17141_v56, 0.0  ;;  %v13389_v28 = vpop.f32.mrb[11].mxu1  ;;  %v14721_v48 = vpop.f32.mrb[235].mxu0 }
 0x4c3   :  { %v13390_v16 = vadd.f32 %v13389_v28, %v13388_v41  ;;  %v17146_v46 = vadd.f32 %v13387_v42, %v17056_v58  ;;  %v18928_v41 = vmax.f32 %v16227_v51, 0.0 }
 0x4c4   :  { %v17152_v30 = vpack.c.bf16 %v18868_v24, %v18869_v12 }
 0x4c5   :  { %v17155_v43 = vadd.f32 %v13390_v16, %v17059_v19 }
 0x4c6   :  { %5246 = vmatprep.mubr.bf16.mxu1 %v17152_v30  ;;  %5347 = vmatprep.mubr.bf16.mxu0 %v17152_v30 }
 0x4c7   :  { %v4074_v57 = vpop.f32.mrb[236].mxu0  ;;  %5247 = vmatmul.mubr.bf16.gmra.mrb[40].mxu1 %v17123_v31  ;;  %5348 = vmatmul.mubr.bf16.gmra.mrb[28].mxu0 %v18880_v0 }
 0x4c8   :  { %v14724_v58 = vpop.f32.mrb[237].mxu0  ;;  %5254 = vmatprep.mubr.bf16.mxu1 %v18880_v0  ;;  %5353 = vmatprep.mubr.bf16.mxu0 %v18880_v0 }
 0x4c9   :  { %v4076_v5 = vpop.f32.mrb[238].mxu0 }
 0x4ca   :  { %v14725_v39 = vpop.f32.mrb[239].mxu0 }
 0x4cb   :  { %v13428_v39 = vpop.f32.mrb[12].mxu1 }
 0x4cf   :  { %v4080_v54 = vpop.f32.mrb[240].mxu0  ;;  %5255 = vmatmul.mubr.bf16.gmra.mrb[44].mxu1 %v17152_v30  ;;  %5354 = vmatmul.mubr.bf16.gmra.mrb[32].mxu0 %v17093_v23 }
 0x4d0   :  { %v4081_v19 = vadd.f32 %v4080_v54, %v17026_v37  ;;  %v14728_v26 = vpop.f32.mrb[241].mxu0  ;;  %5260 = vmatprep.mubr.bf16.mxu1 %v18880_v0  ;;  %5359 = vmatprep.mubr.bf16.mxu0 %v18880_v0 }
 0x4d1   :  { %v4083_v29 = vpop.f32.mrb[242].mxu0 }
 0x4d2   :  { %v4174_v7 = vmul.f32 %v17064_v1, %v4081_v19  ;;  %v4084_v9 = vadd.f32 %v4083_v29, %v17029_v61  ;;  %v14729_v17 = vpop.f32.mrb[243].mxu0  ;;  %v18930_v19 = vmax.f32 %v16240_v62, 0.0 }
 0x4d4   :  { %v4176_v27 = vadd.f32 %v17062_v40, %v4174_v7  ;;  %v4175_v60 = vmul.f32 %v17064_v1, %v4084_v9  ;;  %v13429_v7 = vpop.f32.mrb[13].mxu1  ;;  %v18932_v9 = vmax.f32 %v16243_v63, 0.0 }
 0x4d6   :  { %v17174_v38 = vadd.f32 %v4176_v27, %v18926_v55  ;;  %v4177_v37 = vadd.f32 %v17062_v40, %v4175_v60  ;;  %v17210_v60 = vadd.f32 %v13429_v7, %v13428_v39  ;;  %v13431_v55 = vpop.f32.mrb[14].mxu1 }
 0x4d7   :  { %v4088_v42 = vpop.f32.mrb[244].mxu0  ;;  %5261 = vmatmul.mubr.bf16.gmra.mrb[48].mxu1 %v18880_v0  ;;  %5360 = vmatmul.mubr.bf16.gmra.mrb[36].mxu0 %v17123_v31 }
 0x4d8   :  { %18927 = vst [vmem:[#allocation23_spill] sm:$0xff] %v17174_v38  ;;  %v17181_v18 = vadd.f32 %v4177_v37, %v18928_v41  ;;  %v4089_v61 = vadd.f32 %v4088_v42, %v17035_v25  ;;  %v14732_v28 = vpop.f32.mrb[245].mxu0  ;;  %v18867_v16 = vmax.f32 %v17174_v38, 0.0  ;;  %v13432_v41 = vpop.f32.mrb[15].mxu1 }
 0x4d9   :  { %v4091_v48 = vpop.f32.mrb[246].mxu0  ;;  %v17216_v63 = vadd.f32 %v13432_v41, %v13431_v55 }
 0x4da   :  { %18929 = vst [vmem:[#allocation24_spill] sm:$0xff] %v17181_v18  ;;  %v18866_v49 = vmax.f32 %v17181_v18, 0.0  ;;  %v4184_v57 = vmul.f32 %v17064_v1, %v4089_v61  ;;  %v4092_v58 = vadd.f32 %v4091_v48, %v17041_v44  ;;  %v14733_v5 = vpop.f32.mrb[247].mxu0 }
 0x4dc   :  { %v17192_v51 = vpack.c.bf16 %v18866_v49, %v18867_v16  ;;  %v4186_v25 = vadd.f32 %v17062_v40, %v4184_v57  ;;  %v4185_v54 = vmul.f32 %v17064_v1, %v4092_v58  ;;  %v13434_v58 = vpop.f32.mrb[16].mxu1 }
 0x4de   :  { %v17198_v26 = vadd.f32 %v4186_v25, %v18930_v19  ;;  %v4187_v29 = vadd.f32 %v17062_v40, %v4185_v54  ;;  %5266 = vmatprep.mubr.bf16.mxu1 %v17192_v51  ;;  %5367 = vmatprep.mubr.bf16.mxu0 %v17192_v51  ;;  %v18934_v25 = vmax.f32 %v16246_v2, 0.0 }
 0x4df   :  { %v4096_v44 = vpop.f32.mrb[248].mxu0  ;;  %5267 = vmatmul.mubr.bf16.gmra.mrb[52].mxu1 %v18880_v0  ;;  %5368 = vmatmul.mubr.bf16.gmra.mrb[40].mxu0 %v17152_v30 }
 0x4e0   :  { %18931 = vst [vmem:[#allocation25_spill] sm:$0xff] %v17198_v26  ;;  %v17207_v17 = vadd.f32 %v4187_v29, %v18932_v9  ;;  %v4097_v62 = vadd.f32 %v4096_v44, %v17047_v6  ;;  %v14736_v27 = vpop.f32.mrb[249].mxu0  ;;  %v18865_v37 = vmax.f32 %v17198_v26, 0.0  ;;  %v13435_v29 = vpop.f32.mrb[17].mxu1  ;;  %v18936_v44 = vmax.f32 %v16249_v4, 0.0 }
 0x4e1   :  { %v4099_v42 = vpop.f32.mrb[250].mxu0  ;;  %v17239_v2 = vadd.f32 %v13435_v29, %v13434_v58 }
 0x4e2   :  { %18933 = vst [vmem:[#allocation26_spill] sm:$0xff] %v17207_v17  ;;  %v18864_v61 = vmax.f32 %v17207_v17, 0.0  ;;  %v4194_v28 = vmul.f32 %v17064_v1, %v4097_v62  ;;  %v4100_v48 = vadd.f32 %v4099_v42, %v17053_v13  ;;  %v14737_v57 = vpop.f32.mrb[251].mxu0  ;;  %v13437_v62 = vpop.f32.mrb[18].mxu1 }
 0x4e3   :  { %v13438_v55 = vpop.f32.mrb[19].mxu1 }
 0x4e4   :  { %v17222_v6 = vpack.c.bf16 %v18864_v61, %v18865_v37  ;;  %v4196_v5 = vadd.f32 %v17062_v40, %v4194_v28  ;;  %v4195_v39 = vmul.f32 %v17064_v1, %v4100_v48  ;;  %v17243_v48 = vadd.f32 %v13438_v55, %v13437_v62  ;;  %v13440_v57 = vpop.f32.mrb[20].mxu1  ;;  %v15211_v55 = vld [vmem:[#allocation6 + $0x680] sm:$0xff]  }
 0x4e6   :  { %v17228_v54 = vadd.f32 %v4196_v5, %v18934_v25  ;;  %v4197_v13 = vadd.f32 %v17062_v40, %v4195_v39  ;;  %5274 = vmatprep.mubr.bf16.mxu1 %v17222_v6  ;;  %5375 = vmatprep.mubr.bf16.mxu0 %v17222_v6  ;;  %v13441_v5 = vpop.f32.mrb[21].mxu1 }
 0x4e7   :  { %5275 = vmatmul.mubr.bf16.gmra.mrb[56].mxu1 %v17192_v51  ;;  %5376 = vmatmul.mubr.bf16.gmra.mrb[44].mxu0 %v18880_v0  ;;  %v4104_v19 = vpop.f32.mrb[252].mxu0  ;;  %v17257_v25 = vadd.f32 %v13441_v5, %v13440_v57  ;;  %v15218_v5 = vld [vmem:[#allocation6 + $0x688] sm:$0xff]  }
 0x4e8   :  { %18935 = vst [vmem:[#allocation27_spill] sm:$0xff] %v17228_v54  ;;  %v17237_v7 = vadd.f32 %v4197_v13, %v18936_v44  ;;  %v14740_v9 = vpop.f32.mrb[253].mxu0  ;;  %v18863_v42 = vmax.f32 %v17228_v54, 0.0  ;;  %v13443_v13 = vpop.f32.mrb[22].mxu1 }
 0x4e9   :  { %v4106_v27 = vpop.f32.mrb[254].mxu0  ;;  %v13444_v29 = vpop.f32.mrb[23].mxu1 }
 0x4ea   :  { %18937 = vst [vmem:[#allocation28_spill] sm:$0xff] %v17237_v7  ;;  %v18856_v41 = vmax.f32 %v17237_v7, 0.0  ;;  %v14741_v28 = vpop.f32.mrb[255].mxu0  ;;  %v17259_v9 = vadd.f32 %v13444_v29, %v13443_v13  ;;  %v13446_v62 = vpop.f32.mrb[24].mxu1 }
 0x4eb   :  { %v13447_v27 = vpop.f32.mrb[25].mxu1 }
 0x4ec   :  { %v17249_v4 = vpack.c.bf16 %v18856_v41, %v18863_v42  ;;  %v13449_v28 = vpop.f32.mrb[26].mxu1  ;;  %v15225_v27 = vld [vmem:[#allocation6 + $0x690] sm:$0xff]   ;;  %v15274_v42 = vld [vmem:[#allocation6 + $0x7e0] sm:$0xff]  }
 0x4ed   :  { %v13450_v41 = vpop.f32.mrb[27].mxu1 }
 0x4ee   :  { %5282 = vmatprep.mubr.bf16.mxu1 %v17249_v4  ;;  %5383 = vmatprep.mubr.bf16.mxu0 %v17249_v4 }
 0x4ef   :  { %5283 = vmatmul.mubr.bf16.gmra.mrb[60].mxu1 %v17222_v6  ;;  %5384 = vmatmul.mubr.bf16.gmra.mrb[48].mxu0 %v18880_v0  ;;  %v4110_v58 = vpop.f32.mrb[0].mxu0 }
 0x4f0   :  { %5452 = vmatprep.mubr.bf16.mxu1 %v17123_v31  ;;  %v14744_v39 = vpop.f32.mrb[1].mxu0  ;;  %5389 = vmatprep.mubr.bf16.mxu0 %v18880_v0 }
 0x4f1   :  { %v4112_v19 = vpop.f32.mrb[2].mxu0 }
 0x4f2   :  { %v14745_v44 = vpop.f32.mrb[3].mxu0 }
 0x4f3   :  { %v13452_v44 = vpop.f32.mrb[28].mxu1 }
 0x4f4   :  { %v13453_v62 = vpop.f32.mrb[29].mxu1 }
 0x4f7   :  { %v4116_v58 = vpop.f32.mrb[4].mxu0  ;;  %5390 = vmatmul.mubr.bf16.gmra.mrb[52].mxu0 %v17192_v51  ;;  %5453 = vmatmul.mubr.bf16.vlgmr.msra.gmra.mrb[64].mxu1 %v17093_v23 }
 0x4f8   :  { %v4117_v39 = vadd.f32 %v4116_v58, %v17085_v32  ;;  %14759 = vmatpush3.bf16.msra.mxu1 %v15211_v55  ;;  %v14748_v57 = vpop.f32.mrb[5].mxu0  ;;  %5460 = vmatprep.mubr.bf16.mxu1 %v17152_v30  ;;  %v13455_v55 = vpop.f32.mrb[30].mxu1  ;;  %v18938_v58 = vmax.f32 %v16294_v20, 0.0  ;;  %v15228_v20 = vld [vmem:[#allocation6 + $0x698] sm:$0xff]  }
 0x4f9   :  { %v4119_v19 = vpop.f32.mrb[6].mxu0  ;;  %5395 = vmatprep.mubr.bf16.mxu0 %v18880_v0  ;;  %14760 = vmatprep.subr.bf16.mxu1 %v18878_v3  ;;  %v13456_v28 = vpop.f32.mrb[31].mxu1  ;;  %v15229_v55 = vld [vmem:[#allocation6 + $0x6a0] sm:$0xff]  }
 0x4fa   :  { %v4204_v13 = vmul.f32 %v17064_v1, %v4117_v39  ;;  %v4120_v41 = vadd.f32 %v4119_v19, %v17096_v36  ;;  %v14749_v29 = vpop.f32.mrb[7].mxu0  ;;  %v18940_v19 = vmax.f32 %v16299_v22, 0.0  ;;  %v18942_v28 = vmax.f32 %v16312_v50, 0.0  ;;  %v15230_v50 = vld [vmem:[#allocation6 + $0x6a8] sm:$0xff]  }
 0x4fc   :  { %v4206_v23 = vadd.f32 %v17062_v40, %v4204_v13  ;;  %v4205_v32 = vmul.f32 %v17064_v1, %v4120_v41  ;;  %14761 = vmatpush3.bf16.msra.mxu1 %v15218_v5 }
 0x4fd   :  { %14762 = vmatprep.subr.bf16.mxu1 %v18878_v3 }
 0x4fe   :  { %v17274_v57 = vadd.f32 %v4206_v23, %v18938_v58  ;;  %v4207_v39 = vadd.f32 %v17062_v40, %v4205_v32 }
 0x4ff   :  { %v4124_v36 = vpop.f32.mrb[8].mxu0  ;;  %5396 = vmatmul.mubr.bf16.gmra.mrb[56].mxu0 %v17222_v6  ;;  %5461 = vmatmul.mubr.bf16.gmra.mrb[68].mxu1 %v17123_v31 }
 0x500   :  { %18939 = vst [vmem:[#allocation29_spill] sm:$0xff] %v17274_v57  ;;  %v17281_v13 = vadd.f32 %v4207_v39, %v18940_v19  ;;  %v4125_v5 = vadd.f32 %v4124_v36, %v17117_v35  ;;  %v14752_v41 = vpop.f32.mrb[9].mxu0  ;;  %5468 = vmatprep.mubr.bf16.mxu1 %v18880_v0  ;;  %14763 = vmatpush3.bf16.msra.mxu1 %v15225_v27  ;;  %v18862_v44 = vmax.f32 %v17274_v57, 0.0  ;;  %v18944_v36 = vmax.f32 %v16316_v52, 0.0 }
 0x501   :  { %v4127_v29 = vpop.f32.mrb[10].mxu0  ;;  %14764 = vmatprep.subr.bf16.mxu1 %v18878_v3 }
 0x502   :  { %18941 = vst [vmem:[#allocation30_spill] sm:$0xff] %v17281_v13  ;;  %v18861_v62 = vmax.f32 %v17281_v13, 0.0  ;;  %v4214_v31 = vmul.f32 %v17064_v1, %v4125_v5  ;;  %v4128_v22 = vadd.f32 %v4127_v29, %v17128_v47  ;;  %v14753_v23 = vpop.f32.mrb[11].mxu0  ;;  %v18959_v13 = vmov 0  }
 0x504   :  { %v17294_v35 = vpack.c.bf16 %v18861_v62, %v18862_v44  ;;  %v4216_v32 = vadd.f32 %v17062_v40, %v4214_v31  ;;  %v4215_v27 = vmul.f32 %v17064_v1, %v4128_v22  ;;  %14765 = vmatpush3.bf16.msra.mxu1 %v15228_v20 }
 0x505   :  { %14766 = vmatprep.subr.bf16.mxu1 %v18878_v3 }
 0x506   :  { %v17301_v58 = vadd.f32 %v4216_v32, %v18942_v28  ;;  %v4217_v47 = vadd.f32 %v17062_v40, %v4215_v27  ;;  %5403 = vmatprep.mubr.bf16.mxu0 %v17294_v35  ;;  %v15232_v32 = vld [vmem:[#allocation6 + $0x6b8] sm:$0xff]  }
 0x507   :  { %v4132_v39 = vpop.f32.mrb[12].mxu0  ;;  %5404 = vmatmul.mubr.bf16.gmra.mrb[60].mxu0 %v17249_v4  ;;  %5469 = vmatmul.mubr.bf16.gmra.mrb[72].mxu1 %v17152_v30 }
 0x508   :  { %18943 = vst [vmem:[#allocation31_spill] sm:$0xff] %v17301_v58  ;;  %v17309_v19 = vadd.f32 %v4217_v47, %v18944_v36  ;;  %v4133_v5 = vadd.f32 %v4132_v39, %v17146_v46  ;;  %v14756_v41 = vpop.f32.mrb[13].mxu0  ;;  %5476 = vmatprep.mubr.bf16.mxu1 %v18880_v0  ;;  %14767 = vmatpush3.bf16.msra.mxu1 %v15229_v55  ;;  %v18860_v29 = vmax.f32 %v17301_v58, 0.0  ;;  %v15231_v46 = vld [vmem:[#allocation6 + $0x6b0] sm:$0xff]  }
 0x509   :  { %v4135_v20 = vpop.f32.mrb[14].mxu0  ;;  %14768 = vmatprep.subr.bf16.mxu1 %v18878_v3  ;;  %v17958_v58 = vld [vmem:[#allocation11 + $0xc8] ss:$16 sps:$4 sm:$0xff]  }
 0x50a   :  { %18945 = vst [vmem:[#allocation32_spill] sm:$0xff] %v17309_v19  ;;  %v18859_v31 = vmax.f32 %v17309_v19, 0.0  ;;  %v4136_v30 = vadd.f32 %v4135_v20, %v17155_v43  ;;  %v14757_v22 = vpop.f32.mrb[15].mxu0  ;;  %v4224_v41 = vmul.f32 %v17064_v1, %v4133_v5  ;;  %18958 = vst [vmem:[#allocation43_spill] sm:$0xff] %v17958_v58 }
 0x50b   :  { %v15235_v22 = vld [vmem:[#allocation6 + $0x708] sm:$0xff]  }
 0x50c   :  { %v17321_v52 = vpack.c.bf16 %v18859_v31, %v18860_v29  ;;  %14769 = vmatpush3.bf16.msra.mxu1 %v15230_v50  ;;  %v4226_v20 = vadd.f32 %v17062_v40, %v4224_v41  ;;  %v15248_v41 = vld [vmem:[#allocation6 + $0x748] sm:$0xff]  }
 0x50d   :  { %14770 = vmatprep.subr.bf16.mxu1 %v18878_v3 }
 0x50e   :  { %5411 = vmatprep.mubr.bf16.mxu0 %v17321_v52 }
 0x50f   :  { %5412 = vmatmul.mubr.bf16.gmra.mrb[64].mxu0 %v18880_v0  ;;  %5477 = vmatmul.mubr.bf16.gmra.mrb[76].mxu1 %v18880_v0  ;;  %v13522_v23 = vpop.f32.mrb[16].mxu0 }
 0x510   :  { %5482 = vmatprep.mubr.bf16.mxu1 %v17192_v51  ;;  %5581 = vmatprep.mubr.bf16.mxu0 %v17192_v51  ;;  %v13523_v43 = vpop.f32.mrb[17].mxu0 }
 0x511   :  { %14771 = vmatpush3.bf16.msra.mxu1 %v15231_v46  ;;  %v13524_v27 = vadd.f32 %v13523_v43, %v13522_v23  ;;  %v13525_v55 = vpop.f32.mrb[18].mxu0  ;;  %v18946_v46 = vmax.f32 %v16390_v53, 0.0 }
 0x512   :  { %14772 = vmatprep.subr.bf16.mxu1 %v18878_v3  ;;  %v13526_v28 = vpop.f32.mrb[19].mxu0 }
 0x513   :  { %v17331_v47 = vadd.f32 %v13524_v27, %v17210_v60  ;;  %v13527_v39 = vadd.f32 %v13526_v28, %v13525_v55  ;;  %v15234_v60 = vld [vmem:[#allocation6 + $0x6c0] sm:$0xff]   ;;  %v15239_v27 = vld [vmem:[#allocation6 + $0x718] sm:$0xff]  }
 0x514   :  { %v15240_v55 = vld [vmem:[#allocation6 + $0x6d8] sm:$0xff]   ;;  %v15241_v28 = vld [vmem:[#allocation6 + $0x720] sm:$0xff]  }
 0x515   :  { %14773 = vmatpush3.bf16.msra.mxu1 %v15232_v32  ;;  %v17334_v36 = vadd.f32 %v13527_v39, %v17216_v63  ;;  %v4225_v63 = vmul.f32 %v17064_v1, %v4136_v30  ;;  %v15236_v30 = vld [vmem:[#allocation6 + $0x6c8] sm:$0xff]   ;;  %v18948_v1 = vmax.f32 %v16388_v14, 0.0  ;;  %v15237_v32 = vld [vmem:[#allocation6 + $0x710] sm:$0xff]   ;;  %v15242_v39 = vld [vmem:[#allocation6 + $0x6e0] sm:$0xff]  }
 0x516   :  { %v15238_v14 = vld [vmem:[#allocation6 + $0x6d0] sm:$0xff]  }
 0x517   :  { %5483 = vmatmul.mubr.bf16.gmra.mrb[80].mxu1 %v18880_v0  ;;  %5582 = vmatmul.mubr.bf16.vlgmr.msra.gmra.mrb[68].mxu0 %v18880_v0  ;;  %v4227_v50 = vadd.f32 %v17062_v40, %v4225_v63  ;;  %v17368_v5 = vadd.f32 %v4226_v20, %v18948_v1  ;;  %v15247_v63 = vld [vmem:[#allocation6 + $0x788] sm:$0xff]   ;;  %v15252_v20 = vld [vmem:[#allocation6 + $0x750] sm:$0xff]   ;;  %v15254_v1 = vld [vmem:[#allocation6 + $0x758] sm:$0xff]  }
 0x518   :  { %5488 = vmatprep.mubr.bf16.mxu1 %v17222_v6  ;;  %5589 = vmatprep.mubr.bf16.mxu0 %v17222_v6 }
 0x519   :  { %v17362_v23 = vadd.f32 %v4227_v50, %v18946_v46  ;;  %18949 = vst [vmem:[#allocation34_spill] sm:$0xff] %v17368_v5  ;;  %v18858_v53 = vmax.f32 %v17368_v5, 0.0  ;;  %v15250_v50 = vld [vmem:[#allocation6 + $0x790] sm:$0xff]  }
 0x51a   :  { %v15249_v46 = vld [vmem:[#allocation6 + $0x730] sm:$0xff]  }
 0x51b   :  { %18947 = vst [vmem:[#allocation33_spill] sm:$0xff] %v17362_v23  ;;  %v18857_v40 = vmax.f32 %v17362_v23, 0.0 }
 0x51d   :  { %v17378_v43 = vpack.c.bf16 %v18857_v40, %v18858_v53 }
 0x51f   :  { %5489 = vmatmul.mubr.bf16.gmra.mrb[84].mxu1 %v17192_v51  ;;  %5590 = vmatmul.mubr.bf16.gmra.mrb[72].mxu0 %v17192_v51  ;;  %v15233_v51 = vld [vmem:[#allocation6 + $0x700] sm:$0xff]  }
 0x520   :  { %5496 = vmatprep.mubr.bf16.mxu1 %v17249_v4  ;;  %5597 = vmatprep.mubr.bf16.mxu0 %v17249_v4 }
 0x521   :  { %13809 = vmatprep.subr.bf16.mxu0 %v15233_v51  ;;  %v15243_v51 = vld [vmem:[#allocation6 + $0x728] sm:$0xff]  }
 0x522   :  { %13810 = vmatpush3.bf16.msra.mxu0 %v15234_v60  ;;  %v15246_v60 = vld [vmem:[#allocation6 + $0x740] sm:$0xff]  }
 0x523   :  { %13811 = vmatprep.subr.bf16.mxu0 %v15235_v22  ;;  %v15253_v22 = vld [vmem:[#allocation6 + $0x798] sm:$0xff]  }
 0x526   :  { %13812 = vmatpush3.bf16.msra.mxu0 %v15236_v30  ;;  %v15251_v30 = vld [vmem:[#allocation6 + $0x6f0] sm:$0xff]  }
 0x527   :  { %5497 = vmatmul.mubr.bf16.gmra.mrb[88].mxu1 %v17222_v6  ;;  %5598 = vmatmul.mubr.bf16.gmra.mrb[76].mxu0 %v17222_v6 }
 0x528   :  { %5504 = vmatprep.mubr.bf16.mxu1 %v18880_v0  ;;  %5605 = vmatprep.mubr.bf16.mxu0 %v18880_v0 }
 0x529   :  { %13813 = vmatprep.subr.bf16.mxu0 %v15237_v32  ;;  %v15255_v32 = vld [vmem:[#allocation6 + $0x7a0] sm:$0xff]  }
 0x52a   :  { %13814 = vmatpush3.bf16.msra.mxu0 %v15238_v14  ;;  %v15256_v14 = vld [vmem:[#allocation6 + $0x760] sm:$0xff]  }
 0x52b   :  { %13815 = vmatprep.subr.bf16.mxu0 %v15239_v27  ;;  %v15257_v27 = vld [vmem:[#allocation6 + $0x7a8] sm:$0xff]  }
 0x52e   :  { %13816 = vmatpush3.bf16.msra.mxu0 %v15240_v55 }
 0x52f   :  { %5505 = vmatmul.mubr.bf16.gmra.mrb[92].mxu1 %v17249_v4  ;;  %5606 = vmatmul.mubr.bf16.gmra.mrb[80].mxu0 %v17249_v4 }
 0x530   :  { %5512 = vmatprep.mubr.bf16.mxu1 %v18880_v0  ;;  %5611 = vmatprep.mubr.bf16.mxu0 %v18880_v0 }
 0x531   :  { %13817 = vmatprep.subr.bf16.mxu0 %v15241_v28 }
 0x532   :  { %13818 = vmatpush3.bf16.msra.mxu0 %v15242_v39  ;;  %v15258_v39 = vld [vmem:[#allocation6 + $0x738] sm:$0xff]  }
 0x533   :  { %13819 = vmatprep.subr.bf16.mxu0 %v15243_v51 }
 0x537   :  { %5513 = vmatmul.mubr.bf16.gmra.mrb[96].mxu1 %v18880_v0  ;;  %5612 = vmatmul.mubr.bf16.gmra.mrb[84].mxu0 %v18880_v0 }
 0x538   :  { %5518 = vmatprep.mubr.bf16.mxu1 %v17294_v35  ;;  %5617 = vmatprep.mubr.bf16.mxu0 %v17294_v35 }
 0x53f   :  { %5519 = vmatmul.mubr.bf16.gmra.mrb[100].mxu1 %v18880_v0  ;;  %5618 = vmatmul.mubr.bf16.gmra.mrb[88].mxu0 %v18880_v0 }
 0x540   :  { %5524 = vmatprep.mubr.bf16.mxu1 %v17321_v52  ;;  %5625 = vmatprep.mubr.bf16.mxu0 %v17321_v52 }
 0x547   :  { %5525 = vmatmul.mubr.bf16.gmra.mrb[104].mxu1 %v17294_v35  ;;  %5626 = vmatmul.mubr.bf16.gmra.mrb[92].mxu0 %v17294_v35 }
 0x548   :  { %5532 = vmatprep.mubr.bf16.mxu1 %v17378_v43  ;;  %5633 = vmatprep.mubr.bf16.mxu0 %v17378_v43 }
 0x54f   :  { %5533 = vmatmul.mubr.bf16.gmra.mrb[108].mxu1 %v17321_v52  ;;  %5634 = vmatmul.mubr.bf16.gmra.mrb[96].mxu0 %v17321_v52 }
 0x550   :  { %5540 = vmatprep.mubr.bf16.mxu1 %v18880_v0  ;;  %5641 = vmatprep.mubr.bf16.mxu0 %v18880_v0 }
 0x557   :  { %5541 = vmatmul.mubr.bf16.gmra.mrb[112].mxu1 %v17378_v43  ;;  %5642 = vmatmul.mubr.bf16.gmra.mrb[100].mxu0 %v17378_v43 }
 0x558   :  { %5647 = vmatprep.mubr.bf16.mxu0 %v18880_v0  ;;  %14774 = vmatprep.mubr.msk.bf16.mxu1 %vm15948_vm0, %v18878_v3 }
 0x55f   :  { %5648 = vmatmul.mubr.bf16.gmra.mrb[104].mxu0 %v18880_v0  ;;  %14775 = vmatmul.mubr.bf16.vlgmr.msra.gmra.mrb[116].mxu1 %v17222_v6  ;;  %v15244_v6 = vld [vmem:[#allocation6 + $0x6e8] sm:$0xff]  }
 0x560   :  { %5653 = vmatprep.mubr.bf16.mxu0 %v18880_v0  ;;  %14778 = vmatprep.mubr.msk.bf16.mxu1 %vm15948_vm0, %v18878_v3 }
 0x561   :  { %13820 = vmatpush3.bf16.msra.mxu0 %v15244_v6 }
 0x562   :  { %13821 = vmatprep.subr.bf16.mxu0 %v15249_v46 }
 0x565   :  { %13822 = vmatpush3.bf16.msra.mxu0 %v15251_v30  ;;  %v15263_v30 = vld [vmem:[#allocation6 + $0x7b8] sm:$0xff]  }
 0x566   :  { %13823 = vmatprep.subr.bf16.mxu0 %v15258_v39 }
 0x567   :  { %5654 = vmatmul.mubr.bf16.gmra.mrb[108].mxu0 %v18880_v0  ;;  %14779 = vmatmul.mubr.bf16.gmra.mrb[120].mxu1 %v17249_v4  ;;  %v15245_v4 = vld [vmem:[#allocation6 + $0x780] sm:$0xff]  }
 0x568   :  { %5661 = vmatprep.mubr.bf16.mxu0 %v18880_v0  ;;  %14782 = vmatprep.mubr.msk.bf16.mxu1 %vm15948_vm0, %v18878_v3 }
 0x569   :  { %13903 = vmatprep.subr.bf16.mxu1 %v15245_v4  ;;  %v15260_v4 = vld [vmem:[#allocation6 + $0x6f8] sm:$0xff]  }
 0x56a   :  { %13904 = vmatpush3.bf16.msra.mxu1 %v15246_v60  ;;  %v15261_v60 = vld [vmem:[#allocation6 + $0x7b0] sm:$0xff]   ;;  %13824 = vmatpush3.bf16.msra.mxu0 %v15260_v4 }
 0x56b   :  { %13905 = vmatprep.subr.bf16.mxu1 %v15247_v63 }
 0x56e   :  { %13906 = vmatpush3.bf16.msra.mxu1 %v15248_v41 }
 0x56f   :  { %5662 = vmatmul.mubr.bf16.gmra.mrb[112].mxu0 %v18880_v0  ;;  %14783 = vmatmul.mubr.bf16.gmra.mrb[124].mxu1 %v18880_v0 }
 0x570   :  { %5669 = vmatprep.mubr.bf16.mxu0 %v18880_v0  ;;  %14786 = vmatprep.mubr.msk.bf16.mxu1 %vm15948_vm0, %v18878_v3 }
 0x571   :  { %13907 = vmatprep.subr.bf16.mxu1 %v15250_v50 }
 0x572   :  { %13908 = vmatpush3.bf16.msra.mxu1 %v15252_v20 }
 0x573   :  { %13909 = vmatprep.subr.bf16.mxu1 %v15253_v22 }
 0x576   :  { %13910 = vmatpush3.bf16.msra.mxu1 %v15254_v1 }
 0x577   :  { %5670 = vmatmul.mubr.bf16.gmra.mrb[116].mxu0 %v18880_v0  ;;  %14787 = vmatmul.mubr.bf16.gmra.mrb[128].mxu1 %v18880_v0 }
 0x578   :  { %14790 = vmatprep.mubr.msk.bf16.mxu1 %vm15948_vm0, %v18878_v3  ;;  %6844 = vmatprep.mubr.bf16.mxu0 %v18880_v0 }
 0x579   :  { %13911 = vmatprep.subr.bf16.mxu1 %v15255_v32 }
 0x57a   :  { %13912 = vmatpush3.bf16.msra.mxu1 %v15256_v14 }
 0x57b   :  { %13913 = vmatprep.subr.bf16.mxu1 %v15257_v27 }
 0x57f   :  { %14791 = vmatmul.mubr.bf16.gmra.mrb[132].mxu1 %v17294_v35  ;;  %v15259_v35 = vld [vmem:[#allocation6 + $0x768] sm:$0xff]   ;;  %6845 = vmatmul.mubr.bf16.vlgmr.msra.gmra.mrb[120].mxu0 %v18880_v0 }
 0x580   :  { %14794 = vmatprep.mubr.msk.bf16.mxu1 %vm15948_vm0, %v18878_v3  ;;  %13914 = vmatpush3.bf16.msra.mxu1 %v15259_v35  ;;  %v15264_v35 = vld [vmem:[#allocation6 + $0x778] sm:$0xff]  }
 0x581   :  { %13915 = vmatprep.subr.bf16.mxu1 %v15261_v60  ;;  %6852 = vmatprep.mubr.bf16.mxu0 %v18880_v0 }
 0x587   :  { %14795 = vmatmul.mubr.bf16.gmra.mrb[136].mxu1 %v17321_v52  ;;  %v15262_v52 = vld [vmem:[#allocation6 + $0x770] sm:$0xff]   ;;  %6853 = vmatmul.mubr.bf16.gmra.mrb[124].mxu0 %v18880_v0 }
 0x588   :  { %14798 = vmatprep.mubr.msk.bf16.mxu1 %vm15948_vm0, %v18878_v3  ;;  %13916 = vmatpush3.bf16.msra.mxu1 %v15262_v52  ;;  %v15265_v52 = vld [vmem:[#allocation6 + $0x800] sm:$0xff]  }
 0x589   :  { %13917 = vmatprep.subr.bf16.mxu1 %v15263_v30  ;;  %13997 = vmatprep.subr.bf16.mxu0 %v15265_v52 }
 0x58a   :  { %v13458_v55 = vpop.f32.mrb[32].mxu1  ;;  %v13528_v28 = vpop.f32.mrb[20].mxu0  ;;  %6860 = vmatprep.mubr.bf16.mxu0 %v18880_v0 }
 0x58b   :  { %v13459_v51 = vpop.f32.mrb[33].mxu1  ;;  %v13529_v6 = vpop.f32.mrb[21].mxu0 }
 0x58c   :  { %v17419_v63 = vadd.f32 %v13459_v51, %v13458_v55  ;;  %v13530_v41 = vadd.f32 %v13529_v6, %v13528_v28  ;;  %v13461_v50 = vpop.f32.mrb[34].mxu1  ;;  %v13531_v20 = vpop.f32.mrb[22].mxu0  ;;  %13918 = vmatpush3.bf16.msra.mxu1 %v15264_v35 }
 0x58d   :  { %v13462_v22 = vpop.f32.mrb[35].mxu1  ;;  %v13532_v46 = vpop.f32.mrb[23].mxu0 }
 0x58e   :  { %v17422_v1 = vadd.f32 %v13530_v41, %v17239_v2  ;;  %v17424_v32 = vadd.f32 %v13462_v22, %v13461_v50  ;;  %v13533_v14 = vadd.f32 %v13532_v46, %v13531_v20  ;;  %v15266_v22 = vld [vmem:[#allocation6 + $0x7c0] sm:$0xff]  }
 0x58f   :  { %14799 = vmatmul.mubr.bf16.gmra.mrb[140].mxu1 %v17378_v43  ;;  %13998 = vmatpush3.bf16.msra.mxu0 %v15266_v22 }
 0x590   :  { %v17428_v27 = vadd.f32 %v13533_v14, %v17243_v48  ;;  %14802 = vmatprep.mubr.msk.bf16.mxu1 %vm15948_vm0, %v18878_v3  ;;  %6861 = vmatmul.mubr.bf16.gmra.mrb[128].mxu0 %v18880_v0 }
 0x591   :  { %6868 = vmatprep.mubr.bf16.mxu0 %v18880_v0 }
 0x592   :  { %v13464_v2 = vpop.f32.mrb[36].mxu1  ;;  %v13534_v55 = vpop.f32.mrb[24].mxu0 }
 0x593   :  { %v13465_v28 = vpop.f32.mrb[37].mxu1  ;;  %v13535_v39 = vpop.f32.mrb[25].mxu0 }
 0x594   :  { %v17434_v51 = vadd.f32 %v13465_v28, %v13464_v2  ;;  %v13536_v43 = vadd.f32 %v13535_v39, %v13534_v55  ;;  %v13467_v6 = vpop.f32.mrb[38].mxu1  ;;  %v13537_v4 = vpop.f32.mrb[26].mxu0 }
 0x595   :  { %v13468_v48 = vpop.f32.mrb[39].mxu1  ;;  %v13538_v60 = vpop.f32.mrb[27].mxu0 }
 0x596   :  { %v17437_v41 = vadd.f32 %v13536_v43, %v17257_v25  ;;  %v17439_v50 = vadd.f32 %v13468_v48, %v13467_v6  ;;  %v13539_v20 = vadd.f32 %v13538_v60, %v13537_v4 }
 0x597   :  { %14803 = vmatmul.mubr.bf16.gmra.mrb[144].mxu1 %v18880_v0 }
 0x598   :  { %v17443_v46 = vadd.f32 %v13539_v20, %v17259_v9  ;;  %14806 = vmatprep.mubr.msk.bf16.mxu1 %vm15948_vm0, %v18878_v3  ;;  %6869 = vmatmul.mubr.bf16.gmra.mrb[132].mxu0 %v18880_v0 }
 0x599   :  { %6874 = vmatprep.mubr.bf16.mxu0 %v18880_v0 }
 0x59a   :  { %v13470_v30 = vpop.f32.mrb[40].mxu1  ;;  %v13540_v14 = vpop.f32.mrb[28].mxu0 }
 0x59b   :  { %v13471_v25 = vpop.f32.mrb[41].mxu1  ;;  %v13541_v35 = vpop.f32.mrb[29].mxu0  ;;  %v15267_v14 = vld [vmem:[#allocation6 + $0x808] sm:$0xff]  }
 0x59c   :  { %v17449_v2 = vadd.f32 %v13471_v25, %v13470_v30  ;;  %v13473_v55 = vpop.f32.mrb[42].mxu1  ;;  %v13543_v28 = vpop.f32.mrb[30].mxu0  ;;  %13999 = vmatprep.subr.bf16.mxu0 %v15267_v14  ;;  %v15268_v25 = vld [vmem:[#allocation6 + $0x7c8] sm:$0xff]  }
 0x59d   :  { %v13474_v39 = vpop.f32.mrb[43].mxu1  ;;  %v13544_v9 = vpop.f32.mrb[31].mxu0  ;;  %14000 = vmatpush3.bf16.msra.mxu0 %v15268_v25 }
 0x59e   :  { %v17451_v43 = vadd.f32 %v13474_v39, %v13473_v55 }
 0x59f   :  { %14807 = vmatmul.mubr.bf16.gmra.mrb[148].mxu1 %v18880_v0 }
 0x5a0   :  { %14810 = vmatprep.mubr.msk.bf16.mxu1 %vm15948_vm0, %v18878_v3  ;;  %6875 = vmatmul.mubr.bf16.gmra.mrb[136].mxu0 %v18880_v0 }
 0x5a2   :  { %v13476_v6 = vpop.f32.mrb[44].mxu1  ;;  %v13546_v4 = vpop.f32.mrb[32].mxu0 }
 0x5a3   :  { %v13477_v48 = vpop.f32.mrb[45].mxu1  ;;  %v13547_v60 = vpop.f32.mrb[33].mxu0 }
 0x5a4   :  { %v13479_v20 = vpop.f32.mrb[46].mxu1  ;;  %v13549_v52 = vpop.f32.mrb[34].mxu0 }
 0x5a5   :  { %v13480_v22 = vpop.f32.mrb[47].mxu1  ;;  %v13550_v30 = vpop.f32.mrb[35].mxu0 }
 0x5a6   :  { %v15269_v30 = vld [vmem:[#allocation6 + $0x810] sm:$0xff]  }
 0x5a7   :  { %14811 = vmatmul.mubr.bf16.gmra.mrb[152].mxu1 %v18880_v0  ;;  %14001 = vmatprep.subr.bf16.mxu0 %v15269_v30  ;;  %v15270_v30 = vld [vmem:[#allocation6 + $0x7d0] sm:$0xff]  }
 0x5a8   :  { %14814 = vmatprep.mubr.msk.bf16.mxu1 %vm15948_vm0, %v18878_v3  ;;  %14002 = vmatpush3.bf16.msra.mxu0 %v15270_v30 }
 0x5aa   :  { %v13482_v35 = vpop.f32.mrb[48].mxu1  ;;  %v13552_v55 = vpop.f32.mrb[36].mxu0 }
 0x5ab   :  { %v13483_v28 = vpop.f32.mrb[49].mxu1  ;;  %v13553_v39 = vpop.f32.mrb[37].mxu0 }
 0x5ac   :  { %v13554_v9 = vadd.f32 %v13553_v39, %v13552_v55  ;;  %v13485_v6 = vpop.f32.mrb[50].mxu1  ;;  %v13555_v4 = vpop.f32.mrb[38].mxu0 }
 0x5ad   :  { %v13486_v48 = vpop.f32.mrb[51].mxu1  ;;  %v13556_v60 = vpop.f32.mrb[39].mxu0 }
 0x5ae   :  { %v17464_v20 = vadd.f32 %v13554_v9, %v17419_v63  ;;  %v13557_v52 = vadd.f32 %v13556_v60, %v13555_v4 }
 0x5af   :  { %14815 = vmatmul.mubr.bf16.gmra.mrb[156].mxu1 %v18880_v0 }
 0x5b0   :  { %v17468_v22 = vadd.f32 %v13557_v52, %v17424_v32  ;;  %14818 = vmatprep.mubr.msk.bf16.mxu1 %vm15948_vm0, %v18878_v3 }
 0x5b2   :  { %v13488_v14 = vpop.f32.mrb[52].mxu1  ;;  %v13558_v25 = vpop.f32.mrb[40].mxu0 }
 0x5b3   :  { %v13489_v35 = vpop.f32.mrb[53].mxu1  ;;  %v13559_v55 = vpop.f32.mrb[41].mxu0 }
 0x5b4   :  { %v17473_v28 = vadd.f32 %v13489_v35, %v13488_v14  ;;  %v13560_v63 = vadd.f32 %v13559_v55, %v13558_v25  ;;  %v13491_v39 = vpop.f32.mrb[54].mxu1  ;;  %v13561_v9 = vpop.f32.mrb[42].mxu0 }
 0x5b5   :  { %v13492_v6 = vpop.f32.mrb[55].mxu1  ;;  %v13562_v4 = vpop.f32.mrb[43].mxu0 }
 0x5b6   :  { %v17475_v32 = vadd.f32 %v13492_v6, %v13491_v39  ;;  %v13563_v48 = vadd.f32 %v13562_v4, %v13561_v9  ;;  %v17478_v60 = vadd.f32 %v13560_v63, %v17434_v51 }
 0x5b7   :  { %14819 = vmatmul.mubr.bf16.gmra.mrb[160].mxu1 %v18880_v0 }
 0x5b8   :  { %14822 = vmatprep.mubr.msk.bf16.mxu1 %vm15948_vm0, %v18878_v3  ;;  %v17484_v52 = vadd.f32 %v13563_v48, %v17439_v50 }
 0x5ba   :  { %v13494_v14 = vpop.f32.mrb[56].mxu1  ;;  %v13564_v25 = vpop.f32.mrb[44].mxu0 }
 0x5bb   :  { %v13495_v35 = vpop.f32.mrb[57].mxu1  ;;  %v13565_v55 = vpop.f32.mrb[45].mxu0 }
 0x5bc   :  { %v17486_v39 = vadd.f32 %v13495_v35, %v13494_v14  ;;  %v13566_v9 = vadd.f32 %v13565_v55, %v13564_v25  ;;  %v13497_v6 = vpop.f32.mrb[58].mxu1  ;;  %v13567_v51 = vpop.f32.mrb[46].mxu0 }
 0x5bd   :  { %v13498_v63 = vpop.f32.mrb[59].mxu1  ;;  %v13568_v4 = vpop.f32.mrb[47].mxu0 }
 0x5be   :  { %v17488_v40 = vadd.f32 %v13498_v63, %v13497_v6  ;;  %v13569_v53 = vadd.f32 %v13568_v4, %v13567_v51  ;;  %v17491_v31 = vadd.f32 %v13566_v9, %v17449_v2  ;;  %v15271_v4 = vld [vmem:[#allocation6 + $0x818] sm:$0xff]  }
 0x5bf   :  { %14823 = vmatmul.mubr.bf16.gmra.mrb[164].mxu1 %v18880_v0  ;;  %v15272_v2 = vld [vmem:[#allocation6 + $0x7d8] sm:$0xff]   ;;  %14003 = vmatprep.subr.bf16.mxu0 %v15271_v4 }
 0x5c0   :  { %v17495_v50 = vadd.f32 %v13569_v53, %v17451_v43  ;;  %6973 = vmatprep.mubr.bf16.mxu1 %v18880_v0  ;;  %14004 = vmatpush3.bf16.msra.mxu0 %v15272_v2 }
 0x5c2   :  { %v13500_v48 = vpop.f32.mrb[60].mxu1  ;;  %v13570_v30 = vpop.f32.mrb[48].mxu0 }
 0x5c3   :  { %v13501_v14 = vpop.f32.mrb[61].mxu1  ;;  %v13571_v25 = vpop.f32.mrb[49].mxu0 }
 0x5c4   :  { %v17498_v35 = vadd.f32 %v13501_v14, %v13500_v48  ;;  %v13503_v55 = vpop.f32.mrb[62].mxu1  ;;  %v13573_v6 = vpop.f32.mrb[50].mxu0 }
 0x5c5   :  { %v13504_v63 = vpop.f32.mrb[63].mxu1  ;;  %v13574_v51 = vpop.f32.mrb[51].mxu0  ;;  %v15273_v6 = vld [vmem:[#allocation6 + $0x820] sm:$0xff]  }
 0x5c6   :  { %v17500_v9 = vadd.f32 %v13504_v63, %v13503_v55  ;;  %14005 = vmatprep.subr.bf16.mxu0 %v15273_v6  ;;  %v15276_v6 = vld [vmem:[#allocation6 + $0x7e8] sm:$0xff]  }
 0x5c7   :  { %6974 = vmatmul.mubr.bf16.vlgmr.msra.gmra.mrb[168].mxu1 %v18880_v0  ;;  %14006 = vmatpush3.bf16.msra.mxu0 %v15274_v42 }
 0x5ca   :  { %v13576_v53 = vpop.f32.mrb[52].mxu0  ;;  %v13616_v43 = vpop.f32.mrb[64].mxu1 }
 0x5cb   :  { %v13577_v29 = vpop.f32.mrb[53].mxu0  ;;  %v13617_v30 = vpop.f32.mrb[65].mxu1 }
 0x5cc   :  { %v13618_v62 = vadd.f32 %v13617_v30, %v13616_v43  ;;  %v13579_v25 = vpop.f32.mrb[54].mxu0  ;;  %v13619_v48 = vpop.f32.mrb[66].mxu1 }
 0x5cd   :  { %v13580_v14 = vpop.f32.mrb[55].mxu0  ;;  %v13620_v44 = vpop.f32.mrb[67].mxu1 }
 0x5ce   :  { %v13621_v51 = vadd.f32 %v13620_v44, %v13619_v48  ;;  %v17504_v61 = vadd.f32 %v13618_v62, %v17331_v47  ;;  %v15275_v48 = vld [vmem:[#allocation6 + $0x828] sm:$0xff]  }
 0x5cf   :  { %14007 = vmatprep.subr.bf16.mxu0 %v15275_v48 }
 0x5d0   :  { %v17507_v55 = vadd.f32 %v13621_v51, %v17334_v36  ;;  %14008 = vmatpush3.bf16.msra.mxu0 %v15276_v6 }
 0x5d2   :  { %v13582_v63 = vpop.f32.mrb[56].mxu0  ;;  %v13622_v4 = vpop.f32.mrb[68].mxu1 }
 0x5d3   :  { %v13583_v29 = vpop.f32.mrb[57].mxu0  ;;  %v13623_v2 = vpop.f32.mrb[69].mxu1 }
 0x5d4   :  { %v13584_v53 = vadd.f32 %v13583_v29, %v13582_v63  ;;  %v13624_v43 = vadd.f32 %v13623_v2, %v13622_v4  ;;  %v13585_v30 = vpop.f32.mrb[58].mxu0  ;;  %v13625_v25 = vpop.f32.mrb[70].mxu1 }
 0x5d5   :  { %v13586_v14 = vpop.f32.mrb[59].mxu0  ;;  %v13626_v37 = vpop.f32.mrb[71].mxu1 }
 0x5d6   :  { %v13587_v49 = vadd.f32 %v13586_v14, %v13585_v30  ;;  %v13627_v44 = vadd.f32 %v13626_v37, %v13625_v25  ;;  %v17510_v62 = vadd.f32 %v13584_v53, %v17473_v28  ;;  %v17513_v47 = vadd.f32 %v13624_v43, %v17422_v1 }
 0x5d8   :  { %v17516_v42 = vadd.f32 %v13587_v49, %v17475_v32  ;;  %v17519_v36 = vadd.f32 %v13627_v44, %v17428_v27 }
 0x5da   :  { %v13588_v51 = vpop.f32.mrb[60].mxu0  ;;  %v13628_v63 = vpop.f32.mrb[72].mxu1 }
 0x5db   :  { %v13589_v4 = vpop.f32.mrb[61].mxu0  ;;  %v13629_v29 = vpop.f32.mrb[73].mxu1 }
 0x5dc   :  { %v13590_v37 = vadd.f32 %v13589_v4, %v13588_v51  ;;  %v13630_v28 = vadd.f32 %v13629_v29, %v13628_v63  ;;  %v13591_v2 = vpop.f32.mrb[62].mxu0  ;;  %v13631_v53 = vpop.f32.mrb[74].mxu1 }
 0x5dd   :  { %v13592_v1 = vpop.f32.mrb[63].mxu0  ;;  %v13632_v43 = vpop.f32.mrb[75].mxu1 }
 0x5de   :  { %v13593_v30 = vadd.f32 %v13592_v1, %v13591_v2  ;;  %v13633_v49 = vadd.f32 %v13632_v43, %v13631_v53  ;;  %v17522_v32 = vadd.f32 %v13590_v37, %v17486_v39  ;;  %v17525_v27 = vadd.f32 %v13630_v28, %v17437_v41 }
 0x5e0   :  { %v17528_v25 = vadd.f32 %v13593_v30, %v17488_v40  ;;  %v17531_v14 = vadd.f32 %v13633_v49, %v17443_v46 }
 0x5e2   :  { %v13594_v44 = vpop.f32.mrb[64].mxu0  ;;  %v13634_v48 = vpop.f32.mrb[76].mxu1 }
 0x5e3   :  { %v13595_v6 = vpop.f32.mrb[65].mxu0  ;;  %v13635_v51 = vpop.f32.mrb[77].mxu1 }
 0x5e4   :  { %v13596_v63 = vadd.f32 %v13595_v6, %v13594_v44  ;;  %v13597_v4 = vpop.f32.mrb[66].mxu0  ;;  %v13637_v29 = vpop.f32.mrb[78].mxu1  ;;  %v15277_v6 = vld [vmem:[#allocation6 + $0x830] sm:$0xff]  }
 0x5e5   :  { %v13598_v2 = vpop.f32.mrb[67].mxu0  ;;  %v13638_v53 = vpop.f32.mrb[79].mxu1  ;;  %v15278_v51 = vld [vmem:[#allocation6 + $0x7f0] sm:$0xff]   ;;  %14009 = vmatprep.subr.bf16.mxu0 %v15277_v6 }
 0x5e6   :  { %v13599_v39 = vadd.f32 %v13598_v2, %v13597_v4  ;;  %v17534_v37 = vadd.f32 %v13596_v63, %v17498_v35  ;;  %14010 = vmatpush3.bf16.msra.mxu0 %v15278_v51 }
 0x5e8   :  { %v17537_v41 = vadd.f32 %v13599_v39, %v17500_v9 }
 0x5ea   :  { %v13640_v40 = vpop.f32.mrb[80].mxu1  ;;  %v13710_v28 = vpop.f32.mrb[68].mxu0 }
 0x5eb   :  { %v13641_v46 = vpop.f32.mrb[81].mxu1  ;;  %v13711_v1 = vpop.f32.mrb[69].mxu0 }
 0x5ec   :  { %v13712_v43 = vadd.f32 %v13711_v1, %v13710_v28  ;;  %v13643_v30 = vpop.f32.mrb[82].mxu1  ;;  %v13713_v49 = vpop.f32.mrb[70].mxu0 }
 0x5ed   :  { %v13644_v48 = vpop.f32.mrb[83].mxu1  ;;  %v13714_v44 = vpop.f32.mrb[71].mxu0 }
 0x5ee   :  { %v13715_v29 = vadd.f32 %v13714_v44, %v13713_v49  ;;  %v17540_v4 = vadd.f32 %v13712_v43, %v17504_v61  ;;  %v15279_v48 = vld [vmem:[#allocation6 + $0x838] sm:$0xff]  }
 0x5ef   :  { %v15280_v49 = vld [vmem:[#allocation6 + $0x7f8] sm:$0xff]   ;;  %14011 = vmatprep.subr.bf16.mxu0 %v15279_v48 }
 0x5f0   :  { %v17543_v35 = vadd.f32 %v13715_v29, %v17507_v55  ;;  %14012 = vmatpush3.bf16.msra.mxu0 %v15280_v49  ;;  %v15281_v29 = vld [vmem:[#allocation6 + $0x880] sm:$0xff]  }
 0x5f1   :  { %14826 = vmatprep.subr.bf16.mxu0 %v18878_v3  ;;  %14091 = vmatprep.subr.bf16.mxu1 %v15281_v29 }
 0x5f2   :  { %v13646_v9 = vpop.f32.mrb[84].mxu1  ;;  %v13716_v63 = vpop.f32.mrb[72].mxu0 }
 0x5f3   :  { %v13647_v2 = vpop.f32.mrb[85].mxu1  ;;  %v13717_v53 = vpop.f32.mrb[73].mxu0 }
 0x5f4   :  { %v13648_v39 = vadd.f32 %v13647_v2, %v13646_v9  ;;  %v13718_v40 = vadd.f32 %v13717_v53, %v13716_v63  ;;  %v13649_v28 = vpop.f32.mrb[86].mxu1  ;;  %v13719_v46 = vpop.f32.mrb[74].mxu0  ;;  %v15282_v9 = vld [vmem:[#allocation6 + $0x840] sm:$0xff]  }
 0x5f5   :  { %v13650_v1 = vpop.f32.mrb[87].mxu1  ;;  %v13720_v30 = vpop.f32.mrb[75].mxu0  ;;  %14092 = vmatpush3.bf16.msra.mxu1 %v15282_v9 }
 0x5f6   :  { %v13651_v44 = vadd.f32 %v13650_v1, %v13649_v28  ;;  %v13721_v61 = vadd.f32 %v13720_v30, %v13719_v46  ;;  %v17546_v43 = vadd.f32 %v13718_v40, %v17513_v47  ;;  %v17549_v55 = vadd.f32 %v13648_v39, %v17464_v20 }
 0x5f8   :  { %v17552_v6 = vadd.f32 %v13721_v61, %v17519_v36  ;;  %v17555_v51 = vadd.f32 %v13651_v44, %v17468_v22 }
 0x5fa   :  { %v13652_v63 = vpop.f32.mrb[88].mxu1  ;;  %v13722_v2 = vpop.f32.mrb[76].mxu0 }
 0x5fb   :  { %v13653_v53 = vpop.f32.mrb[89].mxu1  ;;  %v13723_v47 = vpop.f32.mrb[77].mxu0 }
 0x5fc   :  { %v13654_v40 = vadd.f32 %v13653_v53, %v13652_v63  ;;  %v13724_v20 = vadd.f32 %v13723_v47, %v13722_v2  ;;  %v13655_v39 = vpop.f32.mrb[90].mxu1  ;;  %v13725_v28 = vpop.f32.mrb[78].mxu0  ;;  %v15284_v63 = vld [vmem:[#allocation6 + $0x888] sm:$0xff]  }
 0x5fd   :  { %v13656_v36 = vpop.f32.mrb[91].mxu1  ;;  %v13726_v46 = vpop.f32.mrb[79].mxu0  ;;  %v15285_v53 = vld [vmem:[#allocation6 + $0x848] sm:$0xff]   ;;  %14093 = vmatprep.subr.bf16.mxu1 %v15284_v63  ;;  %v15289_v63 = vld [vmem:[#allocation6 + $0x858] sm:$0xff]  }
 0x5fe   :  { %v17559_v22 = vadd.f32 %v13654_v40, %v17478_v60  ;;  %v13657_v1 = vadd.f32 %v13656_v36, %v13655_v39  ;;  %v13727_v30 = vadd.f32 %v13726_v46, %v13725_v28  ;;  %v17562_v48 = vadd.f32 %v13724_v20, %v17525_v27  ;;  %14094 = vmatpush3.bf16.msra.mxu1 %v15285_v53  ;;  %v15286_v20 = vld [vmem:[#allocation6 + $0x890] sm:$0xff]  }
 0x5ff   :  { %14095 = vmatprep.subr.bf16.mxu1 %v15286_v20  ;;  %v15294_v20 = vld [vmem:[#allocation6 + $0x868] sm:$0xff]  }
 0x600   :  { %v17565_v49 = vadd.f32 %v13657_v1, %v17484_v52  ;;  %v17568_v44 = vadd.f32 %v13727_v30, %v17531_v14  ;;  %v15287_v14 = vld [vmem:[#allocation6 + $0x850] sm:$0xff]   ;;  %v15288_v30 = vld [vmem:[#allocation6 + $0x898] sm:$0xff]  }
 0x602   :  { %v13658_v61 = vpop.f32.mrb[92].mxu1  ;;  %v13728_v29 = vpop.f32.mrb[80].mxu0  ;;  %14096 = vmatpush3.bf16.msra.mxu1 %v15287_v14 }
 0x603   :  { %v13659_v9 = vpop.f32.mrb[93].mxu1  ;;  %v13729_v2 = vpop.f32.mrb[81].mxu0  ;;  %14097 = vmatprep.subr.bf16.mxu1 %v15288_v30 }
 0x604   :  { %v13660_v47 = vadd.f32 %v13659_v9, %v13658_v61  ;;  %v13661_v60 = vpop.f32.mrb[94].mxu1  ;;  %v13731_v40 = vpop.f32.mrb[82].mxu0 }
 0x605   :  { %v13662_v39 = vpop.f32.mrb[95].mxu1  ;;  %v13732_v28 = vpop.f32.mrb[83].mxu0 }
 0x606   :  { %v17571_v27 = vadd.f32 %v13660_v47, %v17491_v31  ;;  %v13663_v52 = vadd.f32 %v13662_v39, %v13661_v60  ;;  %14098 = vmatpush3.bf16.msra.mxu1 %v15289_v63  ;;  %v15291_v47 = vld [vmem:[#allocation6 + $0x8a0] sm:$0xff]   ;;  %v15293_v39 = vld [vmem:[#allocation6 + $0x8a8] sm:$0xff]  }
 0x607   :  { %v15292_v60 = vld [vmem:[#allocation6 + $0x860] sm:$0xff]   ;;  %14099 = vmatprep.subr.bf16.mxu1 %v15291_v47 }
 0x608   :  { %v17574_v36 = vadd.f32 %v13663_v52, %v17495_v50 }
 0x60a   :  { %v13664_v46 = vpop.f32.mrb[96].mxu1  ;;  %v13734_v1 = vpop.f32.mrb[84].mxu0  ;;  %14100 = vmatpush3.bf16.msra.mxu1 %v15292_v60  ;;  %v15298_v60 = vld [vmem:[#allocation6 + $0x8b8] sm:$0xff]  }
 0x60b   :  { %v13665_v61 = vpop.f32.mrb[97].mxu1  ;;  %v13735_v29 = vpop.f32.mrb[85].mxu0  ;;  %14101 = vmatprep.subr.bf16.mxu1 %v15293_v39  ;;  %v15299_v39 = vld [vmem:[#allocation6 + $0x878] sm:$0xff]  }
 0x60c   :  { %v13667_v9 = vpop.f32.mrb[98].mxu1  ;;  %v13737_v2 = vpop.f32.mrb[86].mxu0 }
 0x60d   :  { %v13668_v53 = vpop.f32.mrb[99].mxu1  ;;  %v13738_v31 = vpop.f32.mrb[87].mxu0  ;;  %v15295_v9 = vld [vmem:[#allocation6 + $0x8b0] sm:$0xff]  }
 0x60e   :  { %14102 = vmatpush3.bf16.msra.mxu1 %v15294_v20  ;;  %v15296_v2 = vld [vmem:[#allocation6 + $0x870] sm:$0xff]  }
 0x60f   :  { %14103 = vmatprep.subr.bf16.mxu1 %v15295_v9 }
 0x612   :  { %v13670_v50 = vpop.f32.mrb[100].mxu1  ;;  %v13740_v40 = vpop.f32.mrb[88].mxu0  ;;  %14104 = vmatpush3.bf16.msra.mxu1 %v15296_v2 }
 0x613   :  { %v13671_v28 = vpop.f32.mrb[101].mxu1  ;;  %v13741_v52 = vpop.f32.mrb[89].mxu0  ;;  %14105 = vmatprep.subr.bf16.mxu1 %v15298_v60 }
 0x614   :  { %v13742_v14 = vadd.f32 %v13741_v52, %v13740_v40  ;;  %v13673_v46 = vpop.f32.mrb[102].mxu1  ;;  %v13743_v1 = vpop.f32.mrb[90].mxu0 }
 0x615   :  { %v13674_v61 = vpop.f32.mrb[103].mxu1  ;;  %v13744_v29 = vpop.f32.mrb[91].mxu0 }
 0x616   :  { %v13745_v30 = vadd.f32 %v13744_v29, %v13743_v1  ;;  %v17577_v63 = vadd.f32 %v13742_v14, %v17549_v55  ;;  %14106 = vmatpush3.bf16.msra.mxu1 %v15299_v39 }
 0x618   :  { %v17580_v53 = vadd.f32 %v13745_v30, %v17555_v51 }
 0x61a   :  { %v13676_v31 = vpop.f32.mrb[104].mxu1  ;;  %v13746_v47 = vpop.f32.mrb[92].mxu0 }
 0x61b   :  { %v13677_v50 = vpop.f32.mrb[105].mxu1  ;;  %v13747_v40 = vpop.f32.mrb[93].mxu0 }
 0x61c   :  { %v13678_v28 = vadd.f32 %v13677_v50, %v13676_v31  ;;  %v13748_v52 = vadd.f32 %v13747_v40, %v13746_v47  ;;  %v13679_v20 = vpop.f32.mrb[106].mxu1  ;;  %v13749_v46 = vpop.f32.mrb[94].mxu0 }
 0x61d   :  { %v13680_v55 = vpop.f32.mrb[107].mxu1  ;;  %v13750_v14 = vpop.f32.mrb[95].mxu0 }
 0x61e   :  { %v17583_v1 = vadd.f32 %v13678_v28, %v17510_v62  ;;  %v13681_v51 = vadd.f32 %v13680_v55, %v13679_v20  ;;  %v13751_v61 = vadd.f32 %v13750_v14, %v13749_v46  ;;  %v17586_v29 = vadd.f32 %v13748_v52, %v17559_v22 }
 0x620   :  { %v17589_v30 = vadd.f32 %v13681_v51, %v17516_v42  ;;  %v17592_v9 = vadd.f32 %v13751_v61, %v17565_v49 }
 0x622   :  { %v13682_v2 = vpop.f32.mrb[108].mxu1  ;;  %v13752_v31 = vpop.f32.mrb[96].mxu0 }
 0x623   :  { %v13683_v47 = vpop.f32.mrb[109].mxu1  ;;  %v13753_v60 = vpop.f32.mrb[97].mxu0 }
 0x624   :  { %v13684_v50 = vadd.f32 %v13683_v47, %v13682_v2  ;;  %v13754_v40 = vadd.f32 %v13753_v60, %v13752_v31  ;;  %v13685_v39 = vpop.f32.mrb[110].mxu1  ;;  %v13755_v62 = vpop.f32.mrb[98].mxu0 }
 0x625   :  { %v13686_v28 = vpop.f32.mrb[111].mxu1  ;;  %v13756_v20 = vpop.f32.mrb[99].mxu0 }
 0x626   :  { %v17595_v46 = vadd.f32 %v13684_v50, %v17522_v32  ;;  %v13687_v22 = vadd.f32 %v13686_v28, %v13685_v39  ;;  %v13757_v52 = vadd.f32 %v13756_v20, %v13755_v62  ;;  %v17598_v42 = vadd.f32 %v13754_v40, %v17571_v27 }
 0x628   :  { %v17601_v49 = vadd.f32 %v13687_v22, %v17528_v25  ;;  %v17604_v55 = vadd.f32 %v13757_v52, %v17574_v36  ;;  %v17613_v22 = vld [vmem:[#allocation9 + $0x3] ss:$0 sm:$0xff] }
 0x62a   :  { %v13688_v14 = vpop.f32.mrb[112].mxu1  ;;  %v13758_v51 = vpop.f32.mrb[100].mxu0 }
 0x62b   :  { %v13689_v61 = vpop.f32.mrb[113].mxu1  ;;  %v13759_v2 = vpop.f32.mrb[101].mxu0  ;;  %v17615_v51 = vld [vmem:[#allocation8] ss:$0 sm:$0xff] }
 0x62c   :  { %v13690_v31 = vadd.f32 %v13689_v61, %v13688_v14  ;;  %v13691_v47 = vpop.f32.mrb[114].mxu1  ;;  %v13761_v60 = vpop.f32.mrb[102].mxu0 }
 0x62d   :  { %v13692_v32 = vpop.f32.mrb[115].mxu1  ;;  %v13762_v50 = vpop.f32.mrb[103].mxu0 }
 0x62e   :  { %v17607_v39 = vadd.f32 %v13690_v31, %v17534_v37  ;;  %v13693_v27 = vadd.f32 %v13692_v32, %v13691_v47 }
 0x630   :  { %v17610_v40 = vadd.f32 %v13693_v27, %v17537_v41 }
 0x632   :  { %v5712_v25 = vpop.f32.mrb[116].mxu1  ;;  %v13764_v62 = vpop.f32.mrb[104].mxu0 }
 0x633   :  { %v5713_v36 = vadd.f32 %v5712_v25, %v17540_v4  ;;  %v14776_v28 = vpop.f32.mrb[117].mxu1  ;;  %v13765_v20 = vpop.f32.mrb[105].mxu0 }
 0x634   :  { %v5715_v52 = vpop.f32.mrb[118].mxu1  ;;  %v13767_v14 = vpop.f32.mrb[106].mxu0 }
 0x635   :  { %v5808_v61 = vmul.f32 %v17615_v51, %v5713_v36  ;;  %v5716_v37 = vadd.f32 %v5715_v52, %v17543_v35  ;;  %v14777_v2 = vpop.f32.mrb[119].mxu1  ;;  %v13768_v31 = vpop.f32.mrb[107].mxu0 }
 0x637   :  { %v5814_v41 = vadd.f32 %v17613_v22, %v5808_v61  ;;  %v5809_v47 = vmul.f32 %v17615_v51, %v5716_v37 }
 0x639   :  { %v5815_v4 = vadd.f32 %v17613_v22, %v5809_v47  ;;  %v5816_v50 = vmax.f32 %v5814_v41, 0.0 }
 0x63a   :  { %v13770_v60 = vpop.f32.mrb[108].mxu0  ;;  %v5720_v32 = vpop.f32.mrb[120].mxu1 }
 0x63b   :  { %v5817_v27 = vmax.f32 %v5815_v4, 0.0  ;;  %v5721_v25 = vadd.f32 %v5720_v32, %v17546_v43  ;;  %v13771_v62 = vpop.f32.mrb[109].mxu0  ;;  %v14780_v28 = vpop.f32.mrb[121].mxu1 }
 0x63c   :  { %v13772_v20 = vadd.f32 %v13771_v62, %v13770_v60  ;;  %v13773_v36 = vpop.f32.mrb[110].mxu0  ;;  %v5723_v14 = vpop.f32.mrb[122].mxu1 }
 0x63d   :  { %v17623_v35 = vpack.c.bf16 %v5817_v27, %v5816_v50  ;;  %v5820_v52 = vmul.f32 %v17615_v51, %v5721_v25  ;;  %v5724_v61 = vadd.f32 %v5723_v14, %v17552_v6  ;;  %v13774_v37 = vpop.f32.mrb[111].mxu0  ;;  %v14781_v2 = vpop.f32.mrb[123].mxu1 }
 0x63e   :  { %v13775_v31 = vadd.f32 %v13774_v37, %v13773_v36  ;;  %v17628_v47 = vadd.f32 %v13772_v20, %v17583_v1 }
 0x63f   :  { %v5822_v41 = vadd.f32 %v17613_v22, %v5820_v52  ;;  %v5821_v43 = vmul.f32 %v17615_v51, %v5724_v61  ;;  %6880 = vmatprep.mubr.bf16.mxu0 %v17623_v35  ;;  %6981 = vmatprep.mubr.bf16.mxu1 %v17623_v35 }
 0x640   :  { %6881 = vmatmul.mubr.bf16.gmra.mrb[140].mxu0 %v18880_v0  ;;  %6982 = vmatmul.mubr.bf16.gmra.mrb[172].mxu1 %v18880_v0  ;;  %v17637_v6 = vadd.f32 %v13775_v31, %v17589_v30 }
 0x641   :  { %v5823_v4 = vadd.f32 %v17613_v22, %v5821_v43  ;;  %v5824_v32 = vmax.f32 %v5822_v41, 0.0 }
 0x642   :  { %v13776_v60 = vpop.f32.mrb[112].mxu0  ;;  %v5728_v1 = vpop.f32.mrb[124].mxu1 }
 0x643   :  { %v5825_v50 = vmax.f32 %v5823_v4, 0.0  ;;  %v5729_v27 = vadd.f32 %v5728_v1, %v17562_v48  ;;  %v13777_v25 = vpop.f32.mrb[113].mxu0  ;;  %v14784_v62 = vpop.f32.mrb[125].mxu1 }
 0x644   :  { %v13778_v28 = vadd.f32 %v13777_v25, %v13776_v60  ;;  %v13779_v20 = vpop.f32.mrb[114].mxu0  ;;  %v5731_v36 = vpop.f32.mrb[126].mxu1 }
 0x645   :  { %v17641_v14 = vpack.c.bf16 %v5825_v50, %v5824_v32  ;;  %v5828_v52 = vmul.f32 %v17615_v51, %v5729_v27  ;;  %v5732_v30 = vadd.f32 %v5731_v36, %v17568_v44  ;;  %v13780_v61 = vpop.f32.mrb[115].mxu0  ;;  %v14785_v37 = vpop.f32.mrb[127].mxu1 }
 0x646   :  { %v13781_v2 = vadd.f32 %v13780_v61, %v13779_v20  ;;  %v17646_v31 = vadd.f32 %v13778_v28, %v17595_v46 }
 0x647   :  { %v5830_v41 = vadd.f32 %v17613_v22, %v5828_v52  ;;  %v5829_v48 = vmul.f32 %v17615_v51, %v5732_v30  ;;  %6888 = vmatprep.mubr.bf16.mxu0 %v17641_v14  ;;  %6989 = vmatprep.mubr.bf16.mxu1 %v17641_v14 }
 0x648   :  { %6889 = vmatmul.mubr.bf16.gmra.mrb[144].mxu0 %v17623_v35  ;;  %6990 = vmatmul.mubr.bf16.gmra.mrb[176].mxu1 %v18880_v0  ;;  %v17655_v44 = vadd.f32 %v13781_v2, %v17601_v49 }
 0x649   :  { %v5831_v43 = vadd.f32 %v17613_v22, %v5829_v48  ;;  %v5832_v60 = vmax.f32 %v5830_v41, 0.0 }
 0x64a   :  { %v13782_v4 = vpop.f32.mrb[116].mxu0  ;;  %v5736_v46 = vpop.f32.mrb[128].mxu1 }
 0x64b   :  { %v5833_v1 = vmax.f32 %v5831_v43, 0.0  ;;  %v13783_v32 = vpop.f32.mrb[117].mxu0  ;;  %v14788_v50 = vpop.f32.mrb[129].mxu1 }
 0x64c   :  { %v13784_v27 = vadd.f32 %v13783_v32, %v13782_v4  ;;  %v13785_v25 = vpop.f32.mrb[118].mxu0  ;;  %v5738_v62 = vpop.f32.mrb[130].mxu1 }
 0x64d   :  { %v17658_v28 = vpack.c.bf16 %v5833_v1, %v5832_v60  ;;  %v13786_v20 = vpop.f32.mrb[119].mxu0  ;;  %v14789_v36 = vpop.f32.mrb[131].mxu1 }
 0x64e   :  { %v13787_v52 = vadd.f32 %v13786_v20, %v13785_v25  ;;  %v17661_v30 = vadd.f32 %v13784_v27, %v17607_v39 }
 0x64f   :  { %6896 = vmatprep.mubr.bf16.mxu0 %v17658_v28  ;;  %6997 = vmatprep.mubr.bf16.mxu1 %v17658_v28 }
 0x650   :  { %6897 = vmatmul.mubr.bf16.gmra.mrb[148].mxu0 %v17641_v14  ;;  %6998 = vmatmul.mubr.bf16.gmra.mrb[180].mxu1 %v18880_v0  ;;  %v17668_v49 = vadd.f32 %v13787_v52, %v17610_v40 }
 0x651   :  { %6904 = vmatprep.mubr.bf16.mxu0 %v18880_v0  ;;  %7003 = vmatprep.mubr.bf16.mxu1 %v18880_v0 }
 0x652   :  { %v5742_v61 = vpop.f32.mrb[132].mxu1  ;;  %v13825_v36 = vpop.f32.mrb[120].mxu0 }
 0x653   :  { %v14792_v37 = vpop.f32.mrb[133].mxu1 }
 0x654   :  { %v5744_v2 = vpop.f32.mrb[134].mxu1 }
 0x655   :  { %v14793_v39 = vpop.f32.mrb[135].mxu1 }
 0x658   :  { %6905 = vmatmul.mubr.bf16.gmra.mrb[152].mxu0 %v17658_v28  ;;  %7004 = vmatmul.mubr.bf16.gmra.mrb[184].mxu1 %v17623_v35 }
 0x659   :  { %6910 = vmatprep.mubr.bf16.mxu0 %v18880_v0  ;;  %7009 = vmatprep.mubr.bf16.mxu1 %v18880_v0 }
 0x65a   :  { %v5748_v41 = vpop.f32.mrb[136].mxu1 }
 0x65b   :  { %v5749_v40 = vadd.f32 %v5748_v41, %v17577_v63  ;;  %v14796_v48 = vpop.f32.mrb[137].mxu1 }
 0x65c   :  { %v5751_v43 = vpop.f32.mrb[138].mxu1 }
 0x65d   :  { %v5836_v4 = vmul.f32 %v17615_v51, %v5749_v40  ;;  %v5752_v46 = vadd.f32 %v5751_v43, %v17580_v53  ;;  %v14797_v60 = vpop.f32.mrb[139].mxu1 }
 0x65f   :  { %v5838_v1 = vadd.f32 %v17613_v22, %v5836_v4  ;;  %v5837_v32 = vmul.f32 %v17615_v51, %v5752_v46 }
 0x660   :  { %6911 = vmatmul.mubr.bf16.gmra.mrb[156].mxu0 %v18880_v0  ;;  %7010 = vmatmul.mubr.bf16.gmra.mrb[188].mxu1 %v17641_v14 }
 0x661   :  { %v5839_v50 = vadd.f32 %v17613_v22, %v5837_v32  ;;  %v5840_v25 = vmax.f32 %v5838_v1, 0.0 }
 0x662   :  { %v5756_v27 = vpop.f32.mrb[140].mxu1 }
 0x663   :  { %v5841_v63 = vmax.f32 %v5839_v50, 0.0  ;;  %v5757_v62 = vadd.f32 %v5756_v27, %v17586_v29  ;;  %v14800_v20 = vpop.f32.mrb[141].mxu1  ;;  %v13826_v29 = vpop.f32.mrb[121].mxu0 }
 0x664   :  { %v5759_v52 = vpop.f32.mrb[142].mxu1  ;;  %v17696_v48 = vadd.f32 %v13826_v29, %v13825_v36  ;;  %v13828_v43 = vpop.f32.mrb[122].mxu0 }
 0x665   :  { %v17685_v53 = vpack.c.bf16 %v5841_v63, %v5840_v25  ;;  %v5844_v61 = vmul.f32 %v17615_v51, %v5757_v62  ;;  %v5760_v37 = vadd.f32 %v5759_v52, %v17592_v9  ;;  %v14801_v2 = vpop.f32.mrb[143].mxu1  ;;  %v13829_v4 = vpop.f32.mrb[123].mxu0 }
 0x666   :  { %v17699_v50 = vadd.f32 %v13829_v4, %v13828_v43  ;;  %v13831_v36 = vpop.f32.mrb[124].mxu0 }
 0x667   :  { %v5846_v39 = vadd.f32 %v17613_v22, %v5844_v61  ;;  %v5845_v41 = vmul.f32 %v17615_v51, %v5760_v37  ;;  %6916 = vmatprep.mubr.bf16.mxu0 %v17685_v53  ;;  %7017 = vmatprep.mubr.bf16.mxu1 %v17685_v53 }
 0x668   :  { %6917 = vmatmul.mubr.bf16.gmra.mrb[160].mxu0 %v18880_v0  ;;  %7018 = vmatmul.mubr.bf16.gmra.mrb[192].mxu1 %v17658_v28 }
 0x669   :  { %v5847_v40 = vadd.f32 %v17613_v22, %v5845_v41  ;;  %v5848_v46 = vmax.f32 %v5846_v39, 0.0 }
 0x66a   :  { %v5764_v9 = vpop.f32.mrb[144].mxu1 }
 0x66b   :  { %v5849_v60 = vmax.f32 %v5847_v40, 0.0  ;;  %v5765_v1 = vadd.f32 %v5764_v9, %v17598_v42  ;;  %v14804_v32 = vpop.f32.mrb[145].mxu1  ;;  %v13832_v42 = vpop.f32.mrb[125].mxu0 }
 0x66c   :  { %v5767_v27 = vpop.f32.mrb[146].mxu1  ;;  %v17712_v2 = vadd.f32 %v13832_v42, %v13831_v36  ;;  %v15283_v42 = vld [vmem:[#allocation6 + $0x8c0] sm:$0xff]  }
 0x66d   :  { %v17701_v25 = vpack.c.bf16 %v5849_v60, %v5848_v46  ;;  %v5852_v63 = vmul.f32 %v17615_v51, %v5765_v1  ;;  %v5768_v62 = vadd.f32 %v5767_v27, %v17604_v55  ;;  %v14805_v20 = vpop.f32.mrb[147].mxu1  ;;  %v13834_v55 = vpop.f32.mrb[126].mxu0 }
 0x66e   :  { %v13835_v41 = vpop.f32.mrb[127].mxu0 }
 0x66f   :  { %v5854_v52 = vadd.f32 %v17613_v22, %v5852_v63  ;;  %v5853_v61 = vmul.f32 %v17615_v51, %v5768_v62  ;;  %6924 = vmatprep.mubr.bf16.mxu0 %v17701_v25  ;;  %7025 = vmatprep.mubr.bf16.mxu1 %v17701_v25  ;;  %v17714_v9 = vadd.f32 %v13835_v41, %v13834_v55  ;;  %v13837_v1 = vpop.f32.mrb[128].mxu0 }
 0x670   :  { %6925 = vmatmul.mubr.bf16.gmra.mrb[164].mxu0 %v17685_v53  ;;  %7026 = vmatmul.mubr.bf16.gmra.mrb[196].mxu1 %v18880_v0  ;;  %v13838_v32 = vpop.f32.mrb[129].mxu0 }
 0x671   :  { %v5855_v37 = vadd.f32 %v17613_v22, %v5853_v61  ;;  %v5856_v29 = vmax.f32 %v5854_v52, 0.0  ;;  %v17724_v27 = vadd.f32 %v13838_v32, %v13837_v1  ;;  %v13840_v63 = vpop.f32.mrb[130].mxu0 }
 0x672   :  { %v5772_v39 = vpop.f32.mrb[148].mxu1  ;;  %v13841_v20 = vpop.f32.mrb[131].mxu0 }
 0x673   :  { %v5857_v40 = vmax.f32 %v5855_v37, 0.0  ;;  %v14808_v43 = vpop.f32.mrb[149].mxu1  ;;  %v17726_v52 = vadd.f32 %v13841_v20, %v13840_v63  ;;  %v13843_v55 = vpop.f32.mrb[132].mxu0 }
 0x674   :  { %v5774_v4 = vpop.f32.mrb[150].mxu1  ;;  %v13844_v39 = vpop.f32.mrb[133].mxu0 }
 0x675   :  { %v17716_v46 = vpack.c.bf16 %v5857_v40, %v5856_v29  ;;  %v14809_v60 = vpop.f32.mrb[151].mxu1  ;;  %v13846_v41 = vpop.f32.mrb[134].mxu0  ;;  %v15290_v29 = vld [vmem:[#allocation6 + $0x8c8] sm:$0xff]  }
 0x676   :  { %v13847_v40 = vpop.f32.mrb[135].mxu0 }
 0x677   :  { %6932 = vmatprep.mubr.bf16.mxu0 %v17716_v46  ;;  %7033 = vmatprep.mubr.bf16.mxu1 %v17716_v46  ;;  %v13849_v20 = vpop.f32.mrb[136].mxu0 }
 0x678   :  { %6933 = vmatmul.mubr.bf16.gmra.mrb[168].mxu0 %v17701_v25  ;;  %7034 = vmatmul.mubr.bf16.gmra.mrb[200].mxu1 %v18880_v0 }
 0x679   :  { %7102 = vmatprep.mubr.bf16.mxu0 %v17641_v14  ;;  %7039 = vmatprep.mubr.bf16.mxu1 %v18880_v0 }
 0x67a   :  { %v5778_v62 = vpop.f32.mrb[152].mxu1 }
 0x67b   :  { %v14812_v36 = vpop.f32.mrb[153].mxu1  ;;  %v15297_v62 = vld [vmem:[#allocation6 + $0x8d0] sm:$0xff]  }
 0x67c   :  { %v5780_v61 = vpop.f32.mrb[154].mxu1 }
 0x67d   :  { %v14813_v37 = vpop.f32.mrb[155].mxu1 }
 0x680   :  { %7040 = vmatmul.mubr.bf16.gmra.mrb[204].mxu1 %v17685_v53  ;;  %7103 = vmatmul.mubr.bf16.vlgmr.msra.gmra.mrb[172].mxu0 %v17623_v35 }
 0x681   :  { %14827 = vmatpush3.bf16.msra.mxu0 %v15283_v42  ;;  %7110 = vmatprep.mubr.bf16.mxu0 %v17658_v28  ;;  %v13850_v42 = vpop.f32.mrb[137].mxu0 }
 0x682   :  { %v5784_v43 = vpop.f32.mrb[156].mxu1  ;;  %7045 = vmatprep.mubr.bf16.mxu1 %v18880_v0  ;;  %14828 = vmatprep.subr.bf16.mxu0 %v18878_v3 }
 0x683   :  { %v5785_v4 = vadd.f32 %v5784_v43, %v17628_v47  ;;  %v14816_v60 = vpop.f32.mrb[157].mxu1  ;;  %v13852_v47 = vpop.f32.mrb[138].mxu0 }
 0x684   :  { %v5787_v1 = vpop.f32.mrb[158].mxu1  ;;  %v13853_v55 = vpop.f32.mrb[139].mxu0 }
 0x685   :  { %v5860_v32 = vmul.f32 %v17615_v51, %v5785_v4  ;;  %v5788_v63 = vadd.f32 %v5787_v1, %v17637_v6  ;;  %v14817_v35 = vpop.f32.mrb[159].mxu1  ;;  %14829 = vmatpush3.bf16.msra.mxu0 %v15290_v29  ;;  %v15300_v6 = vld [vmem:[#allocation6 + $0x8d8] sm:$0xff]  }
 0x686   :  { %14830 = vmatprep.subr.bf16.mxu0 %v18878_v3 }
 0x687   :  { %v5862_v36 = vadd.f32 %v17613_v22, %v5860_v32  ;;  %v5861_v61 = vmul.f32 %v17615_v51, %v5788_v63  ;;  %v15301_v63 = vld [vmem:[#allocation6 + $0x8e0] sm:$0xff]  }
 0x688   :  { %7046 = vmatmul.mubr.bf16.gmra.mrb[208].mxu1 %v17701_v25  ;;  %7111 = vmatmul.mubr.bf16.gmra.mrb[176].mxu0 %v17641_v14 }
 0x689   :  { %v5863_v37 = vadd.f32 %v17613_v22, %v5861_v61  ;;  %7118 = vmatprep.mubr.bf16.mxu0 %v18880_v0  ;;  %14831 = vmatpush3.bf16.msra.mxu0 %v15297_v62  ;;  %v5864_v41 = vmax.f32 %v5862_v36, 0.0 }
 0x68a   :  { %v5792_v39 = vpop.f32.mrb[160].mxu1  ;;  %14832 = vmatprep.subr.bf16.mxu0 %v18878_v3 }
 0x68b   :  { %v5865_v29 = vmax.f32 %v5863_v37, 0.0  ;;  %v5793_v40 = vadd.f32 %v5792_v39, %v17646_v31  ;;  %v14820_v43 = vpop.f32.mrb[161].mxu1 }
 0x68c   :  { %v5795_v4 = vpop.f32.mrb[162].mxu1 }
 0x68d   :  { %v17745_v60 = vpack.c.bf16 %v5865_v29, %v5864_v41  ;;  %v5868_v14 = vmul.f32 %v17615_v51, %v5793_v40  ;;  %v5796_v1 = vadd.f32 %v5795_v4, %v17655_v44  ;;  %v14821_v32 = vpop.f32.mrb[163].mxu1  ;;  %14833 = vmatpush3.bf16.msra.mxu0 %v15300_v6  ;;  %v15302_v44 = vld [vmem:[#allocation6 + $0x8e8] sm:$0xff]   ;;  %v15303_v41 = vld [vmem:[#allocation6 + $0x8f0] sm:$0xff]  }
 0x68e   :  { %14834 = vmatprep.subr.bf16.mxu0 %v18878_v3 }
 0x68f   :  { %v5870_v35 = vadd.f32 %v17613_v22, %v5868_v14  ;;  %v5869_v62 = vmul.f32 %v17615_v51, %v5796_v1  ;;  %7053 = vmatprep.mubr.bf16.mxu1 %v17745_v60 }
 0x690   :  { %7054 = vmatmul.mubr.bf16.gmra.mrb[212].mxu1 %v17716_v46  ;;  %7119 = vmatmul.mubr.bf16.gmra.mrb[180].mxu0 %v17658_v28 }
 0x691   :  { %v5871_v31 = vadd.f32 %v17613_v22, %v5869_v62  ;;  %7126 = vmatprep.mubr.bf16.mxu0 %v18880_v0  ;;  %14835 = vmatpush3.bf16.msra.mxu0 %v15301_v63  ;;  %v5872_v36 = vmax.f32 %v5870_v35, 0.0 }
 0x692   :  { %v5800_v20 = vpop.f32.mrb[164].mxu1  ;;  %14836 = vmatprep.subr.bf16.mxu0 %v18878_v3 }
 0x693   :  { %v5873_v61 = vmax.f32 %v5871_v31, 0.0  ;;  %v5801_v42 = vadd.f32 %v5800_v20, %v17661_v30  ;;  %v14824_v47 = vpop.f32.mrb[165].mxu1  ;;  %v17840_v20 = vld [vmem:[#allocation11 + $0x24] ss:$16 sps:$4 sm:$0xff]  }
 0x694   :  { %v5803_v37 = vpop.f32.mrb[166].mxu1  ;;  %v17863_v47 = vld [vmem:[#allocation11 + $0x40] ss:$16 sps:$4 sm:$0xff]  }
 0x695   :  { %v17759_v6 = vpack.c.bf16 %v5873_v61, %v5872_v36  ;;  %v5876_v55 = vmul.f32 %v17615_v51, %v5801_v42  ;;  %v5804_v28 = vadd.f32 %v5803_v37, %v17668_v49  ;;  %14837 = vmatpush3.bf16.msra.mxu0 %v15302_v44  ;;  %v14825_v39 = vpop.f32.mrb[167].mxu1  ;;  %v15304_v49 = vld [vmem:[#allocation6 + $0x8f8] sm:$0xff]   ;;  %v17827_v44 = vld [vmem:[#allocation11 + $0x8] ss:$16 sps:$4 sm:$0xff]  }
 0x696   :  { %14838 = vmatprep.subr.bf16.mxu0 %v18878_v3  ;;  %v17842_v36 = vld [vmem:[#allocation11 + $0x2c] ss:$16 sps:$4 sm:$0xff]   ;;  %v17846_v61 = vld [vmem:[#allocation11 + $0x28] ss:$16 sps:$4 sm:$0xff]   ;;  %v17881_v39 = vld [vmem:[#allocation11 + $0x60] ss:$16 sps:$4 sm:$0xff]  }
 0x697   :  { %v5878_v29 = vadd.f32 %v17613_v22, %v5876_v55  ;;  %v5877_v40 = vmul.f32 %v17615_v51, %v5804_v28  ;;  %7061 = vmatprep.mubr.bf16.mxu1 %v17759_v6  ;;  %v17859_v42 = vld [vmem:[#allocation11 + $0x4c] ss:$16 sps:$4 sm:$0xff]   ;;  %v17865_v37 = vld [vmem:[#allocation11 + $0x48] ss:$16 sps:$4 sm:$0xff]   ;;  %v17877_v55 = vld [vmem:[#allocation11 + $0x64] ss:$16 sps:$4 sm:$0xff]  }
 0x698   :  { %7062 = vmatmul.mubr.bf16.gmra.mrb[216].mxu1 %v18880_v0  ;;  %7127 = vmatmul.mubr.bf16.gmra.mrb[184].mxu0 %v18880_v0  ;;  %v17879_v28 = vld [vmem:[#allocation11 + $0x6c] ss:$16 sps:$4 sm:$0xff]  }
 0x699   :  { %v5879_v30 = vadd.f32 %v17613_v22, %v5877_v40  ;;  %7132 = vmatprep.mubr.bf16.mxu0 %v17685_v53  ;;  %7231 = vmatprep.mubr.bf16.mxu1 %v17685_v53  ;;  %v5880_v4 = vmax.f32 %v5878_v29, 0.0 }
 0x69a   :  { %14839 = vmatpush3.bf16.msra.mxu0 %v15303_v41  ;;  %v13919_v43 = vpop.f32.mrb[168].mxu1  ;;  %v17883_v41 = vld [vmem:[#allocation11 + $0x68] ss:$16 sps:$4 sm:$0xff]  }
 0x69b   :  { %v5881_v14 = vmax.f32 %v5879_v30, 0.0  ;;  %14840 = vmatprep.subr.bf16.mxu0 %v18878_v3  ;;  %v13920_v51 = vpop.f32.mrb[169].mxu1 }
 0x69c   :  { %v13921_v1 = vadd.f32 %v13920_v51, %v13919_v43  ;;  %v13922_v32 = vpop.f32.mrb[170].mxu1  ;;  %v17894_v51 = vld [vmem:[#allocation11 + $0x84] ss:$16 sps:$4 sm:$0xff]  }
 0x69d   :  { %v17773_v63 = vpack.c.bf16 %v5881_v14, %v5880_v4  ;;  %v13923_v35 = vpop.f32.mrb[171].mxu1 }
 0x69e   :  { %14841 = vmatpush3.bf16.msra.mxu0 %v15304_v49  ;;  %v17776_v22 = vadd.f32 %v13921_v1, %v17696_v48  ;;  %v13924_v62 = vadd.f32 %v13923_v35, %v13922_v32  ;;  %v17820_v48 = vld [vmem:[#allocation11 + $0xc] ss:$16 sps:$4 sm:$0xff]  }
 0x69f   :  { %7772 = vmatprep.subr.bf16.mxu0 %v17820_v48  ;;  %v17896_v1 = vld [vmem:[#allocation11 + $0x8c] ss:$16 sps:$4 sm:$0xff]  }
 0x6a0   :  { %7133 = vmatmul.mubr.bf16.gmra.mrb[188].mxu0 %v18880_v0  ;;  %7232 = vmatmul.mubr.bf16.vlgmr.msra.gmra.mrb[220].mxu1 %v18880_v0  ;;  %v17781_v31 = vadd.f32 %v13924_v62, %v17699_v50  ;;  %v17822_v50 = vld [vmem:[#allocation11] ss:$16 sps:$4 sm:$0xff]  }
 0x6a1   :  { %7138 = vmatprep.mubr.bf16.mxu0 %v17701_v25  ;;  %7239 = vmatprep.mubr.bf16.mxu1 %v17701_v25  ;;  %v17898_v62 = vld [vmem:[#allocation11 + $0x80] ss:$16 sps:$4 sm:$0xff]  }
 0x6a8   :  { %7139 = vmatmul.mubr.bf16.gmra.mrb[192].mxu0 %v17685_v53  ;;  %7240 = vmatmul.mubr.bf16.gmra.mrb[224].mxu1 %v17685_v53  ;;  %v17818_v53 = vld [vmem:[#allocation11 + $0x4] ss:$16 sps:$4 sm:$0xff]  }
 0x6a9   :  { %7146 = vmatprep.mubr.bf16.mxu0 %v17716_v46  ;;  %7247 = vmatprep.mubr.bf16.mxu1 %v17716_v46 }
 0x6aa   :  { %7729 = vmatprep.subr.bf16.mxu1 %v17818_v53 }
 0x6ab   :  { %7730 = vmatpush1.bf16.msra.mxu1 %v17822_v50 }
 0x6ac   :  { %7731 = vmatprep.subr.bf16.mxu1 %v17840_v20 }
 0x6b0   :  { %7147 = vmatmul.mubr.bf16.gmra.mrb[196].mxu0 %v17701_v25  ;;  %7248 = vmatmul.mubr.bf16.gmra.mrb[228].mxu1 %v17701_v25 }
 0x6b1   :  { %7154 = vmatprep.mubr.bf16.mxu0 %v18880_v0  ;;  %7255 = vmatprep.mubr.bf16.mxu1 %v18880_v0 }
 0x6b8   :  { %7155 = vmatmul.mubr.bf16.gmra.mrb[200].mxu0 %v17716_v46  ;;  %7256 = vmatmul.mubr.bf16.gmra.mrb[232].mxu1 %v17716_v46 }
 0x6b9   :  { %7162 = vmatprep.mubr.bf16.mxu0 %v18880_v0  ;;  %7261 = vmatprep.mubr.bf16.mxu1 %v18880_v0 }
 0x6c0   :  { %7163 = vmatmul.mubr.bf16.gmra.mrb[204].mxu0 %v18880_v0  ;;  %7262 = vmatmul.mubr.bf16.gmra.mrb[236].mxu1 %v18880_v0 }
 0x6c1   :  { %7168 = vmatprep.mubr.bf16.mxu0 %v17745_v60  ;;  %7267 = vmatprep.mubr.bf16.mxu1 %v17745_v60 }
 0x6c8   :  { %7169 = vmatmul.mubr.bf16.gmra.mrb[208].mxu0 %v18880_v0  ;;  %7268 = vmatmul.mubr.bf16.gmra.mrb[240].mxu1 %v18880_v0 }
 0x6c9   :  { %7174 = vmatprep.mubr.bf16.mxu0 %v17759_v6  ;;  %7275 = vmatprep.mubr.bf16.mxu1 %v17759_v6 }
 0x6d0   :  { %7175 = vmatmul.mubr.bf16.gmra.mrb[212].mxu0 %v17745_v60  ;;  %7276 = vmatmul.mubr.bf16.gmra.mrb[244].mxu1 %v17745_v60 }
 0x6d1   :  { %7182 = vmatprep.mubr.bf16.mxu0 %v17773_v63  ;;  %7283 = vmatprep.mubr.bf16.mxu1 %v17773_v63 }
 0x6d8   :  { %7183 = vmatmul.mubr.bf16.gmra.mrb[216].mxu0 %v17759_v6  ;;  %7284 = vmatmul.mubr.bf16.gmra.mrb[248].mxu1 %v17759_v6 }
 0x6d9   :  { %7190 = vmatprep.mubr.bf16.mxu0 %v18880_v0  ;;  %7291 = vmatprep.mubr.bf16.mxu1 %v18880_v0 }
 0x6e0   :  { %7191 = vmatmul.mubr.bf16.gmra.mrb[220].mxu0 %v17773_v63  ;;  %7292 = vmatmul.mubr.bf16.gmra.mrb[252].mxu1 %v17773_v63 }
 0x6e1   :  { %7297 = vmatprep.mubr.bf16.mxu1 %v18880_v0  ;;  %14842 = vmatprep.mubr.msk.bf16.mxu0 %vm15948_vm0, %v18878_v3 }
 0x6e8   :  { %7298 = vmatmul.mubr.bf16.gmra.mrb[0].mxu1 %v18880_v0  ;;  %14843 = vmatmul.mubr.bf16.vlgmr.msra.gmra.mrb[224].mxu0 %v17701_v25  ;;  %v17844_v25 = vld [vmem:[#allocation11 + $0x20] ss:$16 sps:$4 sm:$0xff]  }
 0x6e9   :  { %7303 = vmatprep.mubr.bf16.mxu1 %v18880_v0  ;;  %14846 = vmatprep.mubr.msk.bf16.mxu0 %vm15948_vm0, %v18878_v3 }
 0x6ea   :  { %7773 = vmatpush1.bf16.msra.mxu0 %v17827_v44  ;;  %7732 = vmatpush1.bf16.msra.mxu1 %v17844_v25 }
 0x6eb   :  { %7774 = vmatprep.subr.bf16.mxu0 %v17842_v36 }
 0x6ee   :  { %7775 = vmatpush1.bf16.msra.mxu0 %v17846_v61 }
 0x6ef   :  { %7776 = vmatprep.subr.bf16.mxu0 %v17859_v42 }
 0x6f0   :  { %7304 = vmatmul.mubr.bf16.gmra.mrb[4].mxu1 %v18880_v0  ;;  %14847 = vmatmul.mubr.bf16.gmra.mrb[228].mxu0 %v17716_v46  ;;  %v17857_v46 = vld [vmem:[#allocation11 + $0x44] ss:$16 sps:$4 sm:$0xff]  }
 0x6f1   :  { %7311 = vmatprep.mubr.bf16.mxu1 %v18880_v0  ;;  %14850 = vmatprep.mubr.msk.bf16.mxu0 %vm15948_vm0, %v18878_v3 }
 0x6f2   :  { %7733 = vmatprep.subr.bf16.mxu1 %v17857_v46  ;;  %7777 = vmatpush1.bf16.msra.mxu0 %v17865_v37 }
 0x6f3   :  { %7734 = vmatpush1.bf16.msra.mxu1 %v17863_v47  ;;  %7778 = vmatprep.subr.bf16.mxu0 %v17879_v28 }
 0x6f4   :  { %7735 = vmatprep.subr.bf16.mxu1 %v17877_v55 }
 0x6f6   :  { %7779 = vmatpush1.bf16.msra.mxu0 %v17883_v41 }
 0x6f7   :  { %7736 = vmatpush1.bf16.msra.mxu1 %v17881_v39  ;;  %7780 = vmatprep.subr.bf16.mxu0 %v17896_v1 }
 0x6f8   :  { %7312 = vmatmul.mubr.bf16.gmra.mrb[8].mxu1 %v18880_v0  ;;  %14851 = vmatmul.mubr.bf16.gmra.mrb[232].mxu0 %v18880_v0 }
 0x6f9   :  { %7319 = vmatprep.mubr.bf16.mxu1 %v18880_v0  ;;  %14854 = vmatprep.mubr.msk.bf16.mxu0 %vm15948_vm0, %v18878_v3 }
 0x6fa   :  { %7737 = vmatprep.subr.bf16.mxu1 %v17894_v51 }
 0x6fb   :  { %7738 = vmatpush1.bf16.msra.mxu1 %v17898_v62 }
 0x6fc   :  { %7739 = vmatprep.subr.bf16.mxu1 %v17924_v8 }
 0x700   :  { %7320 = vmatmul.mubr.bf16.gmra.mrb[12].mxu1 %v18880_v0  ;;  %14855 = vmatmul.mubr.bf16.gmra.mrb[236].mxu0 %v18880_v0 }
 0x701   :  { %14858 = vmatprep.mubr.msk.bf16.mxu0 %vm15948_vm0, %v18878_v3  ;;  %7761 = vmatprep.mubr.bf16.mxu1 %v18880_v0 }
 0x708   :  { %14859 = vmatmul.mubr.bf16.gmra.mrb[240].mxu0 %v17745_v60 }
 0x709   :  { %14862 = vmatprep.mubr.msk.bf16.mxu0 %vm15948_vm0, %v18878_v3 }
 0x710   :  { %14863 = vmatmul.mubr.bf16.gmra.mrb[244].mxu0 %v17759_v6  ;;  %v17900_v6 = vld [vmem:[#allocation11 + $0x88] ss:$16 sps:$4 sm:$0xff]  }
 0x711   :  { %14866 = vmatprep.mubr.msk.bf16.mxu0 %vm15948_vm0, %v18878_v3  ;;  %18950 = vst [vmem:[#allocation35_spill] sm:$0xff] %v17900_v6  ;;  %7781 = vmatpush1.bf16.msra.mxu0 %v17900_v6 }
 0x712   :  { %7782 = vmatprep.subr.bf16.mxu0 %v17926_v21 }
 0x713   :  { %v13855_v60 = vpop.f32.mrb[140].mxu0  ;;  %v13925_v29 = vpop.f32.mrb[172].mxu1 }
 0x714   :  { %v13856_v40 = vpop.f32.mrb[141].mxu0  ;;  %v13926_v30 = vpop.f32.mrb[173].mxu1 }
 0x715   :  { %v17892_v49 = vadd.f32 %v13856_v40, %v13855_v60  ;;  %v13927_v43 = vadd.f32 %v13926_v30, %v13925_v29  ;;  %v13858_v4 = vpop.f32.mrb[142].mxu0  ;;  %v13928_v14 = vpop.f32.mrb[174].mxu1 }
 0x716   :  { %v13859_v32 = vpop.f32.mrb[143].mxu0  ;;  %v13929_v35 = vpop.f32.mrb[175].mxu1 }
 0x717   :  { %v17903_v16 = vadd.f32 %v13927_v43, %v17712_v2  ;;  %v17905_v24 = vadd.f32 %v13859_v32, %v13858_v4  ;;  %v13930_v60 = vadd.f32 %v13929_v35, %v13928_v14 }
 0x718   :  { %14867 = vmatmul.mubr.bf16.gmra.mrb[248].mxu0 %v17773_v63 }
 0x719   :  { %v17912_v29 = vadd.f32 %v13930_v60, %v17714_v9  ;;  %14870 = vmatprep.mubr.msk.bf16.mxu0 %vm15948_vm0, %v18878_v3 }
 0x71b   :  { %v13861_v2 = vpop.f32.mrb[144].mxu0  ;;  %v13931_v40 = vpop.f32.mrb[176].mxu1 }
 0x71c   :  { %v13862_v30 = vpop.f32.mrb[145].mxu0  ;;  %v13932_v43 = vpop.f32.mrb[177].mxu1 }
 0x71d   :  { %v17917_v4 = vadd.f32 %v13862_v30, %v13861_v2  ;;  %v13933_v14 = vadd.f32 %v13932_v43, %v13931_v40  ;;  %v13864_v32 = vpop.f32.mrb[146].mxu0  ;;  %v13934_v35 = vpop.f32.mrb[178].mxu1  ;;  %v17936_v30 = vld [vmem:[#allocation11 + $0xa0] ss:$16 sps:$4 sm:$0xff]  }
 0x71e   :  { %v13865_v63 = vpop.f32.mrb[147].mxu0  ;;  %v13935_v12 = vpop.f32.mrb[179].mxu1  ;;  %18953 = vst [vmem:[#allocation38_spill] sm:$0xff] %v17936_v30  ;;  %7740 = vmatpush1.bf16.msra.mxu1 %v17936_v30 }
 0x71f   :  { %v17920_v45 = vadd.f32 %v13933_v14, %v17724_v27  ;;  %v17922_v9 = vadd.f32 %v13865_v63, %v13864_v32  ;;  %v13936_v60 = vadd.f32 %v13935_v12, %v13934_v35  ;;  %v17938_v12 = vld [vmem:[#allocation11 + $0xa8] ss:$16 sps:$4 sm:$0xff]  }
 0x720   :  { %14871 = vmatmul.mubr.bf16.gmra.mrb[252].mxu0 %v18880_v0  ;;  %18954 = vst [vmem:[#allocation39_spill] sm:$0xff] %v17938_v12 }
 0x721   :  { %v17930_v2 = vadd.f32 %v13936_v60, %v17726_v52  ;;  %14874 = vmatprep.mubr.msk.bf16.mxu0 %vm15948_vm0, %v18878_v3  ;;  %7783 = vmatpush1.bf16.msra.mxu0 %v17938_v12 }
 0x723   :  { %v13867_v27 = vpop.f32.mrb[148].mxu0  ;;  %v13937_v40 = vpop.f32.mrb[180].mxu1 }
 0x724   :  { %v13868_v43 = vpop.f32.mrb[149].mxu0  ;;  %v13938_v14 = vpop.f32.mrb[181].mxu1 }
 0x725   :  { %v17940_v32 = vadd.f32 %v13868_v43, %v13867_v27  ;;  %v13870_v35 = vpop.f32.mrb[150].mxu0  ;;  %v13940_v52 = vpop.f32.mrb[182].mxu1 }
 0x726   :  { %v13871_v63 = vpop.f32.mrb[151].mxu0  ;;  %v13941_v60 = vpop.f32.mrb[183].mxu1 }
 0x727   :  { %v17944_v59 = vadd.f32 %v13871_v63, %v13870_v35  ;;  %v17952_v35 = vld [vmem:[#allocation11 + $0xc4] ss:$16 sps:$4 sm:$0xff]   ;;  %v17954_v63 = vld [vmem:[#allocation11 + $0xcc] ss:$16 sps:$4 sm:$0xff]   ;;  %v17956_v60 = vld [vmem:[#allocation11 + $0xc0] ss:$16 sps:$4 sm:$0xff]  }
 0x728   :  { %14875 = vmatmul.mubr.bf16.gmra.mrb[0].mxu0 %v18880_v0  ;;  %18955 = vst [vmem:[#allocation40_spill] sm:$0xff] %v17952_v35  ;;  %18956 = vst [vmem:[#allocation41_spill] sm:$0xff] %v17954_v63  ;;  %7741 = vmatprep.subr.bf16.mxu1 %v17952_v35 }
 0x729   :  { %14878 = vmatprep.mubr.msk.bf16.mxu0 %vm15948_vm0, %v18878_v3  ;;  %18957 = vst [vmem:[#allocation42_spill] sm:$0xff] %v17956_v60  ;;  %7784 = vmatprep.subr.bf16.mxu0 %v17954_v63 }
 0x72a   :  { %7742 = vmatpush1.bf16.msra.mxu1 %v17956_v60  ;;  %7785 = vmatpush1.bf16.msra.mxu0 %v17958_v58 }
 0x72b   :  { %v13873_v40 = vpop.f32.mrb[152].mxu0  ;;  %v13943_v23 = vpop.f32.mrb[184].mxu1 }
 0x72c   :  { %v13874_v14 = vpop.f32.mrb[153].mxu0  ;;  %v13944_v27 = vpop.f32.mrb[185].mxu1 }
 0x72d   :  { %v13876_v43 = vpop.f32.mrb[154].mxu0  ;;  %v13946_v5 = vpop.f32.mrb[186].mxu1 }
 0x72e   :  { %v13877_v52 = vpop.f32.mrb[155].mxu0  ;;  %v13947_v19 = vpop.f32.mrb[187].mxu1 }
 0x730   :  { %14879 = vmatmul.mubr.bf16.gmra.mrb[4].mxu0 %v18880_v0 }
 0x731   :  { %14882 = vmatprep.mubr.msk.bf16.mxu0 %vm15948_vm0, %v18878_v3 }
 0x733   :  { %v13879_v23 = vpop.f32.mrb[156].mxu0  ;;  %v13949_v40 = vpop.f32.mrb[188].mxu1 }
 0x734   :  { %v13880_v19 = vpop.f32.mrb[157].mxu0  ;;  %v13950_v5 = vpop.f32.mrb[189].mxu1 }
 0x735   :  { %v13951_v14 = vadd.f32 %v13950_v5, %v13949_v40  ;;  %v13882_v27 = vpop.f32.mrb[158].mxu0  ;;  %v13952_v43 = vpop.f32.mrb[190].mxu1  ;;  %v18960_v19 = vmov 0.0  }
 0x736   :  { %v13883_v52 = vpop.f32.mrb[159].mxu0  ;;  %v13953_v3 = vpop.f32.mrb[191].mxu1 }
 0x737   :  { %v17965_v0 = vadd.f32 %v13951_v14, %v17892_v49  ;;  %v13954_v23 = vadd.f32 %v13953_v3, %v13952_v43 }
 0x738   :  { %14883 = vmatmul.mubr.bf16.gmra.mrb[8].mxu0 %v18959_v13 }
 0x739   :  { %v17969_v57 = vadd.f32 %v13954_v23, %v17905_v24  ;;  %14886 = vmatprep.mubr.msk.bf16.mxu0 %vm15948_vm0, %v18960_v19 }
 0x73b   :  { %v13885_v7 = vpop.f32.mrb[160].mxu0  ;;  %v13955_v54 = vpop.f32.mrb[192].mxu1 }
 0x73c   :  { %v13886_v17 = vpop.f32.mrb[161].mxu0  ;;  %v13956_v40 = vpop.f32.mrb[193].mxu1 }
 0x73d   :  { %v17973_v5 = vadd.f32 %v13886_v17, %v13885_v7  ;;  %v13957_v27 = vadd.f32 %v13956_v40, %v13955_v54  ;;  %v13888_v52 = vpop.f32.mrb[162].mxu0  ;;  %v13958_v26 = vpop.f32.mrb[194].mxu1  ;;  %v17986_v7 = vld [vmem:[#allocation11 + $0xe4] ss:$16 sps:$4 sm:$0xff]   ;;  %v17988_v40 = vld [vmem:[#allocation11 + $0xec] ss:$16 sps:$4 sm:$0xff]  }
 0x73e   :  { %v13889_v49 = vpop.f32.mrb[163].mxu0  ;;  %v13959_v14 = vpop.f32.mrb[195].mxu1  ;;  %18961 = vst [vmem:[#allocation44_spill] sm:$0xff] %v17986_v7  ;;  %18962 = vst [vmem:[#allocation45_spill] sm:$0xff] %v17988_v40  ;;  %7743 = vmatprep.subr.bf16.mxu1 %v17986_v7  ;;  %7786 = vmatprep.subr.bf16.mxu0 %v17988_v40 }
 0x73f   :  { %v17976_v3 = vadd.f32 %v13957_v27, %v17917_v4  ;;  %v17978_v43 = vadd.f32 %v13889_v49, %v13888_v52  ;;  %v13960_v24 = vadd.f32 %v13959_v14, %v13958_v26  ;;  %v17990_v27 = vld [vmem:[#allocation11 + $0xe0] ss:$16 sps:$4 sm:$0xff]   ;;  %v17992_v52 = vld [vmem:[#allocation11 + $0xe8] ss:$16 sps:$4 sm:$0xff]  }
 0x740   :  { %14887 = vmatmul.mubr.bf16.gmra.mrb[12].mxu0 %v18959_v13  ;;  %18963 = vst [vmem:[#allocation46_spill] sm:$0xff] %v17990_v27  ;;  %18964 = vst [vmem:[#allocation47_spill] sm:$0xff] %v17992_v52  ;;  %7744 = vmatpush1.bf16.msra.mxu1 %v17990_v27 }
 0x741   :  { %v17982_v23 = vadd.f32 %v13960_v24, %v17922_v9  ;;  %14890 = vmatprep.mubr.msk.bf16.mxu0 %vm15948_vm0, %v18960_v19  ;;  %7787 = vmatpush1.bf16.msra.mxu0 %v17992_v52 }
 0x742   :  { %7950 = vmatprep.subr.bf16.mxu1 %v17818_v53  ;;  %7993 = vmatprep.subr.bf16.mxu0 %v17820_v48 }
 0x743   :  { %v13891_v17 = vpop.f32.mrb[164].mxu0  ;;  %v13961_v54 = vpop.f32.mrb[196].mxu1 }
 0x744   :  { %v13892_v18 = vpop.f32.mrb[165].mxu0  ;;  %v13962_v4 = vpop.f32.mrb[197].mxu1 }
 0x745   :  { %v17994_v26 = vadd.f32 %v13892_v18, %v13891_v17  ;;  %v13963_v49 = vadd.f32 %v13962_v4, %v13961_v54  ;;  %v13894_v9 = vpop.f32.mrb[166].mxu0  ;;  %v13964_v14 = vpop.f32.mrb[198].mxu1 }
 0x746   :  { %v13895_v19 = vpop.f32.mrb[167].mxu0  ;;  %v13965_v24 = vpop.f32.mrb[199].mxu1 }
 0x747   :  { %v18001_v38 = vadd.f32 %v13963_v49, %v17940_v32  ;;  %v13896_v58 = vadd.f32 %v13895_v19, %v13894_v9  ;;  %v13966_v60 = vadd.f32 %v13965_v24, %v13964_v14 }
 0x748   :  { %14891 = vmatmul.mubr.bf16.gmra.mrb[16].mxu0 %v18959_v13 }
 0x749   :  { %v18007_v18 = vadd.f32 %v13966_v60, %v17944_v59  ;;  %7804 = vmatprep.mubr.bf16.mxu0 %v18959_v13 }
 0x74b   :  { %v13897_v17 = vpop.f32.mrb[168].mxu0  ;;  %v13967_v54 = vpop.f32.mrb[200].mxu1 }
 0x74c   :  { %v13898_v4 = vpop.f32.mrb[169].mxu0  ;;  %v13968_v52 = vpop.f32.mrb[201].mxu1 }
 0x74d   :  { %v13899_v27 = vadd.f32 %v13898_v4, %v13897_v17  ;;  %v13900_v32 = vpop.f32.mrb[170].mxu0  ;;  %v13970_v49 = vpop.f32.mrb[202].mxu1 }
 0x74e   :  { %v13901_v9 = vpop.f32.mrb[171].mxu0  ;;  %v13971_v14 = vpop.f32.mrb[203].mxu1 }
 0x74f   :  { %v13902_v19 = vadd.f32 %v13901_v9, %v13900_v32 }
 0x753   :  { %v13973_v53 = vpop.f32.mrb[204].mxu1  ;;  %v14013_v24 = vpop.f32.mrb[172].mxu0 }
 0x754   :  { %v13974_v48 = vpop.f32.mrb[205].mxu1  ;;  %v14014_v40 = vpop.f32.mrb[173].mxu0 }
 0x755   :  { %v14015_v7 = vadd.f32 %v14014_v40, %v14013_v24  ;;  %v13976_v63 = vpop.f32.mrb[206].mxu1  ;;  %v14016_v59 = vpop.f32.mrb[174].mxu0 }
 0x756   :  { %v13977_v60 = vpop.f32.mrb[207].mxu1  ;;  %v14017_v35 = vpop.f32.mrb[175].mxu0 }
 0x757   :  { %v7105_v12 = vadd.f32 %v14015_v7, %v17776_v22  ;;  %v14018_v54 = vadd.f32 %v14017_v35, %v14016_v59 }
 0x759   :  { %v7108_v52 = vadd.f32 %v14018_v54, %v17781_v31 }
 0x75b   :  { %v13979_v17 = vpop.f32.mrb[208].mxu1  ;;  %v14019_v4 = vpop.f32.mrb[176].mxu0 }
 0x75c   :  { %v13980_v49 = vpop.f32.mrb[209].mxu1  ;;  %v14020_v30 = vpop.f32.mrb[177].mxu0 }
 0x75d   :  { %v13981_v14 = vadd.f32 %v13980_v49, %v13979_v17  ;;  %v14021_v32 = vadd.f32 %v14020_v30, %v14019_v4  ;;  %v13982_v9 = vpop.f32.mrb[210].mxu1  ;;  %v14022_v53 = vpop.f32.mrb[178].mxu0 }
 0x75e   :  { %v13983_v48 = vpop.f32.mrb[211].mxu1  ;;  %v14023_v21 = vpop.f32.mrb[179].mxu0 }
 0x75f   :  { %v18013_v63 = vadd.f32 %v13981_v14, %v17973_v5  ;;  %v7113_v40 = vadd.f32 %v14021_v32, %v17903_v16  ;;  %v13984_v24 = vadd.f32 %v13983_v48, %v13982_v9  ;;  %v14024_v22 = vadd.f32 %v14023_v21, %v14022_v53 }
 0x761   :  { %v18017_v35 = vadd.f32 %v13984_v24, %v17978_v43  ;;  %v7116_v31 = vadd.f32 %v14024_v22, %v17912_v29 }
 0x763   :  { %v13985_v7 = vpop.f32.mrb[212].mxu1  ;;  %v14025_v59 = vpop.f32.mrb[180].mxu0 }
 0x764   :  { %v13986_v60 = vpop.f32.mrb[213].mxu1  ;;  %v14026_v30 = vpop.f32.mrb[181].mxu0 }
 0x765   :  { %v13987_v54 = vadd.f32 %v13986_v60, %v13985_v7  ;;  %v14027_v17 = vadd.f32 %v14026_v30, %v14025_v59  ;;  %v13988_v4 = vpop.f32.mrb[214].mxu1  ;;  %v14028_v49 = vpop.f32.mrb[182].mxu0 }
 0x766   :  { %v13989_v8 = vpop.f32.mrb[215].mxu1  ;;  %v14029_v5 = vpop.f32.mrb[183].mxu0 }
 0x767   :  { %v18021_v14 = vadd.f32 %v13987_v54, %v17994_v26  ;;  %v7121_v21 = vadd.f32 %v14027_v17, %v17920_v45  ;;  %v13990_v16 = vadd.f32 %v13989_v8, %v13988_v4  ;;  %v14030_v43 = vadd.f32 %v14029_v5, %v14028_v49 }
 0x769   :  { %v18024_v32 = vadd.f32 %v13990_v16, %v13896_v58  ;;  %v7124_v29 = vadd.f32 %v14030_v43, %v17930_v2 }
 0x76b   :  { %v13991_v9 = vpop.f32.mrb[216].mxu1  ;;  %v14031_v53 = vpop.f32.mrb[184].mxu0 }
 0x76c   :  { %v13992_v48 = vpop.f32.mrb[217].mxu1  ;;  %v14032_v24 = vpop.f32.mrb[185].mxu0 }
 0x76d   :  { %v13993_v22 = vadd.f32 %v13992_v48, %v13991_v9  ;;  %v13994_v7 = vpop.f32.mrb[218].mxu1  ;;  %v14034_v59 = vpop.f32.mrb[186].mxu0 }
 0x76e   :  { %v13995_v60 = vpop.f32.mrb[219].mxu1  ;;  %v14035_v30 = vpop.f32.mrb[187].mxu0 }
 0x76f   :  { %v18027_v6 = vadd.f32 %v13993_v22, %v13899_v27  ;;  %v13996_v26 = vadd.f32 %v13995_v60, %v13994_v7 }
 0x771   :  { %v18029_v54 = vadd.f32 %v13996_v26, %v13902_v19 }
 0x773   :  { %v14037_v8 = vpop.f32.mrb[188].mxu0  ;;  %v14107_v45 = vpop.f32.mrb[220].mxu1 }
 0x774   :  { %v14038_v58 = vpop.f32.mrb[189].mxu0  ;;  %v14108_v17 = vpop.f32.mrb[221].mxu1 }
 0x775   :  { %v14109_v4 = vadd.f32 %v14108_v17, %v14107_v45  ;;  %v14040_v2 = vpop.f32.mrb[190].mxu0  ;;  %v14110_v49 = vpop.f32.mrb[222].mxu1 }
 0x776   :  { %v14041_v5 = vpop.f32.mrb[191].mxu0  ;;  %v14111_v16 = vpop.f32.mrb[223].mxu1 }
 0x777   :  { %v14112_v43 = vadd.f32 %v14111_v16, %v14110_v49  ;;  %v18031_v9 = vadd.f32 %v14109_v4, %v7105_v12 }
 0x779   :  { %v18033_v53 = vadd.f32 %v14112_v43, %v7108_v52 }
 0x77b   :  { %v14043_v48 = vpop.f32.mrb[192].mxu0  ;;  %v14113_v27 = vpop.f32.mrb[224].mxu1 }
 0x77c   :  { %v14044_v24 = vpop.f32.mrb[193].mxu0  ;;  %v14114_v22 = vpop.f32.mrb[225].mxu1 }
 0x77d   :  { %v14045_v19 = vadd.f32 %v14044_v24, %v14043_v48  ;;  %v14115_v7 = vadd.f32 %v14114_v22, %v14113_v27  ;;  %v14046_v59 = vpop.f32.mrb[194].mxu0  ;;  %v14116_v60 = vpop.f32.mrb[226].mxu1 }
 0x77e   :  { %v14047_v30 = vpop.f32.mrb[195].mxu0  ;;  %v14117_v26 = vpop.f32.mrb[227].mxu1 }
 0x77f   :  { %v7141_v8 = vadd.f32 %v14045_v19, %v17965_v0  ;;  %v14048_v45 = vadd.f32 %v14047_v30, %v14046_v59  ;;  %v14118_v58 = vadd.f32 %v14117_v26, %v14116_v60  ;;  %v18036_v17 = vadd.f32 %v14115_v7, %v7113_v40 }
 0x781   :  { %v7144_v12 = vadd.f32 %v14048_v45, %v17969_v57  ;;  %v18039_v52 = vadd.f32 %v14118_v58, %v7116_v31 }
 0x783   :  { %v14049_v4 = vpop.f32.mrb[196].mxu0  ;;  %v14119_v2 = vpop.f32.mrb[228].mxu1 }
 0x784   :  { %v14050_v49 = vpop.f32.mrb[197].mxu0  ;;  %v14120_v5 = vpop.f32.mrb[229].mxu1 }
 0x785   :  { %v14051_v16 = vadd.f32 %v14050_v49, %v14049_v4  ;;  %v14121_v43 = vadd.f32 %v14120_v5, %v14119_v2  ;;  %v14052_v48 = vpop.f32.mrb[198].mxu0  ;;  %v14122_v27 = vpop.f32.mrb[230].mxu1 }
 0x786   :  { %v14053_v24 = vpop.f32.mrb[199].mxu0  ;;  %v14123_v22 = vpop.f32.mrb[231].mxu1 }
 0x787   :  { %v7149_v0 = vadd.f32 %v14051_v16, %v17976_v3  ;;  %v14054_v19 = vadd.f32 %v14053_v24, %v14052_v48  ;;  %v14124_v59 = vadd.f32 %v14123_v22, %v14122_v27  ;;  %v18042_v40 = vadd.f32 %v14121_v43, %v7121_v21 }
 0x789   :  { %v7152_v57 = vadd.f32 %v14054_v19, %v17982_v23  ;;  %v18045_v31 = vadd.f32 %v14124_v59, %v7124_v29 }
 0x78b   :  { %v14055_v7 = vpop.f32.mrb[200].mxu0  ;;  %v14125_v60 = vpop.f32.mrb[232].mxu1 }
 0x78c   :  { %v14056_v30 = vpop.f32.mrb[201].mxu0  ;;  %v14126_v26 = vpop.f32.mrb[233].mxu1 }
 0x78d   :  { %v14057_v45 = vadd.f32 %v14056_v30, %v14055_v7  ;;  %v14058_v58 = vpop.f32.mrb[202].mxu0  ;;  %v14128_v4 = vpop.f32.mrb[234].mxu1 }
 0x78e   :  { %v14059_v2 = vpop.f32.mrb[203].mxu0  ;;  %v14129_v49 = vpop.f32.mrb[235].mxu1 }
 0x78f   :  { %v7157_v5 = vadd.f32 %v14057_v45, %v18001_v38  ;;  %v14060_v3 = vadd.f32 %v14059_v2, %v14058_v58 }
 0x791   :  { %v7160_v16 = vadd.f32 %v14060_v3, %v18007_v18 }
 0x793   :  { %v14061_v21 = vpop.f32.mrb[204].mxu0  ;;  %v14131_v43 = vpop.f32.mrb[236].mxu1 }
 0x794   :  { %v14062_v48 = vpop.f32.mrb[205].mxu0  ;;  %v14132_v23 = vpop.f32.mrb[237].mxu1 }
 0x795   :  { %v14064_v29 = vpop.f32.mrb[206].mxu0  ;;  %v14134_v27 = vpop.f32.mrb[238].mxu1 }
 0x796   :  { %v14065_v24 = vpop.f32.mrb[207].mxu0  ;;  %v14135_v22 = vpop.f32.mrb[239].mxu1 }
 0x79b   :  { %v14067_v19 = vpop.f32.mrb[208].mxu0  ;;  %v14137_v59 = vpop.f32.mrb[240].mxu1 }
 0x79c   :  { %v14068_v7 = vpop.f32.mrb[209].mxu0  ;;  %v14138_v60 = vpop.f32.mrb[241].mxu1 }
 0x79d   :  { %v14139_v30 = vadd.f32 %v14138_v60, %v14137_v59  ;;  %v14070_v26 = vpop.f32.mrb[210].mxu0  ;;  %v14140_v4 = vpop.f32.mrb[242].mxu1 }
 0x79e   :  { %v14071_v49 = vpop.f32.mrb[211].mxu0  ;;  %v14141_v38 = vpop.f32.mrb[243].mxu1 }
 0x79f   :  { %v14142_v45 = vadd.f32 %v14141_v38, %v14140_v4  ;;  %v18049_v58 = vadd.f32 %v14139_v30, %v7141_v8 }
 0x7a1   :  { %v18051_v18 = vadd.f32 %v14142_v45, %v7144_v12 }
 0x7a3   :  { %v14073_v2 = vpop.f32.mrb[212].mxu0  ;;  %v14143_v3 = vpop.f32.mrb[244].mxu1 }
 0x7a4   :  { %v14074_v21 = vpop.f32.mrb[213].mxu0  ;;  %v14144_v43 = vpop.f32.mrb[245].mxu1 }
 0x7a5   :  { %v14075_v48 = vadd.f32 %v14074_v21, %v14073_v2  ;;  %v14145_v23 = vadd.f32 %v14144_v43, %v14143_v3  ;;  %v14076_v29 = vpop.f32.mrb[214].mxu0  ;;  %v14146_v27 = vpop.f32.mrb[246].mxu1 }
 0x7a6   :  { %v14077_v24 = vpop.f32.mrb[215].mxu0  ;;  %v14147_v22 = vpop.f32.mrb[247].mxu1 }
 0x7a7   :  { %v18054_v19 = vadd.f32 %v14075_v48, %v18013_v63  ;;  %v14078_v59 = vadd.f32 %v14077_v24, %v14076_v29  ;;  %v14148_v7 = vadd.f32 %v14147_v22, %v14146_v27  ;;  %v18056_v60 = vadd.f32 %v14145_v23, %v7149_v0 }
 0x7a9   :  { %v18059_v8 = vadd.f32 %v14078_v59, %v18017_v35  ;;  %v18061_v12 = vadd.f32 %v14148_v7, %v7152_v57 }
 0x7ab   :  { %v14079_v30 = vpop.f32.mrb[216].mxu0  ;;  %v14149_v26 = vpop.f32.mrb[248].mxu1 }
 0x7ac   :  { %v14080_v4 = vpop.f32.mrb[217].mxu0  ;;  %v14150_v49 = vpop.f32.mrb[249].mxu1 }
 0x7ad   :  { %v14081_v38 = vadd.f32 %v14080_v4, %v14079_v30  ;;  %v14151_v45 = vadd.f32 %v14150_v49, %v14149_v26  ;;  %v14082_v2 = vpop.f32.mrb[218].mxu0  ;;  %v14152_v3 = vpop.f32.mrb[250].mxu1 }
 0x7ae   :  { %v14083_v21 = vpop.f32.mrb[219].mxu0  ;;  %v14153_v63 = vpop.f32.mrb[251].mxu1 }
 0x7af   :  { %v18064_v43 = vadd.f32 %v14081_v38, %v18021_v14  ;;  %v14084_v0 = vadd.f32 %v14083_v21, %v14082_v2  ;;  %v14154_v48 = vadd.f32 %v14153_v63, %v14152_v3  ;;  %v18066_v23 = vadd.f32 %v14151_v45, %v7157_v5  ;;  %v18080_v3 = vld [vmem:[#allocation9 + $0x4] ss:$0 sm:$0xff] }
 0x7b1   :  { %v18069_v35 = vadd.f32 %v14084_v0, %v18024_v32  ;;  %v18071_v57 = vadd.f32 %v14154_v48, %v7160_v16  ;;  %v18082_v0 = vld [vmem:[#allocation8] ss:$0 sm:$0xff] }
 0x7b3   :  { %v14085_v29 = vpop.f32.mrb[220].mxu0  ;;  %v14155_v27 = vpop.f32.mrb[252].mxu1 }
 0x7b4   :  { %v14086_v24 = vpop.f32.mrb[221].mxu0  ;;  %v14156_v22 = vpop.f32.mrb[253].mxu1 }
 0x7b5   :  { %v14087_v59 = vadd.f32 %v14086_v24, %v14085_v29  ;;  %v14088_v7 = vpop.f32.mrb[222].mxu0  ;;  %v14158_v30 = vpop.f32.mrb[254].mxu1 }
 0x7b6   :  { %v14089_v26 = vpop.f32.mrb[223].mxu0  ;;  %v14159_v4 = vpop.f32.mrb[255].mxu1 }
 0x7b7   :  { %v18074_v14 = vadd.f32 %v14087_v59, %v18027_v6  ;;  %v14090_v49 = vadd.f32 %v14089_v26, %v14088_v7  ;;  %v18966_v26 = vmax.f32 %v17077_v10, 0.0 }
 0x7b9   :  { %v18077_v5 = vadd.f32 %v14090_v49, %v18029_v54 }
 0x7bb   :  { %v7362_v32 = vpop.f32.mrb[224].mxu0  ;;  %v14161_v38 = vpop.f32.mrb[0].mxu1 }
 0x7bc   :  { %v7363_v16 = vadd.f32 %v7362_v32, %v18031_v9  ;;  %v14844_v45 = vpop.f32.mrb[225].mxu0  ;;  %v14162_v2 = vpop.f32.mrb[1].mxu1  ;;  %v18965_v9 = vmax.f32 %v17072_v11, 0.0 }
 0x7bd   :  { %v7365_v21 = vpop.f32.mrb[226].mxu0  ;;  %v14164_v63 = vpop.f32.mrb[2].mxu1 }
 0x7be   :  { %v7458_v48 = vmul.f32 %v18082_v0, %v7363_v16  ;;  %v7366_v6 = vadd.f32 %v7365_v21, %v18033_v53  ;;  %v14845_v29 = vpop.f32.mrb[227].mxu0  ;;  %v14165_v27 = vpop.f32.mrb[3].mxu1 }
 0x7c0   :  { %v7464_v54 = vadd.f32 %v18080_v3, %v7458_v48  ;;  %v7459_v24 = vmul.f32 %v18082_v0, %v7366_v6 }
 0x7c2   :  { %v7466_v22 = vadd.f32 %v7464_v54, %v18965_v9  ;;  %v7465_v59 = vadd.f32 %v18080_v3, %v7459_v24  ;;  %v18967_v9 = vmax.f32 %v17100_v15, 0.0 }
 0x7c3   :  { %v14167_v7 = vpop.f32.mrb[4].mxu1  ;;  %v7370_v30 = vpop.f32.mrb[228].mxu0 }
 0x7c4   :  { %v7467_v4 = vadd.f32 %v7465_v59, %v18966_v26  ;;  %v7371_v49 = vadd.f32 %v7370_v30, %v18036_v17  ;;  %v14168_v32 = vpop.f32.mrb[5].mxu1  ;;  %v14848_v53 = vpop.f32.mrb[229].mxu0  ;;  %v7468_v2 = vmax.f32 %v7466_v22, 0.0 }
 0x7c5   :  { %v14169_v38 = vadd.f32 %v14168_v32, %v14167_v7  ;;  %v14170_v16 = vpop.f32.mrb[6].mxu1  ;;  %v7373_v45 = vpop.f32.mrb[230].mxu0  ;;  %v18968_v7 = vmax.f32 %v17109_v34, 0.0 }
 0x7c6   :  { %v7469_v21 = vmax.f32 %v7467_v4, 0.0  ;;  %v7470_v63 = vmul.f32 %v18082_v0, %v7371_v49  ;;  %v7374_v11 = vadd.f32 %v7373_v45, %v18039_v52  ;;  %v14171_v48 = vpop.f32.mrb[7].mxu1  ;;  %v14849_v6 = vpop.f32.mrb[231].mxu0 }
 0x7c7   :  { %v14172_v29 = vadd.f32 %v14171_v48, %v14170_v16  ;;  %v18097_v27 = vadd.f32 %v14169_v38, %v18054_v19 }
 0x7c8   :  { %v7568_v10 = vpack.c.bf16 %v7469_v21, %v7468_v2  ;;  %v7472_v17 = vadd.f32 %v18080_v3, %v7470_v63  ;;  %v7471_v54 = vmul.f32 %v18082_v0, %v7374_v11  ;;  %v18969_v21 = vmax.f32 %v17132_v33, 0.0 }
 0x7c9   :  { %v18102_v24 = vadd.f32 %v14172_v29, %v18059_v8  ;;  %v18970_v11 = vmax.f32 %v17141_v56, 0.0 }
 0x7ca   :  { %v7474_v22 = vadd.f32 %v7472_v17, %v18967_v9  ;;  %v7473_v59 = vadd.f32 %v18080_v3, %v7471_v54  ;;  %7762 = vmatmul.mubr.bf16.vlgmr.msra.gmra.mrb[16].mxu1 %v7568_v10  ;;  %7805 = vmatmul.mubr.bf16.vlgmr.msra.gmra.mrb[20].mxu0 %v7568_v10 }
 0x7cb   :  { %7951 = vmatpush1.bf16.msra.mxu1 %v17822_v50  ;;  %7994 = vmatpush1.bf16.msra.mxu0 %v17827_v44  ;;  %v14173_v52 = vpop.f32.mrb[8].mxu1  ;;  %v7378_v19 = vpop.f32.mrb[232].mxu0 }
 0x7cc   :  { %v7475_v30 = vadd.f32 %v7473_v59, %v18968_v7  ;;  %v7379_v26 = vadd.f32 %v7378_v19, %v18042_v40  ;;  %v14174_v8 = vpop.f32.mrb[9].mxu1  ;;  %v14852_v4 = vpop.f32.mrb[233].mxu0  ;;  %7952 = vmatprep.subr.bf16.mxu1 %v17840_v20  ;;  %7995 = vmatprep.subr.bf16.mxu0 %v17842_v36  ;;  %v7476_v50 = vmax.f32 %v7474_v22, 0.0  ;;  %v18972_v22 = vld [vmem:[#allocation36_spill] sm:$0xff]  ;;  %v18978_v19 = vld [vmem:[#allocation42_spill] sm:$0xff] }
 0x7cd   :  { %v14175_v15 = vadd.f32 %v14174_v8, %v14173_v52  ;;  %v14176_v49 = vpop.f32.mrb[10].mxu1  ;;  %v7381_v32 = vpop.f32.mrb[234].mxu0  ;;  %7982 = vmatprep.mubr.bf16.mxu1 %v18959_v13  ;;  %8025 = vmatprep.mubr.bf16.mxu0 %v18959_v13  ;;  %v18974_v52 = vld [vmem:[#allocation38_spill] sm:$0xff]  ;;  %v18980_v8 = vld [vmem:[#allocation44_spill] sm:$0xff]  ;;  %v18981_v4 = vld [vmem:[#allocation45_spill] sm:$0xff] }
 0x7ce   :  { %v7477_v44 = vmax.f32 %v7475_v30, 0.0  ;;  %v7478_v34 = vmul.f32 %v18082_v0, %v7379_v26  ;;  %v7382_v53 = vadd.f32 %v7381_v32, %v18045_v31  ;;  %v14177_v40 = vpop.f32.mrb[11].mxu1  ;;  %v14853_v38 = vpop.f32.mrb[235].mxu0 }
 0x7cf   :  { %v14178_v16 = vadd.f32 %v14177_v40, %v14176_v49  ;;  %7953 = vmatpush1.bf16.msra.mxu1 %v17844_v25  ;;  %7996 = vmatpush1.bf16.msra.mxu0 %v17846_v61  ;;  %v18121_v20 = vadd.f32 %v14175_v15, %v18064_v43 }
 0x7d0   :  { %v7949_v36 = vpack.c.bf16 %v7477_v44, %v7476_v50  ;;  %v7480_v45 = vadd.f32 %v18080_v3, %v7478_v34  ;;  %v7479_v2 = vmul.f32 %v18082_v0, %v7382_v53  ;;  %7954 = vmatprep.subr.bf16.mxu1 %v17857_v46  ;;  %7997 = vmatprep.subr.bf16.mxu0 %v17859_v42  ;;  %v18982_v44 = vld [vmem:[#allocation46_spill] sm:$0xff]  ;;  %v18983_v34 = vld [vmem:[#allocation47_spill] sm:$0xff] }
 0x7d1   :  { %v18128_v31 = vadd.f32 %v14178_v16, %v18069_v35 }
 0x7d2   :  { %v7482_v25 = vadd.f32 %v7480_v45, %v18969_v21  ;;  %v7481_v61 = vadd.f32 %v18080_v3, %v7479_v2  ;;  %v18986_v21 = vld [vmem:[#allocation24_spill] sm:$0xff] }
 0x7d3   :  { %7955 = vmatpush1.bf16.msra.mxu1 %v17863_v47  ;;  %7998 = vmatpush1.bf16.msra.mxu0 %v17865_v37  ;;  %v14179_v43 = vpop.f32.mrb[12].mxu1  ;;  %v7386_v63 = vpop.f32.mrb[236].mxu0 }
 0x7d4   :  { %v7483_v48 = vadd.f32 %v7481_v61, %v18970_v11  ;;  %v14180_v46 = vpop.f32.mrb[13].mxu1  ;;  %7956 = vmatprep.subr.bf16.mxu1 %v17877_v55  ;;  %7999 = vmatprep.subr.bf16.mxu0 %v17879_v28  ;;  %v14856_v42 = vpop.f32.mrb[237].mxu0  ;;  %v7484_v29 = vmax.f32 %v7482_v25, 0.0  ;;  %v18971_v28 = vld [vmem:[#allocation35_spill] sm:$0xff]  ;;  %v18987_v25 = vmax.f32 %v18986_v21, 0.0 }
 0x7d5   :  { %v14181_v35 = vadd.f32 %v14180_v46, %v14179_v43  ;;  %v14182_v33 = vpop.f32.mrb[14].mxu1  ;;  %v7388_v6 = vpop.f32.mrb[238].mxu0 }
 0x7d6   :  { %v7485_v10 = vmax.f32 %v7483_v48, 0.0  ;;  %v14183_v17 = vpop.f32.mrb[15].mxu1  ;;  %v14857_v47 = vpop.f32.mrb[239].mxu0 }
 0x7d7   :  { %v14184_v54 = vadd.f32 %v14183_v17, %v14182_v33  ;;  %7957 = vmatpush1.bf16.msra.mxu1 %v17881_v39  ;;  %8000 = vmatpush1.bf16.msra.mxu0 %v17883_v41  ;;  %v18142_v56 = vadd.f32 %v14181_v35, %v18074_v14  ;;  %v18973_v41 = vld [vmem:[#allocation37_spill] sm:$0xff] }
 0x7d8   :  { %v18144_v37 = vpack.c.bf16 %v7485_v10, %v7484_v29  ;;  %7958 = vmatprep.subr.bf16.mxu1 %v17894_v51  ;;  %8001 = vmatprep.subr.bf16.mxu0 %v17896_v1  ;;  %v18975_v51 = vld [vmem:[#allocation39_spill] sm:$0xff]  ;;  %v18976_v1 = vld [vmem:[#allocation40_spill] sm:$0xff]  ;;  %v18989_v29 = vld [vmem:[#allocation25_spill] sm:$0xff] }
 0x7d9   :  { %v18149_v55 = vadd.f32 %v14184_v54, %v18077_v5  ;;  %v18977_v5 = vld [vmem:[#allocation41_spill] sm:$0xff]  ;;  %v18990_v10 = vmax.f32 %v18989_v29, 0.0  ;;  %v18991_v54 = vld [vmem:[#allocation26_spill] sm:$0xff] }
 0x7db   :  { %7959 = vmatpush1.bf16.msra.mxu1 %v17898_v62  ;;  %8002 = vmatpush1.bf16.msra.mxu0 %v18971_v28  ;;  %v7392_v9 = vpop.f32.mrb[240].mxu0  ;;  %v18979_v62 = vld [vmem:[#allocation43_spill] sm:$0xff]  ;;  %v18992_v28 = vmax.f32 %v18991_v54, 0.0 }
 0x7dc   :  { %v14860_v39 = vpop.f32.mrb[241].mxu0  ;;  %7960 = vmatprep.subr.bf16.mxu1 %v18972_v22  ;;  %8003 = vmatprep.subr.bf16.mxu0 %v18973_v41 }
 0x7dd   :  { %v7394_v14 = vpop.f32.mrb[242].mxu0 }
 0x7de   :  { %v14861_v59 = vpop.f32.mrb[243].mxu0 }
 0x7df   :  { %7961 = vmatpush1.bf16.msra.mxu1 %v18974_v52  ;;  %8004 = vmatpush1.bf16.msra.mxu0 %v18975_v51 }
 0x7e0   :  { %7962 = vmatprep.subr.bf16.mxu1 %v18976_v1  ;;  %8005 = vmatprep.subr.bf16.mxu0 %v18977_v5 }
 0x7e3   :  { %7963 = vmatpush1.bf16.msra.mxu1 %v18978_v19  ;;  %8006 = vmatpush1.bf16.msra.mxu0 %v18979_v62  ;;  %v7398_v7 = vpop.f32.mrb[244].mxu0  ;;  %v18994_v62 = vld [vmem:[#allocation27_spill] sm:$0xff] }
 0x7e4   :  { %v7399_v30 = vadd.f32 %v7398_v7, %v18049_v58  ;;  %v14864_v26 = vpop.f32.mrb[245].mxu0  ;;  %7964 = vmatprep.subr.bf16.mxu1 %v18980_v8  ;;  %8007 = vmatprep.subr.bf16.mxu0 %v18981_v4  ;;  %v18984_v58 = vld [vmem:[#allocation23_spill] sm:$0xff]  ;;  %v18995_v7 = vmax.f32 %v18994_v62, 0.0  ;;  %v18996_v8 = vld [vmem:[#allocation28_spill] sm:$0xff] }
 0x7e5   :  { %v7401_v15 = vpop.f32.mrb[246].mxu0  ;;  %v18985_v38 = vmax.f32 %v18984_v58, 0.0  ;;  %v18997_v4 = vmax.f32 %v18996_v8, 0.0 }
 0x7e6   :  { %v7486_v49 = vmul.f32 %v18082_v0, %v7399_v30  ;;  %v7402_v32 = vadd.f32 %v7401_v15, %v18051_v18  ;;  %v14865_v50 = vpop.f32.mrb[247].mxu0 }
 0x7e7   :  { %7965 = vmatpush1.bf16.msra.mxu1 %v18982_v44  ;;  %8008 = vmatpush1.bf16.msra.mxu0 %v18983_v34 }
 0x7e8   :  { %v7488_v53 = vadd.f32 %v18080_v3, %v7486_v49  ;;  %v7487_v40 = vmul.f32 %v18082_v0, %v7402_v32 }
 0x7ea   :  { %v7490_v16 = vadd.f32 %v7488_v53, %v18985_v38  ;;  %v7489_v45 = vadd.f32 %v18080_v3, %v7487_v40  ;;  %7983 = vmatmul.mubr.bf16.vlgmr.msra.gmra.mrb[20].mxu1 %v7949_v36  ;;  %8026 = vmatmul.mubr.bf16.vlgmr.msra.gmra.mrb[24].mxu0 %v7949_v36 }
 0x7eb   :  { %v7406_v2 = vpop.f32.mrb[248].mxu0 }
 0x7ec   :  { %v7491_v18 = vadd.f32 %v7489_v45, %v18987_v25  ;;  %v7407_v61 = vadd.f32 %v7406_v2, %v18056_v60  ;;  %v14868_v43 = vpop.f32.mrb[249].mxu0  ;;  %v7492_v11 = vmax.f32 %v7490_v16, 0.0 }
 0x7ed   :  { %v7409_v63 = vpop.f32.mrb[250].mxu0 }
 0x7ee   :  { %v7493_v48 = vmax.f32 %v7491_v18, 0.0  ;;  %v7494_v46 = vmul.f32 %v18082_v0, %v7407_v61  ;;  %v7410_v42 = vadd.f32 %v7409_v63, %v18061_v12  ;;  %v14869_v35 = vpop.f32.mrb[251].mxu0 }
 0x7f0   :  { %v18178_v33 = vpack.c.bf16 %v7493_v48, %v7492_v11  ;;  %v7496_v6 = vadd.f32 %v18080_v3, %v7494_v46  ;;  %v7495_v36 = vmul.f32 %v18082_v0, %v7410_v42  ;;  %v18999_v11 = vld [vmem:[#allocation29_spill] sm:$0xff] }
 0x7f1   :  { %v19000_v48 = vmax.f32 %v18999_v11, 0.0  ;;  %v15364_v11 = vld [vmem:[#allocation15 + $0x190] sm:$0xff]  }
 0x7f2   :  { %18988 = vst [vmem:[#allocation35_spill] sm:$0xff] %v18178_v33  ;;  %v7498_v17 = vadd.f32 %v7496_v6, %v18990_v10  ;;  %v7497_v60 = vadd.f32 %v18080_v3, %v7495_v36  ;;  %v19001_v6 = vld [vmem:[#allocation30_spill] sm:$0xff] }
 0x7f3   :  { %v7414_v47 = vpop.f32.mrb[252].mxu0  ;;  %v19002_v36 = vmax.f32 %v19001_v6, 0.0  ;;  %v15369_v6 = vld [vmem:[#allocation15 + $0x160] sm:$0xff]  }
 0x7f4   :  { %v7499_v9 = vadd.f32 %v7497_v60, %v18992_v28  ;;  %v7415_v39 = vadd.f32 %v7414_v47, %v18066_v23  ;;  %v14872_v22 = vpop.f32.mrb[253].mxu0  ;;  %v7500_v41 = vmax.f32 %v7498_v17, 0.0 }
 0x7f5   :  { %v7417_v12 = vpop.f32.mrb[254].mxu0 }
 0x7f6   :  { %v7501_v14 = vmax.f32 %v7499_v9, 0.0  ;;  %v7502_v59 = vmul.f32 %v18082_v0, %v7415_v39  ;;  %v7418_v52 = vadd.f32 %v7417_v12, %v18071_v57  ;;  %v14873_v51 = vpop.f32.mrb[255].mxu0  ;;  %v19004_v12 = vld [vmem:[#allocation31_spill] sm:$0xff] }
 0x7f8   :  { %v18190_v1 = vpack.c.bf16 %v7501_v14, %v7500_v41  ;;  %v7504_v5 = vadd.f32 %v18080_v3, %v7502_v59  ;;  %v7503_v19 = vmul.f32 %v18082_v0, %v7418_v52  ;;  %v19005_v41 = vmax.f32 %v19004_v12, 0.0  ;;  %v19006_v52 = vld [vmem:[#allocation32_spill] sm:$0xff]  ;;  %v15382_v12 = vld [vmem:[#allocation15 + $0x1f8] sm:$0xff]  }
 0x7f9   :  { %v19007_v51 = vmax.f32 %v19006_v52, 0.0  ;;  %v18903_v52 = vlaneseq }
 0x7fa   :  { %18993 = vst [vmem:[#allocation36_spill] sm:$0xff] %v18190_v1  ;;  %v7506_v30 = vadd.f32 %v7504_v5, %v18995_v7  ;;  %v7505_v23 = vadd.f32 %v18080_v3, %v7503_v19 }
 0x7fb   :  { %v7422_v26 = vpop.f32.mrb[0].mxu0 }
 0x7fc   :  { %v7507_v15 = vadd.f32 %v7505_v23, %v18997_v4  ;;  %v14876_v49 = vpop.f32.mrb[1].mxu0  ;;  %v7508_v50 = vmax.f32 %v7506_v30, 0.0 }
 0x7fd   :  { %v7424_v32 = vpop.f32.mrb[2].mxu0 }
 0x7fe   :  { %v7509_v57 = vmax.f32 %v7507_v15, 0.0  ;;  %v14877_v44 = vpop.f32.mrb[3].mxu0  ;;  %v19009_v32 = vld [vmem:[#allocation34_spill] sm:$0xff] }
 0x7ff   :  { %v19011_v44 = vld [vmem:[#allocation33_spill] sm:$0xff] }
 0x800   :  { %v18199_v34 = vpack.c.bf16 %v7509_v57, %v7508_v50  ;;  %v19010_v50 = vmax.f32 %v19009_v32, 0.0 }
 0x802   :  { %18998 = vst [vmem:[#allocation37_spill] sm:$0xff] %v18199_v34 }
 0x803   :  { %v7428_v53 = vpop.f32.mrb[4].mxu0 }
 0x804   :  { %v14880_v40 = vpop.f32.mrb[5].mxu0  ;;  %v19012_v53 = vmax.f32 %v19011_v44, 0.0 }
 0x805   :  { %v7430_v58 = vpop.f32.mrb[6].mxu0 }
 0x806   :  { %v14881_v38 = vpop.f32.mrb[7].mxu0 }
 0x80b   :  { %v7434_v16 = vpop.f32.mrb[8].mxu0 }
 0x80c   :  { %v7435_v45 = vadd.f32 %v7434_v16, %v18097_v27  ;;  %v14884_v2 = vpop.f32.mrb[9].mxu0  ;;  %v15353_v16 = vld [vmem:[#allocation15 + $0x140] sm:$0xff]  }
 0x80d   :  { %v7437_v21 = vpop.f32.mrb[10].mxu0  ;;  %v15356_v2 = vld [vmem:[#allocation15 + $0x180] sm:$0xff]   ;;  %14206 = vmatprep.subr.bf16.mxu1 %v15353_v16 }
 0x80e   :  { %v7510_v25 = vmul.f32 %v18082_v0, %v7435_v45  ;;  %v7438_v18 = vadd.f32 %v7437_v21, %v18102_v24  ;;  %v14885_v61 = vpop.f32.mrb[11].mxu0  ;;  %v15354_v45 = vld [vmem:[#allocation15 + $0x1c0] sm:$0xff]   ;;  %v15357_v21 = vld [vmem:[#allocation15 + $0x148] sm:$0xff]  }
 0x80f   :  { %14228 = vmatprep.subr.bf16.mxu0 %v15354_v45  ;;  %v15360_v61 = vld [vmem:[#allocation15 + $0x188] sm:$0xff]  }
 0x810   :  { %v7512_v43 = vadd.f32 %v18080_v3, %v7510_v25  ;;  %v7511_v63 = vmul.f32 %v18082_v0, %v7438_v18  ;;  %v15358_v25 = vld [vmem:[#allocation15 + $0x1c8] sm:$0xff]   ;;  %14229 = vmatpush3.bf16.msra.mxu0 %v15356_v2 }
 0x811   :  { %14230 = vmatprep.subr.bf16.mxu0 %v15358_v25 }
 0x812   :  { %v7514_v46 = vadd.f32 %v7512_v43, %v19000_v48  ;;  %v7513_v42 = vadd.f32 %v18080_v3, %v7511_v63  ;;  %v15362_v43 = vld [vmem:[#allocation15 + $0x1d0] sm:$0xff]   ;;  %v15365_v48 = vld [vmem:[#allocation15 + $0x158] sm:$0xff]  }
 0x813   :  { %v7442_v35 = vpop.f32.mrb[12].mxu0  ;;  %v15363_v63 = vld [vmem:[#allocation15 + $0x110] sm:$0xff]  }
 0x814   :  { %v7515_v27 = vadd.f32 %v7513_v42, %v19002_v36  ;;  %v7443_v29 = vadd.f32 %v7442_v35, %v18121_v20  ;;  %v14888_v10 = vpop.f32.mrb[13].mxu0  ;;  %v7516_v60 = vmax.f32 %v7514_v46, 0.0  ;;  %14231 = vmatpush3.bf16.msra.mxu0 %v15360_v61  ;;  %v15366_v46 = vld [vmem:[#allocation15 + $0x1d8] sm:$0xff]   ;;  %v15370_v36 = vld [vmem:[#allocation15 + $0x1e0] sm:$0xff]  }
 0x815   :  { %v7445_v17 = vpop.f32.mrb[14].mxu0  ;;  %14232 = vmatprep.subr.bf16.mxu0 %v15362_v43  ;;  %v15367_v42 = vld [vmem:[#allocation15 + $0x118] sm:$0xff]   ;;  %v15373_v10 = vld [vmem:[#allocation15 + $0x168] sm:$0xff]  }
 0x816   :  { %v7517_v24 = vmax.f32 %v7515_v27, 0.0  ;;  %v7518_v47 = vmul.f32 %v18082_v0, %v7443_v29  ;;  %v7446_v54 = vadd.f32 %v7445_v17, %v18128_v31  ;;  %v14889_v28 = vpop.f32.mrb[15].mxu0  ;;  %v15368_v35 = vld [vmem:[#allocation15 + $0x198] sm:$0xff]   ;;  %v15371_v27 = vld [vmem:[#allocation15 + $0x120] sm:$0xff]   ;;  %v15374_v17 = vld [vmem:[#allocation15 + $0x1e8] sm:$0xff]  }
 0x817   :  { %v15372_v29 = vld [vmem:[#allocation15 + $0x1a0] sm:$0xff]   ;;  %v15379_v28 = vld [vmem:[#allocation15 + $0x130] sm:$0xff]  }
 0x818   :  { %v18214_v9 = vpack.c.bf16 %v7517_v24, %v7516_v60  ;;  %v7520_v39 = vadd.f32 %v18080_v3, %v7518_v47  ;;  %v7519_v22 = vmul.f32 %v18082_v0, %v7446_v54  ;;  %14233 = vmatpush3.bf16.msra.mxu0 %v15364_v11  ;;  %v15375_v60 = vld [vmem:[#allocation15 + $0x128] sm:$0xff]   ;;  %v15377_v47 = vld [vmem:[#allocation15 + $0x170] sm:$0xff]  }
 0x819   :  { %14234 = vmatprep.subr.bf16.mxu0 %v15366_v46  ;;  %v15376_v24 = vld [vmem:[#allocation15 + $0x1a8] sm:$0xff]   ;;  %v15378_v54 = vld [vmem:[#allocation15 + $0x1f0] sm:$0xff]  }
 0x81a   :  { %19003 = vst [vmem:[#allocation38_spill] sm:$0xff] %v18214_v9  ;;  %v7522_v14 = vadd.f32 %v7520_v39, %v19005_v41  ;;  %v7521_v20 = vadd.f32 %v18080_v3, %v7519_v22  ;;  %v15380_v39 = vld [vmem:[#allocation15 + $0x1b0] sm:$0xff]   ;;  %v15381_v22 = vld [vmem:[#allocation15 + $0x178] sm:$0xff]  }
 0x81b   :  { %v7450_v59 = vpop.f32.mrb[16].mxu0  ;;  %v15383_v41 = vld [vmem:[#allocation15 + $0x138] sm:$0xff]  }
 0x81c   :  { %v7523_v5 = vadd.f32 %v7521_v20, %v19007_v51  ;;  %v7451_v19 = vadd.f32 %v7450_v59, %v18142_v56  ;;  %v14892_v62 = vpop.f32.mrb[17].mxu0  ;;  %v7524_v7 = vmax.f32 %v7522_v14, 0.0  ;;  %14235 = vmatpush3.bf16.msra.mxu0 %v15368_v35  ;;  %v15384_v14 = vld [vmem:[#allocation15 + $0x1b8] sm:$0xff]   ;;  %v15385_v20 = vld [vmem:[#allocation15 + $0x40] sm:$0xff]   ;;  %v7817_v51 = vshrl.u32 %v18903_v52, 7 }
 0x81d   :  { %v7453_v31 = vpop.f32.mrb[18].mxu0  ;;  %14236 = vmatprep.subr.bf16.mxu0 %v15370_v36  ;;  %v15386_v59 = vld [vmem:[#allocation15 + $0xc0] sm:$0xff]   ;;  %v7566_v62 = vld [vmem:[#allocation12] sm:$0xf] }
 0x81e   :  { %v7525_v30 = vmax.f32 %v7523_v5, 0.0  ;;  %v7526_v23 = vmul.f32 %v18082_v0, %v7451_v19  ;;  %v7454_v26 = vadd.f32 %v7453_v31, %v18149_v55  ;;  %v14893_v8 = vpop.f32.mrb[19].mxu0  ;;  %v15355_v55 = vld [vmem:[#allocation15 + $0x100] sm:$0xff]   ;;  %v7818_v5 = vsub.s32 0, %v7817_v51 }
 0x81f   :  { %14207 = vmatpush3.bf16.msra.mxu1 %v15355_v55  ;;  %v7826_v19 = vsub.s32 2, %v7817_v51  ;;  %v7822_v31 = vsub.s32 1, %v7817_v51 }
 0x820   :  { %v18226_v4 = vpack.c.bf16 %v7525_v30, %v7524_v7  ;;  %v7528_v15 = vadd.f32 %v18080_v3, %v7526_v23  ;;  %v7527_v49 = vmul.f32 %v18082_v0, %v7454_v26  ;;  %v15359_v0 = vld [vmem:[#allocation15 + $0x108] sm:$0xff]   ;;  %14208 = vmatprep.subr.bf16.mxu1 %v15357_v21  ;;  %14237 = vmatpush3.bf16.msra.mxu0 %v15372_v29  ;;  %v7830_v7 = vsub.s32 3, %v7817_v51  ;;  %v7567_v30 = vld [vmem:[#allocation14] sm:$0xf] }
 0x821   :  { %14238 = vmatprep.subr.bf16.mxu0 %v15374_v17  ;;  %v18238_v23 = vrot.slane %v7566_v62, %v7818_v5  ;;  %v18240_v26 = vrot.slane %v7566_v62, %v7826_v19  ;;  %v18242_v8 = vrot.slane %v7566_v62, %v7822_v31  ;;  %v18248_v32 = vrot.slane %v7567_v30, %v7826_v19 }
 0x822   :  { %19008 = vst [vmem:[#allocation39_spill] sm:$0xff] %v18226_v4  ;;  %v7530_v57 = vadd.f32 %v7528_v15, %v19010_v50  ;;  %v7529_v56 = vadd.f32 %v18080_v3, %v7527_v49  ;;  %v15361_v3 = vld [vmem:[#allocation15 + $0x150] sm:$0xff]   ;;  %v18244_v15 = vrot.slane %v7566_v62, %v7830_v7  ;;  %v18246_v49 = vrot.slane %v7567_v30, %v7818_v5 }
 0x823   :  { %14209 = vmatpush3.bf16.msra.mxu1 %v15359_v0  ;;  %19014 = vst [vmem:[#allocation41_spill] sm:$0xff] %v18238_v23  ;;  %19015 = vst [vmem:[#allocation42_spill] sm:$0xff] %v18240_v26  ;;  %v18252_v44 = vrot.slane %v7567_v30, %v7830_v7 }
 0x824   :  { %v7531_v40 = vadd.f32 %v7529_v56, %v19012_v53  ;;  %v7532_v58 = vmax.f32 %v7530_v57, 0.0  ;;  %14210 = vmatprep.subr.bf16.mxu1 %v15361_v3  ;;  %14239 = vmatpush3.bf16.msra.mxu0 %v15376_v24  ;;  %19016 = vst [vmem:[#allocation43_spill] sm:$0xff] %v18242_v8  ;;  %v18250_v56 = vrot.slane %v7567_v30, %v7822_v31 }
 0x825   :  { %14240 = vmatprep.subr.bf16.mxu0 %v15378_v54 }
 0x826   :  { %v7533_v38 = vmax.f32 %v7531_v40, 0.0 }
 0x827   :  { %14211 = vmatpush3.bf16.msra.mxu1 %v15363_v63 }
 0x828   :  { %v18235_v18 = vpack.c.bf16 %v7533_v38, %v7532_v58  ;;  %14212 = vmatprep.subr.bf16.mxu1 %v15365_v48  ;;  %14241 = vmatpush3.bf16.msra.mxu0 %v15380_v39 }
 0x829   :  { %14242 = vmatprep.subr.bf16.mxu0 %v15382_v12 }
 0x82a   :  { %19013 = vst [vmem:[#allocation40_spill] sm:$0xff] %v18235_v18 }
 0x82b   :  { %14213 = vmatpush3.bf16.msra.mxu1 %v15367_v42 }
 0x82c   :  { %14214 = vmatprep.subr.bf16.mxu1 %v15369_v6  ;;  %14243 = vmatpush3.bf16.msra.mxu0 %v15384_v14 }
 0x82d   :  { %14272 = vmatprep.subr.bf16.mxu0 %v15386_v59 }
 0x82f   :  { %14215 = vmatpush3.bf16.msra.mxu1 %v15371_v27 }
 0x830   :  { %14216 = vmatprep.subr.bf16.mxu1 %v15373_v10 }
 0x833   :  { %14217 = vmatpush3.bf16.msra.mxu1 %v15375_v60 }
 0x834   :  { %14218 = vmatprep.subr.bf16.mxu1 %v15377_v47 }
 0x837   :  { %14219 = vmatpush3.bf16.msra.mxu1 %v15379_v28 }
 0x838   :  { %14220 = vmatprep.subr.bf16.mxu1 %v15381_v22 }
 0x83b   :  { %14221 = vmatpush3.bf16.msra.mxu1 %v15383_v41 }
 0x83c   :  { %14250 = vmatprep.subr.bf16.mxu1 %v15385_v20 }
 0x89d   :  { %v7763_v50 = vpop.f32.mrb[16].mxu1  ;;  %v7806_v57 = vpop.f32.mrb[20].mxu0 }
 0x89e   :  { %v7836_v53 = vmul.f32 %v18238_v23, %v7763_v50  ;;  %v7838_v40 = vmul.f32 %v18240_v26, %v7806_v57  ;;  %v7765_v58 = vpop.f32.mrb[17].mxu1  ;;  %v7808_v38 = vpop.f32.mrb[21].mxu0 }
 0x89f   :  { %v7837_v16 = vmul.f32 %v18242_v8, %v7765_v58  ;;  %v7839_v45 = vmul.f32 %v18244_v15, %v7808_v38  ;;  %v7767_v55 = vpop.f32.mrb[18].mxu1  ;;  %v7810_v2 = vpop.f32.mrb[22].mxu0 }
 0x8a0   :  { %v7865_v21 = vadd.f32 %v18246_v49, %v7836_v53  ;;  %v7867_v25 = vadd.f32 %v18248_v32, %v7838_v40  ;;  %v7840_v0 = vmul.f32 %v18238_v23, %v7767_v55  ;;  %v7842_v61 = vmul.f32 %v18240_v26, %v7810_v2  ;;  %v7769_v3 = vpop.f32.mrb[19].mxu1  ;;  %v7812_v43 = vpop.f32.mrb[23].mxu0 }
 0x8a1   :  { %v7866_v63 = vadd.f32 %v18250_v56, %v7837_v16  ;;  %v7868_v11 = vadd.f32 %v18252_v44, %v7839_v45  ;;  %v7841_v48 = vmul.f32 %v18242_v8, %v7769_v3  ;;  %v7843_v46 = vmul.f32 %v18244_v15, %v7812_v43 }
 0x8a2   :  { %v7869_v42 = vadd.f32 %v18246_v49, %v7840_v0  ;;  %v7871_v35 = vadd.f32 %v18248_v32, %v7842_v61  ;;  %v7873_v27 = vmax.f32 %v7865_v21, 0.0  ;;  %v7875_v29 = vmax.f32 %v7867_v25, 0.0 }
 0x8a3   :  { %v7870_v6 = vadd.f32 %v18250_v56, %v7841_v48  ;;  %v7872_v36 = vadd.f32 %v18252_v44, %v7843_v46  ;;  %v7874_v60 = vmax.f32 %v7866_v63, 0.0  ;;  %v7876_v24 = vmax.f32 %v7868_v11, 0.0 }
 0x8a4   :  { %v7877_v10 = vmax.f32 %v7869_v42, 0.0  ;;  %v7879_v17 = vmax.f32 %v7871_v35, 0.0 }
 0x8a5   :  { %v7878_v47 = vmax.f32 %v7870_v6, 0.0  ;;  %v7880_v54 = vmax.f32 %v7872_v36, 0.0 }
 0x8a6   :  { %v18270_v28 = vpack.c.bf16 %v7877_v10, %v7873_v27  ;;  %v18272_v39 = vpack.c.bf16 %v7879_v17, %v7875_v29  ;;  %v15387_v29 = vld [vmem:[#allocation15] sm:$0xff]   ;;  %v15389_v17 = vld [vmem:[#allocation15 + $0x48] sm:$0xff]  }
 0x8a7   :  { %v7882_v22 = vpack.c.bf16 %v7878_v47, %v7874_v60  ;;  %v7884_v12 = vpack.c.bf16 %v7880_v54, %v7876_v24  ;;  %v15388_v10 = vld [vmem:[#allocation15 + $0x80] sm:$0xff]   ;;  %v15390_v60 = vld [vmem:[#allocation15 + $0xc8] sm:$0xff]   ;;  %v15393_v54 = vld [vmem:[#allocation15 + $0x50] sm:$0xff]  }
 0x8a8   :  { %v15391_v24 = vld [vmem:[#allocation15 + $0x8] sm:$0xff]  }
 0x8a9   :  { %v15392_v47 = vld [vmem:[#allocation15 + $0x88] sm:$0xff]  }
 0x8bd   :  { %v7984_v41 = vpop.f32.mrb[20].mxu1  ;;  %v8027_v14 = vpop.f32.mrb[24].mxu0 }
 0x8be   :  { %v8036_v20 = vmul.f32 %v7984_v41, %v18238_v23  ;;  %v8038_v59 = vmul.f32 %v8027_v14, %v18240_v26  ;;  %v7986_v51 = vpop.f32.mrb[21].mxu1  ;;  %v8029_v5 = vpop.f32.mrb[25].mxu0  ;;  %v15394_v41 = vld [vmem:[#allocation15 + $0xd0] sm:$0xff]  }
 0x8bf   :  { %v8037_v19 = vmul.f32 %v7986_v51, %v18242_v8  ;;  %v8039_v62 = vmul.f32 %v8029_v5, %v18244_v15  ;;  %v7988_v31 = vpop.f32.mrb[22].mxu1  ;;  %v8031_v7 = vpop.f32.mrb[26].mxu0  ;;  %v15395_v14 = vld [vmem:[#allocation15 + $0x10] sm:$0xff]   ;;  %v15398_v51 = vld [vmem:[#allocation15 + $0xd8] sm:$0xff]  }
 0x8c0   :  { %v8044_v30 = vadd.f32 %v8036_v20, %v18246_v49  ;;  %v8046_v50 = vadd.f32 %v8038_v59, %v18248_v32  ;;  %v8040_v57 = vmul.f32 %v7988_v31, %v18238_v23  ;;  %v8042_v53 = vmul.f32 %v8031_v7, %v18240_v26  ;;  %v7990_v40 = vpop.f32.mrb[23].mxu1  ;;  %v8033_v58 = vpop.f32.mrb[27].mxu0  ;;  %v15396_v20 = vld [vmem:[#allocation15 + $0x90] sm:$0xff]   ;;  %v15397_v59 = vld [vmem:[#allocation15 + $0x58] sm:$0xff]   ;;  %v15404_v31 = vld [vmem:[#allocation15 + $0xa0] sm:$0xff]  }
 0x8c1   :  { %v8045_v38 = vadd.f32 %v8037_v19, %v18250_v56  ;;  %v8047_v16 = vadd.f32 %v8039_v62, %v18252_v44  ;;  %v8041_v45 = vmul.f32 %v7990_v40, %v18242_v8  ;;  %v8043_v55 = vmul.f32 %v8033_v58, %v18244_v15  ;;  %v15399_v5 = vld [vmem:[#allocation15 + $0x18] sm:$0xff]   ;;  %v15403_v62 = vld [vmem:[#allocation15 + $0x20] sm:$0xff]   ;;  %v15405_v7 = vld [vmem:[#allocation15 + $0x68] sm:$0xff]  }
 0x8c2   :  { %v8048_v2 = vadd.f32 %v8040_v57, %v18246_v49  ;;  %v8050_v21 = vadd.f32 %v8042_v53, %v18248_v32  ;;  %v8052_v61 = vmax.f32 %v8044_v30, 0.0  ;;  %v8054_v3 = vmax.f32 %v8046_v50, 0.0  ;;  %v15400_v19 = vld [vmem:[#allocation15 + $0x98] sm:$0xff]   ;;  %v15406_v30 = vld [vmem:[#allocation15 + $0xe8] sm:$0xff]   ;;  %v15409_v53 = vld [vmem:[#allocation15 + $0x70] sm:$0xff]  }
 0x8c3   :  { %v8049_v25 = vadd.f32 %v8041_v45, %v18250_v56  ;;  %v8051_v0 = vadd.f32 %v8043_v55, %v18252_v44  ;;  %v8053_v11 = vmax.f32 %v8045_v38, 0.0  ;;  %v8055_v48 = vmax.f32 %v8047_v16, 0.0  ;;  %v15407_v50 = vld [vmem:[#allocation15 + $0x28] sm:$0xff]   ;;  %v15410_v40 = vld [vmem:[#allocation15 + $0xf0] sm:$0xff]   ;;  %v15413_v16 = vld [vmem:[#allocation15 + $0x78] sm:$0xff]  }
 0x8c4   :  { %v8056_v43 = vmax.f32 %v8048_v2, 0.0  ;;  %v8058_v63 = vmax.f32 %v8050_v21, 0.0  ;;  %v15408_v57 = vld [vmem:[#allocation15 + $0xa8] sm:$0xff]   ;;  %v15411_v58 = vld [vmem:[#allocation15 + $0x30] sm:$0xff]   ;;  %v15414_v45 = vld [vmem:[#allocation15 + $0xf8] sm:$0xff]  }
 0x8c5   :  { %v8057_v46 = vmax.f32 %v8049_v25, 0.0  ;;  %v8059_v42 = vmax.f32 %v8051_v0, 0.0  ;;  %v15412_v38 = vld [vmem:[#allocation15 + $0xb0] sm:$0xff]   ;;  %v15415_v55 = vld [vmem:[#allocation15 + $0x38] sm:$0xff]  }
 0x8c6   :  { %v8060_v35 = vpack.c.bf16 %v8056_v43, %v8052_v61  ;;  %v8062_v6 = vpack.c.bf16 %v8058_v63, %v8054_v3  ;;  %v15416_v2 = vld [vmem:[#allocation15 + $0xb8] sm:$0xff]   ;;  %v18293_v25 = vld [vmem:[#allocation11 + $0xc] ss:$16 sps:$4 sm:$0xff]   ;;  %v18301_v61 = vld [vmem:[#allocation11 + $0x8] ss:$16 sps:$4 sm:$0xff]  }
 0x8c7   :  { %v8061_v36 = vpack.c.bf16 %v8057_v46, %v8053_v11  ;;  %v8063_v27 = vpack.c.bf16 %v8059_v42, %v8055_v48  ;;  %v18290_v21 = vld [vmem:[#allocation11 + $0x4] ss:$16 sps:$4 sm:$0xff]   ;;  %19018 = vst [vmem:[#allocation45_spill] sm:$0xff] %v18293_v25  ;;  %v18298_v0 = vld [vmem:[#allocation11] ss:$16 sps:$4 sm:$0xff]  }
 0x8c8   :  { %19017 = vst [vmem:[#allocation44_spill] sm:$0xff] %v18290_v21  ;;  %v18304_v3 = vld [vmem:[#allocation11 + $0x24] ss:$16 sps:$4 sm:$0xff]   ;;  %v18307_v43 = vld [vmem:[#allocation11 + $0x2c] ss:$16 sps:$4 sm:$0xff]  }
 0x8c9   :  { %8353 = vmatprep.mubr.bf16.mxu1 %v8061_v36  ;;  %8394 = vmatprep.mubr.bf16.mxu0 %v8063_v27  ;;  %v18318_v63 = vld [vmem:[#allocation11 + $0x44] ss:$16 sps:$4 sm:$0xff]   ;;  %v18321_v11 = vld [vmem:[#allocation11 + $0x4c] ss:$16 sps:$4 sm:$0xff]   ;;  %v18324_v48 = vld [vmem:[#allocation11 + $0x40] ss:$16 sps:$4 sm:$0xff]  }
 0x8ca   :  { %8354 = vmatmul.mubr.bf16.vlgmr.msra.gmra.mrb[24].mxu1 %v8060_v35  ;;  %8395 = vmatmul.mubr.bf16.vlgmr.msra.gmra.mrb[28].mxu0 %v8062_v6  ;;  %v18327_v46 = vld [vmem:[#allocation11 + $0x48] ss:$16 sps:$4 sm:$0xff]   ;;  %v18330_v42 = vld [vmem:[#allocation11 + $0x64] ss:$16 sps:$4 sm:$0xff]   ;;  %v18333_v35 = vld [vmem:[#allocation11 + $0x6c] ss:$16 sps:$4 sm:$0xff]  }
 0x8cb   :  { %14251 = vmatpush3.bf16.msra.mxu1 %v15387_v29  ;;  %14273 = vmatpush3.bf16.msra.mxu0 %v15388_v10  ;;  %v18336_v6 = vld [vmem:[#allocation11 + $0x60] ss:$16 sps:$4 sm:$0xff]   ;;  %v18339_v36 = vld [vmem:[#allocation11 + $0x68] ss:$16 sps:$4 sm:$0xff]   ;;  %v18342_v27 = vld [vmem:[#allocation11 + $0x84] ss:$16 sps:$4 sm:$0xff]  }
 0x8cc   :  { %8627 = vmatprep.mubr.bf16.mxu1 %v7882_v22  ;;  %8668 = vmatprep.mubr.bf16.mxu0 %v7884_v12  ;;  %v15401_v22 = vld [vmem:[#allocation15 + $0x60] sm:$0xff]   ;;  %v18348_v10 = vld [vmem:[#allocation11 + $0x80] ss:$16 sps:$4 sm:$0xff]  }
 0x8cd   :  { %14252 = vmatprep.subr.bf16.mxu1 %v15389_v17  ;;  %14274 = vmatprep.subr.bf16.mxu0 %v15390_v60  ;;  %v15402_v12 = vld [vmem:[#allocation15 + $0xe0] sm:$0xff]   ;;  %v18354_v60 = vld [vmem:[#allocation11 + $0xa4] ss:$16 sps:$4 sm:$0xff]  }
 0x8ce   :  { %v18345_v29 = vld [vmem:[#allocation11 + $0x8c] ss:$16 sps:$4 sm:$0xff]   ;;  %v18351_v17 = vld [vmem:[#allocation11 + $0x88] ss:$16 sps:$4 sm:$0xff]  }
 0x8cf   :  { %14253 = vmatpush3.bf16.msra.mxu1 %v15391_v24  ;;  %14275 = vmatpush3.bf16.msra.mxu0 %v15392_v47  ;;  %v18357_v24 = vld [vmem:[#allocation11 + $0xac] ss:$16 sps:$4 sm:$0xff]   ;;  %v18360_v47 = vld [vmem:[#allocation11 + $0xa0] ss:$16 sps:$4 sm:$0xff]  }
 0x8d0   :  { %14254 = vmatprep.subr.bf16.mxu1 %v15393_v54  ;;  %14276 = vmatprep.subr.bf16.mxu0 %v15394_v41  ;;  %v18363_v54 = vld [vmem:[#allocation11 + $0xa8] ss:$16 sps:$4 sm:$0xff]   ;;  %v18366_v41 = vld [vmem:[#allocation11 + $0xc4] ss:$16 sps:$4 sm:$0xff]  }
 0x8d3   :  { %14255 = vmatpush3.bf16.msra.mxu1 %v15395_v14  ;;  %14277 = vmatpush3.bf16.msra.mxu0 %v15396_v20  ;;  %v18369_v14 = vld [vmem:[#allocation11 + $0xcc] ss:$16 sps:$4 sm:$0xff]   ;;  %v18372_v20 = vld [vmem:[#allocation11 + $0xc0] ss:$16 sps:$4 sm:$0xff]  }
 0x8d4   :  { %14256 = vmatprep.subr.bf16.mxu1 %v15397_v59  ;;  %14278 = vmatprep.subr.bf16.mxu0 %v15398_v51  ;;  %v18375_v59 = vld [vmem:[#allocation11 + $0xc8] ss:$16 sps:$4 sm:$0xff]   ;;  %v18378_v51 = vld [vmem:[#allocation11 + $0xe4] ss:$16 sps:$4 sm:$0xff]  }
 0x8d7   :  { %14257 = vmatpush3.bf16.msra.mxu1 %v15399_v5  ;;  %14279 = vmatpush3.bf16.msra.mxu0 %v15400_v19  ;;  %v18381_v5 = vld [vmem:[#allocation11 + $0xec] ss:$16 sps:$4 sm:$0xff]   ;;  %v18384_v19 = vld [vmem:[#allocation11 + $0xe0] ss:$16 sps:$4 sm:$0xff]  }
 0x8d8   :  { %14258 = vmatprep.subr.bf16.mxu1 %v15401_v22  ;;  %14280 = vmatprep.subr.bf16.mxu0 %v15402_v12  ;;  %v18387_v22 = vld [vmem:[#allocation11 + $0xe8] ss:$16 sps:$4 sm:$0xff]  }
 0x8d9   :  { %v15417_v12 = vld [vmem:[#allocation15 + $0x240] sm:$0xff]  }
 0x8db   :  { %14259 = vmatpush3.bf16.msra.mxu1 %v15403_v62  ;;  %14281 = vmatpush3.bf16.msra.mxu0 %v15404_v31  ;;  %v15418_v62 = vld [vmem:[#allocation15 + $0x2c0] sm:$0xff]  }
 0x8dc   :  { %14260 = vmatprep.subr.bf16.mxu1 %v15405_v7  ;;  %14282 = vmatprep.subr.bf16.mxu0 %v15406_v30  ;;  %v15419_v31 = vld [vmem:[#allocation15 + $0x200] sm:$0xff]   ;;  %v15421_v30 = vld [vmem:[#allocation15 + $0x248] sm:$0xff]  }
 0x8dd   :  { %v15420_v7 = vld [vmem:[#allocation15 + $0x280] sm:$0xff]  }
 0x8df   :  { %14261 = vmatpush3.bf16.msra.mxu1 %v15407_v50  ;;  %14283 = vmatpush3.bf16.msra.mxu0 %v15408_v57  ;;  %v15422_v50 = vld [vmem:[#allocation15 + $0x2c8] sm:$0xff]  }
 0x8e0   :  { %14262 = vmatprep.subr.bf16.mxu1 %v15409_v53  ;;  %14284 = vmatprep.subr.bf16.mxu0 %v15410_v40  ;;  %v15423_v57 = vld [vmem:[#allocation15 + $0x208] sm:$0xff]   ;;  %v15425_v40 = vld [vmem:[#allocation15 + $0x250] sm:$0xff]  }
 0x8e1   :  { %v15424_v53 = vld [vmem:[#allocation15 + $0x288] sm:$0xff]  }
 0x8e3   :  { %14263 = vmatpush3.bf16.msra.mxu1 %v15411_v58  ;;  %14285 = vmatpush3.bf16.msra.mxu0 %v15412_v38  ;;  %v15426_v58 = vld [vmem:[#allocation15 + $0x2d0] sm:$0xff]  }
 0x8e4   :  { %14264 = vmatprep.subr.bf16.mxu1 %v15413_v16  ;;  %14286 = vmatprep.subr.bf16.mxu0 %v15414_v45  ;;  %v15427_v38 = vld [vmem:[#allocation15 + $0x210] sm:$0xff]   ;;  %v15429_v16 = vld [vmem:[#allocation15 + $0x258] sm:$0xff]  }
 0x8e5   :  { %v15430_v45 = vld [vmem:[#allocation15 + $0x2d8] sm:$0xff]  }
 0x8e7   :  { %14265 = vmatpush3.bf16.msra.mxu1 %v15415_v55  ;;  %14287 = vmatpush3.bf16.msra.mxu0 %v15416_v2  ;;  %v15431_v55 = vld [vmem:[#allocation15 + $0x218] sm:$0xff]  }
 0x8e8   :  { %8678 = vmatprep.subr.bf16.mxu1 %v18290_v21  ;;  %8721 = vmatprep.subr.bf16.mxu0 %v18293_v25  ;;  %v15432_v2 = vld [vmem:[#allocation15 + $0x298] sm:$0xff]  }
 0x8ea   :  { %8628 = vmatmul.mubr.bf16.vlgmr.msra.gmra.mrb[28].mxu1 %v18270_v28  ;;  %8669 = vmatmul.mubr.bf16.vlgmr.msra.gmra.mrb[32].mxu0 %v18272_v39  ;;  %v18312_v28 = vld [vmem:[#allocation11 + $0x20] ss:$16 sps:$4 sm:$0xff]   ;;  %v18315_v39 = vld [vmem:[#allocation11 + $0x28] ss:$16 sps:$4 sm:$0xff]  }
 0x8eb   :  { %8679 = vmatpush1.bf16.msra.mxu1 %v18298_v0  ;;  %8722 = vmatpush1.bf16.msra.mxu0 %v18301_v61 }
 0x8ec   :  { %8680 = vmatprep.subr.bf16.mxu1 %v18304_v3  ;;  %8723 = vmatprep.subr.bf16.mxu0 %v18307_v43 }
 0x8ed   :  { %8710 = vmatprep.mubr.bf16.mxu1 %v18959_v13  ;;  %8753 = vmatprep.mubr.bf16.mxu0 %v18959_v13 }
 0x8ef   :  { %8681 = vmatpush1.bf16.msra.mxu1 %v18312_v28  ;;  %8724 = vmatpush1.bf16.msra.mxu0 %v18315_v39 }
 0x8f0   :  { %8682 = vmatprep.subr.bf16.mxu1 %v18318_v63  ;;  %8725 = vmatprep.subr.bf16.mxu0 %v18321_v11 }
 0x8f3   :  { %8683 = vmatpush1.bf16.msra.mxu1 %v18324_v48  ;;  %8726 = vmatpush1.bf16.msra.mxu0 %v18327_v46 }
 0x8f4   :  { %8684 = vmatprep.subr.bf16.mxu1 %v18330_v42  ;;  %8727 = vmatprep.subr.bf16.mxu0 %v18333_v35 }
 0x8f7   :  { %8685 = vmatpush1.bf16.msra.mxu1 %v18336_v6  ;;  %8728 = vmatpush1.bf16.msra.mxu0 %v18339_v36 }
 0x8f8   :  { %8686 = vmatprep.subr.bf16.mxu1 %v18342_v27  ;;  %8729 = vmatprep.subr.bf16.mxu0 %v18345_v29 }
 0x8fb   :  { %8687 = vmatpush1.bf16.msra.mxu1 %v18348_v10  ;;  %8730 = vmatpush1.bf16.msra.mxu0 %v18351_v17 }
 0x8fc   :  { %8688 = vmatprep.subr.bf16.mxu1 %v18354_v60  ;;  %8731 = vmatprep.subr.bf16.mxu0 %v18357_v24 }
 0x8ff   :  { %8689 = vmatpush1.bf16.msra.mxu1 %v18360_v47  ;;  %8732 = vmatpush1.bf16.msra.mxu0 %v18363_v54 }
 0x900   :  { %8690 = vmatprep.subr.bf16.mxu1 %v18366_v41  ;;  %8733 = vmatprep.subr.bf16.mxu0 %v18369_v14 }
 0x903   :  { %8691 = vmatpush1.bf16.msra.mxu1 %v18372_v20  ;;  %8734 = vmatpush1.bf16.msra.mxu0 %v18375_v59 }
 0x904   :  { %8692 = vmatprep.subr.bf16.mxu1 %v18378_v51  ;;  %8735 = vmatprep.subr.bf16.mxu0 %v18381_v5 }
 0x907   :  { %8693 = vmatpush1.bf16.msra.mxu1 %v18384_v19  ;;  %8736 = vmatpush1.bf16.msra.mxu0 %v18387_v22 }
 0x908   :  { %14294 = vmatprep.subr.bf16.mxu1 %v15417_v12  ;;  %14316 = vmatprep.subr.bf16.mxu0 %v15418_v62  ;;  %v15433_v12 = vld [vmem:[#allocation15 + $0x260] sm:$0xff]  }
 0x909   :  { %v15434_v62 = vld [vmem:[#allocation15 + $0x2e0] sm:$0xff]  }
 0x90a   :  { %8711 = vmatmul.mubr.bf16.vlgmr.msra.gmra.mrb[32].mxu1 %v18144_v37  ;;  %8754 = vmatmul.mubr.bf16.vlgmr.msra.gmra.mrb[36].mxu0 %v18144_v37  ;;  %v15428_v37 = vld [vmem:[#allocation15 + $0x290] sm:$0xff]  }
 0x90b   :  { %14295 = vmatpush3.bf16.msra.mxu1 %v15419_v31  ;;  %14317 = vmatpush3.bf16.msra.mxu0 %v15420_v7  ;;  %v15435_v31 = vld [vmem:[#allocation15 + $0x220] sm:$0xff]  }
 0x90c   :  { %14296 = vmatprep.subr.bf16.mxu1 %v15421_v30  ;;  %14318 = vmatprep.subr.bf16.mxu0 %v15422_v50  ;;  %v15436_v7 = vld [vmem:[#allocation15 + $0x2a0] sm:$0xff]   ;;  %v15437_v30 = vld [vmem:[#allocation15 + $0x268] sm:$0xff]  }
 0x90d   :  { %v15438_v50 = vld [vmem:[#allocation15 + $0x2e8] sm:$0xff]  }
 0x90f   :  { %14297 = vmatpush3.bf16.msra.mxu1 %v15423_v57  ;;  %14319 = vmatpush3.bf16.msra.mxu0 %v15424_v53  ;;  %v15439_v57 = vld [vmem:[#allocation15 + $0x228] sm:$0xff]  }
 0x910   :  { %14298 = vmatprep.subr.bf16.mxu1 %v15425_v40  ;;  %14320 = vmatprep.subr.bf16.mxu0 %v15426_v58  ;;  %v15440_v53 = vld [vmem:[#allocation15 + $0x2a8] sm:$0xff]   ;;  %v15441_v40 = vld [vmem:[#allocation15 + $0x270] sm:$0xff]  }
 0x911   :  { %v15442_v58 = vld [vmem:[#allocation15 + $0x2f0] sm:$0xff]  }
 0x913   :  { %14299 = vmatpush3.bf16.msra.mxu1 %v15427_v38  ;;  %14321 = vmatpush3.bf16.msra.mxu0 %v15428_v37  ;;  %v15443_v38 = vld [vmem:[#allocation15 + $0x230] sm:$0xff]  }
 0x914   :  { %14300 = vmatprep.subr.bf16.mxu1 %v15429_v16  ;;  %14322 = vmatprep.subr.bf16.mxu0 %v15430_v45  ;;  %v15444_v37 = vld [vmem:[#allocation15 + $0x2b0] sm:$0xff]   ;;  %v15445_v16 = vld [vmem:[#allocation15 + $0x278] sm:$0xff]  }
 0x915   :  { %v15446_v45 = vld [vmem:[#allocation15 + $0x2f8] sm:$0xff]  }
 0x917   :  { %14301 = vmatpush3.bf16.msra.mxu1 %v15431_v55  ;;  %14323 = vmatpush3.bf16.msra.mxu0 %v15432_v2  ;;  %v15447_v55 = vld [vmem:[#allocation15 + $0x238] sm:$0xff]  }
 0x918   :  { %14302 = vmatprep.subr.bf16.mxu1 %v15433_v12  ;;  %14324 = vmatprep.subr.bf16.mxu0 %v15434_v62  ;;  %v15448_v2 = vld [vmem:[#allocation15 + $0x2b8] sm:$0xff]  }
 0x91b   :  { %14303 = vmatpush3.bf16.msra.mxu1 %v15435_v31  ;;  %14325 = vmatpush3.bf16.msra.mxu0 %v15436_v7 }
 0x91c   :  { %14304 = vmatprep.subr.bf16.mxu1 %v15437_v30  ;;  %14326 = vmatprep.subr.bf16.mxu0 %v15438_v50 }
 0x91f   :  { %14305 = vmatpush3.bf16.msra.mxu1 %v15439_v57  ;;  %14327 = vmatpush3.bf16.msra.mxu0 %v15440_v53 }
 0x920   :  { %14306 = vmatprep.subr.bf16.mxu1 %v15441_v40  ;;  %14328 = vmatprep.subr.bf16.mxu0 %v15442_v58 }
 0x923   :  { %14307 = vmatpush3.bf16.msra.mxu1 %v15443_v38  ;;  %14329 = vmatpush3.bf16.msra.mxu0 %v15444_v37 }
 0x924   :  { %14308 = vmatprep.subr.bf16.mxu1 %v15445_v16  ;;  %14330 = vmatprep.subr.bf16.mxu0 %v15446_v45 }
 0x927   :  { %14309 = vmatpush3.bf16.msra.mxu1 %v15447_v55  ;;  %14331 = vmatpush3.bf16.msra.mxu0 %v15448_v2 }
 0x928   :  { %9134 = vmatprep.subr.bf16.mxu1 %v18290_v21  ;;  %9177 = vmatprep.subr.bf16.mxu0 %v18293_v25 }
 0x99d   :  { %v14222_v12 = vpop.f32.mrb[24].mxu1  ;;  %v14244_v62 = vpop.f32.mrb[28].mxu0 }
 0x99e   :  { %v14223_v31 = vpop.f32.mrb[25].mxu1  ;;  %v14245_v7 = vpop.f32.mrb[29].mxu0 }
 0x99f   :  { %v14224_v30 = vadd.f32 %v14223_v31, %v14222_v12  ;;  %v14246_v50 = vadd.f32 %v14245_v7, %v14244_v62  ;;  %v14225_v57 = vpop.f32.mrb[26].mxu1  ;;  %v14247_v53 = vpop.f32.mrb[30].mxu0 }
 0x9a0   :  { %v14226_v40 = vpop.f32.mrb[27].mxu1  ;;  %v14248_v58 = vpop.f32.mrb[31].mxu0 }
 0x9a1   :  { %v8397_v38 = vadd.f32 %v14246_v50, %v14224_v30  ;;  %v14227_v37 = vadd.f32 %v14226_v40, %v14225_v57  ;;  %v14249_v16 = vadd.f32 %v14248_v58, %v14247_v53 }
 0x9a3   :  { %v8400_v45 = vadd.f32 %v14249_v16, %v14227_v37 }
 0x9bd   :  { %v14266_v55 = vpop.f32.mrb[28].mxu1  ;;  %v14288_v2 = vpop.f32.mrb[32].mxu0 }
 0x9be   :  { %v14267_v52 = vpop.f32.mrb[29].mxu1  ;;  %v14289_v18 = vpop.f32.mrb[33].mxu0 }
 0x9bf   :  { %v14268_v4 = vadd.f32 %v14267_v52, %v14266_v55  ;;  %v14290_v9 = vadd.f32 %v14289_v18, %v14288_v2  ;;  %v14269_v34 = vpop.f32.mrb[30].mxu1  ;;  %v14291_v1 = vpop.f32.mrb[34].mxu0 }
 0x9c0   :  { %v14270_v25 = vpop.f32.mrb[31].mxu1  ;;  %v14292_v21 = vpop.f32.mrb[35].mxu0 }
 0x9c1   :  { %v8630_v12 = vadd.f32 %v14268_v4, %v8397_v38  ;;  %v14271_v62 = vadd.f32 %v14270_v25, %v14269_v34  ;;  %v14293_v31 = vadd.f32 %v14292_v21, %v14291_v1 }
 0x9c3   :  { %v18394_v7 = vadd.f32 %v14290_v9, %v8630_v12  ;;  %v8633_v33 = vadd.f32 %v14271_v62, %v8400_v45 }
 0x9c5   :  { %v18396_v30 = vadd.f32 %v14293_v31, %v8633_v33 }
 0x9dd   :  { %v8712_v50 = vpop.f32.mrb[32].mxu1  ;;  %v8755_v57 = vpop.f32.mrb[36].mxu0 }
 0x9de   :  { %v8764_v53 = vmul.f32 %v8712_v50, %v18238_v23  ;;  %v8766_v40 = vmul.f32 %v8755_v57, %v18240_v26  ;;  %v8714_v52 = vpop.f32.mrb[33].mxu1  ;;  %v8757_v18 = vpop.f32.mrb[37].mxu0 }
 0x9df   :  { %v8765_v58 = vmul.f32 %v8714_v52, %v18242_v8  ;;  %v8767_v37 = vmul.f32 %v8757_v18, %v18244_v15  ;;  %v8716_v4 = vpop.f32.mrb[34].mxu1  ;;  %v8759_v34 = vpop.f32.mrb[38].mxu0 }
 0x9e0   :  { %v8772_v1 = vadd.f32 %v8764_v53, %v18246_v49  ;;  %v8774_v9 = vadd.f32 %v8766_v40, %v18248_v32  ;;  %v8768_v33 = vmul.f32 %v8716_v4, %v18238_v23  ;;  %v8770_v21 = vmul.f32 %v8759_v34, %v18240_v26  ;;  %v8718_v25 = vpop.f32.mrb[35].mxu1  ;;  %v8761_v38 = vpop.f32.mrb[39].mxu0 }
 0x9e1   :  { %v8773_v16 = vadd.f32 %v8765_v58, %v18250_v56  ;;  %v8775_v45 = vadd.f32 %v8767_v37, %v18252_v44  ;;  %v8769_v55 = vmul.f32 %v8718_v25, %v18242_v8  ;;  %v8771_v2 = vmul.f32 %v8761_v38, %v18244_v15 }
 0x9e2   :  { %v8776_v12 = vadd.f32 %v8768_v33, %v18246_v49  ;;  %v8778_v62 = vadd.f32 %v8770_v21, %v18248_v32  ;;  %v8780_v57 = vmax.f32 %v8772_v1, 0.0  ;;  %v8782_v53 = vmax.f32 %v8774_v9, 0.0  ;;  %v15449_v1 = vld [vmem:[#allocation15 + $0x340] sm:$0xff]  }
 0x9e3   :  { %v8777_v31 = vadd.f32 %v8769_v55, %v18250_v56  ;;  %v8779_v50 = vadd.f32 %v8771_v2, %v18252_v44  ;;  %v8781_v18 = vmax.f32 %v8773_v16, 0.0  ;;  %v8783_v58 = vmax.f32 %v8775_v45, 0.0  ;;  %v15450_v9 = vld [vmem:[#allocation15 + $0x3c0] sm:$0xff]   ;;  %v15453_v16 = vld [vmem:[#allocation15 + $0x348] sm:$0xff]  }
 0x9e4   :  { %v8784_v40 = vmax.f32 %v8776_v12, 0.0  ;;  %v8786_v52 = vmax.f32 %v8778_v62, 0.0  ;;  %v15451_v33 = vld [vmem:[#allocation15 + $0x300] sm:$0xff]   ;;  %v15454_v45 = vld [vmem:[#allocation15 + $0x3c8] sm:$0xff]   ;;  %v15457_v12 = vld [vmem:[#allocation15 + $0x350] sm:$0xff]  }
 0x9e5   :  { %v8785_v4 = vmax.f32 %v8777_v31, 0.0  ;;  %v8787_v37 = vmax.f32 %v8779_v50, 0.0  ;;  %v15452_v21 = vld [vmem:[#allocation15 + $0x380] sm:$0xff]   ;;  %v15455_v55 = vld [vmem:[#allocation15 + $0x308] sm:$0xff]   ;;  %v15458_v62 = vld [vmem:[#allocation15 + $0x3d0] sm:$0xff]  }
 0x9e6   :  { %v8788_v34 = vpack.c.bf16 %v8784_v40, %v8780_v57  ;;  %v8790_v25 = vpack.c.bf16 %v8786_v52, %v8782_v53  ;;  %v15456_v2 = vld [vmem:[#allocation15 + $0x388] sm:$0xff]   ;;  %v15459_v31 = vld [vmem:[#allocation15 + $0x310] sm:$0xff]   ;;  %v15461_v57 = vld [vmem:[#allocation15 + $0x358] sm:$0xff]  }
 0x9e7   :  { %v8789_v8 = vpack.c.bf16 %v8785_v4, %v8781_v18  ;;  %v8791_v38 = vpack.c.bf16 %v8787_v37, %v8783_v58  ;;  %v15460_v50 = vld [vmem:[#allocation15 + $0x390] sm:$0xff]   ;;  %v15462_v53 = vld [vmem:[#allocation15 + $0x3d8] sm:$0xff]   ;;  %v15465_v18 = vld [vmem:[#allocation15 + $0x360] sm:$0xff]  }
 0x9e8   :  { %v15463_v40 = vld [vmem:[#allocation15 + $0x318] sm:$0xff]   ;;  %v15466_v58 = vld [vmem:[#allocation15 + $0x3e0] sm:$0xff]  }
 0x9e9   :  { %9081 = vmatprep.mubr.bf16.mxu1 %v8789_v8  ;;  %9122 = vmatprep.mubr.bf16.mxu0 %v8791_v38  ;;  %v19019_v8 = vld [vmem:[#allocation35_spill] sm:$0xff]  ;;  %v15464_v52 = vld [vmem:[#allocation15 + $0x398] sm:$0xff]  }
 0x9ea   :  { %9082 = vmatmul.mubr.bf16.vlgmr.msra.gmra.mrb[36].mxu1 %v8788_v34  ;;  %9123 = vmatmul.mubr.bf16.vlgmr.msra.gmra.mrb[40].mxu0 %v8790_v25  ;;  %v15467_v4 = vld [vmem:[#allocation15 + $0x320] sm:$0xff]   ;;  %v15469_v34 = vld [vmem:[#allocation15 + $0x368] sm:$0xff]  }
 0x9eb   :  { %9135 = vmatpush1.bf16.msra.mxu1 %v18298_v0  ;;  %9178 = vmatpush1.bf16.msra.mxu0 %v18301_v61  ;;  %v15468_v37 = vld [vmem:[#allocation15 + $0x3a0] sm:$0xff]   ;;  %v15470_v25 = vld [vmem:[#allocation15 + $0x3e8] sm:$0xff]  }
 0x9ec   :  { %9136 = vmatprep.subr.bf16.mxu1 %v18304_v3  ;;  %9179 = vmatprep.subr.bf16.mxu0 %v18307_v43  ;;  %v15471_v38 = vld [vmem:[#allocation15 + $0x328] sm:$0xff]  }
 0x9ed   :  { %9166 = vmatprep.mubr.bf16.mxu1 %v18959_v13  ;;  %9209 = vmatprep.mubr.bf16.mxu0 %v18959_v13 }
 0x9ef   :  { %9137 = vmatpush1.bf16.msra.mxu1 %v18312_v28  ;;  %9180 = vmatpush1.bf16.msra.mxu0 %v18315_v39 }
 0x9f0   :  { %9138 = vmatprep.subr.bf16.mxu1 %v18318_v63  ;;  %9181 = vmatprep.subr.bf16.mxu0 %v18321_v11 }
 0x9f3   :  { %9139 = vmatpush1.bf16.msra.mxu1 %v18324_v48  ;;  %9182 = vmatpush1.bf16.msra.mxu0 %v18327_v46 }
 0x9f4   :  { %9140 = vmatprep.subr.bf16.mxu1 %v18330_v42  ;;  %9183 = vmatprep.subr.bf16.mxu0 %v18333_v35 }
 0x9f7   :  { %9141 = vmatpush1.bf16.msra.mxu1 %v18336_v6  ;;  %9184 = vmatpush1.bf16.msra.mxu0 %v18339_v36 }
 0x9f8   :  { %9142 = vmatprep.subr.bf16.mxu1 %v18342_v27  ;;  %9185 = vmatprep.subr.bf16.mxu0 %v18345_v29 }
 0x9fb   :  { %9143 = vmatpush1.bf16.msra.mxu1 %v18348_v10  ;;  %9186 = vmatpush1.bf16.msra.mxu0 %v18351_v17 }
 0x9fc   :  { %9144 = vmatprep.subr.bf16.mxu1 %v18354_v60  ;;  %9187 = vmatprep.subr.bf16.mxu0 %v18357_v24 }
 0x9ff   :  { %9145 = vmatpush1.bf16.msra.mxu1 %v18360_v47  ;;  %9188 = vmatpush1.bf16.msra.mxu0 %v18363_v54 }
 0xa00   :  { %9146 = vmatprep.subr.bf16.mxu1 %v18366_v41  ;;  %9189 = vmatprep.subr.bf16.mxu0 %v18369_v14 }
 0xa03   :  { %9147 = vmatpush1.bf16.msra.mxu1 %v18372_v20  ;;  %9190 = vmatpush1.bf16.msra.mxu0 %v18375_v59 }
 0xa04   :  { %9148 = vmatprep.subr.bf16.mxu1 %v18378_v51  ;;  %9191 = vmatprep.subr.bf16.mxu0 %v18381_v5 }
 0xa07   :  { %9149 = vmatpush1.bf16.msra.mxu1 %v18384_v19  ;;  %9192 = vmatpush1.bf16.msra.mxu0 %v18387_v22 }
 0xa08   :  { %14338 = vmatprep.subr.bf16.mxu1 %v15449_v1  ;;  %14360 = vmatprep.subr.bf16.mxu0 %v15450_v9  ;;  %v15473_v1 = vld [vmem:[#allocation15 + $0x370] sm:$0xff]  }
 0xa09   :  { %v15474_v9 = vld [vmem:[#allocation15 + $0x3f0] sm:$0xff]  }
 0xa0a   :  { %9167 = vmatmul.mubr.bf16.vlgmr.msra.gmra.mrb[40].mxu1 %v19019_v8  ;;  %9210 = vmatmul.mubr.bf16.vlgmr.msra.gmra.mrb[44].mxu0 %v19019_v8  ;;  %v15472_v8 = vld [vmem:[#allocation15 + $0x3a8] sm:$0xff]  }
 0xa0b   :  { %14339 = vmatpush3.bf16.msra.mxu1 %v15451_v33  ;;  %14361 = vmatpush3.bf16.msra.mxu0 %v15452_v21  ;;  %v15475_v33 = vld [vmem:[#allocation15 + $0x330] sm:$0xff]  }
 0xa0c   :  { %14340 = vmatprep.subr.bf16.mxu1 %v15453_v16  ;;  %14362 = vmatprep.subr.bf16.mxu0 %v15454_v45  ;;  %v15476_v21 = vld [vmem:[#allocation15 + $0x3b0] sm:$0xff]   ;;  %v15477_v16 = vld [vmem:[#allocation15 + $0x378] sm:$0xff]  }
 0xa0d   :  { %v15478_v45 = vld [vmem:[#allocation15 + $0x3f8] sm:$0xff]  }
 0xa0f   :  { %14341 = vmatpush3.bf16.msra.mxu1 %v15455_v55  ;;  %14363 = vmatpush3.bf16.msra.mxu0 %v15456_v2  ;;  %v15479_v55 = vld [vmem:[#allocation15 + $0x338] sm:$0xff]  }
 0xa10   :  { %14342 = vmatprep.subr.bf16.mxu1 %v15457_v12  ;;  %14364 = vmatprep.subr.bf16.mxu0 %v15458_v62  ;;  %v15480_v2 = vld [vmem:[#allocation15 + $0x3b8] sm:$0xff]   ;;  %v19020_v12 = vld [vmem:[#allocation44_spill] sm:$0xff] }
 0xa11   :  { %v19021_v62 = vld [vmem:[#allocation45_spill] sm:$0xff] }
 0xa13   :  { %14343 = vmatpush3.bf16.msra.mxu1 %v15459_v31  ;;  %14365 = vmatpush3.bf16.msra.mxu0 %v15460_v50 }
 0xa14   :  { %14344 = vmatprep.subr.bf16.mxu1 %v15461_v57  ;;  %14366 = vmatprep.subr.bf16.mxu0 %v15462_v53 }
 0xa17   :  { %14345 = vmatpush3.bf16.msra.mxu1 %v15463_v40  ;;  %14367 = vmatpush3.bf16.msra.mxu0 %v15464_v52 }
 0xa18   :  { %14346 = vmatprep.subr.bf16.mxu1 %v15465_v18  ;;  %14368 = vmatprep.subr.bf16.mxu0 %v15466_v58 }
 0xa1b   :  { %14347 = vmatpush3.bf16.msra.mxu1 %v15467_v4  ;;  %14369 = vmatpush3.bf16.msra.mxu0 %v15468_v37 }
 0xa1c   :  { %14348 = vmatprep.subr.bf16.mxu1 %v15469_v34  ;;  %14370 = vmatprep.subr.bf16.mxu0 %v15470_v25 }
 0xa1f   :  { %14349 = vmatpush3.bf16.msra.mxu1 %v15471_v38  ;;  %14371 = vmatpush3.bf16.msra.mxu0 %v15472_v8 }
 0xa20   :  { %14350 = vmatprep.subr.bf16.mxu1 %v15473_v1  ;;  %14372 = vmatprep.subr.bf16.mxu0 %v15474_v9 }
 0xa23   :  { %14351 = vmatpush3.bf16.msra.mxu1 %v15475_v33  ;;  %14373 = vmatpush3.bf16.msra.mxu0 %v15476_v21 }
 0xa24   :  { %14352 = vmatprep.subr.bf16.mxu1 %v15477_v16  ;;  %14374 = vmatprep.subr.bf16.mxu0 %v15478_v45 }
 0xa27   :  { %14353 = vmatpush3.bf16.msra.mxu1 %v15479_v55  ;;  %14375 = vmatpush3.bf16.msra.mxu0 %v15480_v2 }
 0xa28   :  { %9590 = vmatprep.subr.bf16.mxu1 %v19020_v12  ;;  %9633 = vmatprep.subr.bf16.mxu0 %v19021_v62 }
 0xabd   :  { %v14310_v31 = vpop.f32.mrb[36].mxu1  ;;  %v14332_v50 = vpop.f32.mrb[40].mxu0 }
 0xabe   :  { %v14311_v57 = vpop.f32.mrb[37].mxu1  ;;  %v14333_v53 = vpop.f32.mrb[41].mxu0 }
 0xabf   :  { %v14312_v40 = vadd.f32 %v14311_v57, %v14310_v31  ;;  %v14334_v52 = vadd.f32 %v14333_v53, %v14332_v50  ;;  %v14313_v18 = vpop.f32.mrb[38].mxu1  ;;  %v14335_v58 = vpop.f32.mrb[42].mxu0  ;;  %v19022_v31 = vld [vmem:[#allocation43_spill] sm:$0xff] }
 0xac0   :  { %v14314_v4 = vpop.f32.mrb[39].mxu1  ;;  %v14336_v37 = vpop.f32.mrb[43].mxu0 }
 0xac1   :  { %v9125_v34 = vadd.f32 %v14334_v52, %v14312_v40  ;;  %v14315_v25 = vadd.f32 %v14314_v4, %v14313_v18  ;;  %v14337_v38 = vadd.f32 %v14336_v37, %v14335_v58 }
 0xac3   :  { %v18451_v8 = vadd.f32 %v9125_v34, %v18394_v7  ;;  %v9128_v1 = vadd.f32 %v14337_v38, %v14315_v25 }
 0xac5   :  { %v18454_v9 = vadd.f32 %v9128_v1, %v18396_v30 }
 0xadd   :  { %v9168_v33 = vpop.f32.mrb[40].mxu1  ;;  %v9211_v21 = vpop.f32.mrb[44].mxu0 }
 0xade   :  { %v9220_v16 = vmul.f32 %v9168_v33, %v18238_v23  ;;  %v9222_v45 = vmul.f32 %v9211_v21, %v18240_v26  ;;  %v9170_v55 = vpop.f32.mrb[41].mxu1  ;;  %v9213_v2 = vpop.f32.mrb[45].mxu0 }
 0xadf   :  { %v9221_v50 = vmul.f32 %v9170_v55, %v19022_v31  ;;  %v9223_v57 = vmul.f32 %v9213_v2, %v18244_v15  ;;  %v9172_v53 = vpop.f32.mrb[42].mxu1  ;;  %v9215_v40 = vpop.f32.mrb[46].mxu0 }
 0xae0   :  { %v9228_v7 = vadd.f32 %v9220_v16, %v18246_v49  ;;  %v9230_v52 = vadd.f32 %v9222_v45, %v18248_v32  ;;  %v9224_v30 = vmul.f32 %v9172_v53, %v18238_v23  ;;  %v9226_v18 = vmul.f32 %v9215_v40, %v18240_v26  ;;  %v9174_v58 = vpop.f32.mrb[43].mxu1  ;;  %v9217_v4 = vpop.f32.mrb[47].mxu0 }
 0xae1   :  { %v9229_v37 = vadd.f32 %v9221_v50, %v18250_v56  ;;  %v9231_v34 = vadd.f32 %v9223_v57, %v18252_v44  ;;  %v9225_v25 = vmul.f32 %v9174_v58, %v19022_v31  ;;  %v9227_v38 = vmul.f32 %v9217_v4, %v18244_v15 }
 0xae2   :  { %v9232_v1 = vadd.f32 %v9224_v30, %v18246_v49  ;;  %v9234_v33 = vadd.f32 %v9226_v18, %v18248_v32  ;;  %v9236_v45 = vmax.f32 %v9228_v7, 0.0  ;;  %v9238_v55 = vmax.f32 %v9230_v52, 0.0  ;;  %v15483_v7 = vld [vmem:[#allocation15 + $0x400] sm:$0xff]   ;;  %v15485_v30 = vld [vmem:[#allocation15 + $0x448] sm:$0xff]  }
 0xae3   :  { %v9233_v21 = vadd.f32 %v9225_v25, %v18250_v56  ;;  %v9235_v16 = vadd.f32 %v9227_v38, %v18252_v44  ;;  %v9237_v40 = vmax.f32 %v9229_v37, 0.0  ;;  %v9239_v50 = vmax.f32 %v9231_v34, 0.0  ;;  %v15484_v52 = vld [vmem:[#allocation15 + $0x480] sm:$0xff]   ;;  %v15486_v18 = vld [vmem:[#allocation15 + $0x4c8] sm:$0xff]   ;;  %v15489_v25 = vld [vmem:[#allocation15 + $0x450] sm:$0xff]  }
 0xae4   :  { %v9240_v2 = vmax.f32 %v9232_v1, 0.0  ;;  %v9242_v53 = vmax.f32 %v9234_v33, 0.0  ;;  %v15487_v37 = vld [vmem:[#allocation15 + $0x408] sm:$0xff]   ;;  %v15490_v38 = vld [vmem:[#allocation15 + $0x4d0] sm:$0xff]  }
 0xae5   :  { %v9241_v26 = vmax.f32 %v9233_v21, 0.0  ;;  %v9243_v57 = vmax.f32 %v9235_v16, 0.0  ;;  %v15488_v34 = vld [vmem:[#allocation15 + $0x488] sm:$0xff]   ;;  %v15491_v1 = vld [vmem:[#allocation15 + $0x410] sm:$0xff]   ;;  %v15493_v21 = vld [vmem:[#allocation15 + $0x458] sm:$0xff]  }
 0xae6   :  { %v9244_v23 = vpack.c.bf16 %v9240_v2, %v9236_v45  ;;  %v9246_v58 = vpack.c.bf16 %v9242_v53, %v9238_v55  ;;  %v15492_v33 = vld [vmem:[#allocation15 + $0x490] sm:$0xff]   ;;  %v15494_v16 = vld [vmem:[#allocation15 + $0x4d8] sm:$0xff]   ;;  %v15497_v2 = vld [vmem:[#allocation15 + $0x460] sm:$0xff]  }
 0xae7   :  { %v9245_v31 = vpack.c.bf16 %v9241_v26, %v9237_v40  ;;  %v9247_v4 = vpack.c.bf16 %v9243_v57, %v9239_v50  ;;  %v15481_v26 = vld [vmem:[#allocation15 + $0x440] sm:$0xff]   ;;  %v15495_v45 = vld [vmem:[#allocation15 + $0x418] sm:$0xff]   ;;  %v15501_v57 = vld [vmem:[#allocation15 + $0x468] sm:$0xff]  }
 0xae8   :  { %v15496_v55 = vld [vmem:[#allocation15 + $0x498] sm:$0xff]   ;;  %v15498_v53 = vld [vmem:[#allocation15 + $0x4e0] sm:$0xff]  }
 0xae9   :  { %9537 = vmatprep.mubr.bf16.mxu1 %v9245_v31  ;;  %9578 = vmatprep.mubr.bf16.mxu0 %v9247_v4  ;;  %v15482_v31 = vld [vmem:[#allocation15 + $0x4c0] sm:$0xff]   ;;  %v15503_v4 = vld [vmem:[#allocation15 + $0x428] sm:$0xff]  }
 0xaea   :  { %9538 = vmatmul.mubr.bf16.vlgmr.msra.gmra.mrb[44].mxu1 %v9244_v23  ;;  %9579 = vmatmul.mubr.bf16.vlgmr.msra.gmra.mrb[48].mxu0 %v9246_v58  ;;  %v19023_v23 = vld [vmem:[#allocation36_spill] sm:$0xff]  ;;  %v15499_v40 = vld [vmem:[#allocation15 + $0x420] sm:$0xff]  }
 0xaeb   :  { %9591 = vmatpush1.bf16.msra.mxu1 %v18298_v0  ;;  %9634 = vmatpush1.bf16.msra.mxu0 %v18301_v61  ;;  %v15500_v50 = vld [vmem:[#allocation15 + $0x4a0] sm:$0xff]   ;;  %v15502_v58 = vld [vmem:[#allocation15 + $0x4e8] sm:$0xff]  }
 0xaec   :  { %9592 = vmatprep.subr.bf16.mxu1 %v18304_v3  ;;  %9635 = vmatprep.subr.bf16.mxu0 %v18307_v43 }
 0xaed   :  { %9622 = vmatprep.mubr.bf16.mxu1 %v18959_v13  ;;  %9665 = vmatprep.mubr.bf16.mxu0 %v18959_v13 }
 0xaef   :  { %9593 = vmatpush1.bf16.msra.mxu1 %v18312_v28  ;;  %9636 = vmatpush1.bf16.msra.mxu0 %v18315_v39 }
 0xaf0   :  { %9594 = vmatprep.subr.bf16.mxu1 %v18318_v63  ;;  %9637 = vmatprep.subr.bf16.mxu0 %v18321_v11 }
 0xaf3   :  { %9595 = vmatpush1.bf16.msra.mxu1 %v18324_v48  ;;  %9638 = vmatpush1.bf16.msra.mxu0 %v18327_v46 }
 0xaf4   :  { %9596 = vmatprep.subr.bf16.mxu1 %v18330_v42  ;;  %9639 = vmatprep.subr.bf16.mxu0 %v18333_v35 }
 0xaf7   :  { %9597 = vmatpush1.bf16.msra.mxu1 %v18336_v6  ;;  %9640 = vmatpush1.bf16.msra.mxu0 %v18339_v36 }
 0xaf8   :  { %9598 = vmatprep.subr.bf16.mxu1 %v18342_v27  ;;  %9641 = vmatprep.subr.bf16.mxu0 %v18345_v29 }
 0xafb   :  { %9599 = vmatpush1.bf16.msra.mxu1 %v18348_v10  ;;  %9642 = vmatpush1.bf16.msra.mxu0 %v18351_v17 }
 0xafc   :  { %9600 = vmatprep.subr.bf16.mxu1 %v18354_v60  ;;  %9643 = vmatprep.subr.bf16.mxu0 %v18357_v24 }
 0xaff   :  { %9601 = vmatpush1.bf16.msra.mxu1 %v18360_v47  ;;  %9644 = vmatpush1.bf16.msra.mxu0 %v18363_v54 }
 0xb00   :  { %9602 = vmatprep.subr.bf16.mxu1 %v18366_v41  ;;  %9645 = vmatprep.subr.bf16.mxu0 %v18369_v14 }
 0xb03   :  { %9603 = vmatpush1.bf16.msra.mxu1 %v18372_v20  ;;  %9646 = vmatpush1.bf16.msra.mxu0 %v18375_v59 }
 0xb04   :  { %9604 = vmatprep.subr.bf16.mxu1 %v18378_v51  ;;  %9647 = vmatprep.subr.bf16.mxu0 %v18381_v5 }
 0xb07   :  { %9605 = vmatpush1.bf16.msra.mxu1 %v18384_v19  ;;  %9648 = vmatpush1.bf16.msra.mxu0 %v18387_v22 }
 0xb08   :  { %14382 = vmatprep.subr.bf16.mxu1 %v15481_v26  ;;  %14404 = vmatprep.subr.bf16.mxu0 %v15482_v31  ;;  %v15505_v26 = vld [vmem:[#allocation15 + $0x470] sm:$0xff]  }
 0xb09   :  { %v15506_v31 = vld [vmem:[#allocation15 + $0x4f0] sm:$0xff]  }
 0xb0a   :  { %9623 = vmatmul.mubr.bf16.vlgmr.msra.gmra.mrb[48].mxu1 %v19023_v23  ;;  %9666 = vmatmul.mubr.bf16.vlgmr.msra.gmra.mrb[52].mxu0 %v19023_v23  ;;  %v15504_v23 = vld [vmem:[#allocation15 + $0x4a8] sm:$0xff]  }
 0xb0b   :  { %14383 = vmatpush3.bf16.msra.mxu1 %v15483_v7  ;;  %14405 = vmatpush3.bf16.msra.mxu0 %v15484_v52  ;;  %v15507_v7 = vld [vmem:[#allocation15 + $0x430] sm:$0xff]  }
 0xb0c   :  { %14384 = vmatprep.subr.bf16.mxu1 %v15485_v30  ;;  %14406 = vmatprep.subr.bf16.mxu0 %v15486_v18  ;;  %v15508_v52 = vld [vmem:[#allocation15 + $0x4b0] sm:$0xff]   ;;  %v15509_v30 = vld [vmem:[#allocation15 + $0x478] sm:$0xff]  }
 0xb0d   :  { %v15510_v18 = vld [vmem:[#allocation15 + $0x4f8] sm:$0xff]  }
 0xb0f   :  { %14385 = vmatpush3.bf16.msra.mxu1 %v15487_v37  ;;  %14407 = vmatpush3.bf16.msra.mxu0 %v15488_v34  ;;  %v15511_v37 = vld [vmem:[#allocation15 + $0x438] sm:$0xff]  }
 0xb10   :  { %14386 = vmatprep.subr.bf16.mxu1 %v15489_v25  ;;  %14408 = vmatprep.subr.bf16.mxu0 %v15490_v38  ;;  %v15512_v34 = vld [vmem:[#allocation15 + $0x4b8] sm:$0xff]  }
 0xb13   :  { %14387 = vmatpush3.bf16.msra.mxu1 %v15491_v1  ;;  %14409 = vmatpush3.bf16.msra.mxu0 %v15492_v33 }
 0xb14   :  { %14388 = vmatprep.subr.bf16.mxu1 %v15493_v21  ;;  %14410 = vmatprep.subr.bf16.mxu0 %v15494_v16 }
 0xb17   :  { %14389 = vmatpush3.bf16.msra.mxu1 %v15495_v45  ;;  %14411 = vmatpush3.bf16.msra.mxu0 %v15496_v55 }
 0xb18   :  { %14390 = vmatprep.subr.bf16.mxu1 %v15497_v2  ;;  %14412 = vmatprep.subr.bf16.mxu0 %v15498_v53 }
 0xb1b   :  { %14391 = vmatpush3.bf16.msra.mxu1 %v15499_v40  ;;  %14413 = vmatpush3.bf16.msra.mxu0 %v15500_v50 }
 0xb1c   :  { %14392 = vmatprep.subr.bf16.mxu1 %v15501_v57  ;;  %14414 = vmatprep.subr.bf16.mxu0 %v15502_v58 }
 0xb1f   :  { %14393 = vmatpush3.bf16.msra.mxu1 %v15503_v4  ;;  %14415 = vmatpush3.bf16.msra.mxu0 %v15504_v23 }
 0xb20   :  { %14394 = vmatprep.subr.bf16.mxu1 %v15505_v26  ;;  %14416 = vmatprep.subr.bf16.mxu0 %v15506_v31  ;;  %v19024_v26 = vld [vmem:[#allocation41_spill] sm:$0xff] }
 0xb23   :  { %14395 = vmatpush3.bf16.msra.mxu1 %v15507_v7  ;;  %14417 = vmatpush3.bf16.msra.mxu0 %v15508_v52  ;;  %v19025_v7 = vld [vmem:[#allocation42_spill] sm:$0xff] }
 0xb24   :  { %14396 = vmatprep.subr.bf16.mxu1 %v15509_v30  ;;  %14418 = vmatprep.subr.bf16.mxu0 %v15510_v18 }
 0xb27   :  { %14397 = vmatpush3.bf16.msra.mxu1 %v15511_v37  ;;  %14419 = vmatpush3.bf16.msra.mxu0 %v15512_v34  ;;  %v19026_v37 = vld [vmem:[#allocation43_spill] sm:$0xff] }
 0xb28   :  { %10046 = vmatprep.subr.bf16.mxu1 %v19020_v12  ;;  %10089 = vmatprep.subr.bf16.mxu0 %v19021_v62 }
 0xbbd   :  { %v14354_v25 = vpop.f32.mrb[44].mxu1  ;;  %v14376_v38 = vpop.f32.mrb[48].mxu0 }
 0xbbe   :  { %v14355_v1 = vpop.f32.mrb[45].mxu1  ;;  %v14377_v33 = vpop.f32.mrb[49].mxu0 }
 0xbbf   :  { %v14356_v21 = vadd.f32 %v14355_v1, %v14354_v25  ;;  %v14378_v16 = vadd.f32 %v14377_v33, %v14376_v38  ;;  %v14357_v45 = vpop.f32.mrb[46].mxu1  ;;  %v14379_v55 = vpop.f32.mrb[50].mxu0 }
 0xbc0   :  { %v14358_v2 = vpop.f32.mrb[47].mxu1  ;;  %v14380_v53 = vpop.f32.mrb[51].mxu0 }
 0xbc1   :  { %v9581_v40 = vadd.f32 %v14378_v16, %v14356_v21  ;;  %v14359_v50 = vadd.f32 %v14358_v2, %v14357_v45  ;;  %v14381_v57 = vadd.f32 %v14380_v53, %v14379_v55 }
 0xbc3   :  { %v18509_v58 = vadd.f32 %v9581_v40, %v18451_v8  ;;  %v9584_v4 = vadd.f32 %v14381_v57, %v14359_v50 }
 0xbc5   :  { %v18512_v12 = vadd.f32 %v9584_v4, %v18454_v9 }
 0xbdd   :  { %v9624_v62 = vpop.f32.mrb[48].mxu1  ;;  %v9667_v23 = vpop.f32.mrb[52].mxu0 }
 0xbde   :  { %v9676_v31 = vmul.f32 %v9624_v62, %v19024_v26  ;;  %v9678_v52 = vmul.f32 %v9667_v23, %v19025_v7  ;;  %v9626_v30 = vpop.f32.mrb[49].mxu1  ;;  %v9669_v18 = vpop.f32.mrb[53].mxu0 }
 0xbdf   :  { %v9677_v34 = vmul.f32 %v9626_v30, %v19026_v37  ;;  %v9679_v25 = vmul.f32 %v9669_v18, %v18244_v15  ;;  %v9628_v38 = vpop.f32.mrb[50].mxu1  ;;  %v9671_v1 = vpop.f32.mrb[54].mxu0 }
 0xbe0   :  { %v9684_v8 = vadd.f32 %v9676_v31, %v18246_v49  ;;  %v9686_v33 = vadd.f32 %v9678_v52, %v18248_v32  ;;  %v9680_v9 = vmul.f32 %v9628_v38, %v19024_v26  ;;  %v9682_v21 = vmul.f32 %v9671_v1, %v19025_v7  ;;  %v9630_v16 = vpop.f32.mrb[51].mxu1  ;;  %v9673_v45 = vpop.f32.mrb[55].mxu0 }
 0xbe1   :  { %v9685_v55 = vadd.f32 %v9677_v34, %v18250_v56  ;;  %v9687_v2 = vadd.f32 %v9679_v25, %v18252_v44  ;;  %v9681_v53 = vmul.f32 %v9630_v16, %v19026_v37  ;;  %v9683_v40 = vmul.f32 %v9673_v45, %v18244_v15 }
 0xbe2   :  { %v9688_v50 = vadd.f32 %v9680_v9, %v18246_v49  ;;  %v9690_v57 = vadd.f32 %v9682_v21, %v18248_v32  ;;  %v9692_v23 = vmax.f32 %v9684_v8, 0.0  ;;  %v9694_v31 = vmax.f32 %v9686_v33, 0.0  ;;  %v15543_v8 = vld [vmem:[#allocation15 + $0x538] sm:$0xff]   ;;  %v18567_v21 = vld [vmem:[#allocation11 + $0xc] ss:$16 sps:$4 sm:$0xff]  }
 0xbe3   :  { %v9689_v4 = vadd.f32 %v9681_v53, %v18250_v56  ;;  %v9691_v62 = vadd.f32 %v9683_v40, %v18252_v44  ;;  %v9693_v18 = vmax.f32 %v9685_v55, 0.0  ;;  %v9695_v34 = vmax.f32 %v9687_v2, 0.0  ;;  %v15544_v33 = vld [vmem:[#allocation15 + $0x5b8] sm:$0xff]  }
 0xbe4   :  { %v9696_v52 = vmax.f32 %v9688_v50, 0.0  ;;  %v9698_v30 = vmax.f32 %v9690_v57, 0.0  ;;  %v18564_v9 = vld [vmem:[#allocation11 + $0x4] ss:$16 sps:$4 sm:$0xff]  }
 0xbe5   :  { %v9697_v38 = vmax.f32 %v9689_v4, 0.0  ;;  %v9699_v25 = vmax.f32 %v9691_v62, 0.0 }
 0xbe6   :  { %v9700_v1 = vpack.c.bf16 %v9696_v52, %v9692_v23  ;;  %v9702_v16 = vpack.c.bf16 %v9698_v30, %v9694_v31 }
 0xbe7   :  { %v9701_v37 = vpack.c.bf16 %v9697_v38, %v9693_v18  ;;  %v9703_v45 = vpack.c.bf16 %v9699_v25, %v9695_v34 }
 0xbe9   :  { %9993 = vmatprep.mubr.bf16.mxu1 %v9701_v37  ;;  %10034 = vmatprep.mubr.bf16.mxu0 %v9703_v45  ;;  %v15542_v37 = vld [vmem:[#allocation15 + $0x5f8] sm:$0xff]  }
 0xbea   :  { %9994 = vmatmul.mubr.bf16.vlgmr.msra.gmra.mrb[52].mxu1 %v9700_v1  ;;  %10035 = vmatmul.mubr.bf16.vlgmr.msra.gmra.mrb[56].mxu0 %v9702_v16 }
 0xbeb   :  { %10047 = vmatpush1.bf16.msra.mxu1 %v18298_v0  ;;  %10090 = vmatpush1.bf16.msra.mxu0 %v18301_v61  ;;  %v19027_v0 = vld [vmem:[#allocation37_spill] sm:$0xff]  ;;  %v15513_v61 = vld [vmem:[#allocation15 + $0x540] sm:$0xff]  }
 0xbec   :  { %10048 = vmatprep.subr.bf16.mxu1 %v18304_v3  ;;  %10091 = vmatprep.subr.bf16.mxu0 %v18307_v43  ;;  %v15514_v3 = vld [vmem:[#allocation15 + $0x5c0] sm:$0xff]  }
 0xbed   :  { %10078 = vmatprep.mubr.bf16.mxu1 %v18959_v13  ;;  %10121 = vmatprep.mubr.bf16.mxu0 %v18959_v13  ;;  %v15515_v43 = vld [vmem:[#allocation15 + $0x500] sm:$0xff]  }
 0xbef   :  { %10049 = vmatpush1.bf16.msra.mxu1 %v18312_v28  ;;  %10092 = vmatpush1.bf16.msra.mxu0 %v18315_v39  ;;  %v15516_v28 = vld [vmem:[#allocation15 + $0x580] sm:$0xff]   ;;  %v15517_v39 = vld [vmem:[#allocation15 + $0x548] sm:$0xff]  }
 0xbf0   :  { %10050 = vmatprep.subr.bf16.mxu1 %v18318_v63  ;;  %10093 = vmatprep.subr.bf16.mxu0 %v18321_v11  ;;  %v15518_v63 = vld [vmem:[#allocation15 + $0x5c8] sm:$0xff]  }
 0xbf1   :  { %v15519_v11 = vld [vmem:[#allocation15 + $0x508] sm:$0xff]  }
 0xbf3   :  { %10051 = vmatpush1.bf16.msra.mxu1 %v18324_v48  ;;  %10094 = vmatpush1.bf16.msra.mxu0 %v18327_v46  ;;  %v15520_v48 = vld [vmem:[#allocation15 + $0x588] sm:$0xff]   ;;  %v15521_v46 = vld [vmem:[#allocation15 + $0x550] sm:$0xff]  }
 0xbf4   :  { %10052 = vmatprep.subr.bf16.mxu1 %v18330_v42  ;;  %10095 = vmatprep.subr.bf16.mxu0 %v18333_v35  ;;  %v15522_v42 = vld [vmem:[#allocation15 + $0x5d0] sm:$0xff]  }
 0xbf5   :  { %v15523_v35 = vld [vmem:[#allocation15 + $0x510] sm:$0xff]  }
 0xbf7   :  { %10053 = vmatpush1.bf16.msra.mxu1 %v18336_v6  ;;  %10096 = vmatpush1.bf16.msra.mxu0 %v18339_v36  ;;  %v15524_v6 = vld [vmem:[#allocation15 + $0x590] sm:$0xff]   ;;  %v15525_v36 = vld [vmem:[#allocation15 + $0x558] sm:$0xff]  }
 0xbf8   :  { %10054 = vmatprep.subr.bf16.mxu1 %v18342_v27  ;;  %10097 = vmatprep.subr.bf16.mxu0 %v18345_v29  ;;  %v15526_v27 = vld [vmem:[#allocation15 + $0x5d8] sm:$0xff]  }
 0xbf9   :  { %v15527_v29 = vld [vmem:[#allocation15 + $0x518] sm:$0xff]  }
 0xbfb   :  { %10055 = vmatpush1.bf16.msra.mxu1 %v18348_v10  ;;  %10098 = vmatpush1.bf16.msra.mxu0 %v18351_v17  ;;  %v15528_v10 = vld [vmem:[#allocation15 + $0x598] sm:$0xff]   ;;  %v15529_v17 = vld [vmem:[#allocation15 + $0x560] sm:$0xff]  }
 0xbfc   :  { %10056 = vmatprep.subr.bf16.mxu1 %v18354_v60  ;;  %10099 = vmatprep.subr.bf16.mxu0 %v18357_v24  ;;  %v15530_v60 = vld [vmem:[#allocation15 + $0x5e0] sm:$0xff]  }
 0xbfd   :  { %v15531_v24 = vld [vmem:[#allocation15 + $0x520] sm:$0xff]  }
 0xbff   :  { %10057 = vmatpush1.bf16.msra.mxu1 %v18360_v47  ;;  %10100 = vmatpush1.bf16.msra.mxu0 %v18363_v54  ;;  %v15532_v47 = vld [vmem:[#allocation15 + $0x5a0] sm:$0xff]   ;;  %v15533_v54 = vld [vmem:[#allocation15 + $0x568] sm:$0xff]  }
 0xc00   :  { %10058 = vmatprep.subr.bf16.mxu1 %v18366_v41  ;;  %10101 = vmatprep.subr.bf16.mxu0 %v18369_v14  ;;  %v15534_v41 = vld [vmem:[#allocation15 + $0x5e8] sm:$0xff]  }
 0xc01   :  { %v15535_v14 = vld [vmem:[#allocation15 + $0x528] sm:$0xff]  }
 0xc03   :  { %10059 = vmatpush1.bf16.msra.mxu1 %v18372_v20  ;;  %10102 = vmatpush1.bf16.msra.mxu0 %v18375_v59  ;;  %v15536_v20 = vld [vmem:[#allocation15 + $0x5a8] sm:$0xff]   ;;  %v15537_v59 = vld [vmem:[#allocation15 + $0x570] sm:$0xff]  }
 0xc04   :  { %10060 = vmatprep.subr.bf16.mxu1 %v18378_v51  ;;  %10103 = vmatprep.subr.bf16.mxu0 %v18381_v5  ;;  %v15538_v51 = vld [vmem:[#allocation15 + $0x5f0] sm:$0xff]  }
 0xc05   :  { %v15539_v5 = vld [vmem:[#allocation15 + $0x530] sm:$0xff]  }
 0xc07   :  { %10061 = vmatpush1.bf16.msra.mxu1 %v18384_v19  ;;  %10104 = vmatpush1.bf16.msra.mxu0 %v18387_v22  ;;  %v15540_v19 = vld [vmem:[#allocation15 + $0x5b0] sm:$0xff]   ;;  %v15541_v22 = vld [vmem:[#allocation15 + $0x578] sm:$0xff]  }
 0xc08   :  { %14426 = vmatprep.subr.bf16.mxu1 %v15513_v61  ;;  %14448 = vmatprep.subr.bf16.mxu0 %v15514_v3 }
 0xc0a   :  { %10079 = vmatmul.mubr.bf16.vlgmr.msra.gmra.mrb[56].mxu1 %v19027_v0  ;;  %10122 = vmatmul.mubr.bf16.vlgmr.msra.gmra.mrb[60].mxu0 %v19027_v0 }
 0xc0b   :  { %14427 = vmatpush3.bf16.msra.mxu1 %v15515_v43  ;;  %14449 = vmatpush3.bf16.msra.mxu0 %v15516_v28  ;;  %v19028_v43 = vld [vmem:[#allocation43_spill] sm:$0xff] }
 0xc0c   :  { %14428 = vmatprep.subr.bf16.mxu1 %v15517_v39  ;;  %14450 = vmatprep.subr.bf16.mxu0 %v15518_v63 }
 0xc0f   :  { %14429 = vmatpush3.bf16.msra.mxu1 %v15519_v11  ;;  %14451 = vmatpush3.bf16.msra.mxu0 %v15520_v48 }
 0xc10   :  { %14430 = vmatprep.subr.bf16.mxu1 %v15521_v46  ;;  %14452 = vmatprep.subr.bf16.mxu0 %v15522_v42 }
 0xc13   :  { %14431 = vmatpush3.bf16.msra.mxu1 %v15523_v35  ;;  %14453 = vmatpush3.bf16.msra.mxu0 %v15524_v6 }
 0xc14   :  { %14432 = vmatprep.subr.bf16.mxu1 %v15525_v36  ;;  %14454 = vmatprep.subr.bf16.mxu0 %v15526_v27 }
 0xc17   :  { %14433 = vmatpush3.bf16.msra.mxu1 %v15527_v29  ;;  %14455 = vmatpush3.bf16.msra.mxu0 %v15528_v10 }
 0xc18   :  { %14434 = vmatprep.subr.bf16.mxu1 %v15529_v17  ;;  %14456 = vmatprep.subr.bf16.mxu0 %v15530_v60 }
 0xc1b   :  { %14435 = vmatpush3.bf16.msra.mxu1 %v15531_v24  ;;  %14457 = vmatpush3.bf16.msra.mxu0 %v15532_v47 }
 0xc1c   :  { %14436 = vmatprep.subr.bf16.mxu1 %v15533_v54  ;;  %14458 = vmatprep.subr.bf16.mxu0 %v15534_v41 }
 0xc1f   :  { %14437 = vmatpush3.bf16.msra.mxu1 %v15535_v14  ;;  %14459 = vmatpush3.bf16.msra.mxu0 %v15536_v20 }
 0xc20   :  { %14438 = vmatprep.subr.bf16.mxu1 %v15537_v59  ;;  %14460 = vmatprep.subr.bf16.mxu0 %v15538_v51 }
 0xc23   :  { %14439 = vmatpush3.bf16.msra.mxu1 %v15539_v5  ;;  %14461 = vmatpush3.bf16.msra.mxu0 %v15540_v19 }
 0xc24   :  { %14440 = vmatprep.subr.bf16.mxu1 %v15541_v22  ;;  %14462 = vmatprep.subr.bf16.mxu0 %v15542_v37 }
 0xc27   :  { %14441 = vmatpush3.bf16.msra.mxu1 %v15543_v8  ;;  %14463 = vmatpush3.bf16.msra.mxu0 %v15544_v33  ;;  %v18592_v33 = vld [vmem:[#allocation11] ss:$16 sps:$4 sm:$0xff]  }
 0xc28   :  { %10502 = vmatprep.subr.bf16.mxu1 %v18564_v9  ;;  %10545 = vmatprep.subr.bf16.mxu0 %v18567_v21 }
 0xcbd   :  { %v14398_v55 = vpop.f32.mrb[52].mxu1  ;;  %v14420_v2 = vpop.f32.mrb[56].mxu0 }
 0xcbe   :  { %v14399_v53 = vpop.f32.mrb[53].mxu1  ;;  %v14421_v40 = vpop.f32.mrb[57].mxu0 }
 0xcbf   :  { %v14400_v50 = vadd.f32 %v14399_v53, %v14398_v55  ;;  %v14422_v57 = vadd.f32 %v14421_v40, %v14420_v2  ;;  %v14401_v4 = vpop.f32.mrb[54].mxu1  ;;  %v14423_v62 = vpop.f32.mrb[58].mxu0  ;;  %v18595_v55 = vld [vmem:[#allocation11 + $0x8] ss:$16 sps:$4 sm:$0xff]   ;;  %v18598_v2 = vld [vmem:[#allocation11 + $0x24] ss:$16 sps:$4 sm:$0xff]  }
 0xcc0   :  { %v14402_v23 = vpop.f32.mrb[55].mxu1  ;;  %v14424_v31 = vpop.f32.mrb[59].mxu0  ;;  %v18601_v53 = vld [vmem:[#allocation11 + $0x2c] ss:$16 sps:$4 sm:$0xff]   ;;  %v18606_v40 = vld [vmem:[#allocation11 + $0x20] ss:$16 sps:$4 sm:$0xff]  }
 0xcc1   :  { %v10037_v52 = vadd.f32 %v14422_v57, %v14400_v50  ;;  %v14403_v30 = vadd.f32 %v14402_v23, %v14401_v4  ;;  %v14425_v18 = vadd.f32 %v14424_v31, %v14423_v62  ;;  %v18609_v50 = vld [vmem:[#allocation11 + $0x28] ss:$16 sps:$4 sm:$0xff]   ;;  %v18612_v57 = vld [vmem:[#allocation11 + $0x44] ss:$16 sps:$4 sm:$0xff]   ;;  %v18615_v4 = vld [vmem:[#allocation11 + $0x4c] ss:$16 sps:$4 sm:$0xff]  }
 0xcc2   :  { %v18618_v62 = vld [vmem:[#allocation11 + $0x40] ss:$16 sps:$4 sm:$0xff]   ;;  %v18621_v23 = vld [vmem:[#allocation11 + $0x48] ss:$16 sps:$4 sm:$0xff]   ;;  %v18624_v31 = vld [vmem:[#allocation11 + $0x64] ss:$16 sps:$4 sm:$0xff]  }
 0xcc3   :  { %v18571_v34 = vadd.f32 %v10037_v52, %v18509_v58  ;;  %v10040_v38 = vadd.f32 %v14425_v18, %v14403_v30  ;;  %v18627_v52 = vld [vmem:[#allocation11 + $0x6c] ss:$16 sps:$4 sm:$0xff]   ;;  %v18630_v30 = vld [vmem:[#allocation11 + $0x60] ss:$16 sps:$4 sm:$0xff]   ;;  %v18633_v18 = vld [vmem:[#allocation11 + $0x68] ss:$16 sps:$4 sm:$0xff]  }
 0xcc5   :  { %v18574_v25 = vadd.f32 %v10040_v38, %v18512_v12  ;;  %v18636_v38 = vld [vmem:[#allocation11 + $0x84] ss:$16 sps:$4 sm:$0xff]  }
 0xcdd   :  { %v10080_v1 = vpop.f32.mrb[56].mxu1  ;;  %v10123_v16 = vpop.f32.mrb[60].mxu0 }
 0xcde   :  { %v10132_v45 = vmul.f32 %v10080_v1, %v19024_v26  ;;  %v10134_v0 = vmul.f32 %v10123_v16, %v19025_v7  ;;  %v10082_v61 = vpop.f32.mrb[57].mxu1  ;;  %v10125_v3 = vpop.f32.mrb[61].mxu0  ;;  %v18639_v1 = vld [vmem:[#allocation11 + $0x8c] ss:$16 sps:$4 sm:$0xff]   ;;  %v18642_v16 = vld [vmem:[#allocation11 + $0x80] ss:$16 sps:$4 sm:$0xff]  }
 0xcdf   :  { %v10133_v28 = vmul.f32 %v10082_v61, %v19028_v43  ;;  %v10135_v39 = vmul.f32 %v10125_v3, %v18244_v15  ;;  %v10084_v63 = vpop.f32.mrb[58].mxu1  ;;  %v10127_v11 = vpop.f32.mrb[62].mxu0  ;;  %v18651_v61 = vld [vmem:[#allocation11 + $0xac] ss:$16 sps:$4 sm:$0xff]   ;;  %v18654_v3 = vld [vmem:[#allocation11 + $0xa0] ss:$16 sps:$4 sm:$0xff]  }
 0xce0   :  { %v10140_v58 = vadd.f32 %v10132_v45, %v18246_v49  ;;  %v10142_v48 = vadd.f32 %v10134_v0, %v18248_v32  ;;  %v10136_v12 = vmul.f32 %v10084_v63, %v19024_v26  ;;  %v10138_v46 = vmul.f32 %v10127_v11, %v19025_v7  ;;  %v10086_v42 = vpop.f32.mrb[59].mxu1  ;;  %v10129_v35 = vpop.f32.mrb[63].mxu0  ;;  %v18645_v45 = vld [vmem:[#allocation11 + $0x88] ss:$16 sps:$4 sm:$0xff]   ;;  %v18648_v0 = vld [vmem:[#allocation11 + $0xa4] ss:$16 sps:$4 sm:$0xff]  }
 0xce1   :  { %v10141_v6 = vadd.f32 %v10133_v28, %v18250_v56  ;;  %v10143_v36 = vadd.f32 %v10135_v39, %v18252_v44  ;;  %v10137_v27 = vmul.f32 %v10086_v42, %v19028_v43  ;;  %v10139_v29 = vmul.f32 %v10129_v35, %v18244_v15  ;;  %v18657_v28 = vld [vmem:[#allocation11 + $0xa8] ss:$16 sps:$4 sm:$0xff]   ;;  %v18660_v39 = vld [vmem:[#allocation11 + $0xc4] ss:$16 sps:$4 sm:$0xff]   ;;  %v18663_v63 = vld [vmem:[#allocation11 + $0xcc] ss:$16 sps:$4 sm:$0xff]  }
 0xce2   :  { %v10144_v10 = vadd.f32 %v10136_v12, %v18246_v49  ;;  %v10146_v17 = vadd.f32 %v10138_v46, %v18248_v32  ;;  %v10148_v47 = vmax.f32 %v10140_v58, 0.0  ;;  %v10150_v54 = vmax.f32 %v10142_v48, 0.0  ;;  %v18666_v11 = vld [vmem:[#allocation11 + $0xc0] ss:$16 sps:$4 sm:$0xff]   ;;  %v18669_v58 = vld [vmem:[#allocation11 + $0xc8] ss:$16 sps:$4 sm:$0xff]  }
 0xce3   :  { %v10145_v60 = vadd.f32 %v10137_v27, %v18250_v56  ;;  %v10147_v24 = vadd.f32 %v10139_v29, %v18252_v44  ;;  %v10149_v20 = vmax.f32 %v10141_v6, 0.0  ;;  %v10151_v59 = vmax.f32 %v10143_v36, 0.0  ;;  %v18672_v48 = vld [vmem:[#allocation11 + $0xe4] ss:$16 sps:$4 sm:$0xff]   ;;  %v18675_v12 = vld [vmem:[#allocation11 + $0xec] ss:$16 sps:$4 sm:$0xff]  }
 0xce4   :  { %v10152_v41 = vmax.f32 %v10144_v10, 0.0  ;;  %v10154_v14 = vmax.f32 %v10146_v17, 0.0  ;;  %v18678_v46 = vld [vmem:[#allocation11 + $0xe0] ss:$16 sps:$4 sm:$0xff]   ;;  %v18681_v42 = vld [vmem:[#allocation11 + $0xe8] ss:$16 sps:$4 sm:$0xff]  }
 0xce5   :  { %v10153_v51 = vmax.f32 %v10145_v60, 0.0  ;;  %v10155_v5 = vmax.f32 %v10147_v24, 0.0  ;;  %v19029_v35 = vld [vmem:[#allocation38_spill] sm:$0xff]  ;;  %v15549_v10 = vld [vmem:[#allocation15 + $0x648] sm:$0xff]  }
 0xce6   :  { %v10156_v19 = vpack.c.bf16 %v10152_v41, %v10148_v47  ;;  %v10158_v22 = vpack.c.bf16 %v10154_v14, %v10150_v54  ;;  %v15545_v6 = vld [vmem:[#allocation15 + $0x640] sm:$0xff]   ;;  %v15550_v17 = vld [vmem:[#allocation15 + $0x6c8] sm:$0xff]   ;;  %v15553_v47 = vld [vmem:[#allocation15 + $0x650] sm:$0xff]  }
 0xce7   :  { %v10157_v37 = vpack.c.bf16 %v10153_v51, %v10149_v20  ;;  %v10159_v8 = vpack.c.bf16 %v10155_v5, %v10151_v59  ;;  %v15546_v36 = vld [vmem:[#allocation15 + $0x6c0] sm:$0xff]   ;;  %v15551_v60 = vld [vmem:[#allocation15 + $0x608] sm:$0xff]   ;;  %v15554_v54 = vld [vmem:[#allocation15 + $0x6d0] sm:$0xff]  }
 0xce8   :  { %v15547_v27 = vld [vmem:[#allocation15 + $0x600] sm:$0xff]   ;;  %v15552_v24 = vld [vmem:[#allocation15 + $0x688] sm:$0xff]   ;;  %v15555_v41 = vld [vmem:[#allocation15 + $0x610] sm:$0xff]  }
 0xce9   :  { %10449 = vmatprep.mubr.bf16.mxu1 %v10157_v37  ;;  %10490 = vmatprep.mubr.bf16.mxu0 %v10159_v8  ;;  %v15548_v29 = vld [vmem:[#allocation15 + $0x680] sm:$0xff]   ;;  %v15556_v14 = vld [vmem:[#allocation15 + $0x690] sm:$0xff]   ;;  %v15557_v20 = vld [vmem:[#allocation15 + $0x658] sm:$0xff]  }
 0xcea   :  { %10450 = vmatmul.mubr.bf16.vlgmr.msra.gmra.mrb[60].mxu1 %v10156_v19  ;;  %10491 = vmatmul.mubr.bf16.vlgmr.msra.gmra.mrb[64].mxu0 %v10158_v22  ;;  %v15558_v59 = vld [vmem:[#allocation15 + $0x6d8] sm:$0xff]   ;;  %v15561_v19 = vld [vmem:[#allocation15 + $0x660] sm:$0xff]  }
 0xceb   :  { %10503 = vmatpush1.bf16.msra.mxu1 %v18592_v33  ;;  %10546 = vmatpush1.bf16.msra.mxu0 %v18595_v55  ;;  %v15559_v51 = vld [vmem:[#allocation15 + $0x618] sm:$0xff]   ;;  %v15562_v22 = vld [vmem:[#allocation15 + $0x6e0] sm:$0xff]  }
 0xcec   :  { %10504 = vmatprep.subr.bf16.mxu1 %v18598_v2  ;;  %10547 = vmatprep.subr.bf16.mxu0 %v18601_v53  ;;  %v15560_v5 = vld [vmem:[#allocation15 + $0x698] sm:$0xff]   ;;  %v15563_v37 = vld [vmem:[#allocation15 + $0x620] sm:$0xff]  }
 0xced   :  { %10534 = vmatprep.mubr.bf16.mxu1 %v18959_v13  ;;  %10577 = vmatprep.mubr.bf16.mxu0 %v18959_v13  ;;  %v15564_v8 = vld [vmem:[#allocation15 + $0x6a0] sm:$0xff]  }
 0xcef   :  { %10505 = vmatpush1.bf16.msra.mxu1 %v18606_v40  ;;  %10548 = vmatpush1.bf16.msra.mxu0 %v18609_v50 }
 0xcf0   :  { %10506 = vmatprep.subr.bf16.mxu1 %v18612_v57  ;;  %10549 = vmatprep.subr.bf16.mxu0 %v18615_v4 }
 0xcf3   :  { %10507 = vmatpush1.bf16.msra.mxu1 %v18618_v62  ;;  %10550 = vmatpush1.bf16.msra.mxu0 %v18621_v23 }
 0xcf4   :  { %10508 = vmatprep.subr.bf16.mxu1 %v18624_v31  ;;  %10551 = vmatprep.subr.bf16.mxu0 %v18627_v52 }
 0xcf7   :  { %10509 = vmatpush1.bf16.msra.mxu1 %v18630_v30  ;;  %10552 = vmatpush1.bf16.msra.mxu0 %v18633_v18 }
 0xcf8   :  { %10510 = vmatprep.subr.bf16.mxu1 %v18636_v38  ;;  %10553 = vmatprep.subr.bf16.mxu0 %v18639_v1 }
 0xcfb   :  { %10511 = vmatpush1.bf16.msra.mxu1 %v18642_v16  ;;  %10554 = vmatpush1.bf16.msra.mxu0 %v18645_v45 }
 0xcfc   :  { %10512 = vmatprep.subr.bf16.mxu1 %v18648_v0  ;;  %10555 = vmatprep.subr.bf16.mxu0 %v18651_v61 }
 0xcff   :  { %10513 = vmatpush1.bf16.msra.mxu1 %v18654_v3  ;;  %10556 = vmatpush1.bf16.msra.mxu0 %v18657_v28 }
 0xd00   :  { %10514 = vmatprep.subr.bf16.mxu1 %v18660_v39  ;;  %10557 = vmatprep.subr.bf16.mxu0 %v18663_v63 }
 0xd03   :  { %10515 = vmatpush1.bf16.msra.mxu1 %v18666_v11  ;;  %10558 = vmatpush1.bf16.msra.mxu0 %v18669_v58 }
 0xd04   :  { %10516 = vmatprep.subr.bf16.mxu1 %v18672_v48  ;;  %10559 = vmatprep.subr.bf16.mxu0 %v18675_v12 }
 0xd07   :  { %10517 = vmatpush1.bf16.msra.mxu1 %v18678_v46  ;;  %10560 = vmatpush1.bf16.msra.mxu0 %v18681_v42 }
 0xd08   :  { %14470 = vmatprep.subr.bf16.mxu1 %v15545_v6  ;;  %14492 = vmatprep.subr.bf16.mxu0 %v15546_v36  ;;  %v15566_v6 = vld [vmem:[#allocation15 + $0x6e8] sm:$0xff]  }
 0xd09   :  { %v15567_v36 = vld [vmem:[#allocation15 + $0x628] sm:$0xff]  }
 0xd0a   :  { %10535 = vmatmul.mubr.bf16.vlgmr.msra.gmra.mrb[64].mxu1 %v19029_v35  ;;  %10578 = vmatmul.mubr.bf16.vlgmr.msra.gmra.mrb[68].mxu0 %v19029_v35  ;;  %v15565_v35 = vld [vmem:[#allocation15 + $0x668] sm:$0xff]  }
 0xd0b   :  { %14471 = vmatpush3.bf16.msra.mxu1 %v15547_v27  ;;  %14493 = vmatpush3.bf16.msra.mxu0 %v15548_v29  ;;  %v15568_v27 = vld [vmem:[#allocation15 + $0x6a8] sm:$0xff]   ;;  %v15569_v29 = vld [vmem:[#allocation15 + $0x670] sm:$0xff]  }
 0xd0c   :  { %14472 = vmatprep.subr.bf16.mxu1 %v15549_v10  ;;  %14494 = vmatprep.subr.bf16.mxu0 %v15550_v17  ;;  %v15570_v10 = vld [vmem:[#allocation15 + $0x6f0] sm:$0xff]  }
 0xd0d   :  { %v15571_v17 = vld [vmem:[#allocation15 + $0x630] sm:$0xff]  }
 0xd0f   :  { %14473 = vmatpush3.bf16.msra.mxu1 %v15551_v60  ;;  %14495 = vmatpush3.bf16.msra.mxu0 %v15552_v24  ;;  %v15572_v60 = vld [vmem:[#allocation15 + $0x6b0] sm:$0xff]   ;;  %v15573_v24 = vld [vmem:[#allocation15 + $0x678] sm:$0xff]  }
 0xd10   :  { %14474 = vmatprep.subr.bf16.mxu1 %v15553_v47  ;;  %14496 = vmatprep.subr.bf16.mxu0 %v15554_v54  ;;  %v15574_v47 = vld [vmem:[#allocation15 + $0x6f8] sm:$0xff]  }
 0xd11   :  { %v15575_v54 = vld [vmem:[#allocation15 + $0x638] sm:$0xff]  }
 0xd13   :  { %14475 = vmatpush3.bf16.msra.mxu1 %v15555_v41  ;;  %14497 = vmatpush3.bf16.msra.mxu0 %v15556_v14  ;;  %v15576_v41 = vld [vmem:[#allocation15 + $0x6b8] sm:$0xff]  }
 0xd14   :  { %14476 = vmatprep.subr.bf16.mxu1 %v15557_v20  ;;  %14498 = vmatprep.subr.bf16.mxu0 %v15558_v59 }
 0xd17   :  { %14477 = vmatpush3.bf16.msra.mxu1 %v15559_v51  ;;  %14499 = vmatpush3.bf16.msra.mxu0 %v15560_v5 }
 0xd18   :  { %14478 = vmatprep.subr.bf16.mxu1 %v15561_v19  ;;  %14500 = vmatprep.subr.bf16.mxu0 %v15562_v22 }
 0xd1b   :  { %14479 = vmatpush3.bf16.msra.mxu1 %v15563_v37  ;;  %14501 = vmatpush3.bf16.msra.mxu0 %v15564_v8 }
 0xd1c   :  { %14480 = vmatprep.subr.bf16.mxu1 %v15565_v35  ;;  %14502 = vmatprep.subr.bf16.mxu0 %v15566_v6 }
 0xd1f   :  { %14481 = vmatpush3.bf16.msra.mxu1 %v15567_v36  ;;  %14503 = vmatpush3.bf16.msra.mxu0 %v15568_v27 }
 0xd20   :  { %14482 = vmatprep.subr.bf16.mxu1 %v15569_v29  ;;  %14504 = vmatprep.subr.bf16.mxu0 %v15570_v10 }
 0xd23   :  { %14483 = vmatpush3.bf16.msra.mxu1 %v15571_v17  ;;  %14505 = vmatpush3.bf16.msra.mxu0 %v15572_v60 }
 0xd24   :  { %14484 = vmatprep.subr.bf16.mxu1 %v15573_v24  ;;  %14506 = vmatprep.subr.bf16.mxu0 %v15574_v47 }
 0xd27   :  { %14485 = vmatpush3.bf16.msra.mxu1 %v15575_v54  ;;  %14507 = vmatpush3.bf16.msra.mxu0 %v15576_v41 }
 0xd28   :  { %10958 = vmatprep.subr.bf16.mxu1 %v18564_v9  ;;  %11001 = vmatprep.subr.bf16.mxu0 %v18567_v21 }
 0xdbd   :  { %v14442_v14 = vpop.f32.mrb[60].mxu1  ;;  %v14464_v20 = vpop.f32.mrb[64].mxu0 }
 0xdbe   :  { %v14443_v59 = vpop.f32.mrb[61].mxu1  ;;  %v14465_v51 = vpop.f32.mrb[65].mxu0 }
 0xdbf   :  { %v14444_v5 = vadd.f32 %v14443_v59, %v14442_v14  ;;  %v14466_v19 = vadd.f32 %v14465_v51, %v14464_v20  ;;  %v14445_v22 = vpop.f32.mrb[62].mxu1  ;;  %v14467_v37 = vpop.f32.mrb[66].mxu0 }
 0xdc0   :  { %v14446_v8 = vpop.f32.mrb[63].mxu1  ;;  %v14468_v35 = vpop.f32.mrb[67].mxu0 }
 0xdc1   :  { %v10493_v6 = vadd.f32 %v14466_v19, %v14444_v5  ;;  %v14447_v36 = vadd.f32 %v14446_v8, %v14445_v22  ;;  %v14469_v27 = vadd.f32 %v14468_v35, %v14467_v37 }
 0xdc3   :  { %v18689_v29 = vadd.f32 %v10493_v6, %v18571_v34  ;;  %v10496_v10 = vadd.f32 %v14469_v27, %v14447_v36 }
 0xdc5   :  { %v18692_v17 = vadd.f32 %v10496_v10, %v18574_v25 }
 0xddd   :  { %v10536_v60 = vpop.f32.mrb[64].mxu1  ;;  %v10579_v24 = vpop.f32.mrb[68].mxu0 }
 0xdde   :  { %v10588_v47 = vmul.f32 %v10536_v60, %v19024_v26  ;;  %v10590_v54 = vmul.f32 %v10579_v24, %v19025_v7  ;;  %v10538_v41 = vpop.f32.mrb[65].mxu1  ;;  %v10581_v14 = vpop.f32.mrb[69].mxu0 }
 0xddf   :  { %v10589_v20 = vmul.f32 %v10538_v41, %v19028_v43  ;;  %v10591_v59 = vmul.f32 %v10581_v14, %v18244_v15  ;;  %v10540_v51 = vpop.f32.mrb[66].mxu1  ;;  %v10583_v5 = vpop.f32.mrb[70].mxu0 }
 0xde0   :  { %v10596_v34 = vadd.f32 %v10588_v47, %v18246_v49  ;;  %v10598_v19 = vadd.f32 %v10590_v54, %v18248_v32  ;;  %v10592_v25 = vmul.f32 %v10540_v51, %v19024_v26  ;;  %v10594_v22 = vmul.f32 %v10583_v5, %v19025_v7  ;;  %v10542_v37 = vpop.f32.mrb[67].mxu1  ;;  %v10585_v8 = vpop.f32.mrb[71].mxu0 }
 0xde1   :  { %v10597_v35 = vadd.f32 %v10589_v20, %v18250_v56  ;;  %v10599_v6 = vadd.f32 %v10591_v59, %v18252_v44  ;;  %v10593_v36 = vmul.f32 %v10542_v37, %v19028_v43  ;;  %v10595_v27 = vmul.f32 %v10585_v8, %v18244_v15 }
 0xde2   :  { %v10600_v10 = vadd.f32 %v10592_v25, %v18246_v49  ;;  %v10602_v60 = vadd.f32 %v10594_v22, %v18248_v32  ;;  %v10604_v54 = vmax.f32 %v10596_v34, 0.0  ;;  %v10606_v41 = vmax.f32 %v10598_v19, 0.0  ;;  %v15579_v34 = vld [vmem:[#allocation15 + $0x700] sm:$0xff]   ;;  %v15581_v25 = vld [vmem:[#allocation15 + $0x748] sm:$0xff]  }
 0xde3   :  { %v10601_v24 = vadd.f32 %v10593_v36, %v18250_v56  ;;  %v10603_v47 = vadd.f32 %v10595_v27, %v18252_v44  ;;  %v10605_v5 = vmax.f32 %v10597_v35, 0.0  ;;  %v10607_v20 = vmax.f32 %v10599_v6, 0.0  ;;  %v15580_v19 = vld [vmem:[#allocation15 + $0x780] sm:$0xff]   ;;  %v15582_v22 = vld [vmem:[#allocation15 + $0x7c8] sm:$0xff]   ;;  %v15585_v36 = vld [vmem:[#allocation15 + $0x750] sm:$0xff]  }
 0xde4   :  { %v10608_v14 = vmax.f32 %v10600_v10, 0.0  ;;  %v10610_v51 = vmax.f32 %v10602_v60, 0.0  ;;  %v15583_v35 = vld [vmem:[#allocation15 + $0x708] sm:$0xff]   ;;  %v15586_v27 = vld [vmem:[#allocation15 + $0x7d0] sm:$0xff]  }
 0xde5   :  { %v10609_v7 = vmax.f32 %v10601_v24, 0.0  ;;  %v10611_v59 = vmax.f32 %v10603_v47, 0.0  ;;  %v15584_v6 = vld [vmem:[#allocation15 + $0x788] sm:$0xff]   ;;  %v15587_v10 = vld [vmem:[#allocation15 + $0x710] sm:$0xff]   ;;  %v15589_v24 = vld [vmem:[#allocation15 + $0x758] sm:$0xff]  }
 0xde6   :  { %v10612_v26 = vpack.c.bf16 %v10608_v14, %v10604_v54  ;;  %v10614_v37 = vpack.c.bf16 %v10610_v51, %v10606_v41  ;;  %v15588_v60 = vld [vmem:[#allocation15 + $0x790] sm:$0xff]   ;;  %v15590_v47 = vld [vmem:[#allocation15 + $0x7d8] sm:$0xff]   ;;  %v15593_v14 = vld [vmem:[#allocation15 + $0x760] sm:$0xff]  }
 0xde7   :  { %v10613_v43 = vpack.c.bf16 %v10609_v7, %v10605_v5  ;;  %v10615_v8 = vpack.c.bf16 %v10611_v59, %v10607_v20  ;;  %v15577_v7 = vld [vmem:[#allocation15 + $0x740] sm:$0xff]   ;;  %v15591_v54 = vld [vmem:[#allocation15 + $0x718] sm:$0xff]   ;;  %v15597_v59 = vld [vmem:[#allocation15 + $0x768] sm:$0xff]  }
 0xde8   :  { %v15592_v41 = vld [vmem:[#allocation15 + $0x798] sm:$0xff]   ;;  %v15594_v51 = vld [vmem:[#allocation15 + $0x7e0] sm:$0xff]  }
 0xde9   :  { %10905 = vmatprep.mubr.bf16.mxu1 %v10613_v43  ;;  %10946 = vmatprep.mubr.bf16.mxu0 %v10615_v8  ;;  %v15578_v43 = vld [vmem:[#allocation15 + $0x7c0] sm:$0xff]   ;;  %v15599_v8 = vld [vmem:[#allocation15 + $0x728] sm:$0xff]  }
 0xdea   :  { %10906 = vmatmul.mubr.bf16.vlgmr.msra.gmra.mrb[68].mxu1 %v10612_v26  ;;  %10947 = vmatmul.mubr.bf16.vlgmr.msra.gmra.mrb[72].mxu0 %v10614_v37  ;;  %v19030_v26 = vld [vmem:[#allocation39_spill] sm:$0xff] }
 0xdeb   :  { %10959 = vmatpush1.bf16.msra.mxu1 %v18592_v33  ;;  %11002 = vmatpush1.bf16.msra.mxu0 %v18595_v55  ;;  %v15595_v5 = vld [vmem:[#allocation15 + $0x720] sm:$0xff]   ;;  %v15598_v37 = vld [vmem:[#allocation15 + $0x7e8] sm:$0xff]  }
 0xdec   :  { %10960 = vmatprep.subr.bf16.mxu1 %v18598_v2  ;;  %11003 = vmatprep.subr.bf16.mxu0 %v18601_v53  ;;  %v15596_v20 = vld [vmem:[#allocation15 + $0x7a0] sm:$0xff]  }
 0xded   :  { %10990 = vmatprep.mubr.bf16.mxu1 %v18959_v13  ;;  %11033 = vmatprep.mubr.bf16.mxu0 %v18959_v13 }
 0xdef   :  { %10961 = vmatpush1.bf16.msra.mxu1 %v18606_v40  ;;  %11004 = vmatpush1.bf16.msra.mxu0 %v18609_v50 }
 0xdf0   :  { %10962 = vmatprep.subr.bf16.mxu1 %v18612_v57  ;;  %11005 = vmatprep.subr.bf16.mxu0 %v18615_v4 }
 0xdf3   :  { %10963 = vmatpush1.bf16.msra.mxu1 %v18618_v62  ;;  %11006 = vmatpush1.bf16.msra.mxu0 %v18621_v23 }
 0xdf4   :  { %10964 = vmatprep.subr.bf16.mxu1 %v18624_v31  ;;  %11007 = vmatprep.subr.bf16.mxu0 %v18627_v52 }
 0xdf7   :  { %10965 = vmatpush1.bf16.msra.mxu1 %v18630_v30  ;;  %11008 = vmatpush1.bf16.msra.mxu0 %v18633_v18 }
 0xdf8   :  { %10966 = vmatprep.subr.bf16.mxu1 %v18636_v38  ;;  %11009 = vmatprep.subr.bf16.mxu0 %v18639_v1 }
 0xdfb   :  { %10967 = vmatpush1.bf16.msra.mxu1 %v18642_v16  ;;  %11010 = vmatpush1.bf16.msra.mxu0 %v18645_v45 }
 0xdfc   :  { %10968 = vmatprep.subr.bf16.mxu1 %v18648_v0  ;;  %11011 = vmatprep.subr.bf16.mxu0 %v18651_v61 }
 0xdff   :  { %10969 = vmatpush1.bf16.msra.mxu1 %v18654_v3  ;;  %11012 = vmatpush1.bf16.msra.mxu0 %v18657_v28 }
 0xe00   :  { %10970 = vmatprep.subr.bf16.mxu1 %v18660_v39  ;;  %11013 = vmatprep.subr.bf16.mxu0 %v18663_v63 }
 0xe03   :  { %10971 = vmatpush1.bf16.msra.mxu1 %v18666_v11  ;;  %11014 = vmatpush1.bf16.msra.mxu0 %v18669_v58 }
 0xe04   :  { %10972 = vmatprep.subr.bf16.mxu1 %v18672_v48  ;;  %11015 = vmatprep.subr.bf16.mxu0 %v18675_v12 }
 0xe07   :  { %10973 = vmatpush1.bf16.msra.mxu1 %v18678_v46  ;;  %11016 = vmatpush1.bf16.msra.mxu0 %v18681_v42 }
 0xe08   :  { %14514 = vmatprep.subr.bf16.mxu1 %v15577_v7  ;;  %14536 = vmatprep.subr.bf16.mxu0 %v15578_v43  ;;  %v15601_v7 = vld [vmem:[#allocation15 + $0x770] sm:$0xff]  }
 0xe09   :  { %v15602_v43 = vld [vmem:[#allocation15 + $0x7f0] sm:$0xff]  }
 0xe0a   :  { %10991 = vmatmul.mubr.bf16.vlgmr.msra.gmra.mrb[72].mxu1 %v19030_v26  ;;  %11034 = vmatmul.mubr.bf16.vlgmr.msra.gmra.mrb[76].mxu0 %v19030_v26  ;;  %v15600_v26 = vld [vmem:[#allocation15 + $0x7a8] sm:$0xff]  }
 0xe0b   :  { %14515 = vmatpush3.bf16.msra.mxu1 %v15579_v34  ;;  %14537 = vmatpush3.bf16.msra.mxu0 %v15580_v19  ;;  %v15603_v34 = vld [vmem:[#allocation15 + $0x730] sm:$0xff]  }
 0xe0c   :  { %14516 = vmatprep.subr.bf16.mxu1 %v15581_v25  ;;  %14538 = vmatprep.subr.bf16.mxu0 %v15582_v22  ;;  %v15604_v19 = vld [vmem:[#allocation15 + $0x7b0] sm:$0xff]   ;;  %v15605_v25 = vld [vmem:[#allocation15 + $0x778] sm:$0xff]  }
 0xe0d   :  { %v15606_v22 = vld [vmem:[#allocation15 + $0x7f8] sm:$0xff]  }
 0xe0f   :  { %14517 = vmatpush3.bf16.msra.mxu1 %v15583_v35  ;;  %14539 = vmatpush3.bf16.msra.mxu0 %v15584_v6  ;;  %v15607_v35 = vld [vmem:[#allocation15 + $0x738] sm:$0xff]  }
 0xe10   :  { %14518 = vmatprep.subr.bf16.mxu1 %v15585_v36  ;;  %14540 = vmatprep.subr.bf16.mxu0 %v15586_v27  ;;  %v15608_v6 = vld [vmem:[#allocation15 + $0x7b8] sm:$0xff]  }
 0xe13   :  { %14519 = vmatpush3.bf16.msra.mxu1 %v15587_v10  ;;  %14541 = vmatpush3.bf16.msra.mxu0 %v15588_v60 }
 0xe14   :  { %14520 = vmatprep.subr.bf16.mxu1 %v15589_v24  ;;  %14542 = vmatprep.subr.bf16.mxu0 %v15590_v47 }
 0xe17   :  { %14521 = vmatpush3.bf16.msra.mxu1 %v15591_v54  ;;  %14543 = vmatpush3.bf16.msra.mxu0 %v15592_v41 }
 0xe18   :  { %14522 = vmatprep.subr.bf16.mxu1 %v15593_v14  ;;  %14544 = vmatprep.subr.bf16.mxu0 %v15594_v51 }
 0xe1b   :  { %14523 = vmatpush3.bf16.msra.mxu1 %v15595_v5  ;;  %14545 = vmatpush3.bf16.msra.mxu0 %v15596_v20 }
 0xe1c   :  { %14524 = vmatprep.subr.bf16.mxu1 %v15597_v59  ;;  %14546 = vmatprep.subr.bf16.mxu0 %v15598_v37 }
 0xe1f   :  { %14525 = vmatpush3.bf16.msra.mxu1 %v15599_v8  ;;  %14547 = vmatpush3.bf16.msra.mxu0 %v15600_v26 }
 0xe20   :  { %14526 = vmatprep.subr.bf16.mxu1 %v15601_v7  ;;  %14548 = vmatprep.subr.bf16.mxu0 %v15602_v43  ;;  %v19031_v7 = vld [vmem:[#allocation41_spill] sm:$0xff] }
 0xe23   :  { %14527 = vmatpush3.bf16.msra.mxu1 %v15603_v34  ;;  %14549 = vmatpush3.bf16.msra.mxu0 %v15604_v19  ;;  %v19032_v34 = vld [vmem:[#allocation42_spill] sm:$0xff] }
 0xe24   :  { %14528 = vmatprep.subr.bf16.mxu1 %v15605_v25  ;;  %14550 = vmatprep.subr.bf16.mxu0 %v15606_v22 }
 0xe27   :  { %14529 = vmatpush3.bf16.msra.mxu1 %v15607_v35  ;;  %14551 = vmatpush3.bf16.msra.mxu0 %v15608_v6  ;;  %v19033_v35 = vld [vmem:[#allocation43_spill] sm:$0xff] }
 0xe28   :  { %11414 = vmatprep.subr.bf16.mxu1 %v18564_v9  ;;  %11457 = vmatprep.subr.bf16.mxu0 %v18567_v21 }
 0xebd   :  { %v14486_v36 = vpop.f32.mrb[68].mxu1  ;;  %v14508_v27 = vpop.f32.mrb[72].mxu0 }
 0xebe   :  { %v14487_v10 = vpop.f32.mrb[69].mxu1  ;;  %v14509_v60 = vpop.f32.mrb[73].mxu0 }
 0xebf   :  { %v14488_v24 = vadd.f32 %v14487_v10, %v14486_v36  ;;  %v14510_v47 = vadd.f32 %v14509_v60, %v14508_v27  ;;  %v14489_v54 = vpop.f32.mrb[70].mxu1  ;;  %v14511_v41 = vpop.f32.mrb[74].mxu0 }
 0xec0   :  { %v14490_v14 = vpop.f32.mrb[71].mxu1  ;;  %v14512_v51 = vpop.f32.mrb[75].mxu0 }
 0xec1   :  { %v10949_v5 = vadd.f32 %v14510_v47, %v14488_v24  ;;  %v14491_v20 = vadd.f32 %v14490_v14, %v14489_v54  ;;  %v14513_v59 = vadd.f32 %v14512_v51, %v14511_v41 }
 0xec3   :  { %v18747_v37 = vadd.f32 %v10949_v5, %v18689_v29  ;;  %v10952_v8 = vadd.f32 %v14513_v59, %v14491_v20 }
 0xec5   :  { %v18750_v9 = vadd.f32 %v10952_v8, %v18692_v17 }
 0xedd   :  { %v10992_v21 = vpop.f32.mrb[72].mxu1  ;;  %v11035_v26 = vpop.f32.mrb[76].mxu0 }
 0xede   :  { %v11044_v43 = vmul.f32 %v10992_v21, %v19031_v7  ;;  %v11046_v19 = vmul.f32 %v11035_v26, %v19032_v34  ;;  %v10994_v25 = vpop.f32.mrb[73].mxu1  ;;  %v11037_v22 = vpop.f32.mrb[77].mxu0 }
 0xedf   :  { %v11045_v6 = vmul.f32 %v10994_v25, %v19033_v35  ;;  %v11047_v36 = vmul.f32 %v11037_v22, %v18244_v15  ;;  %v10996_v27 = vpop.f32.mrb[74].mxu1  ;;  %v11039_v10 = vpop.f32.mrb[78].mxu0 }
 0xee0   :  { %v11052_v29 = vadd.f32 %v11044_v43, %v18246_v49  ;;  %v11054_v60 = vadd.f32 %v11046_v19, %v18248_v32  ;;  %v11048_v17 = vmul.f32 %v10996_v27, %v19031_v7  ;;  %v11050_v24 = vmul.f32 %v11039_v10, %v19032_v34  ;;  %v10998_v47 = vpop.f32.mrb[75].mxu1  ;;  %v11041_v54 = vpop.f32.mrb[79].mxu0 }
 0xee1   :  { %v11053_v41 = vadd.f32 %v11045_v6, %v18250_v56  ;;  %v11055_v14 = vadd.f32 %v11047_v36, %v18252_v44  ;;  %v11049_v51 = vmul.f32 %v10998_v47, %v19033_v35  ;;  %v11051_v5 = vmul.f32 %v11041_v54, %v18244_v15 }
 0xee2   :  { %v11056_v20 = vadd.f32 %v11048_v17, %v18246_v49  ;;  %v11058_v59 = vadd.f32 %v11050_v24, %v18248_v32  ;;  %v11060_v26 = vmax.f32 %v11052_v29, 0.0  ;;  %v11062_v43 = vmax.f32 %v11054_v60, 0.0  ;;  %v15640_v29 = vld [vmem:[#allocation15 + $0x8b8] sm:$0xff]  }
 0xee3   :  { %v11057_v8 = vadd.f32 %v11049_v51, %v18250_v56  ;;  %v11059_v21 = vadd.f32 %v11051_v5, %v18252_v44  ;;  %v11061_v22 = vmax.f32 %v11053_v41, 0.0  ;;  %v11063_v6 = vmax.f32 %v11055_v14, 0.0 }
 0xee4   :  { %v11064_v19 = vmax.f32 %v11056_v20, 0.0  ;;  %v11066_v25 = vmax.f32 %v11058_v59, 0.0 }
 0xee5   :  { %v11065_v27 = vmax.f32 %v11057_v8, 0.0  ;;  %v11067_v36 = vmax.f32 %v11059_v21, 0.0 }
 0xee6   :  { %v11068_v10 = vpack.c.bf16 %v11064_v19, %v11060_v26  ;;  %v11070_v47 = vpack.c.bf16 %v11066_v25, %v11062_v43 }
 0xee7   :  { %v11069_v35 = vpack.c.bf16 %v11065_v27, %v11061_v22  ;;  %v11071_v54 = vpack.c.bf16 %v11067_v36, %v11063_v6 }
 0xee9   :  { %11361 = vmatprep.mubr.bf16.mxu1 %v11069_v35  ;;  %11402 = vmatprep.mubr.bf16.mxu0 %v11071_v54  ;;  %v15639_v35 = vld [vmem:[#allocation15 + $0x838] sm:$0xff]  }
 0xeea   :  { %11362 = vmatmul.mubr.bf16.vlgmr.msra.gmra.mrb[76].mxu1 %v11068_v10  ;;  %11403 = vmatmul.mubr.bf16.vlgmr.msra.gmra.mrb[80].mxu0 %v11070_v47 }
 0xeeb   :  { %11415 = vmatpush1.bf16.msra.mxu1 %v18592_v33  ;;  %11458 = vmatpush1.bf16.msra.mxu0 %v18595_v55  ;;  %v15609_v33 = vld [vmem:[#allocation15 + $0x840] sm:$0xff]  }
 0xeec   :  { %11416 = vmatprep.subr.bf16.mxu1 %v18598_v2  ;;  %11459 = vmatprep.subr.bf16.mxu0 %v18601_v53  ;;  %v15610_v55 = vld [vmem:[#allocation15 + $0x8c0] sm:$0xff]  }
 0xeed   :  { %11446 = vmatprep.mubr.bf16.mxu1 %v18959_v13  ;;  %11489 = vmatprep.mubr.bf16.mxu0 %v18959_v13  ;;  %v19034_v13 = vld [vmem:[#allocation40_spill] sm:$0xff]  ;;  %v15611_v2 = vld [vmem:[#allocation15 + $0x800] sm:$0xff]  }
 0xeee   :  { %v15612_v53 = vld [vmem:[#allocation15 + $0x880] sm:$0xff]  }
 0xeef   :  { %11417 = vmatpush1.bf16.msra.mxu1 %v18606_v40  ;;  %11460 = vmatpush1.bf16.msra.mxu0 %v18609_v50  ;;  %v15613_v40 = vld [vmem:[#allocation15 + $0x848] sm:$0xff]  }
 0xef0   :  { %11418 = vmatprep.subr.bf16.mxu1 %v18612_v57  ;;  %11461 = vmatprep.subr.bf16.mxu0 %v18615_v4  ;;  %v15614_v50 = vld [vmem:[#allocation15 + $0x8c8] sm:$0xff]  }
 0xef1   :  { %v15615_v57 = vld [vmem:[#allocation15 + $0x808] sm:$0xff]  }
 0xef2   :  { %v15616_v4 = vld [vmem:[#allocation15 + $0x888] sm:$0xff]  }
 0xef3   :  { %11419 = vmatpush1.bf16.msra.mxu1 %v18618_v62  ;;  %11462 = vmatpush1.bf16.msra.mxu0 %v18621_v23  ;;  %v15617_v62 = vld [vmem:[#allocation15 + $0x850] sm:$0xff]  }
 0xef4   :  { %11420 = vmatprep.subr.bf16.mxu1 %v18624_v31  ;;  %11463 = vmatprep.subr.bf16.mxu0 %v18627_v52  ;;  %v15618_v23 = vld [vmem:[#allocation15 + $0x8d0] sm:$0xff]  }
 0xef5   :  { %v15619_v31 = vld [vmem:[#allocation15 + $0x810] sm:$0xff]  }
 0xef6   :  { %v15620_v52 = vld [vmem:[#allocation15 + $0x890] sm:$0xff]  }
 0xef7   :  { %11421 = vmatpush1.bf16.msra.mxu1 %v18630_v30  ;;  %11464 = vmatpush1.bf16.msra.mxu0 %v18633_v18  ;;  %v15621_v30 = vld [vmem:[#allocation15 + $0x858] sm:$0xff]  }
 0xef8   :  { %11422 = vmatprep.subr.bf16.mxu1 %v18636_v38  ;;  %11465 = vmatprep.subr.bf16.mxu0 %v18639_v1  ;;  %v15622_v18 = vld [vmem:[#allocation15 + $0x8d8] sm:$0xff]  }
 0xef9   :  { %v15623_v38 = vld [vmem:[#allocation15 + $0x818] sm:$0xff]  }
 0xefa   :  { %v15624_v1 = vld [vmem:[#allocation15 + $0x898] sm:$0xff]  }
 0xefb   :  { %11423 = vmatpush1.bf16.msra.mxu1 %v18642_v16  ;;  %11466 = vmatpush1.bf16.msra.mxu0 %v18645_v45  ;;  %v15625_v16 = vld [vmem:[#allocation15 + $0x860] sm:$0xff]  }
 0xefc   :  { %11424 = vmatprep.subr.bf16.mxu1 %v18648_v0  ;;  %11467 = vmatprep.subr.bf16.mxu0 %v18651_v61  ;;  %v15626_v45 = vld [vmem:[#allocation15 + $0x8e0] sm:$0xff]  }
 0xefd   :  { %v15627_v0 = vld [vmem:[#allocation15 + $0x820] sm:$0xff]  }
 0xefe   :  { %v15628_v61 = vld [vmem:[#allocation15 + $0x8a0] sm:$0xff]  }
 0xeff   :  { %11425 = vmatpush1.bf16.msra.mxu1 %v18654_v3  ;;  %11468 = vmatpush1.bf16.msra.mxu0 %v18657_v28  ;;  %v15629_v3 = vld [vmem:[#allocation15 + $0x868] sm:$0xff]  }
 0xf00   :  { %11426 = vmatprep.subr.bf16.mxu1 %v18660_v39  ;;  %11469 = vmatprep.subr.bf16.mxu0 %v18663_v63  ;;  %v15630_v28 = vld [vmem:[#allocation15 + $0x8e8] sm:$0xff]  }
 0xf01   :  { %v15631_v39 = vld [vmem:[#allocation15 + $0x828] sm:$0xff]  }
 0xf02   :  { %v15632_v63 = vld [vmem:[#allocation15 + $0x8a8] sm:$0xff]  }
 0xf03   :  { %11427 = vmatpush1.bf16.msra.mxu1 %v18666_v11  ;;  %11470 = vmatpush1.bf16.msra.mxu0 %v18669_v58  ;;  %v15633_v11 = vld [vmem:[#allocation15 + $0x870] sm:$0xff]  }
 0xf04   :  { %11428 = vmatprep.subr.bf16.mxu1 %v18672_v48  ;;  %11471 = vmatprep.subr.bf16.mxu0 %v18675_v12  ;;  %v15634_v58 = vld [vmem:[#allocation15 + $0x8f0] sm:$0xff]  }
 0xf05   :  { %v15635_v48 = vld [vmem:[#allocation15 + $0x830] sm:$0xff]  }
 0xf06   :  { %v15636_v12 = vld [vmem:[#allocation15 + $0x8b0] sm:$0xff]  }
 0xf07   :  { %11429 = vmatpush1.bf16.msra.mxu1 %v18678_v46  ;;  %11472 = vmatpush1.bf16.msra.mxu0 %v18681_v42  ;;  %v15637_v46 = vld [vmem:[#allocation15 + $0x878] sm:$0xff]  }
 0xf08   :  { %14558 = vmatprep.subr.bf16.mxu1 %v15609_v33  ;;  %14580 = vmatprep.subr.bf16.mxu0 %v15610_v55  ;;  %v15638_v42 = vld [vmem:[#allocation15 + $0x8f8] sm:$0xff]  }
 0xf0a   :  { %11447 = vmatmul.mubr.bf16.vlgmr.msra.gmra.mrb[80].mxu1 %v19034_v13  ;;  %11490 = vmatmul.mubr.bf16.vlgmr.msra.gmra.mrb[84].mxu0 %v19034_v13  ;;  %v19035_v13 = vld [vmem:[#allocation43_spill] sm:$0xff] }
 0xf0b   :  { %14559 = vmatpush3.bf16.msra.mxu1 %v15611_v2  ;;  %14581 = vmatpush3.bf16.msra.mxu0 %v15612_v53 }
 0xf0c   :  { %14560 = vmatprep.subr.bf16.mxu1 %v15613_v40  ;;  %14582 = vmatprep.subr.bf16.mxu0 %v15614_v50 }
 0xf0f   :  { %14561 = vmatpush3.bf16.msra.mxu1 %v15615_v57  ;;  %14583 = vmatpush3.bf16.msra.mxu0 %v15616_v4 }
 0xf10   :  { %14562 = vmatprep.subr.bf16.mxu1 %v15617_v62  ;;  %14584 = vmatprep.subr.bf16.mxu0 %v15618_v23 }
 0xf13   :  { %14563 = vmatpush3.bf16.msra.mxu1 %v15619_v31  ;;  %14585 = vmatpush3.bf16.msra.mxu0 %v15620_v52 }
 0xf14   :  { %14564 = vmatprep.subr.bf16.mxu1 %v15621_v30  ;;  %14586 = vmatprep.subr.bf16.mxu0 %v15622_v18 }
 0xf17   :  { %14565 = vmatpush3.bf16.msra.mxu1 %v15623_v38  ;;  %14587 = vmatpush3.bf16.msra.mxu0 %v15624_v1 }
 0xf18   :  { %14566 = vmatprep.subr.bf16.mxu1 %v15625_v16  ;;  %14588 = vmatprep.subr.bf16.mxu0 %v15626_v45 }
 0xf1b   :  { %14567 = vmatpush3.bf16.msra.mxu1 %v15627_v0  ;;  %14589 = vmatpush3.bf16.msra.mxu0 %v15628_v61 }
 0xf1c   :  { %14568 = vmatprep.subr.bf16.mxu1 %v15629_v3  ;;  %14590 = vmatprep.subr.bf16.mxu0 %v15630_v28 }
 0xf1f   :  { %14569 = vmatpush3.bf16.msra.mxu1 %v15631_v39  ;;  %14591 = vmatpush3.bf16.msra.mxu0 %v15632_v63 }
 0xf20   :  { %14570 = vmatprep.subr.bf16.mxu1 %v15633_v11  ;;  %14592 = vmatprep.subr.bf16.mxu0 %v15634_v58 }
 0xf23   :  { %14571 = vmatpush3.bf16.msra.mxu1 %v15635_v48  ;;  %14593 = vmatpush3.bf16.msra.mxu0 %v15636_v12 }
 0xf24   :  { %14572 = vmatprep.subr.bf16.mxu1 %v15637_v46  ;;  %14594 = vmatprep.subr.bf16.mxu0 %v15638_v42 }
 0xf27   :  { %14573 = vmatpush3.bf16.msra.mxu1 %v15639_v35  ;;  %14595 = vmatpush3.bf16.msra.mxu0 %v15640_v29  ;;  %v19036_v29 = vlaneseq }
 0xfbd   :  { %v14530_v60 = vpop.f32.mrb[76].mxu1  ;;  %v14552_v17 = vpop.f32.mrb[80].mxu0 }
 0xfbe   :  { %v14531_v24 = vpop.f32.mrb[77].mxu1  ;;  %v14553_v41 = vpop.f32.mrb[81].mxu0 }
 0xfbf   :  { %v14532_v14 = vadd.f32 %v14531_v24, %v14530_v60  ;;  %v14554_v51 = vadd.f32 %v14553_v41, %v14552_v17  ;;  %v14533_v5 = vpop.f32.mrb[78].mxu1  ;;  %v14555_v20 = vpop.f32.mrb[82].mxu0  ;;  %v11879_v60 = vand.u32 127, %v19036_v29 }
 0xfc0   :  { %v14534_v59 = vpop.f32.mrb[79].mxu1  ;;  %v14556_v8 = vpop.f32.mrb[83].mxu0 }
 0xfc1   :  { %v11405_v21 = vadd.f32 %v14554_v51, %v14532_v14  ;;  %v14535_v26 = vadd.f32 %v14534_v59, %v14533_v5  ;;  %v14557_v43 = vadd.f32 %v14556_v8, %v14555_v20  ;;  %v12608_v14 = vld [vmem:[#allocation17] ss:$0 sm:$0xff]  ;;  %vm11880_vm1 = vcmp.lt.s32.totalorder %v11879_v60, 9 }
 0xfc2   :  { %vm11903_vm2 = vcmp.eq.s32.totalorder %v11879_v60, 9 }
 0xfc3   :  { %v11411_v19 = vadd.f32 %v11405_v21, %v18747_v37  ;;  %v11408_v25 = vadd.f32 %v14557_v43, %v14535_v26 }
 0xfc5   :  { %v11412_v22 = vadd.f32 %v11408_v25, %v18750_v9 }
 0xfdd   :  { %v11448_v6 = vpop.f32.mrb[80].mxu1  ;;  %v11491_v27 = vpop.f32.mrb[84].mxu0 }
 0xfde   :  { %v11500_v36 = vmul.f32 %v11448_v6, %v19031_v7  ;;  %v11502_v10 = vmul.f32 %v11491_v27, %v19032_v34  ;;  %v11450_v47 = vpop.f32.mrb[81].mxu1  ;;  %v11493_v54 = vpop.f32.mrb[85].mxu0 }
 0xfdf   :  { %v11501_v33 = vmul.f32 %v11450_v47, %v19035_v13  ;;  %v11503_v55 = vmul.f32 %v11493_v54, %v18244_v15  ;;  %v11452_v2 = vpop.f32.mrb[82].mxu1  ;;  %v11495_v53 = vpop.f32.mrb[86].mxu0 }
 0xfe0   :  { %v11508_v40 = vadd.f32 %v11500_v36, %v18246_v49  ;;  %v11510_v37 = vadd.f32 %v11502_v10, %v18248_v32  ;;  %v11504_v9 = vmul.f32 %v11452_v2, %v19031_v7  ;;  %v11506_v50 = vmul.f32 %v11495_v53, %v19032_v34  ;;  %v11454_v57 = vpop.f32.mrb[83].mxu1  ;;  %v11497_v4 = vpop.f32.mrb[87].mxu0 }
 0xfe1   :  { %v11509_v62 = vadd.f32 %v11501_v33, %v18250_v56  ;;  %v11511_v23 = vadd.f32 %v11503_v55, %v18252_v44  ;;  %v11505_v31 = vmul.f32 %v11454_v57, %v19035_v13  ;;  %v11507_v52 = vmul.f32 %v11497_v4, %v18244_v15 }
 0xfe2   :  { %v11512_v30 = vadd.f32 %v11504_v9, %v18246_v49  ;;  %v11514_v18 = vadd.f32 %v11506_v50, %v18248_v32  ;;  %v11516_v1 = vmax.f32 %v11508_v40, 0.0  ;;  %v11518_v34 = vmax.f32 %v11510_v37, 0.0 }
 0xfe3   :  { %v11513_v38 = vadd.f32 %v11505_v31, %v18250_v56  ;;  %v11515_v7 = vadd.f32 %v11507_v52, %v18252_v44  ;;  %v11517_v0 = vmax.f32 %v11509_v62, 0.0  ;;  %v11519_v61 = vmax.f32 %v11511_v23, 0.0 }
 0xfe4   :  { %v11520_v16 = vmax.f32 %v11512_v30, 0.0  ;;  %v11522_v45 = vmax.f32 %v11514_v18, 0.0 }
 0xfe5   :  { %v11521_v3 = vmax.f32 %v11513_v38, 0.0  ;;  %v11523_v28 = vmax.f32 %v11515_v7, 0.0 }
 0xfe6   :  { %v11524_v39 = vpack.c.bf16 %v11520_v16, %v11516_v1  ;;  %v11526_v63 = vpack.c.bf16 %v11522_v45, %v11518_v34 }
 0xfe7   :  { %v11525_v11 = vpack.c.bf16 %v11521_v3, %v11517_v0  ;;  %v11527_v15 = vpack.c.bf16 %v11523_v28, %v11519_v61 }
 0xfe9   :  { %11817 = vmatprep.mubr.bf16.mxu1 %v11525_v11  ;;  %11858 = vmatprep.mubr.bf16.mxu0 %v11527_v15 }
 0xfea   :  { %11818 = vmatmul.mubr.bf16.vlgmr.msra.gmra.mrb[84].mxu1 %v11524_v39  ;;  %11859 = vmatmul.mubr.bf16.vlgmr.msra.gmra.mrb[88].mxu0 %v11526_v63 }
0x10bd   :  { %v14574_v49 = vpop.f32.mrb[84].mxu1  ;;  %v14596_v32 = vpop.f32.mrb[88].mxu0 }
0x10be   :  { %v14575_v56 = vpop.f32.mrb[85].mxu1  ;;  %v14597_v44 = vpop.f32.mrb[89].mxu0 }
0x10bf   :  { %v14576_v58 = vadd.f32 %v14575_v56, %v14574_v49  ;;  %v14598_v48 = vadd.f32 %v14597_v44, %v14596_v32  ;;  %v14577_v12 = vpop.f32.mrb[86].mxu1  ;;  %v14599_v46 = vpop.f32.mrb[90].mxu0 }
0x10c0   :  { %v14578_v42 = vpop.f32.mrb[87].mxu1  ;;  %v14600_v35 = vpop.f32.mrb[91].mxu0 }
0x10c1   :  { %v11861_v17 = vadd.f32 %v14598_v48, %v14576_v58  ;;  %v14579_v24 = vadd.f32 %v14578_v42, %v14577_v12  ;;  %v14601_v41 = vadd.f32 %v14600_v35, %v14599_v46 }
0x10c3   :  { %v11864_v51 = vadd.f32 %v14601_v41, %v14579_v24  ;;  %v11867_v5 = vadd.f32 %v11861_v17, %v11411_v19 }
0x10c5   :  { %v11876_v20 = vadd.f32 %v12608_v14, %v11867_v5  ;;  %v11868_v59 = vadd.f32 %v11864_v51, %v11412_v22 }
0x10c7   :  { %v11881_v8 = vsel %vm11880_vm1, %v11876_v20, -1e+30  ;;  %15641 = vtanh.f32 %v11876_v20  ;;  %v11877_v21 = vadd.f32 %v12608_v14, %v11868_v59 }
0x10c8   :  { %11883 = vmax.xlane.f32.xlu0 %v11881_v8 }
0x10c9   :  { %15643 = vtanh.f32 %v11877_v21  ;;  %v11882_v26 = vsel %vm11880_vm1, %v11877_v21, -1e+30 }
0x10cc   :  { %11885 = vmax.xlane.f32.xlu0 %v11882_v26 }
0x10d1   :  { %v15642_v43 = vpop.eup %15641 }
0x10d2   :  { %v11906_v25 = vsel %vm11903_vm2, %v15642_v43, 0.0 }
0x10d3   :  { %v15644_v6 = vpop.eup %15643 }
0x10d4   :  { %v11907_v27 = vsel %vm11903_vm2, %v15644_v6, 0.0 }
0x1155   :  { %v11884_v36 = vpop.xlane.xlu0 %11883 }
0x1156   :  { %v11887_v10 = vsub.f32 %v11881_v8, %v11884_v36 }
0x1158   :  { %v11889_v19 = vmul.f32 1.442695, %v11887_v10 }
0x1159   :  { %v11886_v47 = vpop.xlane.xlu0 %11885 }
0x115a   :  { %15645 = vpow2.f32 %v11889_v19  ;;  %v11888_v22 = vsub.f32 %v11882_v26, %v11886_v47 }
0x115c   :  { %v11891_v54 = vmul.f32 1.442695, %v11888_v22 }
0x115e   :  { %15647 = vpow2.f32 %v11891_v54 }
0x1164   :  { %v15646_v13 = vpop.eup %15645 }
0x1165   :  { %v11893_v33 = vsel %vm11880_vm1, %v15646_v13, 0.0 }
0x1166   :  { %11895 = vadd.xlane.f32.xlu1 %v11893_v33 }
0x1168   :  { %v15648_v55 = vpop.eup %15647 }
0x1169   :  { %v11894_v2 = vsel %vm11880_vm1, %v15648_v55, 0.0 }
0x116a   :  { %11897 = vadd.xlane.f32.xlu1 %v11894_v2 }
0x11f3   :  { %v11896_v53 = vpop.xlane.xlu1 %11895 }
0x11f4   :  { %15649 = vrcp.f32 %v11896_v53 }
0x11f7   :  { %v11898_v40 = vpop.xlane.xlu1 %11897 }
0x11f8   :  { %15651 = vrcp.f32 %v11898_v40 }
0x11fe   :  { %v15650_v37 = vpop.eup %15649 }
0x11ff   :  { %v11901_v9 = vmul.f32 %v15650_v37, %v11893_v33 }
0x1201   :  { %v11908_v50 = vsel %vm11880_vm1, %v11901_v9, %v11906_v25 }
0x1202   :  { %v15652_v57 = vpop.eup %15651  ;;  %11910 = vst [vmem:[%s18843_s10] sm:$0xff] %v11908_v50 }
0x1203   :  { %v11902_v4 = vmul.f32 %v15652_v57, %v11894_v2 }
0x1205   :  { %v11909_v62 = vsel %vm11880_vm1, %v11902_v4, %v11907_v27 }
0x1206   :  { %11911 = vst [vmem:[%s18843_s10 + $0x8] sm:$0xff] %v11909_v62 }
0x1207   :  { %11916 = vsyncpa [#allocation5], 1 }
0x1208   :  { %11917 = vsyncpa [#allocation7], 1 }
0x1209   :  { %11918 = vsyncpa [#allocation10], 1 }
0x120a   :  { %11919 = vsyncpa [#allocation13], 1 }
0x120b   :  { %11920 = vsyncpa [#allocation16], 1 }

</bundles_post_ra>
